<compile_context>
chip_gen: v6e
topology: v6e:2x2x1
jax: 0.10.0
libtpu: 0.0.40
codegen_flags: <defaults>
</compile_context>

<pallas_src>
import math

import numpy as np
import jax
import jax.numpy as jnp
from jax.experimental import pallas as pl
from jax.experimental.pallas import tpu as pltpu

# Model hyper-parameters (consistent with the module's __init__):
NUM_CLASSES = 8
EMBED_DIM = 32
GEO_DIM = 128
ROI_DIM = 64
HIDDEN = 512
BN_EPS = 1e-5
JBLK = 16          # j-block width of the pairwise relness tile (bounds VMEM)


# ---------------------------------------------------------------------------
# One-time parameter preprocessing (host, float64): transposes, BN folds,
# seq-1 attention fold, block-diagonal rel_w2 for the MXU pairwise reduce.
# ---------------------------------------------------------------------------
def prepare_params(p):
    def f64(x):
        return np.asarray(x, np.float64)

    out = {}
    # geometry (pos) embedding MLP: Linear(9,128) -> ReLU -> Linear(128,128)
    out['pos_w1t'] = f64(p['pos_w1']).T
    out['pos_b1'] = f64(p['pos_b1'])[None, :]
    out['pos_w2t'] = f64(p['pos_w2']).T
    out['pos_b2'] = f64(p['pos_b2'])[None, :]
    # semantic embedding
    out['sem_emb'] = f64(p['sem_emb'])

    # visual branch: Linear(64,512) -> BN -> ReLU -> Linear(512,512) -> MHA(seq=1)
    vis_w1, vis_shift = [], []
    for prefix, att in (('sub', 'subj_att'), ('obj', 'obj_att')):
        g = f64(p[f'{prefix}_bn_g']); b = f64(p[f'{prefix}_bn_b'])
        m = f64(p[f'{prefix}_bn_m']); v = f64(p[f'{prefix}_bn_v'])
        scale = g / np.sqrt(v + BN_EPS)
        shift = b - m * scale
        vis_w1.append(f64(p[f'{prefix}_w1']).T * scale[None, :])
        vis_shift.append(f64(p[f'{prefix}_b1']) * scale + shift)
        # seq-1 MHA is purely affine: y = x @ (Wv^T Wo^T) + (bv Wo^T + bo)
        A = f64(p[f'{att}_wv']).T @ f64(p[f'{att}_wo']).T
        a_b = f64(p[f'{att}_bv']) @ f64(p[f'{att}_wo']).T + f64(p[f'{att}_bo'])
        out[f'{prefix}_w2att'] = f64(p[f'{prefix}_w2']).T @ A
        out[f'{prefix}_b2att'] = (f64(p[f'{prefix}_b2']) @ A + a_b)[None, :]
    out['vis_w1'] = np.concatenate(vis_w1, axis=1)            # (64, 1024) [sub|obj]
    out['vis_shift'] = np.concatenate(vis_shift)[None, :]     # (1, 1024)

    # relness MLP: ReLU -> Linear(320,512) -> BN -> ReLU -> Linear(512,1)
    # rel_repr = [pos[sub](128) | sem[sub](32) | pos[obj](128) | sem[obj](32)]
    g = f64(p['rel_bn_g']); b = f64(p['rel_bn_b'])
    m = f64(p['rel_bn_m']); v = f64(p['rel_bn_v'])
    scale = g / np.sqrt(v + BN_EPS)
    shift = b - m * scale
    w1s = f64(p['rel_w1']).T * scale[None, :]                  # (320, 512), BN folded
    half = GEO_DIM + EMBED_DIM                                 # 160
    # single fused weight for the per-node activation [relu(pos)|relu(sem)] (160):
    #   cols 0:512  = "node as subject" contribution, cols 512:1024 = "as object"
    out['rel_w1_cat'] = np.concatenate([w1s[:half], w1s[half:]], axis=1)   # (160, 1024)
    out['rel_shift'] = (f64(p['rel_b1']) * scale + shift)[None, :]         # (1, 512)
    # block-diagonal copies of rel_w2 so the 512-wide pairwise reduce is one MXU
    # dot per j-block with a lane-dense (N, JBLK) result (no relayout needed).
    w2 = f64(p['rel_w2']).reshape(HIDDEN)
    wbig = np.zeros((JBLK * HIDDEN, JBLK), np.float64)
    for j in range(JBLK):
        wbig[j * HIDDEN:(j + 1) * HIDDEN, j] = w2
    out['rel_wbig'] = wbig                                     # (JBLK*512, JBLK)
    out['rel_b2'] = f64(p['rel_b2']).reshape(1, 1)             # scalar (via SMEM)
    return {k: jnp.asarray(val, jnp.float32) for k, val in out.items()}


# ---------------------------------------------------------------------------
# Stage 1: per-node GEMMs over the stacked node set (M = B * N_pad rows).
# ---------------------------------------------------------------------------
def _node_kernel(logits_ref, box_ref, roi_ref,
                 pw1_ref, pb1_ref, pw2_ref, pb2_ref, sem_ref,
                 vw1_ref, vsh_ref, sw2_ref, sb2_ref, ow2_ref, ob2_ref,
                 rw1_ref,
                 sub_ref, obj_ref, u_ref):
    f32 = jnp.float32
    # geometry (pos) embedding: Linear -> ReLU -> Linear
    ph = jnp.dot(box_ref[...], pw1_ref[...], preferred_element_type=f32) + pb1_ref[...]
    ph = jnp.maximum(ph, 0.0)
    pos = jnp.dot(ph, pw2_ref[...], preferred_element_type=f32) + pb2_ref[...]      # (M,128)

    # semantic embedding: softmax(logits) @ embed (EUP reciprocal for the denom)
    x = logits_ref[...]
    x = x - jnp.max(x, axis=-1, keepdims=True)
    e = jnp.exp(x)
    probs = e * pl.reciprocal(jnp.sum(e, axis=-1, keepdims=True), approx=True)
    sem = jnp.dot(probs, sem_ref[...], preferred_element_type=f32)                  # (M,32)

    # visual branch (BN + seq-1 MHA folded), sub & obj fused along the output dim
    h = jnp.dot(roi_ref[...], vw1_ref[...], preferred_element_type=f32) + vsh_ref[...]
    h = jnp.maximum(h, 0.0)                                                         # (M,1024)
    sub_ref[...] = jnp.dot(h[:, :HIDDEN], sw2_ref[...],
                           preferred_element_type=f32) + sb2_ref[...]               # (M,512)
    obj_ref[...] = jnp.dot(h[:, HIDDEN:], ow2_ref[...],
                           preferred_element_type=f32) + ob2_ref[...]               # (M,512)

    # relness input projection: single GEMM [relu(pos)|relu(sem)] (160) -> 1024
    a = jnp.concatenate([jnp.maximum(pos, 0.0), jnp.maximum(sem, 0.0)], axis=-1)
    u_ref[...] = jnp.dot(a, rw1_ref[...], preferred_element_type=f32)               # (M,1024)


def _node_call(pp, logits, box, roi):
    m = logits.shape[0]
    tm = m if m <= 512 else 512
    m_pad = -(-m // tm) * tm
    if m_pad != m:
        pad = m_pad - m
        logits = jnp.pad(logits, ((0, pad), (0, 0)))
        box = jnp.pad(box, ((0, pad), (0, 0)))
        roi = jnp.pad(roi, ((0, pad), (0, 0)))
    weights = (pp['pos_w1t'], pp['pos_b1'], pp['pos_w2t'], pp['pos_b2'], pp['sem_emb'],
               pp['vis_w1'], pp['vis_shift'],
               pp['sub_w2att'], pp['sub_b2att'], pp['obj_w2att'], pp['obj_b2att'],
               pp['rel_w1_cat'])

    def row(c):
        return pl.BlockSpec((tm, c), lambda i: (i, 0))

    in_specs = ([row(NUM_CLASSES), row(9), row(ROI_DIM)]
                + [pl.BlockSpec(w.shape, lambda i: (0, 0)) for w in weights])
    out_specs = [pl.BlockSpec((tm, HIDDEN), lambda i: (i, 0)),
                 pl.BlockSpec((tm, HIDDEN), lambda i: (i, 0)),
                 pl.BlockSpec((tm, 2 * HIDDEN), lambda i: (i, 0))]
    out_shape = [jax.ShapeDtypeStruct((m_pad, HIDDEN), jnp.float32),
                 jax.ShapeDtypeStruct((m_pad, HIDDEN), jnp.float32),
                 jax.ShapeDtypeStruct((m_pad, 2 * HIDDEN), jnp.float32)]
    return pl.pallas_call(
        _node_kernel,
        out_shape=out_shape,
        grid=(m_pad // tm,),
        in_specs=in_specs,
        out_specs=out_specs,
        compiler_params=pltpu.CompilerParams(dimension_semantics=("parallel",)),
    )(logits, box, roi, *weights)


# ---------------------------------------------------------------------------
# Stage 2: per-image pairwise scores, grid=(B,), weights resident across images.
# ---------------------------------------------------------------------------
def _pair_kernel(sub_ref, obj_ref, u_ref, rsh_ref, wbig_ref, rb2_ref, out_ref):
    f32 = jnp.float32
    n = sub_ref.shape[0]
    # instance-pair visual scores: sub_feat @ obj_feat.T (no transpose materialized)
    vsc = jax.lax.dot_general(sub_ref[...], obj_ref[...],
                              (((1,), (1,)), ((), ())),
                              preferred_element_type=f32)                 # (n, n)
    u = u_ref[...]
    u_s = u[:, :HIDDEN]          # node-as-subject contribution
    u_o = u[:, HIDDEN:]          # node-as-object contribution
    shift = rsh_ref[...]         # (1, 512) folded BN shift / bias
    wbig = wbig_ref[...]         # (JBLK*512, JBLK) block-diag rel_w2
    rb2 = rb2_ref[0, 0]          # scalar bias from SMEM

    # static j-block loop: bounds the (n, w*512) intermediate (v7x VMEM safety)
    for j0 in range(0, n, JBLK):
        w = min(JBLK, n - j0)
        pieces = [jnp.maximum(u_s + (u_o[j:j + 1, :] + shift), 0.0)
                  for j in range(j0, j0 + w)]
        hp = jnp.concatenate(pieces, axis=1) if w > 1 else pieces[0]      # (n, w*512)
        # 512-wide reduce on the MXU -> lane-dense (n, w), no VPU mul / XLU reduce
        rel = jnp.dot(hp, wbig[:w * HIDDEN, :w], preferred_element_type=f32)
        out_ref[0, :, j0:j0 + w] = jax.nn.sigmoid(rel + rb2 + vsc[:, j0:j0 + w])


def _pair_call(pp, sub_feat, obj_feat, u, batch, n_pad):
    def blk(c):
        return pl.BlockSpec((n_pad, c), lambda b: (b, 0))

    in_specs = [blk(HIDDEN), blk(HIDDEN), blk(2 * HIDDEN),
                pl.BlockSpec(pp['rel_shift'].shape, lambda b: (0, 0)),
                pl.BlockSpec(pp['rel_wbig'].shape, lambda b: (0, 0)),
                pl.BlockSpec(memory_space=pltpu.MemorySpace.SMEM)]
    return pl.pallas_call(
        _pair_kernel,
        out_shape=jax.ShapeDtypeStruct((batch, n_pad, n_pad), jnp.float32),
        grid=(batch,),
        in_specs=in_specs,
        out_specs=pl.BlockSpec((1, n_pad, n_pad), lambda b: (b, 0, 0)),
        compiler_params=pltpu.CompilerParams(dimension_semantics=("parallel",)),
    )(sub_feat, obj_feat, u, pp['rel_shift'], pp['rel_wbig'], pp['rel_b2'])


@jax.jit
def _batched_forward(pp, logits, boxes, rois):
    b, n_pad, _ = logits.shape
    m = b * n_pad
    sub_feat, obj_feat, u = _node_call(pp,
                                       logits.reshape(m, NUM_CLASSES),
                                       boxes.reshape(m, 9),
                                       rois.reshape(m, ROI_DIM))
    return _pair_call(pp, sub_feat, obj_feat, u, b, n_pad)


# ---------------------------------------------------------------------------
# Full forward pass (eval mode, visual_features_on=True)
# ---------------------------------------------------------------------------
def relation_proposal_forward(prepared_params, proposals, inst_roi_feat, rel_pair_idxs):
    """proposals: list of (pred_logits [N,C], box_geom_feat [N,9]).
    inst_roi_feat: [sum(N), ROI_DIM]; rel_pair_idxs: list of [P,2] int32."""
    # TODO(synk): training branch (_train_sampling randperm/sort + FocalLoss) is
    # data-dependent dynamic-shape host logic; only the eval forward is implemented.
    # TODO(synk): encode_box_info (bbox -> 9-d geometry feature) is dataset glue; the
    # 9-d geometry feature is taken directly as an input here.
    # TODO(synk): if rel_pair_idxs is sparse (top-k pairs), a PrefetchScalarGridSpec
    # pair-gather kernel would avoid the dense N x N relness slab.
    batch = len(proposals)
    ns = [int(p[0].shape[0]) for p in proposals]
    n_pad = max(8, -(-max(ns) // 8) * 8)        # one shape bucket for the whole batch
    logits = np.zeros((batch, n_pad, NUM_CLASSES), np.float32)
    boxes = np.zeros((batch, n_pad, 9), np.float32)
    rois = np.zeros((batch, n_pad, ROI_DIM), np.float32)
    off = 0
    for i, ((lg, bx), n) in enumerate(zip(proposals, ns)):
        logits[i, :n] = np.asarray(lg)
        boxes[i, :n] = np.asarray(bx)
        rois[i, :n] = np.asarray(inst_roi_feat[off:off + n])
        off += n

    dense = _batched_forward(prepared_params, jnp.asarray(logits),
                             jnp.asarray(boxes), jnp.asarray(rois))  # (B, N_pad, N_pad)

    outs = []
    for i, (n, pair_idx) in enumerate(zip(ns, rel_pair_idxs)):
        s_i, o_i = pair_idx[:, 0], pair_idx[:, 1]
        vals = dense[i, s_i, o_i]
        outs.append(jnp.zeros((n, n), jnp.float32).at[s_i, o_i].set(vals))
    return outs, None   # losses = None in eval mode


# ---------------------------------------------------------------------------
# Pure-JAX reference (unfused, mirrors the PyTorch module in eval mode)
# ---------------------------------------------------------------------------
def _reference_image(p, pred_logits, box_info, roi, pair_idx):
    def linear(x, w, b):
        return x @ w.T + b

    def bn(x, g, b, m, v):
        return (x - m) / jnp.sqrt(v + BN_EPS) * g + b

    pos = linear(jax.nn.relu(linear(box_info, p['pos_w1'], p['pos_b1'])),
                 p['pos_w2'], p['pos_b2'])
    sem = jax.nn.softmax(pred_logits, axis=-1) @ p['sem_emb']

    def vis(prefix, att):
        h = linear(roi, p[f'{prefix}_w1'], p[f'{prefix}_b1'])
        h = bn(h, p[f'{prefix}_bn_g'], p[f'{prefix}_bn_b'],
               p[f'{prefix}_bn_m'], p[f'{prefix}_bn_v'])
        h = jax.nn.relu(h)
        h = linear(h, p[f'{prefix}_w2'], p[f'{prefix}_b2'])
        # seq-len-1 MHA: softmax over a single key == 1, dropout identity in eval
        v = linear(h, p[f'{att}_wv'], p[f'{att}_bv'])
        return linear(v, p[f'{att}_wo'], p[f'{att}_bo'])

    sub_feat = vis('sub', 'subj_att')
    obj_feat = vis('obj', 'obj_att')
    vsc = sub_feat @ obj_feat.T

    s_i, o_i = pair_idx[:, 0], pair_idx[:, 1]
    rel_repr = jnp.concatenate([pos[s_i], sem[s_i], pos[o_i], sem[o_i]], axis=1)
    h = jax.nn.relu(rel_repr)
    h = linear(h, p['rel_w1'], p['rel_b1'])
    h = bn(h, p['rel_bn_g'], p['rel_bn_b'], p['rel_bn_m'], p['rel_bn_v'])
    h = jax.nn.relu(h)
    relness = linear(h, p['rel_w2'], p['rel_b2'])[:, 0]
    relness = jax.nn.sigmoid(relness + vsc[s_i, o_i])
    n = pred_logits.shape[0]
    return jnp.zeros((n, n), jnp.float32).at[s_i, o_i].set(relness)


# ---------------------------------------------------------------------------
# Deterministic parameter init (synthetic, PyTorch-like uniform fan-in init)
# ---------------------------------------------------------------------------
def _linear_params(key, in_dim, out_dim):
    kw, kb = jax.random.split(key)
    lim = 1.0 / math.sqrt(in_dim)
    w = jax.random.uniform(kw, (out_dim, in_dim), jnp.float32, -lim, lim)
    b = jax.random.uniform(kb, (out_dim,), jnp.float32, -lim, lim)
    return w, b


def _bn_params(key, dim):
    k1, k2, k3, k4 = jax.random.split(key, 4)
    gamma = 1.0 + 0.1 * jax.random.normal(k1, (dim,), jnp.float32)
    beta = 0.1 * jax.random.normal(k2, (dim,), jnp.float32)
    mean = 0.1 * jax.random.normal(k3, (dim,), jnp.float32)
    var = jax.random.uniform(k4, (dim,), jnp.float32, 0.5, 1.5)
    return gamma, beta, mean, var


def init_params(key):
    ki = iter(jax.random.split(key, 32))
    p = {}
    p['pos_w1'], p['pos_b1'] = _linear_params(next(ki), 9, GEO_DIM)
    p['pos_w2'], p['pos_b2'] = _linear_params(next(ki), GEO_DIM, GEO_DIM)
    p['sem_emb'] = 0.1 * jax.random.normal(next(ki), (NUM_CLASSES, EMBED_DIM), jnp.float32)
    rel_in = 2 * EMBED_DIM + 2 * GEO_DIM
    p['rel_w1'], p['rel_b1'] = _linear_params(next(ki), rel_in, HIDDEN)
    p['rel_bn_g'], p['rel_bn_b'], p['rel_bn_m'], p['rel_bn_v'] = _bn_params(next(ki), HIDDEN)
    p['rel_w2'], p['rel_b2'] = _linear_params(next(ki), HIDDEN, 1)
    for prefix in ('sub', 'obj'):
        p[f'{prefix}_w1'], p[f'{prefix}_b1'] = _linear_params(next(ki), ROI_DIM, HIDDEN)
        (p[f'{prefix}_bn_g'], p[f'{prefix}_bn_b'],
         p[f'{prefix}_bn_m'], p[f'{prefix}_bn_v']) = _bn_params(next(ki), HIDDEN)
        p[f'{prefix}_w2'], p[f'{prefix}_b2'] = _linear_params(next(ki), HIDDEN, HIDDEN)
    for prefix in ('subj_att', 'obj_att'):
        for name in ('q', 'k', 'v', 'o'):
            w, b = _linear_params(next(ki), HIDDEN, HIDDEN)
            p[f'{prefix}_w{name}'] = w
            p[f'{prefix}_b{name}'] = b
    return p


# ---------------------------------------------------------------------------
if __name__ == "__main__":
    key = jax.random.PRNGKey(0)
    params_key, data_key = jax.random.split(key)
    params = init_params(params_key)
    prepared = prepare_params(params)          # one-time: transposes / BN & MHA folds

    box_counts = [16, 12]  # two "images"
    dk = iter(jax.random.split(data_key, 3 * len(box_counts)))

    proposals, roi_list, pair_idxs = [], [], []
    for n in box_counts:
        pred_logits = jax.random.normal(next(dk), (n, NUM_CLASSES), jnp.float32)
        box_info = jax.random.uniform(next(dk), (n, 9), jnp.float32)
        roi = jax.random.normal(next(dk), (n, ROI_DIM), jnp.float32)
        proposals.append((pred_logits, box_info))
        roi_list.append(roi)
        ii, jj = np.meshgrid(np.arange(n), np.arange(n), indexing='ij')
        msk = ii != jj
        pair_idxs.append(jnp.asarray(np.stack([ii[msk], jj[msk]], axis=1), dtype=jnp.int32))

    inst_roi_feat = jnp.concatenate(roi_list, axis=0)

    matrices, losses = relation_proposal_forward(prepared, proposals, inst_roi_feat, pair_idxs)
    jax.block_until_ready(matrices)
    assert losses is None
    assert all(m.shape == (n, n) for m, n in zip(matrices, box_counts))

    # correctness check against a pure-JAX reference of the original module
    offset = 0
    for (pred_logits, box_info), pair_idx, n, m in zip(proposals, pair_idxs, box_counts, matrices):
        roi = inst_roi_feat[offset:offset + n]
        offset += n
        ref = _reference_image(params, pred_logits, box_info, roi, pair_idx)
        np.testing.assert_allclose(np.asarray(m), np.asarray(ref), rtol=1e-3, atol=1e-3)

    print("KERNEL_OK")
</pallas_src>

<mosaic_0001>
module attributes {stable_mosaic.version = 11 : i64} {
  func.func @_node_kernel(%arg0: i32, %arg1: memref<32x8xf32, #tpu.memory_space<vmem>>, %arg2: memref<32x9xf32, #tpu.memory_space<vmem>>, %arg3: memref<32x64xf32, #tpu.memory_space<vmem>>, %arg4: memref<9x128xf32, #tpu.memory_space<vmem>>, %arg5: memref<1x128xf32, #tpu.memory_space<vmem>>, %arg6: memref<128x128xf32, #tpu.memory_space<vmem>>, %arg7: memref<1x128xf32, #tpu.memory_space<vmem>>, %arg8: memref<8x32xf32, #tpu.memory_space<vmem>>, %arg9: memref<64x1024xf32, #tpu.memory_space<vmem>>, %arg10: memref<1x1024xf32, #tpu.memory_space<vmem>>, %arg11: memref<512x512xf32, #tpu.memory_space<vmem>>, %arg12: memref<1x512xf32, #tpu.memory_space<vmem>>, %arg13: memref<512x512xf32, #tpu.memory_space<vmem>>, %arg14: memref<1x512xf32, #tpu.memory_space<vmem>>, %arg15: memref<160x1024xf32, #tpu.memory_space<vmem>>, %arg16: memref<32x512xf32, #tpu.memory_space<vmem>>, %arg17: memref<32x512xf32, #tpu.memory_space<vmem>>, %arg18: memref<32x1024xf32, #tpu.memory_space<vmem>>) attributes {dimension_semantics = [#tpu.dimension_semantics<parallel>], iteration_bounds = array<i64: 1>, scalar_prefetch = 0 : i64, scratch_operands = 0 : i64, tpu.core_type = #tpu.core_type<tc>, window_params = [{transform_indices = @transform_0, window_bounds = array<i64: 32, 8>}, {transform_indices = @transform_1, window_bounds = array<i64: 32, 9>}, {transform_indices = @transform_2, window_bounds = array<i64: 32, 64>}, {pipeline_mode = #tpu.pipeline_mode<synchronous>, transform_indices = @transform_3, window_bounds = array<i64: 9, 128>}, {pipeline_mode = #tpu.pipeline_mode<synchronous>, transform_indices = @transform_4, window_bounds = array<i64: 1, 128>}, {pipeline_mode = #tpu.pipeline_mode<synchronous>, transform_indices = @transform_5, window_bounds = array<i64: 128, 128>}, {pipeline_mode = #tpu.pipeline_mode<synchronous>, transform_indices = @transform_6, window_bounds = array<i64: 1, 128>}, {pipeline_mode = #tpu.pipeline_mode<synchronous>, transform_indices = @transform_7, window_bounds = array<i64: 8, 32>}, {pipeline_mode = #tpu.pipeline_mode<synchronous>, transform_indices = @transform_8, window_bounds = array<i64: 64, 1024>}, {pipeline_mode = #tpu.pipeline_mode<synchronous>, transform_indices = @transform_9, window_bounds = array<i64: 1, 1024>}, {pipeline_mode = #tpu.pipeline_mode<synchronous>, transform_indices = @transform_10, window_bounds = array<i64: 512, 512>}, {pipeline_mode = #tpu.pipeline_mode<synchronous>, transform_indices = @transform_11, window_bounds = array<i64: 1, 512>}, {pipeline_mode = #tpu.pipeline_mode<synchronous>, transform_indices = @transform_12, window_bounds = array<i64: 512, 512>}, {pipeline_mode = #tpu.pipeline_mode<synchronous>, transform_indices = @transform_13, window_bounds = array<i64: 1, 512>}, {pipeline_mode = #tpu.pipeline_mode<synchronous>, transform_indices = @transform_14, window_bounds = array<i64: 160, 1024>}, {transform_indices = @transform_15, window_bounds = array<i64: 32, 512>}, {transform_indices = @transform_16, window_bounds = array<i64: 32, 512>}, {transform_indices = @transform_17, window_bounds = array<i64: 32, 1024>}]} {
    %c0 = arith.constant 0 : index
    %c0_0 = arith.constant 0 : index
    %0 = vector.load %arg2[%c0, %c0_0] : memref<32x9xf32, #tpu.memory_space<vmem>>, vector<32x9xf32>
    %c0_1 = arith.constant 0 : index
    %c0_2 = arith.constant 0 : index
    %1 = vector.load %arg4[%c0_1, %c0_2] : memref<9x128xf32, #tpu.memory_space<vmem>>, vector<9x128xf32>
    %cst = arith.constant dense<0.000000e+00> : vector<32x128xf32>
    %2 = tpu.matmul %0, %1, %cst {dimension_numbers = #tpu.dot_dimension_numbers<[1], [0], [0], [1], [0, 0, 1, 1], [], []>} : vector<32x9xf32>, vector<9x128xf32>, vector<32x128xf32> -> vector<32x128xf32>
    %c0_3 = arith.constant 0 : index
    %c0_4 = arith.constant 0 : index
    %3 = vector.load %arg5[%c0_3, %c0_4] : memref<1x128xf32, #tpu.memory_space<vmem>>, vector<1x128xf32>
    %4 = vector.broadcast %3 : vector<1x128xf32> to vector<32x128xf32>
    %5 = arith.addf %2, %4 : vector<32x128xf32>
    %cst_5 = arith.constant 0.000000e+00 : f32
    %6 = vector.broadcast %cst_5 : f32 to vector<32x128xf32>
    %7 = arith.maximumf %5, %6 : vector<32x128xf32>
    %c0_6 = arith.constant 0 : index
    %c0_7 = arith.constant 0 : index
    %8 = vector.load %arg6[%c0_6, %c0_7] : memref<128x128xf32, #tpu.memory_space<vmem>>, vector<128x128xf32>
    %cst_8 = arith.constant dense<0.000000e+00> : vector<32x128xf32>
    %9 = tpu.matmul %7, %8, %cst_8 {dimension_numbers = #tpu.dot_dimension_numbers<[1], [0], [0], [1], [0, 0, 1, 1], [], []>} : vector<32x128xf32>, vector<128x128xf32>, vector<32x128xf32> -> vector<32x128xf32>
    %c0_9 = arith.constant 0 : index
    %c0_10 = arith.constant 0 : index
    %10 = vector.load %arg7[%c0_9, %c0_10] : memref<1x128xf32, #tpu.memory_space<vmem>>, vector<1x128xf32>
    %11 = vector.broadcast %10 : vector<1x128xf32> to vector<32x128xf32>
    %12 = arith.addf %9, %11 : vector<32x128xf32>
    %c0_11 = arith.constant 0 : index
    %c0_12 = arith.constant 0 : index
    %13 = vector.load %arg1[%c0_11, %c0_12] : memref<32x8xf32, #tpu.memory_space<vmem>>, vector<32x8xf32>
    %cst_13 = arith.constant dense<0xFF800000> : vector<32xf32>
    %14 = vector.multi_reduction <maximumf>, %13, %cst_13 [1] : vector<32x8xf32> to vector<32xf32>
    %15 = vector.shape_cast %14 : vector<32xf32> to vector<32x1xf32>
    %16 = vector.broadcast %15 : vector<32x1xf32> to vector<32x8xf32>
    %17 = arith.subf %13, %16 : vector<32x8xf32>
    %18 = math.exp %17 : vector<32x8xf32>
    %cst_14 = arith.constant dense<0.000000e+00> : vector<32xf32>
    %19 = vector.multi_reduction <add>, %18, %cst_14 [1] : vector<32x8xf32> to vector<32xf32>
    %20 = vector.shape_cast %19 : vector<32xf32> to vector<32x1xf32>
    %21 = tpu.reciprocal %20 {approx = true} : vector<32x1xf32> -> vector<32x1xf32>
    %22 = vector.broadcast %21 : vector<32x1xf32> to vector<32x8xf32>
    %23 = arith.mulf %18, %22 : vector<32x8xf32>
    %c0_15 = arith.constant 0 : index
    %c0_16 = arith.constant 0 : index
    %24 = vector.load %arg8[%c0_15, %c0_16] : memref<8x32xf32, #tpu.memory_space<vmem>>, vector<8x32xf32>
    %cst_17 = arith.constant dense<0.000000e+00> : vector<32x32xf32>
    %25 = tpu.matmul %23, %24, %cst_17 {dimension_numbers = #tpu.dot_dimension_numbers<[1], [0], [0], [1], [0, 0, 1, 1], [], []>} : vector<32x8xf32>, vector<8x32xf32>, vector<32x32xf32> -> vector<32x32xf32>
    %c0_18 = arith.constant 0 : index
    %c0_19 = arith.constant 0 : index
    %26 = vector.load %arg3[%c0_18, %c0_19] : memref<32x64xf32, #tpu.memory_space<vmem>>, vector<32x64xf32>
    %c0_20 = arith.constant 0 : index
    %c0_21 = arith.constant 0 : index
    %27 = vector.load %arg9[%c0_20, %c0_21] : memref<64x1024xf32, #tpu.memory_space<vmem>>, vector<64x1024xf32>
    %cst_22 = arith.constant dense<0.000000e+00> : vector<32x1024xf32>
    %28 = tpu.matmul %26, %27, %cst_22 {dimension_numbers = #tpu.dot_dimension_numbers<[1], [0], [0], [1], [0, 0, 1, 1], [], []>} : vector<32x64xf32>, vector<64x1024xf32>, vector<32x1024xf32> -> vector<32x1024xf32>
    %c0_23 = arith.constant 0 : index
    %c0_24 = arith.constant 0 : index
    %29 = vector.load %arg10[%c0_23, %c0_24] : memref<1x1024xf32, #tpu.memory_space<vmem>>, vector<1x1024xf32>
    %30 = vector.broadcast %29 : vector<1x1024xf32> to vector<32x1024xf32>
    %31 = arith.addf %28, %30 : vector<32x1024xf32>
    %cst_25 = arith.constant 0.000000e+00 : f32
    %32 = vector.broadcast %cst_25 : f32 to vector<32x1024xf32>
    %33 = arith.maximumf %31, %32 : vector<32x1024xf32>
    %34 = vector.extract_strided_slice %33 {offsets = [0, 0], sizes = [32, 512], strides = [1, 1]} : vector<32x1024xf32> to vector<32x512xf32>
    %c0_26 = arith.constant 0 : index
    %c0_27 = arith.constant 0 : index
    %35 = vector.load %arg11[%c0_26, %c0_27] : memref<512x512xf32, #tpu.memory_space<vmem>>, vector<512x512xf32>
    %cst_28 = arith.constant dense<0.000000e+00> : vector<32x512xf32>
    %36 = tpu.matmul %34, %35, %cst_28 {dimension_numbers = #tpu.dot_dimension_numbers<[1], [0], [0], [1], [0, 0, 1, 1], [], []>} : vector<32x512xf32>, vector<512x512xf32>, vector<32x512xf32> -> vector<32x512xf32>
    %c0_29 = arith.constant 0 : index
    %c0_30 = arith.constant 0 : index
    %37 = vector.load %arg12[%c0_29, %c0_30] : memref<1x512xf32, #tpu.memory_space<vmem>>, vector<1x512xf32>
    %38 = vector.broadcast %37 : vector<1x512xf32> to vector<32x512xf32>
    %39 = arith.addf %36, %38 : vector<32x512xf32>
    %c0_31 = arith.constant 0 : index
    %c0_32 = arith.constant 0 : index
    %40 = vector.load %arg16[%c0_31, %c0_32] : memref<32x512xf32, #tpu.memory_space<vmem>>, vector<32x512xf32>
    tpu.vector_store %arg16[%c0_31, %c0_32], %39 {strides = array<i32>} : memref<32x512xf32, #tpu.memory_space<vmem>>, vector<32x512xf32>,
    %41 = vector.extract_strided_slice %33 {offsets = [0, 512], sizes = [32, 512], strides = [1, 1]} : vector<32x1024xf32> to vector<32x512xf32>
    %c0_33 = arith.constant 0 : index
    %c0_34 = arith.constant 0 : index
    %42 = vector.load %arg13[%c0_33, %c0_34] : memref<512x512xf32, #tpu.memory_space<vmem>>, vector<512x512xf32>
    %cst_35 = arith.constant dense<0.000000e+00> : vector<32x512xf32>
    %43 = tpu.matmul %41, %42, %cst_35 {dimension_numbers = #tpu.dot_dimension_numbers<[1], [0], [0], [1], [0, 0, 1, 1], [], []>} : vector<32x512xf32>, vector<512x512xf32>, vector<32x512xf32> -> vector<32x512xf32>
    %c0_36 = arith.constant 0 : index
    %c0_37 = arith.constant 0 : index
    %44 = vector.load %arg14[%c0_36, %c0_37] : memref<1x512xf32, #tpu.memory_space<vmem>>, vector<1x512xf32>
    %45 = vector.broadcast %44 : vector<1x512xf32> to vector<32x512xf32>
    %46 = arith.addf %43, %45 : vector<32x512xf32>
    %c0_38 = arith.constant 0 : index
    %c0_39 = arith.constant 0 : index
    %47 = vector.load %arg17[%c0_38, %c0_39] : memref<32x512xf32, #tpu.memory_space<vmem>>, vector<32x512xf32>
    tpu.vector_store %arg17[%c0_38, %c0_39], %46 {strides = array<i32>} : memref<32x512xf32, #tpu.memory_space<vmem>>, vector<32x512xf32>,
    %cst_40 = arith.constant 0.000000e+00 : f32
    %48 = vector.broadcast %cst_40 : f32 to vector<32x128xf32>
    %49 = arith.maximumf %12, %48 : vector<32x128xf32>
    %cst_41 = arith.constant 0.000000e+00 : f32
    %50 = vector.broadcast %cst_41 : f32 to vector<32x32xf32>
    %51 = arith.maximumf %25, %50 : vector<32x32xf32>
    %52 = tpu.concatenate %49, %51 in 1 : vector<32x128xf32>, vector<32x32xf32> -> vector<32x160xf32>
    %c0_42 = arith.constant 0 : index
    %c0_43 = arith.constant 0 : index
    %53 = vector.load %arg15[%c0_42, %c0_43] : memref<160x1024xf32, #tpu.memory_space<vmem>>, vector<160x1024xf32>
    %cst_44 = arith.constant dense<0.000000e+00> : vector<32x1024xf32>
    %54 = tpu.matmul %52, %53, %cst_44 {dimension_numbers = #tpu.dot_dimension_numbers<[1], [0], [0], [1], [0, 0, 1, 1], [], []>} : vector<32x160xf32>, vector<160x1024xf32>, vector<32x1024xf32> -> vector<32x1024xf32>
    %c0_45 = arith.constant 0 : index
    %c0_46 = arith.constant 0 : index
    %55 = vector.load %arg18[%c0_45, %c0_46] : memref<32x1024xf32, #tpu.memory_space<vmem>>, vector<32x1024xf32>
    tpu.vector_store %arg18[%c0_45, %c0_46], %54 {strides = array<i32>} : memref<32x1024xf32, #tpu.memory_space<vmem>>, vector<32x1024xf32>,
    return
  }
  func.func @transform_0(%arg0: i32) -> (i32, i32) {
    %c0_i32 = arith.constant 0 : i32
    %c0_i32_0 = arith.constant 0 : i32
    return %arg0, %c0_i32 : i32, i32
  }
  func.func @transform_1(%arg0: i32) -> (i32, i32) {
    %c0_i32 = arith.constant 0 : i32
    %c0_i32_0 = arith.constant 0 : i32
    return %arg0, %c0_i32 : i32, i32
  }
  func.func @transform_2(%arg0: i32) -> (i32, i32) {
    %c0_i32 = arith.constant 0 : i32
    %c0_i32_0 = arith.constant 0 : i32
    return %arg0, %c0_i32 : i32, i32
  }
  func.func @transform_3(%arg0: i32) -> (i32, i32) {
    %c0_i32 = arith.constant 0 : i32
    %c0_i32_0 = arith.constant 0 : i32
    %c0_i32_1 = arith.constant 0 : i32
    return %c0_i32, %c0_i32_0 : i32, i32
  }
  func.func @transform_4(%arg0: i32) -> (i32, i32) {
    %c0_i32 = arith.constant 0 : i32
    %c0_i32_0 = arith.constant 0 : i32
    %c0_i32_1 = arith.constant 0 : i32
    return %c0_i32, %c0_i32_0 : i32, i32
  }
  func.func @transform_5(%arg0: i32) -> (i32, i32) {
    %c0_i32 = arith.constant 0 : i32
    %c0_i32_0 = arith.constant 0 : i32
    %c0_i32_1 = arith.constant 0 : i32
    return %c0_i32, %c0_i32_0 : i32, i32
  }
  func.func @transform_6(%arg0: i32) -> (i32, i32) {
    %c0_i32 = arith.constant 0 : i32
    %c0_i32_0 = arith.constant 0 : i32
    %c0_i32_1 = arith.constant 0 : i32
    return %c0_i32, %c0_i32_0 : i32, i32
  }
  func.func @transform_7(%arg0: i32) -> (i32, i32) {
    %c0_i32 = arith.constant 0 : i32
    %c0_i32_0 = arith.constant 0 : i32
    %c0_i32_1 = arith.constant 0 : i32
    return %c0_i32, %c0_i32_0 : i32, i32
  }
  func.func @transform_8(%arg0: i32) -> (i32, i32) {
    %c0_i32 = arith.constant 0 : i32
    %c0_i32_0 = arith.constant 0 : i32
    %c0_i32_1 = arith.constant 0 : i32
    return %c0_i32, %c0_i32_0 : i32, i32
  }
  func.func @transform_9(%arg0: i32) -> (i32, i32) {
    %c0_i32 = arith.constant 0 : i32
    %c0_i32_0 = arith.constant 0 : i32
    %c0_i32_1 = arith.constant 0 : i32
    return %c0_i32, %c0_i32_0 : i32, i32
  }
  func.func @transform_10(%arg0: i32) -> (i32, i32) {
    %c0_i32 = arith.constant 0 : i32
    %c0_i32_0 = arith.constant 0 : i32
    %c0_i32_1 = arith.constant 0 : i32
    return %c0_i32, %c0_i32_0 : i32, i32
  }
  func.func @transform_11(%arg0: i32) -> (i32, i32) {
    %c0_i32 = arith.constant 0 : i32
    %c0_i32_0 = arith.constant 0 : i32
    %c0_i32_1 = arith.constant 0 : i32
    return %c0_i32, %c0_i32_0 : i32, i32
  }
  func.func @transform_12(%arg0: i32) -> (i32, i32) {
    %c0_i32 = arith.constant 0 : i32
    %c0_i32_0 = arith.constant 0 : i32
    %c0_i32_1 = arith.constant 0 : i32
    return %c0_i32, %c0_i32_0 : i32, i32
  }
  func.func @transform_13(%arg0: i32) -> (i32, i32) {
    %c0_i32 = arith.constant 0 : i32
    %c0_i32_0 = arith.constant 0 : i32
    %c0_i32_1 = arith.constant 0 : i32
    return %c0_i32, %c0_i32_0 : i32, i32
  }
  func.func @transform_14(%arg0: i32) -> (i32, i32) {
    %c0_i32 = arith.constant 0 : i32
    %c0_i32_0 = arith.constant 0 : i32
    %c0_i32_1 = arith.constant 0 : i32
    return %c0_i32, %c0_i32_0 : i32, i32
  }
  func.func @transform_15(%arg0: i32) -> (i32, i32) {
    %c0_i32 = arith.constant 0 : i32
    %c0_i32_0 = arith.constant 0 : i32
    return %arg0, %c0_i32 : i32, i32
  }
  func.func @transform_16(%arg0: i32) -> (i32, i32) {
    %c0_i32 = arith.constant 0 : i32
    %c0_i32_0 = arith.constant 0 : i32
    return %arg0, %c0_i32 : i32, i32
  }
  func.func @transform_17(%arg0: i32) -> (i32, i32) {
    %c0_i32 = arith.constant 0 : i32
    %c0_i32_0 = arith.constant 0 : i32
    return %arg0, %c0_i32 : i32, i32
  }
}

module attributes {stable_mosaic.version = 11 : i64} {
  func.func @_pair_kernel(%arg0: i32, %arg1: memref<16x512xf32, #tpu.memory_space<vmem>>, %arg2: memref<16x512xf32, #tpu.memory_space<vmem>>, %arg3: memref<16x1024xf32, #tpu.memory_space<vmem>>, %arg4: memref<1x512xf32, #tpu.memory_space<vmem>>, %arg5: memref<8192x16xf32, #tpu.memory_space<vmem>>, %arg6: memref<1x1xf32, #tpu.memory_space<smem>>, %arg7: memref<1x16x16xf32, #tpu.memory_space<vmem>>) attributes {dimension_semantics = [#tpu.dimension_semantics<parallel>], iteration_bounds = array<i64: 2>, scalar_prefetch = 0 : i64, scratch_operands = 0 : i64, tpu.core_type = #tpu.core_type<tc>, window_params = [{transform_indices = @transform_0, window_bounds = array<i64: 16, 512>}, {transform_indices = @transform_1, window_bounds = array<i64: 16, 512>}, {transform_indices = @transform_2, window_bounds = array<i64: 16, 1024>}, {pipeline_mode = #tpu.pipeline_mode<synchronous>, transform_indices = @transform_3, window_bounds = array<i64: 1, 512>}, {pipeline_mode = #tpu.pipeline_mode<synchronous>, transform_indices = @transform_4, window_bounds = array<i64: 8192, 16>}, {transform_indices = @transform_5, window_bounds = array<i64: 1, 1>}, {transform_indices = @transform_6, window_bounds = array<i64: 1, 16, 16>}]} {
    %c0 = arith.constant 0 : index
    %c0_0 = arith.constant 0 : index
    %0 = vector.load %arg1[%c0, %c0_0] : memref<16x512xf32, #tpu.memory_space<vmem>>, vector<16x512xf32>
    %c0_1 = arith.constant 0 : index
    %c0_2 = arith.constant 0 : index
    %1 = vector.load %arg2[%c0_1, %c0_2] : memref<16x512xf32, #tpu.memory_space<vmem>>, vector<16x512xf32>
    %cst = arith.constant dense<0.000000e+00> : vector<16x16xf32>
    %2 = tpu.matmul %0, %1, %cst {dimension_numbers = #tpu.dot_dimension_numbers<[1], [1], [0], [0], [0, 0, 1, 0], [], []>} : vector<16x512xf32>, vector<16x512xf32>, vector<16x16xf32> -> vector<16x16xf32>
    %c0_3 = arith.constant 0 : index
    %c0_4 = arith.constant 0 : index
    %3 = vector.load %arg3[%c0_3, %c0_4] : memref<16x1024xf32, #tpu.memory_space<vmem>>, vector<16x1024xf32>
    %4 = vector.extract_strided_slice %3 {offsets = [0, 0], sizes = [16, 512], strides = [1, 1]} : vector<16x1024xf32> to vector<16x512xf32>
    %5 = vector.extract_strided_slice %3 {offsets = [0, 512], sizes = [16, 512], strides = [1, 1]} : vector<16x1024xf32> to vector<16x512xf32>
    %c0_5 = arith.constant 0 : index
    %c0_6 = arith.constant 0 : index
    %6 = vector.load %arg4[%c0_5, %c0_6] : memref<1x512xf32, #tpu.memory_space<vmem>>, vector<1x512xf32>
    %c0_7 = arith.constant 0 : index
    %c0_8 = arith.constant 0 : index
    %7 = vector.load %arg5[%c0_7, %c0_8] : memref<8192x16xf32, #tpu.memory_space<vmem>>, vector<8192x16xf32>
    %c0_9 = arith.constant 0 : index
    %c0_10 = arith.constant 0 : index
    %8 = memref.load %arg6[%c0_9, %c0_10] : memref<1x1xf32, #tpu.memory_space<smem>>
    %9 = vector.extract_strided_slice %5 {offsets = [0, 0], sizes = [1, 512], strides = [1, 1]} : vector<16x512xf32> to vector<1x512xf32>
    %10 = arith.addf %9, %6 : vector<1x512xf32>
    %11 = vector.broadcast %10 : vector<1x512xf32> to vector<16x512xf32>
    %12 = arith.addf %4, %11 : vector<16x512xf32>
    %cst_11 = arith.constant 0.000000e+00 : f32
    %13 = vector.broadcast %cst_11 : f32 to vector<16x512xf32>
    %14 = arith.maximumf %12, %13 : vector<16x512xf32>
    %15 = vector.extract_strided_slice %5 {offsets = [1, 0], sizes = [1, 512], strides = [1, 1]} : vector<16x512xf32> to vector<1x512xf32>
    %16 = arith.addf %15, %6 : vector<1x512xf32>
    %17 = vector.broadcast %16 : vector<1x512xf32> to vector<16x512xf32>
    %18 = arith.addf %4, %17 : vector<16x512xf32>
    %cst_12 = arith.constant 0.000000e+00 : f32
    %19 = vector.broadcast %cst_12 : f32 to vector<16x512xf32>
    %20 = arith.maximumf %18, %19 : vector<16x512xf32>
    %21 = vector.extract_strided_slice %5 {offsets = [2, 0], sizes = [1, 512], strides = [1, 1]} : vector<16x512xf32> to vector<1x512xf32>
    %22 = arith.addf %21, %6 : vector<1x512xf32>
    %23 = vector.broadcast %22 : vector<1x512xf32> to vector<16x512xf32>
    %24 = arith.addf %4, %23 : vector<16x512xf32>
    %cst_13 = arith.constant 0.000000e+00 : f32
    %25 = vector.broadcast %cst_13 : f32 to vector<16x512xf32>
    %26 = arith.maximumf %24, %25 : vector<16x512xf32>
    %27 = vector.extract_strided_slice %5 {offsets = [3, 0], sizes = [1, 512], strides = [1, 1]} : vector<16x512xf32> to vector<1x512xf32>
    %28 = arith.addf %27, %6 : vector<1x512xf32>
    %29 = vector.broadcast %28 : vector<1x512xf32> to vector<16x512xf32>
    %30 = arith.addf %4, %29 : vector<16x512xf32>
    %cst_14 = arith.constant 0.000000e+00 : f32
    %31 = vector.broadcast %cst_14 : f32 to vector<16x512xf32>
    %32 = arith.maximumf %30, %31 : vector<16x512xf32>
    %33 = vector.extract_strided_slice %5 {offsets = [4, 0], sizes = [1, 512], strides = [1, 1]} : vector<16x512xf32> to vector<1x512xf32>
    %34 = arith.addf %33, %6 : vector<1x512xf32>
    %35 = vector.broadcast %34 : vector<1x512xf32> to vector<16x512xf32>
    %36 = arith.addf %4, %35 : vector<16x512xf32>
    %cst_15 = arith.constant 0.000000e+00 : f32
    %37 = vector.broadcast %cst_15 : f32 to vector<16x512xf32>
    %38 = arith.maximumf %36, %37 : vector<16x512xf32>
    %39 = vector.extract_strided_slice %5 {offsets = [5, 0], sizes = [1, 512], strides = [1, 1]} : vector<16x512xf32> to vector<1x512xf32>
    %40 = arith.addf %39, %6 : vector<1x512xf32>
    %41 = vector.broadcast %40 : vector<1x512xf32> to vector<16x512xf32>
    %42 = arith.addf %4, %41 : vector<16x512xf32>
    %cst_16 = arith.constant 0.000000e+00 : f32
    %43 = vector.broadcast %cst_16 : f32 to vector<16x512xf32>
    %44 = arith.maximumf %42, %43 : vector<16x512xf32>
    %45 = vector.extract_strided_slice %5 {offsets = [6, 0], sizes = [1, 512], strides = [1, 1]} : vector<16x512xf32> to vector<1x512xf32>
    %46 = arith.addf %45, %6 : vector<1x512xf32>
    %47 = vector.broadcast %46 : vector<1x512xf32> to vector<16x512xf32>
    %48 = arith.addf %4, %47 : vector<16x512xf32>
    %cst_17 = arith.constant 0.000000e+00 : f32
    %49 = vector.broadcast %cst_17 : f32 to vector<16x512xf32>
    %50 = arith.maximumf %48, %49 : vector<16x512xf32>
    %51 = vector.extract_strided_slice %5 {offsets = [7, 0], sizes = [1, 512], strides = [1, 1]} : vector<16x512xf32> to vector<1x512xf32>
    %52 = arith.addf %51, %6 : vector<1x512xf32>
    %53 = vector.broadcast %52 : vector<1x512xf32> to vector<16x512xf32>
    %54 = arith.addf %4, %53 : vector<16x512xf32>
    %cst_18 = arith.constant 0.000000e+00 : f32
    %55 = vector.broadcast %cst_18 : f32 to vector<16x512xf32>
    %56 = arith.maximumf %54, %55 : vector<16x512xf32>
    %57 = vector.extract_strided_slice %5 {offsets = [8, 0], sizes = [1, 512], strides = [1, 1]} : vector<16x512xf32> to vector<1x512xf32>
    %58 = arith.addf %57, %6 : vector<1x512xf32>
    %59 = vector.broadcast %58 : vector<1x512xf32> to vector<16x512xf32>
    %60 = arith.addf %4, %59 : vector<16x512xf32>
    %cst_19 = arith.constant 0.000000e+00 : f32
    %61 = vector.broadcast %cst_19 : f32 to vector<16x512xf32>
    %62 = arith.maximumf %60, %61 : vector<16x512xf32>
    %63 = vector.extract_strided_slice %5 {offsets = [9, 0], sizes = [1, 512], strides = [1, 1]} : vector<16x512xf32> to vector<1x512xf32>
    %64 = arith.addf %63, %6 : vector<1x512xf32>
    %65 = vector.broadcast %64 : vector<1x512xf32> to vector<16x512xf32>
    %66 = arith.addf %4, %65 : vector<16x512xf32>
    %cst_20 = arith.constant 0.000000e+00 : f32
    %67 = vector.broadcast %cst_20 : f32 to vector<16x512xf32>
    %68 = arith.maximumf %66, %67 : vector<16x512xf32>
    %69 = vector.extract_strided_slice %5 {offsets = [10, 0], sizes = [1, 512], strides = [1, 1]} : vector<16x512xf32> to vector<1x512xf32>
    %70 = arith.addf %69, %6 : vector<1x512xf32>
    %71 = vector.broadcast %70 : vector<1x512xf32> to vector<16x512xf32>
    %72 = arith.addf %4, %71 : vector<16x512xf32>
    %cst_21 = arith.constant 0.000000e+00 : f32
    %73 = vector.broadcast %cst_21 : f32 to vector<16x512xf32>
    %74 = arith.maximumf %72, %73 : vector<16x512xf32>
    %75 = vector.extract_strided_slice %5 {offsets = [11, 0], sizes = [1, 512], strides = [1, 1]} : vector<16x512xf32> to vector<1x512xf32>
    %76 = arith.addf %75, %6 : vector<1x512xf32>
    %77 = vector.broadcast %76 : vector<1x512xf32> to vector<16x512xf32>
    %78 = arith.addf %4, %77 : vector<16x512xf32>
    %cst_22 = arith.constant 0.000000e+00 : f32
    %79 = vector.broadcast %cst_22 : f32 to vector<16x512xf32>
    %80 = arith.maximumf %78, %79 : vector<16x512xf32>
    %81 = vector.extract_strided_slice %5 {offsets = [12, 0], sizes = [1, 512], strides = [1, 1]} : vector<16x512xf32> to vector<1x512xf32>
    %82 = arith.addf %81, %6 : vector<1x512xf32>
    %83 = vector.broadcast %82 : vector<1x512xf32> to vector<16x512xf32>
    %84 = arith.addf %4, %83 : vector<16x512xf32>
    %cst_23 = arith.constant 0.000000e+00 : f32
    %85 = vector.broadcast %cst_23 : f32 to vector<16x512xf32>
    %86 = arith.maximumf %84, %85 : vector<16x512xf32>
    %87 = vector.extract_strided_slice %5 {offsets = [13, 0], sizes = [1, 512], strides = [1, 1]} : vector<16x512xf32> to vector<1x512xf32>
    %88 = arith.addf %87, %6 : vector<1x512xf32>
    %89 = vector.broadcast %88 : vector<1x512xf32> to vector<16x512xf32>
    %90 = arith.addf %4, %89 : vector<16x512xf32>
    %cst_24 = arith.constant 0.000000e+00 : f32
    %91 = vector.broadcast %cst_24 : f32 to vector<16x512xf32>
    %92 = arith.maximumf %90, %91 : vector<16x512xf32>
    %93 = vector.extract_strided_slice %5 {offsets = [14, 0], sizes = [1, 512], strides = [1, 1]} : vector<16x512xf32> to vector<1x512xf32>
    %94 = arith.addf %93, %6 : vector<1x512xf32>
    %95 = vector.broadcast %94 : vector<1x512xf32> to vector<16x512xf32>
    %96 = arith.addf %4, %95 : vector<16x512xf32>
    %cst_25 = arith.constant 0.000000e+00 : f32
    %97 = vector.broadcast %cst_25 : f32 to vector<16x512xf32>
    %98 = arith.maximumf %96, %97 : vector<16x512xf32>
    %99 = vector.extract_strided_slice %5 {offsets = [15, 0], sizes = [1, 512], strides = [1, 1]} : vector<16x512xf32> to vector<1x512xf32>
    %100 = arith.addf %99, %6 : vector<1x512xf32>
    %101 = vector.broadcast %100 : vector<1x512xf32> to vector<16x512xf32>
    %102 = arith.addf %4, %101 : vector<16x512xf32>
    %cst_26 = arith.constant 0.000000e+00 : f32
    %103 = vector.broadcast %cst_26 : f32 to vector<16x512xf32>
    %104 = arith.maximumf %102, %103 : vector<16x512xf32>
    %105 = tpu.concatenate %14, %20, %26, %32, %38, %44, %50, %56, %62, %68, %74, %80, %86, %92, %98, %104 in 1 : vector<16x512xf32>, vector<16x512xf32>, vector<16x512xf32>, vector<16x512xf32>, vector<16x512xf32>, vector<16x512xf32>, vector<16x512xf32>, vector<16x512xf32>, vector<16x512xf32>, vector<16x512xf32>, vector<16x512xf32>, vector<16x512xf32>, vector<16x512xf32>, vector<16x512xf32>, vector<16x512xf32>, vector<16x512xf32> -> vector<16x8192xf32>
    %cst_27 = arith.constant dense<0.000000e+00> : vector<16x16xf32>
    %106 = tpu.matmul %105, %7, %cst_27 {dimension_numbers = #tpu.dot_dimension_numbers<[1], [0], [0], [1], [0, 0, 1, 1], [], []>} : vector<16x8192xf32>, vector<8192x16xf32>, vector<16x16xf32> -> vector<16x16xf32>
    %107 = vector.broadcast %8 : f32 to vector<16x16xf32>
    %108 = arith.addf %106, %107 : vector<16x16xf32>
    %109 = arith.addf %108, %2 : vector<16x16xf32>
    %110 = arith.negf %109 : vector<16x16xf32>
    %111 = math.exp %110 : vector<16x16xf32>
    %cst_28 = arith.constant 1.000000e+00 : f32
    %112 = vector.broadcast %cst_28 : f32 to vector<16x16xf32>
    %113 = arith.addf %112, %111 : vector<16x16xf32>
    %114 = arith.divf %112, %113 : vector<16x16xf32>
    %c0_29 = arith.constant 0 : index
    %c0_30 = arith.constant 0 : index
    %c0_31 = arith.constant 0 : index
    %115 = vector.load %arg7[%c0_29, %c0_30, %c0_31] : memref<1x16x16xf32, #tpu.memory_space<vmem>>, vector<1x16x16xf32>
    %116 = vector.shape_cast %115 : vector<1x16x16xf32> to vector<16x16xf32>
    %117 = vector.shape_cast %114 : vector<16x16xf32> to vector<1x16x16xf32>
    tpu.vector_store %arg7[%c0_29, %c0_30, %c0_31], %117 {strides = array<i32>} : memref<1x16x16xf32, #tpu.memory_space<vmem>>, vector<1x16x16xf32>,
    return
  }
  func.func @transform_0(%arg0: i32) -> (i32, i32) {
    %c0_i32 = arith.constant 0 : i32
    %c0_i32_0 = arith.constant 0 : i32
    return %arg0, %c0_i32 : i32, i32
  }
  func.func @transform_1(%arg0: i32) -> (i32, i32) {
    %c0_i32 = arith.constant 0 : i32
    %c0_i32_0 = arith.constant 0 : i32
    return %arg0, %c0_i32 : i32, i32
  }
  func.func @transform_2(%arg0: i32) -> (i32, i32) {
    %c0_i32 = arith.constant 0 : i32
    %c0_i32_0 = arith.constant 0 : i32
    return %arg0, %c0_i32 : i32, i32
  }
  func.func @transform_3(%arg0: i32) -> (i32, i32) {
    %c0_i32 = arith.constant 0 : i32
    %c0_i32_0 = arith.constant 0 : i32
    %c0_i32_1 = arith.constant 0 : i32
    return %c0_i32, %c0_i32_0 : i32, i32
  }
  func.func @transform_4(%arg0: i32) -> (i32, i32) {
    %c0_i32 = arith.constant 0 : i32
    %c0_i32_0 = arith.constant 0 : i32
    %c0_i32_1 = arith.constant 0 : i32
    return %c0_i32, %c0_i32_0 : i32, i32
  }
  func.func @transform_5(%arg0: i32) -> (i32, i32) {
    %c0_i32 = arith.constant 0 : i32
    %c0_i32_0 = arith.constant 0 : i32
    %c0_i32_1 = arith.constant 0 : i32
    return %c0_i32, %c0_i32_0 : i32, i32
  }
  func.func @transform_6(%arg0: i32) -> (i32, i32, i32) {
    %c0_i32 = arith.constant 0 : i32
    %c0_i32_0 = arith.constant 0 : i32
    %c0_i32_1 = arith.constant 0 : i32
    return %arg0, %c0_i32, %c0_i32_0 : i32, i32, i32
  }
}

</mosaic_0001>

<bundles_post_ra>
// kernel: _batched_forward.2
= control target key start
LH: loop header
LB: loop body
LE: loop exit
PB: predicated region body
PF: predicated region fallthrough
CT: control target
= control target key end

     0   :  { %s4330_s0 = inlined_call_operand.vmem [shape: f32[32,8], index: 0, kind: input, shape index: {}]   ;;  %s4331_s1 = inlined_call_operand.vmem [shape: f32[32,9], index: 1, kind: input, shape index: {}]   ;;  %s4332_s2 = inlined_call_operand.hbm [shape: f32[32,64], index: 2, kind: input, shape index: {}]   ;;  %s4333_s3 = inlined_call_operand.hbm [shape: f32[9,128], index: 3, kind: input, shape index: {}]   ;;  %s4334_s4 = inlined_call_operand.hbm [shape: f32[1,128], index: 4, kind: input, shape index: {}]   ;;  %s4335_s5 = inlined_call_operand.hbm [shape: f32[128,128], index: 5, kind: input, shape index: {}]   ;;  %s4336_s6 = inlined_call_operand.hbm [shape: f32[1,128], index: 6, kind: input, shape index: {}]   ;;  %s4337_s7 = inlined_call_operand.hbm [shape: f32[8,32], index: 7, kind: input, shape index: {}]   ;;  %s4338_s8 = inlined_call_operand.hbm [shape: f32[64,1024], index: 8, kind: input, shape index: {}]   ;;  %s4339_s9 = inlined_call_operand.hbm [shape: f32[1,1024], index: 9, kind: input, shape index: {}]   ;;  %s4340_s10 = inlined_call_operand.hbm [shape: f32[512,512], index: 10, kind: input, shape index: {}]   ;;  %s4341_s11 = inlined_call_operand.hbm [shape: f32[1,512], index: 11, kind: input, shape index: {}]   ;;  %s4342_s12 = inlined_call_operand.hbm [shape: f32[512,512], index: 12, kind: input, shape index: {}]   ;;  %s4343_s13 = inlined_call_operand.hbm [shape: f32[1,512], index: 13, kind: input, shape index: {}]   ;;  %s4344_s14 = inlined_call_operand.hbm [shape: f32[160,1024], index: 14, kind: input, shape index: {}]   ;;  %s4345_s15 = inlined_call_operand.vmem [shape: f32[32,512], index: 15, kind: output, shape index: {0}]   ;;  %s4346_s16 = inlined_call_operand.vmem [shape: f32[32,512], index: 16, kind: output, shape index: {1}]   ;;  %s4347_s17 = inlined_call_operand.vmem [shape: f32[32,1024], index: 17, kind: output, shape index: {2}]  }
   0x1   :  { %4350 = sst [smem:[#allocation29_spill]] %s4330_s0 }
   0x2   :  { %4351 = sst [smem:[#allocation30_spill]] %s4331_s1 }
   0x3   :  { %23 = vsyncpa [#allocation3], 0 }
   0x4   :  { %24 = vsyncpa [#allocation5], 0 }
   0x5   :  { %25 = vsyncpa [#allocation8], 0 }
   0x6   :  { %26 = vsyncpa [#allocation11], 0 }
   0x7   :  { %27 = vsyncpa [#allocation14], 0 }
   0x8   :  { %28 = vsyncpa [#allocation17], 0 }
   0x9   :  { %29 = vsyncpa [#allocation20], 0  ;;  %s3431_s24 = smov [#allocation4]   ;;  %s3432_s26 = smov [#allocation7]  }
   0xa   :  { %s51_s25 = sshll.u32 %s3431_s24, 4  ;;  %s73_s27 = sshll.u32 %s3432_s26, 4  ;;  %s52_s25 = int_to_ptr.vmem [resolvable:$true] %s51_s25  ;;  %s74_s27 = int_to_ptr.vmem [resolvable:$true] %s73_s27 }
   0xb   :  { %s3165_s28 = scalar_lea.vmem %s52_s25, 256  ;;  %p3170_p1 = scmp.lt.s32.totalorder %s52_s25, %s52_s25 }
   0xc   :  { %p3166_p0 = scmp.ne.s32.totalorder %s52_s25, %s3165_s28  ;;  %p3171_p2 = scmp.lt.s32.totalorder %s3165_s28, %s3165_s28 }
   0xe   :  { %p3172_p3 = por %p3171_p2, %p3170_p1 }
  0x10   :  { %p3173_p4 = pnand %p3172_p3, %p3166_p0 }
  0x12   :  { %3176 = shalt.err (!%p3173_p4)
}
  0x13   :  { %s3433_s29 = smov 128   ;;  %s3434_s0 = smov 8  }
  0x14   :  { %57 = dma.hbm_to_vmem [thread:$0]  %s4333_s3, 256, %s52_s25, [#allocation5], %s3433_s29, %s3433_s29, %s3434_s0  }
  0x15   :  { %s3185_s19 = scalar_lea.vmem %s74_s27, 2048  ;;  %p3190_p6 = scmp.lt.s32.totalorder %s74_s27, %s74_s27 }
  0x16   :  { %p3186_p5 = scmp.ne.s32.totalorder %s74_s27, %s3185_s19  ;;  %p3191_p7 = scmp.lt.s32.totalorder %s3185_s19, %s3185_s19 }
  0x18   :  { %p3192_p8 = por %p3191_p7, %p3190_p6 }
  0x1a   :  { %p3193_p9 = pnand %p3192_p8, %p3186_p5 }
  0x1c   :  { %3196 = shalt.err (!%p3193_p9)
}
  0x1d   :  { %79 = dma.hbm_to_vmem [thread:$0]  %s4335_s5, 2048, %s74_s27, [#allocation8], %s3433_s29, %s3433_s29, %s3434_s0  }
  0x1e   :  { %s3435_s21 = smov [#allocation10]   ;;  %s3436_s23 = smov [#allocation13]  }
  0x1f   :  { %s96_s22 = sshll.u32 %s3435_s21, 4  ;;  %s118_s24 = sshll.u32 %s3436_s23, 4  ;;  %s97_s22 = int_to_ptr.vmem [resolvable:$true] %s96_s22  ;;  %s119_s24 = int_to_ptr.vmem [resolvable:$true] %s118_s24 }
  0x20   :  { %s3205_s3 = scalar_lea.vmem %s97_s22, 128  ;;  %p3210_p11 = scmp.lt.s32.totalorder %s97_s22, %s97_s22 }
  0x21   :  { %p3206_p10 = scmp.ne.s32.totalorder %s97_s22, %s3205_s3  ;;  %p3211_p12 = scmp.lt.s32.totalorder %s3205_s3, %s3205_s3 }
  0x23   :  { %p3212_p13 = por %p3211_p12, %p3210_p11 }
  0x25   :  { %p3213_p0 = pnand %p3212_p13, %p3206_p10 }
  0x27   :  { %3216 = shalt.err (!%p3213_p0)
}
  0x28   :  { %99 = dma.hbm_to_vmem [thread:$0]  %s4337_s7, 128, %s97_s22, [#allocation11]  }
  0x29   :  { %s3225_s28 = scalar_lea.vmem %s119_s24, 128  ;;  %p3230_p2 = scmp.lt.s32.totalorder %s119_s24, %s119_s24 }
  0x2a   :  { %p3226_p1 = scmp.ne.s32.totalorder %s119_s24, %s3225_s28  ;;  %p3231_p3 = scmp.lt.s32.totalorder %s3225_s28, %s3225_s28 }
  0x2c   :  { %p3232_p4 = por %p3231_p3, %p3230_p2 }
  0x2e   :  { %p3233_p5 = pnand %p3232_p4, %p3226_p1 }
  0x30   :  { %3236 = shalt.err (!%p3233_p5)
}
  0x31   :  { %121 = dma.hbm_to_vmem [thread:$0]  %s4339_s9, 128, %s119_s24, [#allocation14]  }
  0x32   :  { %s3437_s30 = smov [#allocation16]   ;;  %s3438_s19 = smov [#allocation19]  }
  0x33   :  { %s140_s18 = sshll.u32 %s3437_s30, 4  ;;  %s162_s1 = sshll.u32 %s3438_s19, 4  ;;  %s141_s18 = int_to_ptr.vmem [resolvable:$true] %s140_s18  ;;  %s163_s1 = int_to_ptr.vmem [resolvable:$true] %s162_s1 }
  0x34   :  { %s3245_s20 = scalar_lea.vmem %s141_s18, 64  ;;  %p3250_p7 = scmp.lt.s32.totalorder %s141_s18, %s141_s18 }
  0x35   :  { %p3246_p6 = scmp.ne.s32.totalorder %s141_s18, %s3245_s20  ;;  %p3251_p8 = scmp.lt.s32.totalorder %s3245_s20, %s3245_s20 }
  0x37   :  { %p3252_p9 = por %p3251_p8, %p3250_p7 }
  0x39   :  { %p3253_p10 = pnand %p3252_p9, %p3246_p6 }
  0x3b   :  { %3256 = shalt.err (!%p3253_p10)
}
  0x3c   :  { %143 = dma.hbm_to_vmem [thread:$0]  %s4341_s11, 64, %s141_s18, [#allocation17]  }
  0x3d   :  { %s3265_s22 = scalar_lea.vmem %s163_s1, 64  ;;  %p3270_p12 = scmp.lt.s32.totalorder %s163_s1, %s163_s1 }
  0x3e   :  { %p3266_p11 = scmp.ne.s32.totalorder %s163_s1, %s3265_s22  ;;  %p3271_p13 = scmp.lt.s32.totalorder %s3265_s22, %s3265_s22 }
  0x40   :  { %p3272_p0 = por %p3271_p13, %p3270_p12 }
  0x42   :  { %p3273_p1 = pnand %p3272_p0, %p3266_p11 }
  0x44   :  { %3276 = shalt.err (!%p3273_p1)
}
  0x45   :  { %165 = dma.hbm_to_vmem [thread:$0]  %s4343_s13, 64, %s163_s1, [#allocation20]  }
  0x46   :  { %s3439_s24 = smov [#allocation2]   ;;  %s3440_s25 = smov [#allocation6]  }
  0x47   :  { %s39_s3 = sshll.u32 %s3439_s24, 4  ;;  %s64_s26 = sshll.u32 %s3440_s25, 4  ;;  %s40_s3 = int_to_ptr.vmem [resolvable:$true] %s39_s3  ;;  %s65_s26 = int_to_ptr.vmem [resolvable:$true] %s64_s26 }
  0x48   :  { %s3285_s28 = scalar_lea.vmem %s40_s3, 512  ;;  %p3290_p3 = scmp.lt.s32.totalorder %s40_s3, %s40_s3 }
  0x49   :  { %p3286_p2 = scmp.ne.s32.totalorder %s40_s3, %s3285_s28  ;;  %p3291_p4 = scmp.lt.s32.totalorder %s3285_s28, %s3285_s28 }
  0x4b   :  { %p3292_p5 = por %p3291_p4, %p3290_p3 }
  0x4d   :  { %p3293_p6 = pnand %p3292_p5, %p3286_p2 }
  0x4f   :  { %3296 = shalt.err (!%p3293_p6)
}
  0x50   :  { %45 = dma.hbm_to_vmem [thread:$0]  %s4332_s2, 512, %s40_s3, [#allocation3], %s3433_s29, %s3433_s29, %s3434_s0  }
  0x51   :  { %s3305_s13 = scalar_lea.vmem %s65_s26, 16  ;;  %s3309_s27 = scalar_lea.vmem %s65_s26, 32 }
  0x52   :  { %p3306_p7 = scmp.ne.s32.totalorder %s65_s26, %s3305_s13  ;;  %p3310_p8 = scmp.lt.s32.totalorder %s65_s26, %s65_s26 }
  0x53   :  { %p3311_p9 = scmp.lt.s32.totalorder %s3309_s27, %s3305_s13 }
  0x55   :  { %p3312_p10 = por %p3311_p9, %p3310_p8 }
  0x57   :  { %p3313_p11 = pnand %p3312_p10, %p3306_p7 }
  0x59   :  { %3316 = shalt.err (!%p3313_p11)
}
  0x5a   :  { %67 = dma.hbm_to_vmem [thread:$0]  %s4334_s4, 16, %s65_s26, [#allocation5]  }
  0x5b   :  { %s3441_s19 = smov [#allocation9]   ;;  %s3442_s20 = smov [#allocation12]  }
  0x5c   :  { %s86_s1 = sshll.u32 %s3441_s19, 4  ;;  %s105_s7 = sshll.u32 %s3442_s20, 4  ;;  %s87_s1 = int_to_ptr.vmem [resolvable:$true] %s86_s1  ;;  %s106_s7 = int_to_ptr.vmem [resolvable:$true] %s105_s7 }
  0x5d   :  { %s3325_s21 = scalar_lea.vmem %s87_s1, 16  ;;  %s3329_s2 = scalar_lea.vmem %s87_s1, 32 }
  0x5e   :  { %p3326_p12 = scmp.ne.s32.totalorder %s87_s1, %s3325_s21  ;;  %p3330_p13 = scmp.lt.s32.totalorder %s87_s1, %s87_s1 }
  0x5f   :  { %p3331_p0 = scmp.lt.s32.totalorder %s3329_s2, %s3325_s21 }
  0x61   :  { %p3332_p1 = por %p3331_p0, %p3330_p13 }
  0x63   :  { %p3333_p2 = pnand %p3332_p1, %p3326_p12 }
  0x65   :  { %3336 = shalt.err (!%p3333_p2)
}
  0x66   :  { %89 = dma.hbm_to_vmem [thread:$0]  %s4336_s6, 16, %s87_s1, [#allocation8]  }
  0x67   :  { %s3345_s22 = scalar_lea.vmem %s106_s7, 8192  ;;  %p3350_p4 = scmp.lt.s32.totalorder %s106_s7, %s106_s7 }
  0x68   :  { %p3346_p3 = scmp.ne.s32.totalorder %s106_s7, %s3345_s22  ;;  %p3351_p5 = scmp.lt.s32.totalorder %s3345_s22, %s3345_s22 }
  0x6a   :  { %p3352_p6 = por %p3351_p5, %p3350_p4 }
  0x6c   :  { %p3353_p7 = pnand %p3352_p6, %p3346_p3 }
  0x6e   :  { %3356 = shalt.err (!%p3353_p7)
}
  0x6f   :  { %s3443_s4 = smov 1024   ;;  %s3444_s9 = smov 64  }
  0x70   :  { %111 = dma.hbm_to_vmem [thread:$0]  %s4338_s8, 8192, %s106_s7, [#allocation11], %s3443_s4, %s3443_s4, %s3444_s9  }
  0x71   :  { %s3445_s3 = smov [#allocation15]  }
  0x72   :  { %s127_s25 = sshll.u32 %s3445_s3, 4  ;;  %s128_s25 = int_to_ptr.vmem [resolvable:$true] %s127_s25 }
  0x73   :  { %s3365_s6 = scalar_lea.vmem %s128_s25, 32768  ;;  %p3370_p9 = scmp.lt.s32.totalorder %s128_s25, %s128_s25 }
  0x74   :  { %p3366_p8 = scmp.ne.s32.totalorder %s128_s25, %s3365_s6  ;;  %p3371_p10 = scmp.lt.s32.totalorder %s3365_s6, %s3365_s6 }
  0x76   :  { %p3372_p11 = por %p3371_p10, %p3370_p9 }
  0x78   :  { %p3373_p12 = pnand %p3372_p11, %p3366_p8 }
  0x7a   :  { %3376 = shalt.err (!%p3373_p12)
}
  0x7b   :  { %s3446_s26 = smov 512   ;;  %s3447_s28 = smov 32  }
  0x7c   :  { %133 = dma.hbm_to_vmem [thread:$0]  %s4340_s10, 32768, %s128_s25, [#allocation14], %s3446_s26, %s3446_s26, %s3447_s28  }
  0x7d   :  { %s3448_s13 = smov [#allocation18]   ;;  %s3449_s8 = smov [#allocation21]  }
  0x7e   :  { %s149_s27 = sshll.u32 %s3448_s13, 4  ;;  %s171_s30 = sshll.u32 %s3449_s8, 4  ;;  %s150_s27 = int_to_ptr.vmem [resolvable:$true] %s149_s27  ;;  %s172_s30 = int_to_ptr.vmem [resolvable:$true] %s171_s30 }
  0x7f   :  { %s3385_s18 = scalar_lea.vmem %s150_s27, 32768  ;;  %p3390_p0 = scmp.lt.s32.totalorder %s150_s27, %s150_s27 }
  0x80   :  { %p3386_p13 = scmp.ne.s32.totalorder %s150_s27, %s3385_s18  ;;  %p3391_p1 = scmp.lt.s32.totalorder %s3385_s18, %s3385_s18 }
  0x82   :  { %p3392_p2 = por %p3391_p1, %p3390_p0 }
  0x84   :  { %p3393_p3 = pnand %p3392_p2, %p3386_p13 }
  0x86   :  { %3396 = shalt.err (!%p3393_p3)
}
  0x87   :  { %155 = dma.hbm_to_vmem [thread:$0]  %s4342_s12, 32768, %s150_s27, [#allocation17], %s3446_s26, %s3446_s26, %s3447_s28  }
  0x88   :  { %s3405_s20 = scalar_lea.vmem %s172_s30, 20480  ;;  %p3410_p5 = scmp.lt.s32.totalorder %s172_s30, %s172_s30 }
  0x89   :  { %p3406_p4 = scmp.ne.s32.totalorder %s172_s30, %s3405_s20  ;;  %p3411_p6 = scmp.lt.s32.totalorder %s3405_s20, %s3405_s20 }
  0x8b   :  { %p3412_p7 = por %p3411_p6, %p3410_p5 }
  0x8d   :  { %p3413_p8 = pnand %p3412_p7, %p3406_p4 }
  0x8f   :  { %3416 = shalt.err (!%p3413_p8)
}
  0x90   :  { %177 = dma.hbm_to_vmem [thread:$0]  %s4344_s14, 20480, %s172_s30, [#allocation20], %s3443_s4, %s3443_s4, %s3444_s9  }
  0x91   :  { %3417 = dma.done.wait [#allocation3], 512  }
  0x92   :  { %3418 = vsyncadd [#allocation3], 4294966784 }
  0x93   :  { %3419 = dma.done.wait [#allocation5], 272  }
  0x94   :  { %3420 = vsyncadd [#allocation5], 4294967024 }
  0x95   :  { %3421 = dma.done.wait [#allocation8], 2064  }
  0x96   :  { %3422 = vsyncadd [#allocation8], 4294965232 }
  0x97   :  { %3423 = dma.done.wait [#allocation11], 8320  }
  0x98   :  { %3424 = vsyncadd [#allocation11], 4294958976 }
  0x99   :  { %3425 = dma.done.wait [#allocation14], 32896  }
  0x9a   :  { %3426 = vsyncadd [#allocation14], 4294934400 }
  0x9b   :  { %3427 = dma.done.wait [#allocation17], 32832  }
  0x9c   :  { %3428 = vsyncadd [#allocation17], 4294934464 }
  0x9d   :  { %3429 = dma.done.wait [#allocation20], 20544  }
  0x9e   :  { %3430 = vsyncadd [#allocation20], 4294946752  ;;  %vm448_vm0 = vcmask 64512   ;;  %s4352_s2 = sld [smem:[#allocation29_spill]]  ;;  %v222_v8 = vld [vmem:[#allocation4 + $0x8] sm:$0x1] }
  0x9f   :  { %vm243_vm1 = vcmask 1040384   ;;  %v221_v9 = vld [vmem:[#allocation4] sm:$0xff]  ;;  %s4353_s3 = sld [smem:[#allocation30_spill]]  ;;  %vm230_vm2 = vcmask 72704   ;;  %v493_v34 = vld [vmem:[#allocation10] sm:$0xff]  ;;  %v351_v36 = vld [vmem:[#allocation7 + $0x78] sm:$0xff] }
  0xa0   :  { %3064 = vmatprep.subr.msk.mxu1 %vm243_vm1, %v222_v8  ;;  %v652_v35 = vld [vmem:[#allocation12 + $0x1c8] sm:$0xff]  ;;  %3112 = vmatprep.subr.mxu0 %v493_v34  ;;  %v349_v38 = vld [vmem:[#allocation7 + $0x68] sm:$0xff]  ;;  %v348_v40 = vld [vmem:[#allocation7 + $0x60] sm:$0xff]  ;;  %vm701_vm3 = vcmask 523264   ;;  %vm2570_vm4 = vcmask 261120  }
  0xa1   :  { %3065 = vmatpush3.msk.msra.mxu1 %vm243_vm1, %v222_v8  ;;  %3113 = vmatpush3.msra.mxu0 %v493_v34  ;;  %v350_v37 = vld [vmem:[#allocation7 + $0x70] sm:$0xff]  ;;  %v2990_v41 = vld [vmem:[#allocation6] ss:$0 sm:$0xff]  ;;  %v345_v47 = vld [vmem:[#allocation7 + $0x48] sm:$0xff] }
  0xa2   :  { %3066 = vmatprep.subr.mxu1 %v221_v9  ;;  %730 = vmatprep.subr.mxu0 %v652_v35  ;;  %v347_v43 = vld [vmem:[#allocation7 + $0x58] sm:$0xff]  ;;  %v346_v45 = vld [vmem:[#allocation7 + $0x50] sm:$0xff]  ;;  %v344_v48 = vld [vmem:[#allocation7 + $0x40] sm:$0xff] }
  0xa3   :  { %3067 = vmatpush3.msra.mxu1 %v221_v9  ;;  %v343_v49 = vld [vmem:[#allocation7 + $0x38] sm:$0xff]  ;;  %v342_v50 = vld [vmem:[#allocation7 + $0x30] sm:$0xff]  ;;  %v341_v51 = vld [vmem:[#allocation7 + $0x28] sm:$0xff] }
  0xa4   :  { %v444_v0 = vld [vmem:[%s4352_s2] sm:$0xff]  ;;  %v446_v1 = vld [vmem:[%s4352_s2 + $0x10] sm:$0xff]  ;;  %v445_v2 = vld [vmem:[%s4352_s2 + $0x8] sm:$0xff]  ;;  %3074 = vmatprep.subr.mxu1 %v351_v36 }
  0xa5   :  { %v449_v3 = vsel %vm448_vm0, %v444_v0, -inf  ;;  %v455_v4 = vsel %vm448_vm0, %v446_v1, -inf  ;;  %v447_v5 = vld [vmem:[%s4352_s2 + $0x18] sm:$0xff]  ;;  %v452_v6 = vsel %vm448_vm0, %v445_v2, -inf  ;;  %v217_v10 = vld [vmem:[%s4353_s3] sm:$0xff]  ;;  %v218_v11 = vld [vmem:[%s4353_s3 + $0x8] sm:$0xff] }
  0xa6   :  { %450 = vmax.xlane.f32.xlu0 %v449_v3  ;;  %456 = vmax.xlane.f32.xlu1 %v455_v4  ;;  %v458_v7 = vsel %vm448_vm0, %v447_v5, -inf  ;;  %v219_v12 = vld [vmem:[%s4353_s3 + $0x10] sm:$0xff]  ;;  %v220_v13 = vld [vmem:[%s4353_s3 + $0x18] sm:$0xff]  ;;  %v338_v56 = vld [vmem:[#allocation7 + $0x10] sm:$0xff] }
  0xa7   :  { %3068 = vmatprep.mubr.msk.f32.mxu1 %vm230_vm2, %v217_v10  ;;  %v340_v53 = vld [vmem:[#allocation7 + $0x20] sm:$0xff]  ;;  %v339_v54 = vld [vmem:[#allocation7 + $0x18] sm:$0xff]  ;;  %v337_v58 = vld [vmem:[#allocation7 + $0x8] sm:$0xff]  ;;  %v3450_v10 = vmov 0.0  }
  0xa8   :  { %3069 = vmatmul.mubr.msk.f32.vlgmr.msra.gmra.mxu1 %vm230_vm2, %v218_v11  ;;  %v336_v60 = vld [vmem:[#allocation7] sm:$0xff]  ;;  %v656_v63 = vld [vmem:[#allocation12 + $0x1e8] sm:$0xff]  ;;  %v647_v3 = vld [vmem:[#allocation12 + $0x1a0] sm:$0xff] }
  0xa9   :  { %3071 = vmatprep.mubr.msk.f32.mxu1 %vm230_vm2, %v219_v12  ;;  %3075 = vmatpush3.msra.mxu1 %v351_v36  ;;  %v631_v8 = vld [vmem:[#allocation12 + $0x120] sm:$0xff]  ;;  %v624_v9 = vld [vmem:[#allocation12 + $0xe8] sm:$0xff]  ;;  %v3650_v34 = vld [vmem:[#allocation2 + $0x10] sm:$0xff] }
  0xaa   :  { %453 = vmax.xlane.f32.xlu0 %v452_v6  ;;  %459 = vmax.xlane.f32.xlu1 %v458_v7  ;;  %v639_v6 = vld [vmem:[#allocation12 + $0x160] sm:$0xff]  ;;  %v632_v7 = vld [vmem:[#allocation12 + $0x128] sm:$0xff]  ;;  %v1143_v35 = vld [vmem:[#allocation15 + $0x148] sm:$0xff] }
  0xab   :  { %3076 = vmatprep.subr.mxu1 %v350_v37  ;;  %v623_v11 = vld [vmem:[#allocation12 + $0xe0] sm:$0xff]  ;;  %v616_v12 = vld [vmem:[#allocation12 + $0xa8] sm:$0xff] }
  0xac   :  { %3072 = vmatmul.mubr.msk.f32.gmra.mxu1 %vm230_vm2, %v220_v13  ;;  %v615_v13 = vld [vmem:[#allocation12 + $0xa0] sm:$0xff]  ;;  %v1142_v36 = vld [vmem:[#allocation15 + $0x140] sm:$0xff] }
  0xad   :  { %3077 = vmatpush3.msra.mxu1 %v350_v37  ;;  %v1139_v37 = vld [vmem:[#allocation15 + $0x128] sm:$0xff] }
  0xae   :  { %3078 = vmatprep.subr.mxu1 %v349_v38 }
  0xaf   :  { %3079 = vmatpush3.msra.mxu1 %v349_v38  ;;  %v1138_v38 = vld [vmem:[#allocation15 + $0x120] sm:$0xff] }
  0xb0   :  { %3080 = vmatprep.subr.mxu1 %v348_v40 }
  0xb1   :  { %3081 = vmatpush3.msra.mxu1 %v348_v40  ;;  %v1135_v40 = vld [vmem:[#allocation15 + $0x108] sm:$0xff] }
  0xb2   :  { %3082 = vmatprep.subr.mxu1 %v347_v43 }
  0xb3   :  { %3083 = vmatpush3.msra.mxu1 %v347_v43 }
  0xb4   :  { %3084 = vmatprep.subr.mxu1 %v346_v45 }
  0xb5   :  { %3085 = vmatpush3.msra.mxu1 %v346_v45  ;;  %v1127_v45 = vld [vmem:[#allocation15 + $0xc8] sm:$0xff] }
  0xb6   :  { %3086 = vmatprep.subr.mxu1 %v345_v47 }
  0xb7   :  { %3087 = vmatpush3.msra.mxu1 %v345_v47  ;;  %v1123_v47 = vld [vmem:[#allocation15 + $0xa8] sm:$0xff] }
  0xb8   :  { %3088 = vmatprep.subr.mxu1 %v344_v48 }
  0xb9   :  { %3089 = vmatpush3.msra.mxu1 %v344_v48 }
  0xba   :  { %3090 = vmatprep.subr.mxu1 %v343_v49 }
  0xbb   :  { %3091 = vmatpush3.msra.mxu1 %v343_v49 }
  0xbc   :  { %3092 = vmatprep.subr.mxu1 %v342_v50 }
  0xbd   :  { %3093 = vmatpush3.msra.mxu1 %v342_v50  ;;  %v1122_v50 = vld [vmem:[#allocation15 + $0xa0] sm:$0xff] }
  0xbe   :  { %3094 = vmatprep.subr.mxu1 %v341_v51 }
  0xbf   :  { %3095 = vmatpush3.msra.mxu1 %v341_v51  ;;  %v1119_v51 = vld [vmem:[#allocation15 + $0x88] sm:$0xff] }
  0xc0   :  { %3096 = vmatprep.subr.mxu1 %v340_v53 }
  0xc1   :  { %3097 = vmatpush3.msra.mxu1 %v340_v53  ;;  %v1115_v53 = vld [vmem:[#allocation15 + $0x68] sm:$0xff] }
  0xc2   :  { %3098 = vmatprep.subr.mxu1 %v339_v54 }
  0xc3   :  { %3099 = vmatpush3.msra.mxu1 %v339_v54 }
  0xc4   :  { %3100 = vmatprep.subr.mxu1 %v338_v56 }
  0xc5   :  { %3101 = vmatpush3.msra.mxu1 %v338_v56  ;;  %v1111_v56 = vld [vmem:[#allocation15 + $0x48] sm:$0xff] }
  0xc6   :  { %3102 = vmatprep.subr.mxu1 %v337_v58 }
  0xc7   :  { %3103 = vmatpush3.msra.mxu1 %v337_v58  ;;  %v1107_v58 = vld [vmem:[#allocation15 + $0x28] sm:$0xff] }
  0xc8   :  { %3104 = vmatprep.subr.mxu1 %v336_v60 }
  0xc9   :  { %3105 = vmatpush3.msra.mxu1 %v336_v60  ;;  %v1103_v60 = vld [vmem:[#allocation15 + $0x8] sm:$0xff] }
  0xca   :  { %908 = vmatprep.subr.mxu1 %v656_v63 }
 0x12f   :  { %v451_v14 = vpop.xlane.xlu0 %450  ;;  %v457_v15 = vpop.xlane.xlu1 %456 }
 0x130   :  { %v461_v16 = vsub.f32 %v444_v0, %v451_v14  ;;  %v463_v17 = vsub.f32 %v446_v1, %v457_v15  ;;  %v655_v1 = vld [vmem:[#allocation12 + $0x1e0] sm:$0xff]  ;;  %v608_v14 = vld [vmem:[#allocation12 + $0x68] sm:$0xff] }
 0x131   :  { %v607_v15 = vld [vmem:[#allocation12 + $0x60] sm:$0xff] }
 0x132   :  { %v465_v18 = vmul.f32 1.442695, %v461_v16  ;;  %v469_v19 = vmul.f32 1.442695, %v463_v17  ;;  %v600_v16 = vld [vmem:[#allocation12 + $0x28] sm:$0xff]  ;;  %v599_v17 = vld [vmem:[#allocation12 + $0x20] sm:$0xff] }
 0x133   :  { %v454_v20 = vpop.xlane.xlu0 %453  ;;  %v460_v21 = vpop.xlane.xlu1 %459 }
 0x134   :  { %3140 = vpow2.f32 %v465_v18  ;;  %v462_v22 = vsub.f32 %v445_v2, %v454_v20  ;;  %v464_v23 = vsub.f32 %v447_v5, %v460_v21  ;;  %v648_v2 = vld [vmem:[#allocation12 + $0x1a8] sm:$0xff]  ;;  %v1163_v18 = vld [vmem:[#allocation15 + $0x1e8] sm:$0xff] }
 0x135   :  { %3142 = vpow2.f32 %v469_v19  ;;  %v640_v5 = vld [vmem:[#allocation12 + $0x168] sm:$0xff]  ;;  %v1159_v21 = vld [vmem:[#allocation15 + $0x1c8] sm:$0xff] }
 0x136   :  { %v467_v24 = vmul.f32 1.442695, %v462_v22  ;;  %v471_v25 = vmul.f32 1.442695, %v464_v23  ;;  %v1162_v19 = vld [vmem:[#allocation15 + $0x1e0] sm:$0xff]  ;;  %v1155_v23 = vld [vmem:[#allocation15 + $0x1a8] sm:$0xff] }
 0x137   :  { %v3640_v20 = vld [vmem:[#allocation2] sm:$0xff] }
 0x138   :  { %3144 = vpow2.f32 %v467_v24  ;;  %v1158_v22 = vld [vmem:[#allocation15 + $0x1c0] sm:$0xff] }
 0x139   :  { %3146 = vpow2.f32 %v471_v25  ;;  %v1154_v24 = vld [vmem:[#allocation15 + $0x1a0] sm:$0xff] }
 0x13a   :  { %v3645_v25 = vld [vmem:[#allocation2 + $0x8] sm:$0xff] }
 0x141   :  { %v3623_v26 = vpop.eup %3140 }
 0x142   :  { %v3625_v27 = vpop.eup %3142  ;;  %v473_v28 = vsel %vm448_vm0, %v3623_v26, 0.0 }
 0x143   :  { %474 = vadd.xlane.f32.xlu0 %v473_v28  ;;  %v479_v29 = vsel %vm448_vm0, %v3625_v27, 0.0  ;;  %v1151_v28 = vld [vmem:[#allocation15 + $0x188] sm:$0xff] }
 0x145   :  { %v3631_v30 = vpop.eup %3144 }
 0x146   :  { %v3633_v31 = vpop.eup %3146  ;;  %v476_v32 = vsel %vm448_vm0, %v3631_v30, 0.0 }
 0x147   :  { %480 = vadd.xlane.f32.xlu0 %v479_v29  ;;  %477 = vadd.xlane.f32.xlu1 %v476_v32  ;;  %v482_v33 = vsel %vm448_vm0, %v3633_v31, 0.0  ;;  %v1150_v29 = vld [vmem:[#allocation15 + $0x180] sm:$0xff]  ;;  %v1147_v32 = vld [vmem:[#allocation15 + $0x168] sm:$0xff] }
 0x14b   :  { %483 = vadd.xlane.f32.xlu1 %v482_v33  ;;  %v1146_v33 = vld [vmem:[#allocation15 + $0x160] sm:$0xff] }
 0x168   :  { %v3070_v39 = vpop.f32.mrf.mxu1 }
 0x169   :  { %v319_v57 = vadd.f32 %v3070_v39, %v2990_v41  ;;  %v3655_v39 = vld [vmem:[#allocation2 + $0x18] sm:$0xff] }
 0x16a   :  { %v313_v42 = vpop.f32.mrf.mxu1 }
 0x16b   :  { %v314_v44 = vadd.f32 %v2990_v41, %v313_v42  ;;  %v333_v61 = vmax.f32 %v319_v57, 0.0  ;;  %v1131_v42 = vld [vmem:[#allocation15 + $0xe8] sm:$0xff]  ;;  %v1110_v57 = vld [vmem:[#allocation15 + $0x40] sm:$0xff] }
 0x16c   :  { %v3073_v52 = vpop.f32.mrf.mxu1 }
 0x16d   :  { %v332_v46 = vmax.f32 %v314_v44, 0.0  ;;  %v329_v62 = vadd.f32 %v3073_v52, %v2990_v41  ;;  %v1130_v44 = vld [vmem:[#allocation15 + $0xe0] sm:$0xff] }
 0x16e   :  { %v323_v55 = vpop.f32.mrf.mxu1  ;;  %v1118_v52 = vld [vmem:[#allocation15 + $0x80] sm:$0xff] }
 0x16f   :  { %3106 = vmatprep.mubr.f32.mxu1 %v332_v46  ;;  %v324_v59 = vadd.f32 %v2990_v41, %v323_v55  ;;  %v335_v4 = vmax.f32 %v329_v62, 0.0  ;;  %v1134_v41 = vld [vmem:[#allocation15 + $0x100] sm:$0xff] }
 0x170   :  { %3107 = vmatmul.mubr.f32.vlgmr.msra.gmra.mxu1 %v333_v61  ;;  %v1126_v46 = vld [vmem:[#allocation15 + $0xc0] sm:$0xff] }
 0x171   :  { %v334_v0 = vmax.f32 %v324_v59, 0.0  ;;  %909 = vmatpush1.msra.mxu1 %v655_v1  ;;  %v1114_v55 = vld [vmem:[#allocation15 + $0x60] sm:$0xff] }
 0x172   :  { %910 = vmatprep.subr.mxu1 %v648_v2  ;;  %v1106_v59 = vld [vmem:[#allocation15 + $0x20] sm:$0xff]  ;;  %v1223_v2 = vld [vmem:[#allocation15 + $0x3c8] sm:$0xff] }
 0x173   :  { %3109 = vmatprep.mubr.f32.mxu1 %v334_v0  ;;  %911 = vmatpush1.msra.mxu1 %v647_v3  ;;  %v1102_v62 = vld [vmem:[#allocation15] sm:$0xff]  ;;  %v1227_v0 = vld [vmem:[#allocation15 + $0x3e8] sm:$0xff] }
 0x174   :  { %912 = vmatprep.subr.mxu1 %v640_v5  ;;  %3110 = vmatmul.mubr.f32.gmra.mxu1 %v335_v4  ;;  %v1226_v1 = vld [vmem:[#allocation15 + $0x3e0] sm:$0xff] }
 0x175   :  { %913 = vmatpush1.msra.mxu1 %v639_v6  ;;  %956 = vmatprep.mubr.f32.mxu1 %v3450_v10  ;;  %v1222_v4 = vld [vmem:[#allocation15 + $0x3c0] sm:$0xff] }
 0x176   :  { %914 = vmatprep.subr.mxu1 %v632_v7  ;;  %v651_v7 = vld [vmem:[#allocation12 + $0x1c0] sm:$0xff] }
 0x177   :  { %915 = vmatpush1.msra.mxu1 %v631_v8 }
 0x178   :  { %916 = vmatprep.subr.mxu1 %v624_v9  ;;  %v644_v9 = vld [vmem:[#allocation12 + $0x188] sm:$0xff] }
 0x179   :  { %917 = vmatpush1.msra.mxu1 %v623_v11  ;;  %v643_v11 = vld [vmem:[#allocation12 + $0x180] sm:$0xff] }
 0x17a   :  { %918 = vmatprep.subr.mxu1 %v616_v12  ;;  %v1218_v12 = vld [vmem:[#allocation15 + $0x3a0] sm:$0xff] }
 0x17b   :  { %919 = vmatpush1.msra.mxu1 %v615_v13 }
 0x17c   :  { %920 = vmatprep.subr.mxu1 %v608_v14  ;;  %v636_v14 = vld [vmem:[#allocation12 + $0x148] sm:$0xff] }
 0x17d   :  { %921 = vmatpush1.msra.mxu1 %v607_v15  ;;  %v635_v15 = vld [vmem:[#allocation12 + $0x140] sm:$0xff] }
 0x17e   :  { %922 = vmatprep.subr.mxu1 %v600_v16  ;;  %v1215_v16 = vld [vmem:[#allocation15 + $0x388] sm:$0xff] }
 0x17f   :  { %923 = vmatpush1.msra.mxu1 %v599_v17  ;;  %v627_v17 = vld [vmem:[#allocation12 + $0x100] sm:$0xff] }
 0x180   :  { %3009 = vmatmul.mubr.msk.f32.vlgmr.msra.gmra.mxu1 %vm701_vm3, %v3640_v20  ;;  %1380 = vmatprep.subr.mxu1 %v1163_v18  ;;  %v1214_v18 = vld [vmem:[#allocation15 + $0x380] sm:$0xff] }
 0x181   :  { %962 = vmatprep.mubr.f32.mxu1 %v3450_v10  ;;  %1381 = vmatpush1.msra.mxu1 %v1162_v19  ;;  %v620_v19 = vld [vmem:[#allocation12 + $0xc8] sm:$0xff] }
 0x182   :  { %1382 = vmatprep.subr.mxu1 %v1159_v21  ;;  %v1211_v21 = vld [vmem:[#allocation15 + $0x368] sm:$0xff] }
 0x183   :  { %1383 = vmatpush1.msra.mxu1 %v1158_v22  ;;  %v619_v22 = vld [vmem:[#allocation12 + $0xc0] sm:$0xff] }
 0x184   :  { %3010 = vmatmul.mubr.msk.f32.gmra.mxu1 %vm701_vm3, %v3645_v25  ;;  %1384 = vmatprep.subr.mxu1 %v1155_v23  ;;  %v612_v23 = vld [vmem:[#allocation12 + $0x88] sm:$0xff] }
 0x185   :  { %968 = vmatprep.mubr.f32.mxu1 %v3450_v10  ;;  %1385 = vmatpush1.msra.mxu1 %v1154_v24  ;;  %v611_v24 = vld [vmem:[#allocation12 + $0x80] sm:$0xff] }
 0x186   :  { %1386 = vmatprep.subr.mxu1 %v1151_v28  ;;  %v604_v28 = vld [vmem:[#allocation12 + $0x48] sm:$0xff] }
 0x187   :  { %1387 = vmatpush1.msra.mxu1 %v1150_v29  ;;  %v603_v29 = vld [vmem:[#allocation12 + $0x40] sm:$0xff] }
 0x188   :  { %3011 = vmatmul.mubr.msk.f32.gmra.mxu1 %vm701_vm3, %v3650_v34  ;;  %1388 = vmatprep.subr.mxu1 %v1147_v32  ;;  %v596_v32 = vld [vmem:[#allocation12 + $0x8] sm:$0xff] }
 0x189   :  { %974 = vmatprep.mubr.f32.mxu1 %v3450_v10  ;;  %1389 = vmatpush1.msra.mxu1 %v1146_v33  ;;  %v595_v33 = vld [vmem:[#allocation12] sm:$0xff] }
 0x18a   :  { %1390 = vmatprep.subr.mxu1 %v1143_v35  ;;  %v654_v35 = vld [vmem:[#allocation12 + $0x1d8] sm:$0xff] }
 0x18b   :  { %1391 = vmatpush1.msra.mxu1 %v1142_v36  ;;  %v653_v36 = vld [vmem:[#allocation12 + $0x1d0] sm:$0xff] }
 0x18c   :  { %3012 = vmatmul.mubr.msk.f32.gmra.mxu1 %vm701_vm3, %v3655_v39  ;;  %1392 = vmatprep.subr.mxu1 %v1139_v37  ;;  %v646_v37 = vld [vmem:[#allocation12 + $0x198] sm:$0xff] }
 0x18d   :  { %1393 = vmatpush1.msra.mxu1 %v1138_v38  ;;  %v645_v38 = vld [vmem:[#allocation12 + $0x190] sm:$0xff] }
 0x18e   :  { %1394 = vmatprep.subr.mxu1 %v1135_v40  ;;  %v638_v40 = vld [vmem:[#allocation12 + $0x158] sm:$0xff] }
 0x18f   :  { %1395 = vmatpush1.msra.mxu1 %v1134_v41  ;;  %v637_v41 = vld [vmem:[#allocation12 + $0x150] sm:$0xff] }
 0x190   :  { %1396 = vmatprep.subr.mxu1 %v1131_v42  ;;  %v630_v42 = vld [vmem:[#allocation12 + $0x118] sm:$0xff] }
 0x191   :  { %1397 = vmatpush1.msra.mxu1 %v1130_v44  ;;  %v622_v44 = vld [vmem:[#allocation12 + $0xd8] sm:$0xff] }
 0x192   :  { %1398 = vmatprep.subr.mxu1 %v1127_v45  ;;  %v621_v45 = vld [vmem:[#allocation12 + $0xd0] sm:$0xff] }
 0x193   :  { %1399 = vmatpush1.msra.mxu1 %v1126_v46  ;;  %v614_v46 = vld [vmem:[#allocation12 + $0x98] sm:$0xff] }
 0x194   :  { %1400 = vmatprep.subr.mxu1 %v1123_v47  ;;  %v613_v47 = vld [vmem:[#allocation12 + $0x90] sm:$0xff] }
 0x195   :  { %1401 = vmatpush1.msra.mxu1 %v1122_v50  ;;  %v598_v50 = vld [vmem:[#allocation12 + $0x18] sm:$0xff] }
 0x196   :  { %1402 = vmatprep.subr.mxu1 %v1119_v51  ;;  %v597_v51 = vld [vmem:[#allocation12 + $0x10] sm:$0xff] }
 0x197   :  { %1403 = vmatpush1.msra.mxu1 %v1118_v52  ;;  %v658_v52 = vld [vmem:[#allocation12 + $0x1f8] sm:$0xff] }
 0x198   :  { %1404 = vmatprep.subr.mxu1 %v1115_v53  ;;  %v657_v53 = vld [vmem:[#allocation12 + $0x1f0] sm:$0xff] }
 0x199   :  { %1405 = vmatpush1.msra.mxu1 %v1114_v55  ;;  %v649_v55 = vld [vmem:[#allocation12 + $0x1b0] sm:$0xff] }
 0x19a   :  { %1406 = vmatprep.subr.mxu1 %v1111_v56  ;;  %v642_v56 = vld [vmem:[#allocation12 + $0x178] sm:$0xff] }
 0x19b   :  { %1407 = vmatpush1.msra.mxu1 %v1110_v57  ;;  %v641_v57 = vld [vmem:[#allocation12 + $0x170] sm:$0xff] }
 0x19c   :  { %1408 = vmatprep.subr.mxu1 %v1107_v58  ;;  %v634_v58 = vld [vmem:[#allocation12 + $0x138] sm:$0xff] }
 0x19d   :  { %1409 = vmatpush1.msra.mxu1 %v1106_v59  ;;  %v633_v59 = vld [vmem:[#allocation12 + $0x130] sm:$0xff] }
 0x19e   :  { %1410 = vmatprep.subr.mxu1 %v1103_v60  ;;  %v626_v60 = vld [vmem:[#allocation12 + $0xf8] sm:$0xff] }
 0x19f   :  { %1411 = vmatpush1.msra.mxu1 %v1102_v62  ;;  %v618_v62 = vld [vmem:[#allocation12 + $0xb8] sm:$0xff] }
 0x1a0   :  { %1412 = vmatprep.subr.mxu1 %v1227_v0  ;;  %v610_v0 = vld [vmem:[#allocation12 + $0x78] sm:$0xff] }
 0x1a1   :  { %1413 = vmatpush2.msra.mxu1 %v1226_v1  ;;  %v609_v1 = vld [vmem:[#allocation12 + $0x70] sm:$0xff] }
 0x1a2   :  { %1414 = vmatprep.subr.mxu1 %v1223_v2  ;;  %v602_v2 = vld [vmem:[#allocation12 + $0x38] sm:$0xff] }
 0x1a3   :  { %1415 = vmatpush2.msra.mxu1 %v1222_v4  ;;  %v1291_v4 = vld [vmem:[#allocation15 + $0x5e8] sm:$0xff] }
 0x1cc   :  { %v475_v43 = vpop.xlane.xlu0 %474 }
 0x1cd   :  { %3148 = vrcp.f32 %v475_v43  ;;  %v629_v43 = vld [vmem:[#allocation12 + $0x110] sm:$0xff] }
 0x1d0   :  { %v478_v48 = vpop.xlane.xlu1 %477  ;;  %v481_v49 = vpop.xlane.xlu0 %480 }
 0x1d1   :  { %3150 = vrcp.f32 %v478_v48  ;;  %v606_v48 = vld [vmem:[#allocation12 + $0x58] sm:$0xff] }
 0x1d2   :  { %3152 = vrcp.f32 %v481_v49  ;;  %v605_v49 = vld [vmem:[#allocation12 + $0x50] sm:$0xff] }
 0x1d4   :  { %v484_v54 = vpop.xlane.xlu1 %483 }
 0x1d5   :  { %3154 = vrcp.f32 %v484_v54  ;;  %v650_v54 = vld [vmem:[#allocation12 + $0x1b8] sm:$0xff] }
 0x1da   :  { %v3149_v61 = vpop.eup %3148 }
 0x1db   :  { %v489_v63 = vmul.f32 %v3149_v61, %v3623_v26  ;;  %v1219_v26 = vld [vmem:[#allocation15 + $0x3a8] sm:$0xff] }
 0x1dc   :  { %1416 = vmatprep.subr.mxu1 %v1219_v26  ;;  %v625_v61 = vld [vmem:[#allocation12 + $0xf0] sm:$0xff] }
 0x1dd   :  { %3114 = vmatprep.mubr.msk.f32.mxu0 %vm448_vm0, %v489_v63  ;;  %1417 = vmatpush2.msra.mxu1 %v1218_v12  ;;  %v617_v63 = vld [vmem:[#allocation12 + $0xb0] sm:$0xff] }
 0x1de   :  { %v3151_v3 = vpop.eup %3150  ;;  %1418 = vmatprep.subr.mxu1 %v1215_v16  ;;  %v1279_v26 = vld [vmem:[#allocation15 + $0x588] sm:$0xff] }
 0x1df   :  { %v3153_v5 = vpop.eup %3152  ;;  %v490_v6 = vmul.f32 %v3151_v3, %v3631_v30  ;;  %1419 = vmatpush2.msra.mxu1 %v1214_v18  ;;  %v601_v3 = vld [vmem:[#allocation12 + $0x30] sm:$0xff]  ;;  %v1254_v18 = vld [vmem:[#allocation15 + $0x4c0] sm:$0xff] }
 0x1e0   :  { %v491_v8 = vmul.f32 %v3153_v5, %v3625_v27  ;;  %v628_v27 = vld [vmem:[#allocation12 + $0x108] sm:$0xff]  ;;  %1420 = vmatprep.subr.mxu1 %v1211_v21  ;;  %v1275_v12 = vld [vmem:[#allocation15 + $0x568] sm:$0xff] }
 0x1e1   :  { %3115 = vmatmul.mubr.msk.f32.vlgmr.msra.gmra.mxu0 %vm448_vm0, %v490_v6  ;;  %v1290_v5 = vld [vmem:[#allocation15 + $0x5e0] sm:$0xff]  ;;  %v1287_v6 = vld [vmem:[#allocation15 + $0x5c8] sm:$0xff] }
 0x1e2   :  { %v3155_v13 = vpop.eup %3154  ;;  %731 = vmatpush1.msra.mxu0 %v651_v7  ;;  %3117 = vmatprep.mubr.msk.f32.mxu0 %vm448_vm0, %v491_v8  ;;  %v1286_v7 = vld [vmem:[#allocation15 + $0x5c0] sm:$0xff]  ;;  %v1283_v8 = vld [vmem:[#allocation15 + $0x5a8] sm:$0xff] }
 0x1e3   :  { %732 = vmatprep.subr.mxu0 %v644_v9  ;;  %v492_v30 = vmul.f32 %v3155_v13, %v3633_v31  ;;  %v1210_v31 = vld [vmem:[#allocation15 + $0x360] sm:$0xff]  ;;  %v1271_v13 = vld [vmem:[#allocation15 + $0x548] sm:$0xff] }
 0x1e4   :  { %733 = vmatpush1.msra.mxu0 %v643_v11  ;;  %1421 = vmatpush2.msra.mxu1 %v1210_v31  ;;  %v1282_v9 = vld [vmem:[#allocation15 + $0x5a0] sm:$0xff]  ;;  %v1259_v16 = vld [vmem:[#allocation15 + $0x4e8] sm:$0xff] }
 0x1e5   :  { %734 = vmatprep.subr.mxu0 %v636_v14  ;;  %3118 = vmatmul.mubr.msk.f32.gmra.mxu0 %vm448_vm0, %v492_v30  ;;  %v1278_v11 = vld [vmem:[#allocation15 + $0x580] sm:$0xff]  ;;  %v1267_v30 = vld [vmem:[#allocation15 + $0x528] sm:$0xff] }
 0x1e6   :  { %735 = vmatpush1.msra.mxu0 %v635_v15  ;;  %778 = vmatprep.mubr.f32.mxu0 %v3450_v10  ;;  %v1270_v14 = vld [vmem:[#allocation15 + $0x540] sm:$0xff]  ;;  %v1263_v15 = vld [vmem:[#allocation15 + $0x508] sm:$0xff] }
 0x1e7   :  { %736 = vmatprep.subr.mxu0 %v628_v27  ;;  %v1262_v27 = vld [vmem:[#allocation15 + $0x500] sm:$0xff]  ;;  %v1203_v31 = vld [vmem:[#allocation15 + $0x328] sm:$0xff] }
 0x1e8   :  { %737 = vmatpush1.msra.mxu0 %v627_v17  ;;  %v1258_v17 = vld [vmem:[#allocation15 + $0x4e0] sm:$0xff] }
 0x1e9   :  { %738 = vmatprep.subr.mxu0 %v620_v19  ;;  %v1251_v19 = vld [vmem:[#allocation15 + $0x4a8] sm:$0xff]  ;;  %v1206_v21 = vld [vmem:[#allocation15 + $0x340] sm:$0xff] }
 0x1ea   :  { %739 = vmatpush1.msra.mxu0 %v619_v22  ;;  %v1250_v22 = vld [vmem:[#allocation15 + $0x4a0] sm:$0xff] }
 0x1eb   :  { %740 = vmatprep.subr.mxu0 %v612_v23  ;;  %v1202_v23 = vld [vmem:[#allocation15 + $0x320] sm:$0xff] }
 0x1ec   :  { %741 = vmatpush1.msra.mxu0 %v611_v24  ;;  %v1246_v24 = vld [vmem:[#allocation15 + $0x480] sm:$0xff] }
 0x1ed   :  { %742 = vmatprep.subr.mxu0 %v604_v28  ;;  %v1199_v28 = vld [vmem:[#allocation15 + $0x308] sm:$0xff] }
 0x1ee   :  { %743 = vmatpush1.msra.mxu0 %v603_v29  ;;  %v1243_v29 = vld [vmem:[#allocation15 + $0x468] sm:$0xff] }
 0x1ef   :  { %744 = vmatprep.subr.mxu0 %v596_v32  ;;  %v1198_v32 = vld [vmem:[#allocation15 + $0x300] sm:$0xff] }
 0x1f0   :  { %745 = vmatpush1.msra.mxu0 %v595_v33  ;;  %v1242_v33 = vld [vmem:[#allocation15 + $0x460] sm:$0xff] }
 0x1f1   :  { %3001 = vmatmul.mubr.msk.f32.vlgmr.msra.gmra.mxu0 %vm701_vm3, %v3640_v20  ;;  %819 = vmatprep.subr.mxu0 %v654_v35  ;;  %v1195_v35 = vld [vmem:[#allocation15 + $0x2e8] sm:$0xff] }
 0x1f2   :  { %820 = vmatpush1.msra.mxu0 %v653_v36  ;;  %784 = vmatprep.mubr.f32.mxu0 %v3450_v10  ;;  %v1239_v36 = vld [vmem:[#allocation15 + $0x448] sm:$0xff] }
 0x1f3   :  { %821 = vmatprep.subr.mxu0 %v646_v37  ;;  %v1194_v37 = vld [vmem:[#allocation15 + $0x2e0] sm:$0xff] }
 0x1f4   :  { %822 = vmatpush1.msra.mxu0 %v645_v38  ;;  %v1191_v38 = vld [vmem:[#allocation15 + $0x2c8] sm:$0xff] }
 0x1f5   :  { %3002 = vmatmul.mubr.msk.f32.gmra.mxu0 %vm701_vm3, %v3645_v25  ;;  %823 = vmatprep.subr.mxu0 %v638_v40  ;;  %v1238_v40 = vld [vmem:[#allocation15 + $0x440] sm:$0xff] }
 0x1f6   :  { %824 = vmatpush1.msra.mxu0 %v637_v41  ;;  %790 = vmatprep.mubr.f32.mxu0 %v3450_v10  ;;  %v1190_v41 = vld [vmem:[#allocation15 + $0x2c0] sm:$0xff] }
 0x1f7   :  { %825 = vmatprep.subr.mxu0 %v630_v42  ;;  %v1235_v42 = vld [vmem:[#allocation15 + $0x428] sm:$0xff] }
 0x1f8   :  { %826 = vmatpush1.msra.mxu0 %v629_v43  ;;  %v1187_v43 = vld [vmem:[#allocation15 + $0x2a8] sm:$0xff] }
 0x1f9   :  { %3003 = vmatmul.mubr.msk.f32.gmra.mxu0 %vm701_vm3, %v3650_v34  ;;  %827 = vmatprep.subr.mxu0 %v622_v44  ;;  %v1186_v44 = vld [vmem:[#allocation15 + $0x2a0] sm:$0xff] }
 0x1fa   :  { %828 = vmatpush1.msra.mxu0 %v621_v45  ;;  %796 = vmatprep.mubr.f32.mxu0 %v3450_v10  ;;  %v1234_v45 = vld [vmem:[#allocation15 + $0x420] sm:$0xff] }
 0x1fb   :  { %829 = vmatprep.subr.mxu0 %v614_v46  ;;  %v1183_v46 = vld [vmem:[#allocation15 + $0x288] sm:$0xff] }
 0x1fc   :  { %830 = vmatpush1.msra.mxu0 %v613_v47  ;;  %v1231_v47 = vld [vmem:[#allocation15 + $0x408] sm:$0xff] }
 0x1fd   :  { %3004 = vmatmul.mubr.msk.f32.gmra.mxu0 %vm701_vm3, %v3655_v39  ;;  %831 = vmatprep.subr.mxu0 %v606_v48  ;;  %v1182_v48 = vld [vmem:[#allocation15 + $0x280] sm:$0xff] }
 0x1fe   :  { %832 = vmatpush1.msra.mxu0 %v605_v49  ;;  %867 = vmatprep.mubr.f32.mxu0 %v3450_v10  ;;  %v1230_v49 = vld [vmem:[#allocation15 + $0x400] sm:$0xff] }
 0x1ff   :  { %833 = vmatprep.subr.mxu0 %v598_v50  ;;  %v1179_v50 = vld [vmem:[#allocation15 + $0x268] sm:$0xff] }
 0x200   :  { %834 = vmatpush1.msra.mxu0 %v597_v51  ;;  %v1355_v51 = vld [vmem:[#allocation15 + $0x7e8] sm:$0xff] }
 0x201   :  { %3005 = vmatmul.mubr.msk.f32.vlgmr.msra.gmra.mxu0 %vm701_vm3, %v3640_v20  ;;  %997 = vmatprep.subr.mxu0 %v658_v52  ;;  %v1354_v52 = vld [vmem:[#allocation15 + $0x7e0] sm:$0xff] }
 0x202   :  { %873 = vmatprep.mubr.f32.mxu0 %v3450_v10  ;;  %998 = vmatpush1.msra.mxu0 %v657_v53  ;;  %v1351_v53 = vld [vmem:[#allocation15 + $0x7c8] sm:$0xff] }
 0x203   :  { %999 = vmatprep.subr.mxu0 %v650_v54  ;;  %v1178_v54 = vld [vmem:[#allocation15 + $0x260] sm:$0xff] }
 0x204   :  { %1000 = vmatpush1.msra.mxu0 %v649_v55  ;;  %v1350_v55 = vld [vmem:[#allocation15 + $0x7c0] sm:$0xff] }
 0x205   :  { %3006 = vmatmul.mubr.msk.f32.gmra.mxu0 %vm701_vm3, %v3645_v25  ;;  %1001 = vmatprep.subr.mxu0 %v642_v56  ;;  %v1175_v56 = vld [vmem:[#allocation15 + $0x248] sm:$0xff] }
 0x206   :  { %879 = vmatprep.mubr.f32.mxu0 %v3450_v10  ;;  %1002 = vmatpush1.msra.mxu0 %v641_v57  ;;  %v1347_v57 = vld [vmem:[#allocation15 + $0x7a8] sm:$0xff] }
 0x207   :  { %1003 = vmatprep.subr.mxu0 %v634_v58  ;;  %v1174_v58 = vld [vmem:[#allocation15 + $0x240] sm:$0xff] }
 0x208   :  { %1004 = vmatpush1.msra.mxu0 %v633_v59  ;;  %v1346_v59 = vld [vmem:[#allocation15 + $0x7a0] sm:$0xff] }
 0x209   :  { %3007 = vmatmul.mubr.msk.f32.gmra.mxu0 %vm701_vm3, %v3650_v34  ;;  %1005 = vmatprep.subr.mxu0 %v626_v60  ;;  %v1171_v60 = vld [vmem:[#allocation15 + $0x228] sm:$0xff] }
 0x20a   :  { %885 = vmatprep.mubr.f32.mxu0 %v3450_v10  ;;  %1006 = vmatpush1.msra.mxu0 %v625_v61  ;;  %v1343_v61 = vld [vmem:[#allocation15 + $0x788] sm:$0xff] }
 0x20b   :  { %1007 = vmatprep.subr.mxu0 %v618_v62  ;;  %v1170_v62 = vld [vmem:[#allocation15 + $0x220] sm:$0xff] }
 0x20c   :  { %1008 = vmatpush1.msra.mxu0 %v617_v63  ;;  %v1342_v63 = vld [vmem:[#allocation15 + $0x780] sm:$0xff] }
 0x20d   :  { %3008 = vmatmul.mubr.msk.f32.gmra.mxu0 %vm701_vm3, %v3655_v39  ;;  %1009 = vmatprep.subr.mxu0 %v610_v0  ;;  %v1167_v0 = vld [vmem:[#allocation15 + $0x208] sm:$0xff] }
 0x20e   :  { %1010 = vmatpush1.msra.mxu0 %v609_v1  ;;  %1045 = vmatprep.mubr.f32.mxu0 %v3450_v10  ;;  %v1339_v1 = vld [vmem:[#allocation15 + $0x768] sm:$0xff] }
 0x20f   :  { %1011 = vmatprep.subr.mxu0 %v602_v2  ;;  %v1166_v2 = vld [vmem:[#allocation15 + $0x200] sm:$0xff] }
 0x210   :  { %1012 = vmatpush1.msra.mxu0 %v601_v3  ;;  %v1338_v3 = vld [vmem:[#allocation15 + $0x760] sm:$0xff] }
 0x211   :  { %3013 = vmatmul.mubr.msk.f32.vlgmr.msra.gmra.mxu0 %vm701_vm3, %v3640_v20  ;;  %1469 = vmatprep.subr.mxu0 %v1291_v4  ;;  %v1274_v20 = vld [vmem:[#allocation15 + $0x560] sm:$0xff]  ;;  %v1165_v4 = vld [vmem:[#allocation15 + $0x1f8] sm:$0xff] }
 0x212   :  { %1051 = vmatprep.mubr.f32.mxu0 %v3450_v10  ;;  %1470 = vmatpush1.msra.mxu0 %v1290_v5  ;;  %v1335_v5 = vld [vmem:[#allocation15 + $0x748] sm:$0xff] }
 0x213   :  { %1471 = vmatprep.subr.mxu0 %v1287_v6  ;;  %v1334_v6 = vld [vmem:[#allocation15 + $0x740] sm:$0xff] }
 0x214   :  { %1472 = vmatpush1.msra.mxu0 %v1286_v7  ;;  %v1331_v7 = vld [vmem:[#allocation15 + $0x728] sm:$0xff] }
 0x215   :  { %3014 = vmatmul.mubr.msk.f32.gmra.mxu0 %vm701_vm3, %v3645_v25  ;;  %1473 = vmatprep.subr.mxu0 %v1283_v8  ;;  %v1266_v25 = vld [vmem:[#allocation15 + $0x520] sm:$0xff] }
 0x216   :  { %1057 = vmatprep.mubr.f32.mxu0 %v3450_v10  ;;  %1474 = vmatpush1.msra.mxu0 %v1282_v9  ;;  %v1330_v8 = vld [vmem:[#allocation15 + $0x720] sm:$0xff]  ;;  %v1327_v9 = vld [vmem:[#allocation15 + $0x708] sm:$0xff] }
 0x217   :  { %1475 = vmatprep.subr.mxu0 %v1279_v26  ;;  %v1326_v26 = vld [vmem:[#allocation15 + $0x700] sm:$0xff] }
 0x218   :  { %1476 = vmatpush1.msra.mxu0 %v1278_v11  ;;  %v1323_v11 = vld [vmem:[#allocation15 + $0x6e8] sm:$0xff] }
 0x219   :  { %3015 = vmatmul.mubr.msk.f32.gmra.mxu0 %vm701_vm3, %v3650_v34  ;;  %1477 = vmatprep.subr.mxu0 %v1275_v12  ;;  %v1255_v34 = vld [vmem:[#allocation15 + $0x4c8] sm:$0xff]  ;;  %v1322_v12 = vld [vmem:[#allocation15 + $0x6e0] sm:$0xff] }
 0x21a   :  { %1063 = vmatprep.mubr.f32.mxu0 %v3450_v10  ;;  %1478 = vmatpush1.msra.mxu0 %v1274_v20  ;;  %v1207_v10 = vld [vmem:[#allocation15 + $0x348] sm:$0xff] }
 0x21b   :  { %1479 = vmatprep.subr.mxu0 %v1271_v13  ;;  %1422 = vmatprep.subr.mxu1 %v1207_v10  ;;  %v1319_v20 = vld [vmem:[#allocation15 + $0x6c8] sm:$0xff]  ;;  %v1318_v13 = vld [vmem:[#allocation15 + $0x6c0] sm:$0xff] }
 0x21c   :  { %1480 = vmatpush1.msra.mxu0 %v1270_v14  ;;  %1423 = vmatpush2.msra.mxu1 %v1206_v21  ;;  %v1315_v14 = vld [vmem:[#allocation15 + $0x6a8] sm:$0xff]  ;;  %v1298_v10 = vld [vmem:[#allocation15 + $0x620] sm:$0xff] }
 0x21d   :  { %3016 = vmatmul.mubr.msk.f32.gmra.mxu0 %vm701_vm3, %v3655_v39  ;;  %1481 = vmatprep.subr.mxu0 %v1267_v30  ;;  %v1247_v39 = vld [vmem:[#allocation15 + $0x488] sm:$0xff]  ;;  %v1314_v30 = vld [vmem:[#allocation15 + $0x6a0] sm:$0xff] }
 0x21e   :  { %1482 = vmatpush1.msra.mxu0 %v1266_v25  ;;  %1424 = vmatprep.subr.mxu1 %v1203_v31  ;;  %v1311_v25 = vld [vmem:[#allocation15 + $0x688] sm:$0xff]  ;;  %v1294_v21 = vld [vmem:[#allocation15 + $0x600] sm:$0xff] }
 0x21f   :  { %1483 = vmatprep.subr.mxu0 %v1263_v15  ;;  %1425 = vmatpush2.msra.mxu1 %v1202_v23  ;;  %v1310_v15 = vld [vmem:[#allocation15 + $0x680] sm:$0xff] }
 0x220   :  { %1484 = vmatpush1.msra.mxu0 %v1262_v27  ;;  %1426 = vmatprep.subr.mxu1 %v1199_v28  ;;  %v1307_v27 = vld [vmem:[#allocation15 + $0x668] sm:$0xff] }
 0x221   :  { %1485 = vmatprep.subr.mxu0 %v1259_v16  ;;  %1427 = vmatpush2.msra.mxu1 %v1198_v32  ;;  %v1306_v16 = vld [vmem:[#allocation15 + $0x660] sm:$0xff]  ;;  %v659_v32 = vld [vmem:[#allocation13] sm:$0xff] }
 0x222   :  { %1486 = vmatpush1.msra.mxu0 %v1258_v17  ;;  %1428 = vmatprep.subr.mxu1 %v1195_v35  ;;  %v1303_v17 = vld [vmem:[#allocation15 + $0x648] sm:$0xff] }
 0x223   :  { %1487 = vmatprep.subr.mxu0 %v1255_v34  ;;  %1429 = vmatpush2.msra.mxu1 %v1194_v37  ;;  %v1302_v34 = vld [vmem:[#allocation15 + $0x640] sm:$0xff] }
 0x224   :  { %1488 = vmatpush1.msra.mxu0 %v1254_v18  ;;  %1430 = vmatprep.subr.mxu1 %v1191_v38  ;;  %v1299_v18 = vld [vmem:[#allocation15 + $0x628] sm:$0xff] }
 0x225   :  { %1489 = vmatprep.subr.mxu0 %v1251_v19  ;;  %1431 = vmatpush2.msra.mxu1 %v1190_v41  ;;  %v1295_v19 = vld [vmem:[#allocation15 + $0x608] sm:$0xff] }
 0x226   :  { %1490 = vmatpush1.msra.mxu0 %v1250_v22  ;;  %1432 = vmatprep.subr.mxu1 %v1187_v43  ;;  %v1293_v22 = vld [vmem:[#allocation15 + $0x5f8] sm:$0xff] }
 0x227   :  { %1491 = vmatprep.subr.mxu0 %v1247_v39  ;;  %1433 = vmatpush2.msra.mxu1 %v1186_v44  ;;  %v661_v39 = vlaneseq }
 0x228   :  { %1492 = vmatpush1.msra.mxu0 %v1246_v24  ;;  %1434 = vmatprep.subr.mxu1 %v1183_v46 }
 0x229   :  { %1493 = vmatprep.subr.mxu0 %v1243_v29  ;;  %1435 = vmatpush2.msra.mxu1 %v1182_v48  ;;  %v3707_v24 = vshrl.u32 %v661_v39, 7  ;;  %v1164_v48 = vld [vmem:[#allocation15 + $0x1f0] sm:$0xff] }
 0x22a   :  { %1494 = vmatpush1.msra.mxu0 %v1242_v33  ;;  %1436 = vmatprep.subr.mxu1 %v1179_v50  ;;  %v1161_v50 = vld [vmem:[#allocation15 + $0x1d8] sm:$0xff]  ;;  %v1132_v39 = vld [vmem:[#allocation15 + $0xf0] sm:$0xff] }
 0x22b   :  { %1495 = vmatprep.subr.mxu0 %v1239_v36  ;;  %1437 = vmatpush2.msra.mxu1 %v1178_v54  ;;  %v3712_v29 = vsub.s32 0, %v3707_v24  ;;  %v3715_v33 = vsub.s32 1, %v3707_v24  ;;  %v1157_v54 = vld [vmem:[#allocation15 + $0x1b8] sm:$0xff] }
 0x22c   :  { %1496 = vmatpush1.msra.mxu0 %v1238_v40  ;;  %1438 = vmatprep.subr.mxu1 %v1175_v56 }
 0x22d   :  { %1497 = vmatprep.subr.mxu0 %v1235_v42  ;;  %1439 = vmatpush2.msra.mxu1 %v1174_v58  ;;  %v664_v36 = vrot.slane %v659_v32, %v3712_v29  ;;  %v668_v37 = vrot.slane %v659_v32, %v3715_v33  ;;  %v1156_v58 = vld [vmem:[#allocation15 + $0x1b0] sm:$0xff] }
 0x22e   :  { %1498 = vmatpush1.msra.mxu0 %v1234_v45  ;;  %1440 = vmatprep.subr.mxu1 %v1171_v60 }
 0x22f   :  { %1499 = vmatprep.subr.mxu0 %v1231_v47  ;;  %1441 = vmatpush2.msra.mxu1 %v1170_v62  ;;  %v3747_v62 = vsub.s32 3, %v3707_v24 }
 0x230   :  { %1500 = vmatpush1.msra.mxu0 %v1230_v49  ;;  %1442 = vmatprep.subr.mxu1 %v1167_v0  ;;  %v1152_v0 = vld [vmem:[#allocation15 + $0x190] sm:$0xff] }
 0x231   :  { %1501 = vmatprep.subr.mxu0 %v1355_v51  ;;  %1443 = vmatpush2.msra.mxu1 %v1166_v2  ;;  %v1149_v2 = vld [vmem:[#allocation15 + $0x178] sm:$0xff] }
 0x232   :  { %1502 = vmatpush2.msra.mxu0 %v1354_v52  ;;  %1558 = vmatprep.subr.mxu1 %v1165_v4  ;;  %v1160_v52 = vld [vmem:[#allocation15 + $0x1d0] sm:$0xff] }
 0x233   :  { %1503 = vmatprep.subr.mxu0 %v1351_v53 }
 0x234   :  { %1504 = vmatpush2.msra.mxu0 %v1350_v55 }
 0x235   :  { %1505 = vmatprep.subr.mxu0 %v1347_v57 }
 0x236   :  { %1506 = vmatpush2.msra.mxu0 %v1346_v59  ;;  %v3740_v59 = vsub.s32 2, %v3707_v24 }
 0x237   :  { %1507 = vmatprep.subr.mxu0 %v1343_v61  ;;  %v1153_v61 = vld [vmem:[#allocation15 + $0x198] sm:$0xff] }
 0x238   :  { %1508 = vmatpush2.msra.mxu0 %v1342_v63 }
 0x239   :  { %1509 = vmatprep.subr.mxu0 %v1339_v1 }
 0x23a   :  { %1510 = vmatpush2.msra.mxu0 %v1338_v3 }
 0x23b   :  { %1511 = vmatprep.subr.mxu0 %v1335_v5 }
 0x23c   :  { %1512 = vmatpush2.msra.mxu0 %v1334_v6  ;;  %v3756_v6 = vrot.slane %v659_v32, %v3740_v59 }
 0x23d   :  { %1513 = vmatprep.subr.mxu0 %v1331_v7  ;;  %v1148_v7 = vld [vmem:[#allocation15 + $0x170] sm:$0xff] }
 0x23e   :  { %1514 = vmatpush2.msra.mxu0 %v1330_v8 }
 0x23f   :  { %1515 = vmatprep.subr.mxu0 %v1327_v9  ;;  %v1145_v9 = vld [vmem:[#allocation15 + $0x158] sm:$0xff] }
 0x240   :  { %1516 = vmatpush2.msra.mxu0 %v1326_v26  ;;  %v3763_v26 = vrot.slane %v659_v32, %v3747_v62  ;;  %v1292_v32 = vld [vmem:[#allocation15 + $0x5f0] sm:$0xff] }
 0x241   :  { %1517 = vmatprep.subr.mxu0 %v1323_v11 }
 0x242   :  { %1518 = vmatpush2.msra.mxu0 %v1322_v12  ;;  %v1144_v12 = vld [vmem:[#allocation15 + $0x150] sm:$0xff] }
 0x243   :  { %1519 = vmatprep.subr.mxu0 %v1319_v20 }
 0x244   :  { %1520 = vmatpush2.msra.mxu0 %v1318_v13  ;;  %v1141_v13 = vld [vmem:[#allocation15 + $0x138] sm:$0xff] }
 0x245   :  { %1521 = vmatprep.subr.mxu0 %v1315_v14 }
 0x246   :  { %1522 = vmatpush2.msra.mxu0 %v1314_v30 }
 0x247   :  { %1523 = vmatprep.subr.mxu0 %v1311_v25 }
 0x248   :  { %1524 = vmatpush2.msra.mxu0 %v1310_v15  ;;  %v1140_v15 = vld [vmem:[#allocation15 + $0x130] sm:$0xff] }
 0x249   :  { %1525 = vmatprep.subr.mxu0 %v1307_v27 }
 0x24a   :  { %1526 = vmatpush2.msra.mxu0 %v1306_v16  ;;  %v1137_v16 = vld [vmem:[#allocation15 + $0x118] sm:$0xff] }
 0x24b   :  { %1527 = vmatprep.subr.mxu0 %v1303_v17 }
 0x24c   :  { %1528 = vmatpush2.msra.mxu0 %v1302_v34  ;;  %v1136_v34 = vld [vmem:[#allocation15 + $0x110] sm:$0xff] }
 0x24d   :  { %1529 = vmatprep.subr.mxu0 %v1299_v18 }
 0x24e   :  { %1530 = vmatpush2.msra.mxu0 %v1298_v10 }
 0x24f   :  { %1531 = vmatprep.subr.mxu0 %v1295_v19  ;;  %v1133_v19 = vld [vmem:[#allocation15 + $0xf8] sm:$0xff] }
 0x250   :  { %1532 = vmatpush2.msra.mxu0 %v1294_v21 }
 0x251   :  { %1647 = vmatprep.subr.mxu0 %v1293_v22 }
 0x2a1   :  { %v3703_v31 = vpop.f32.mrf.mxu0 }
 0x2a3   :  { %v3705_v23 = vpop.f32.mrf.mxu0 }
 0x2a5   :  { %v3709_v28 = vpop.f32.mrf.mxu0 }
 0x2a7   :  { %v3717_v35 = vpop.f32.mrf.mxu0 }
 0x2b1   :  { %v780_v38 = vpop.f32.mrf.mxu0 }
 0x2b2   :  { %v3721_v40 = vadd.f32 %v780_v38, %v664_v36  ;;  %v1289_v38 = vld [vmem:[#allocation15 + $0x5d8] sm:$0xff] }
 0x2b3   :  { %v782_v41 = vpop.f32.mrf.mxu0 }
 0x2b4   :  { %v3723_v42 = vadd.f32 %v782_v41, %v668_v37  ;;  %v1070_v45 = vmax.f32 %v3721_v40, 0.0  ;;  %v1804_v40 = vld [vmem:[#allocation18 + $0x1a0] sm:$0xff] }
 0x2b5   :  { %v786_v43 = vpop.f32.mrf.mxu0 }
 0x2b6   :  { %v1071_v44 = vmax.f32 %v3723_v42, 0.0  ;;  %v3727_v46 = vadd.f32 %v786_v43, %v664_v36  ;;  %v1128_v42 = vld [vmem:[#allocation15 + $0xd0] sm:$0xff] }
 0x2b7   :  { %v788_v47 = vpop.f32.mrf.mxu0  ;;  %v1288_v43 = vld [vmem:[#allocation15 + $0x5d0] sm:$0xff] }
 0x2b8   :  { %v3729_v49 = vadd.f32 %v788_v47, %v668_v37  ;;  %1444 = vmatprep.mubr.f32.mxu1 %v1071_v44  ;;  %v1078_v55 = vmax.f32 %v3727_v46, 0.0  ;;  %v1305_v46 = vld [vmem:[#allocation15 + $0x658] sm:$0xff] }
 0x2b9   :  { %v792_v51 = vpop.f32.mrf.mxu0  ;;  %1445 = vmatmul.mubr.f32.vlgmr.msra.gmra.mxu1 %v1070_v45 }
 0x2ba   :  { %v1079_v53 = vmax.f32 %v3729_v49, 0.0  ;;  %1559 = vmatpush1.msra.mxu1 %v1164_v48  ;;  %v3737_v56 = vadd.f32 %v792_v51, %v664_v36  ;;  %v1125_v48 = vld [vmem:[#allocation15 + $0xb8] sm:$0xff]  ;;  %v1312_v49 = vld [vmem:[#allocation15 + $0x690] sm:$0xff] }
 0x2bb   :  { %1560 = vmatprep.subr.mxu1 %v1161_v50  ;;  %v794_v57 = vpop.f32.mrf.mxu0 }
 0x2bc   :  { %v3742_v60 = vadd.f32 %v794_v57, %v668_v37  ;;  %1561 = vmatpush1.msra.mxu1 %v1160_v52  ;;  %1450 = vmatprep.mubr.f32.mxu1 %v1079_v53  ;;  %v1086_v3 = vmax.f32 %v3737_v56, 0.0  ;;  %v1285_v52 = vld [vmem:[#allocation15 + $0x5b8] sm:$0xff]  ;;  %v1124_v57 = vld [vmem:[#allocation15 + $0xb0] sm:$0xff] }
 0x2bd   :  { %1562 = vmatprep.subr.mxu1 %v1157_v54  ;;  %v798_v63 = vpop.f32.mrf.mxu0  ;;  %1451 = vmatmul.mubr.f32.gmra.mxu1 %v1078_v55  ;;  %v1297_v56 = vld [vmem:[#allocation15 + $0x618] sm:$0xff] }
 0x2be   :  { %v1087_v1 = vmax.f32 %v3742_v60, 0.0  ;;  %1563 = vmatpush1.msra.mxu1 %v1156_v58  ;;  %v3753_v4 = vadd.f32 %v798_v63, %v664_v36  ;;  %v1284_v58 = vld [vmem:[#allocation15 + $0x5b0] sm:$0xff]  ;;  %v1121_v63 = vld [vmem:[#allocation15 + $0x98] sm:$0xff] }
 0x2bf   :  { %1564 = vmatprep.subr.mxu1 %v1153_v61  ;;  %v800_v5 = vpop.f32.mrf.mxu0  ;;  %v1304_v60 = vld [vmem:[#allocation15 + $0x650] sm:$0xff] }
 0x2c0   :  { %v3758_v8 = vadd.f32 %v800_v5, %v668_v37  ;;  %1565 = vmatpush1.msra.mxu1 %v1152_v0  ;;  %1456 = vmatprep.mubr.f32.mxu1 %v1087_v1  ;;  %v1094_v14 = vmax.f32 %v3753_v4, 0.0  ;;  %v1129_v37 = vld [vmem:[#allocation15 + $0xd8] sm:$0xff]  ;;  %v1120_v5 = vld [vmem:[#allocation15 + $0x90] sm:$0xff] }
 0x2c1   :  { %1566 = vmatprep.subr.mxu1 %v1149_v2  ;;  %v869_v11 = vpop.f32.mrf.mxu0  ;;  %1457 = vmatmul.mubr.f32.gmra.mxu1 %v1086_v3  ;;  %v1281_v0 = vld [vmem:[#allocation15 + $0x598] sm:$0xff]  ;;  %v1937_v4 = vld [vmem:[#allocation18 + $0x5c8] sm:$0xff] }
 0x2c2   :  { %v1095_v20 = vmax.f32 %v3758_v8, 0.0  ;;  %1567 = vmatpush1.msra.mxu1 %v1148_v7  ;;  %v3770_v30 = vadd.f32 %v869_v11, %v3756_v6  ;;  %v1280_v7 = vld [vmem:[#allocation15 + $0x590] sm:$0xff] }
 0x2c3   :  { %1568 = vmatprep.subr.mxu1 %v1145_v9  ;;  %v871_v25 = vpop.f32.mrf.mxu0  ;;  %v1296_v8 = vld [vmem:[#allocation15 + $0x610] sm:$0xff] }
 0x2c4   :  { %v3773_v27 = vadd.f32 %v871_v25, %v3763_v26  ;;  %1569 = vmatpush1.msra.mxu1 %v1144_v12  ;;  %1462 = vmatprep.mubr.f32.mxu1 %v1095_v20  ;;  %v1072_v21 = vmax.f32 %v3770_v30, 0.0  ;;  %v1117_v12 = vld [vmem:[#allocation15 + $0x78] sm:$0xff]  ;;  %v1932_v30 = vld [vmem:[#allocation18 + $0x5a0] sm:$0xff] }
 0x2c5   :  { %1570 = vmatprep.subr.mxu1 %v1141_v13  ;;  %v875_v17 = vpop.f32.mrf.mxu0  ;;  %1463 = vmatmul.mubr.f32.gmra.mxu1 %v1094_v14 }
 0x2c6   :  { %v1073_v18 = vmax.f32 %v3773_v27, 0.0  ;;  %v3781_v10 = vadd.f32 %v875_v17, %v3756_v6  ;;  %1571 = vmatpush1.msra.mxu1 %v1140_v15  ;;  %1622 = vmatprep.mubr.f32.mxu1 %v1071_v44  ;;  %v1277_v15 = vld [vmem:[#allocation15 + $0x578] sm:$0xff]  ;;  %v1276_v17 = vld [vmem:[#allocation15 + $0x570] sm:$0xff] }
 0x2c7   :  { %1572 = vmatprep.subr.mxu1 %v1137_v16  ;;  %v877_v22 = vpop.f32.mrf.mxu0  ;;  %v1116_v16 = vld [vmem:[#allocation15 + $0x70] sm:$0xff]  ;;  %v1217_v27 = vld [vmem:[#allocation15 + $0x398] sm:$0xff] }
 0x2c8   :  { %v3787_v36 = vadd.f32 %v877_v22, %v3763_v26  ;;  %1573 = vmatpush1.msra.mxu1 %v1136_v34  ;;  %1533 = vmatprep.mubr.f32.mxu0 %v1073_v18  ;;  %v1080_v44 = vmax.f32 %v3781_v10, 0.0  ;;  %v1113_v34 = vld [vmem:[#allocation15 + $0x58] sm:$0xff]  ;;  %v1924_v10 = vld [vmem:[#allocation18 + $0x560] sm:$0xff] }
 0x2c9   :  { %1574 = vmatprep.subr.mxu1 %v1133_v19  ;;  %v881_v41 = vpop.f32.mrf.mxu0  ;;  %1534 = vmatmul.mubr.f32.vlgmr.msra.gmra.mxu0 %v1072_v21  ;;  %v1273_v19 = vld [vmem:[#allocation15 + $0x558] sm:$0xff] }
 0x2ca   :  { %v1081_v47 = vmax.f32 %v3787_v36, 0.0  ;;  %1575 = vmatpush1.msra.mxu1 %v1132_v39  ;;  %1648 = vmatpush1.msra.mxu0 %v1292_v32  ;;  %v3796_v50 = vadd.f32 %v881_v41, %v3756_v6  ;;  %v1109_v32 = vld [vmem:[#allocation15 + $0x38] sm:$0xff]  ;;  %v1268_v41 = vld [vmem:[#allocation15 + $0x530] sm:$0xff]  ;;  %v1768_v36 = vld [vmem:[#allocation18 + $0x80] sm:$0xff] }
 0x2cb   :  { %1576 = vmatprep.subr.mxu1 %v1129_v37  ;;  %1649 = vmatprep.subr.mxu0 %v1289_v38  ;;  %v883_v51 = vpop.f32.mrf.mxu0  ;;  %v1269_v37 = vld [vmem:[#allocation15 + $0x538] sm:$0xff]  ;;  %v1108_v38 = vld [vmem:[#allocation15 + $0x30] sm:$0xff] }
 0x2cc   :  { %v3799_v54 = vadd.f32 %v883_v51, %v3763_v26  ;;  %1577 = vmatpush1.msra.mxu1 %v1128_v42  ;;  %1650 = vmatpush1.msra.mxu0 %v1288_v43  ;;  %v1088_v9 = vmax.f32 %v3796_v50, 0.0  ;;  %v1105_v42 = vld [vmem:[#allocation15 + $0x18] sm:$0xff]  ;;  %v1264_v51 = vld [vmem:[#allocation15 + $0x510] sm:$0xff]  ;;  %v1916_v50 = vld [vmem:[#allocation18 + $0x520] sm:$0xff] }
 0x2cd   :  { %1539 = vmatprep.mubr.f32.mxu0 %v1081_v47  ;;  %1578 = vmatprep.subr.mxu1 %v1125_v48  ;;  %v887_v61 = vpop.f32.mrf.mxu0  ;;  %v1265_v43 = vld [vmem:[#allocation15 + $0x518] sm:$0xff]  ;;  %v1104_v48 = vld [vmem:[#allocation15 + $0x10] sm:$0xff] }
 0x2ce   :  { %v1089_v2 = vmax.f32 %v3799_v54, 0.0  ;;  %1651 = vmatprep.subr.mxu0 %v1285_v52  ;;  %1540 = vmatmul.mubr.f32.gmra.mxu0 %v1080_v44  ;;  %v3808_v13 = vadd.f32 %v887_v61, %v3756_v6  ;;  %v1112_v6 = vld [vmem:[#allocation15 + $0x50] sm:$0xff]  ;;  %v1229_v52 = vld [vmem:[#allocation15 + $0x3f8] sm:$0xff]  ;;  %v1760_v54 = vld [vmem:[#allocation18 + $0x40] sm:$0xff] }
 0x2cf   :  { %1579 = vmatpush1.msra.mxu1 %v1124_v57  ;;  %1652 = vmatpush1.msra.mxu0 %v1284_v58  ;;  %v889_v11 = vpop.f32.mrf.mxu0  ;;  %v1261_v57 = vld [vmem:[#allocation15 + $0x4f8] sm:$0xff]  ;;  %v1228_v58 = vld [vmem:[#allocation15 + $0x3f0] sm:$0xff] }
 0x2d0   :  { %1580 = vmatprep.subr.mxu1 %v1121_v63  ;;  %1653 = vmatprep.subr.mxu0 %v1281_v0  ;;  %v3811_v25 = vadd.f32 %v889_v11, %v3763_v26  ;;  %v1272_v26 = vld [vmem:[#allocation15 + $0x550] sm:$0xff]  ;;  %v1096_v39 = vmax.f32 %v3808_v13, 0.0  ;;  %v1225_v63 = vld [vmem:[#allocation15 + $0x3d8] sm:$0xff] }
 0x2d1   :  { %1581 = vmatpush1.msra.mxu1 %v1120_v5  ;;  %1654 = vmatpush1.msra.mxu0 %v1280_v7  ;;  %v1260_v61 = vld [vmem:[#allocation15 + $0x4f0] sm:$0xff]  ;;  %v1257_v0 = vld [vmem:[#allocation15 + $0x4d8] sm:$0xff] }
 0x2d2   :  { %1545 = vmatprep.mubr.f32.mxu0 %v1089_v2  ;;  %1582 = vmatprep.subr.mxu1 %v1117_v12  ;;  %v1097_v22 = vmax.f32 %v3811_v25, 0.0  ;;  %v1224_v5 = vld [vmem:[#allocation15 + $0x3d0] sm:$0xff]  ;;  %v1221_v11 = vld [vmem:[#allocation15 + $0x3b8] sm:$0xff] }
 0x2d3   :  { %1655 = vmatprep.subr.mxu0 %v1277_v15  ;;  %1546 = vmatmul.mubr.f32.gmra.mxu0 %v1088_v9  ;;  %v1256_v7 = vld [vmem:[#allocation15 + $0x4d0] sm:$0xff]  ;;  %v1253_v12 = vld [vmem:[#allocation15 + $0x4b8] sm:$0xff] }
 0x2d4   :  { %1583 = vmatpush1.msra.mxu1 %v1116_v16  ;;  %1656 = vmatpush1.msra.mxu0 %v1276_v17  ;;  %v1220_v15 = vld [vmem:[#allocation15 + $0x3b0] sm:$0xff] }
 0x2d5   :  { %1584 = vmatprep.subr.mxu1 %v1113_v34  ;;  %1657 = vmatprep.subr.mxu0 %v1273_v19  ;;  %v1252_v16 = vld [vmem:[#allocation15 + $0x4b0] sm:$0xff]  ;;  %v1213_v19 = vld [vmem:[#allocation15 + $0x378] sm:$0xff] }
 0x2d6   :  { %1585 = vmatpush1.msra.mxu1 %v1112_v6  ;;  %1658 = vmatpush1.msra.mxu0 %v1272_v26  ;;  %v1216_v17 = vld [vmem:[#allocation15 + $0x390] sm:$0xff]  ;;  %v1245_v6 = vld [vmem:[#allocation15 + $0x478] sm:$0xff] }
 0x2d7   :  { %1551 = vmatprep.mubr.f32.mxu0 %v1097_v22  ;;  %1586 = vmatprep.subr.mxu1 %v1109_v32  ;;  %v1248_v34 = vld [vmem:[#allocation15 + $0x490] sm:$0xff] }
 0x2d8   :  { %1659 = vmatprep.subr.mxu0 %v1269_v37  ;;  %1552 = vmatmul.mubr.f32.gmra.mxu0 %v1096_v39  ;;  %v1212_v26 = vld [vmem:[#allocation15 + $0x370] sm:$0xff]  ;;  %v1209_v37 = vld [vmem:[#allocation15 + $0x358] sm:$0xff] }
 0x2d9   :  { %1587 = vmatpush1.msra.mxu1 %v1108_v38  ;;  %1660 = vmatpush1.msra.mxu0 %v1268_v41  ;;  %v1244_v32 = vld [vmem:[#allocation15 + $0x470] sm:$0xff]  ;;  %v1241_v38 = vld [vmem:[#allocation15 + $0x458] sm:$0xff] }
 0x2da   :  { %1588 = vmatprep.subr.mxu1 %v1105_v42  ;;  %1661 = vmatprep.subr.mxu0 %v1265_v43  ;;  %v1208_v41 = vld [vmem:[#allocation15 + $0x350] sm:$0xff]  ;;  %v1205_v43 = vld [vmem:[#allocation15 + $0x338] sm:$0xff] }
 0x2db   :  { %1711 = vmatprep.mubr.f32.mxu0 %v1073_v18  ;;  %1589 = vmatpush1.msra.mxu1 %v1104_v48  ;;  %v1249_v18 = vld [vmem:[#allocation15 + $0x498] sm:$0xff]  ;;  %v1240_v42 = vld [vmem:[#allocation15 + $0x450] sm:$0xff] }
 0x2dc   :  { %1662 = vmatpush1.msra.mxu0 %v1264_v51  ;;  %1590 = vmatprep.subr.mxu1 %v1229_v52  ;;  %v1237_v48 = vld [vmem:[#allocation15 + $0x438] sm:$0xff]  ;;  %v1204_v51 = vld [vmem:[#allocation15 + $0x330] sm:$0xff] }
 0x2dd   :  { %1663 = vmatprep.subr.mxu0 %v1261_v57  ;;  %1591 = vmatpush2.msra.mxu1 %v1228_v58  ;;  %v1236_v52 = vld [vmem:[#allocation15 + $0x430] sm:$0xff]  ;;  %v1201_v57 = vld [vmem:[#allocation15 + $0x318] sm:$0xff] }
 0x2de   :  { %1664 = vmatpush1.msra.mxu0 %v1260_v61  ;;  %1592 = vmatprep.subr.mxu1 %v1225_v63  ;;  %v1233_v58 = vld [vmem:[#allocation15 + $0x418] sm:$0xff]  ;;  %v1200_v61 = vld [vmem:[#allocation15 + $0x310] sm:$0xff] }
 0x2df   :  { %1665 = vmatprep.subr.mxu0 %v1257_v0  ;;  %1593 = vmatpush2.msra.mxu1 %v1224_v5  ;;  %v1232_v63 = vld [vmem:[#allocation15 + $0x410] sm:$0xff]  ;;  %v1197_v0 = vld [vmem:[#allocation15 + $0x2f8] sm:$0xff] }
 0x2e0   :  { %1666 = vmatpush1.msra.mxu0 %v1256_v7  ;;  %1594 = vmatprep.subr.mxu1 %v1221_v11  ;;  %v1357_v5 = vld [vmem:[#allocation15 + $0x7f8] sm:$0xff]  ;;  %v1196_v7 = vld [vmem:[#allocation15 + $0x2f0] sm:$0xff] }
 0x2e1   :  { %1667 = vmatprep.subr.mxu0 %v1253_v12  ;;  %1595 = vmatpush2.msra.mxu1 %v1220_v15  ;;  %v1356_v11 = vld [vmem:[#allocation15 + $0x7f0] sm:$0xff]  ;;  %v1193_v12 = vld [vmem:[#allocation15 + $0x2d8] sm:$0xff] }
 0x2e2   :  { %1668 = vmatpush1.msra.mxu0 %v1252_v16  ;;  %1596 = vmatprep.subr.mxu1 %v1217_v27  ;;  %v1353_v15 = vld [vmem:[#allocation15 + $0x7d8] sm:$0xff]  ;;  %v1192_v16 = vld [vmem:[#allocation15 + $0x2d0] sm:$0xff] }
 0x2e3   :  { %1669 = vmatprep.subr.mxu0 %v1249_v18  ;;  %1597 = vmatpush2.msra.mxu1 %v1216_v17  ;;  %v1352_v27 = vld [vmem:[#allocation15 + $0x7d0] sm:$0xff]  ;;  %v1189_v18 = vld [vmem:[#allocation15 + $0x2b8] sm:$0xff] }
 0x2e4   :  { %1670 = vmatpush1.msra.mxu0 %v1248_v34  ;;  %1598 = vmatprep.subr.mxu1 %v1213_v19  ;;  %v1349_v17 = vld [vmem:[#allocation15 + $0x7b8] sm:$0xff]  ;;  %v1188_v34 = vld [vmem:[#allocation15 + $0x2b0] sm:$0xff] }
 0x2e5   :  { %1671 = vmatprep.subr.mxu0 %v1245_v6  ;;  %1599 = vmatpush2.msra.mxu1 %v1212_v26  ;;  %v1348_v19 = vld [vmem:[#allocation15 + $0x7b0] sm:$0xff]  ;;  %v1185_v6 = vld [vmem:[#allocation15 + $0x298] sm:$0xff] }
 0x2e6   :  { %1672 = vmatpush1.msra.mxu0 %v1244_v32  ;;  %1600 = vmatprep.subr.mxu1 %v1209_v37  ;;  %v1345_v26 = vld [vmem:[#allocation15 + $0x798] sm:$0xff]  ;;  %v1184_v32 = vld [vmem:[#allocation15 + $0x290] sm:$0xff] }
 0x2e7   :  { %1673 = vmatprep.subr.mxu0 %v1241_v38  ;;  %1601 = vmatpush2.msra.mxu1 %v1208_v41  ;;  %v1344_v37 = vld [vmem:[#allocation15 + $0x790] sm:$0xff]  ;;  %v1181_v38 = vld [vmem:[#allocation15 + $0x278] sm:$0xff] }
 0x2e8   :  { %1674 = vmatpush1.msra.mxu0 %v1240_v42  ;;  %1602 = vmatprep.subr.mxu1 %v1205_v43  ;;  %v1341_v41 = vld [vmem:[#allocation15 + $0x778] sm:$0xff]  ;;  %v1180_v42 = vld [vmem:[#allocation15 + $0x270] sm:$0xff] }
 0x2e9   :  { %1675 = vmatprep.subr.mxu0 %v1237_v48  ;;  %1603 = vmatpush2.msra.mxu1 %v1204_v51  ;;  %v1340_v43 = vld [vmem:[#allocation15 + $0x770] sm:$0xff]  ;;  %v1177_v48 = vld [vmem:[#allocation15 + $0x258] sm:$0xff] }
 0x2ea   :  { %1676 = vmatpush1.msra.mxu0 %v1236_v52  ;;  %1604 = vmatprep.subr.mxu1 %v1201_v57  ;;  %v1337_v51 = vld [vmem:[#allocation15 + $0x758] sm:$0xff]  ;;  %v1176_v52 = vld [vmem:[#allocation15 + $0x250] sm:$0xff] }
 0x2eb   :  { %1677 = vmatprep.subr.mxu0 %v1233_v58  ;;  %1605 = vmatpush2.msra.mxu1 %v1200_v61  ;;  %v1336_v57 = vld [vmem:[#allocation15 + $0x750] sm:$0xff]  ;;  %v1173_v58 = vld [vmem:[#allocation15 + $0x238] sm:$0xff] }
 0x2ec   :  { %1678 = vmatpush1.msra.mxu0 %v1232_v63  ;;  %1606 = vmatprep.subr.mxu1 %v1197_v0  ;;  %v1333_v61 = vld [vmem:[#allocation15 + $0x738] sm:$0xff]  ;;  %v1172_v63 = vld [vmem:[#allocation15 + $0x230] sm:$0xff] }
 0x2ed   :  { %1679 = vmatprep.subr.mxu0 %v1357_v5  ;;  %1607 = vmatpush2.msra.mxu1 %v1196_v7  ;;  %v1332_v0 = vld [vmem:[#allocation15 + $0x730] sm:$0xff]  ;;  %v1169_v5 = vld [vmem:[#allocation15 + $0x218] sm:$0xff] }
 0x2ee   :  { %1680 = vmatpush2.msra.mxu0 %v1356_v11  ;;  %1608 = vmatprep.subr.mxu1 %v1193_v12  ;;  %v1329_v7 = vld [vmem:[#allocation15 + $0x718] sm:$0xff]  ;;  %v1168_v11 = vld [vmem:[#allocation15 + $0x210] sm:$0xff] }
 0x2ef   :  { %1681 = vmatprep.subr.mxu0 %v1353_v15  ;;  %1609 = vmatpush2.msra.mxu1 %v1192_v16  ;;  %v1328_v12 = vld [vmem:[#allocation15 + $0x710] sm:$0xff]  ;;  %v1325_v15 = vld [vmem:[#allocation15 + $0x6f8] sm:$0xff] }
 0x2f0   :  { %1682 = vmatpush2.msra.mxu0 %v1352_v27  ;;  %1610 = vmatprep.subr.mxu1 %v1189_v18  ;;  %v1813_v16 = vld [vmem:[#allocation18 + $0x1e8] sm:$0xff]  ;;  %v1812_v18 = vld [vmem:[#allocation18 + $0x1e0] sm:$0xff] }
 0x2f1   :  { %1683 = vmatprep.subr.mxu0 %v1349_v17  ;;  %1611 = vmatpush2.msra.mxu1 %v1188_v34  ;;  %v1324_v27 = vld [vmem:[#allocation15 + $0x6f0] sm:$0xff]  ;;  %v1321_v17 = vld [vmem:[#allocation15 + $0x6d8] sm:$0xff] }
 0x2f2   :  { %1684 = vmatpush2.msra.mxu0 %v1348_v19  ;;  %1612 = vmatprep.subr.mxu1 %v1185_v6  ;;  %v1809_v34 = vld [vmem:[#allocation18 + $0x1c8] sm:$0xff]  ;;  %v1808_v6 = vld [vmem:[#allocation18 + $0x1c0] sm:$0xff] }
 0x2f3   :  { %1685 = vmatprep.subr.mxu0 %v1345_v26  ;;  %1613 = vmatpush2.msra.mxu1 %v1184_v32  ;;  %v1320_v19 = vld [vmem:[#allocation15 + $0x6d0] sm:$0xff]  ;;  %v1317_v26 = vld [vmem:[#allocation15 + $0x6b8] sm:$0xff] }
 0x2f4   :  { %1686 = vmatpush2.msra.mxu0 %v1344_v37  ;;  %1614 = vmatprep.subr.mxu1 %v1181_v38  ;;  %v1805_v32 = vld [vmem:[#allocation18 + $0x1a8] sm:$0xff] }
 0x2f5   :  { %1687 = vmatprep.subr.mxu0 %v1341_v41  ;;  %1615 = vmatpush2.msra.mxu1 %v1180_v42  ;;  %v1316_v37 = vld [vmem:[#allocation15 + $0x6b0] sm:$0xff]  ;;  %v1309_v41 = vld [vmem:[#allocation15 + $0x678] sm:$0xff] }
 0x2f6   :  { %1688 = vmatpush2.msra.mxu0 %v1340_v43  ;;  %1616 = vmatprep.subr.mxu1 %v1177_v48  ;;  %v1801_v38 = vld [vmem:[#allocation18 + $0x188] sm:$0xff]  ;;  %v1796_v48 = vld [vmem:[#allocation18 + $0x160] sm:$0xff] }
 0x2f7   :  { %1689 = vmatprep.subr.mxu0 %v1337_v51  ;;  %1617 = vmatpush2.msra.mxu1 %v1176_v52  ;;  %v1797_v42 = vld [vmem:[#allocation18 + $0x168] sm:$0xff]  ;;  %v1301_v51 = vld [vmem:[#allocation15 + $0x638] sm:$0xff] }
 0x2f8   :  { %1690 = vmatpush2.msra.mxu0 %v1336_v57  ;;  %1618 = vmatprep.subr.mxu1 %v1173_v58  ;;  %v1308_v43 = vld [vmem:[#allocation15 + $0x670] sm:$0xff]  ;;  %v1788_v58 = vld [vmem:[#allocation18 + $0x120] sm:$0xff] }
 0x2f9   :  { %1691 = vmatprep.subr.mxu0 %v1333_v61  ;;  %1619 = vmatpush2.msra.mxu1 %v1172_v63  ;;  %v1789_v52 = vld [vmem:[#allocation18 + $0x128] sm:$0xff] }
 0x2fa   :  { %1692 = vmatpush2.msra.mxu0 %v1332_v0  ;;  %1620 = vmatprep.subr.mxu1 %v1169_v5  ;;  %v1300_v57 = vld [vmem:[#allocation15 + $0x630] sm:$0xff]  ;;  %v1780_v0 = vld [vmem:[#allocation18 + $0xe0] sm:$0xff] }
 0x2fb   :  { %1693 = vmatprep.subr.mxu0 %v1329_v7  ;;  %1621 = vmatpush2.msra.mxu1 %v1168_v11  ;;  %v1781_v61 = vld [vmem:[#allocation18 + $0xe8] sm:$0xff]  ;;  %v1940_v5 = vld [vmem:[#allocation18 + $0x5e0] sm:$0xff] }
 0x2fc   :  { %1694 = vmatpush2.msra.mxu0 %v1328_v12  ;;  %1623 = vmatmul.mubr.f32.vlgmr.msra.gmra.mxu1 %v1070_v45  ;;  %v1313_v45 = vld [vmem:[#allocation15 + $0x698] sm:$0xff]  ;;  %v1941_v63 = vld [vmem:[#allocation18 + $0x5e8] sm:$0xff]  ;;  %v1936_v11 = vld [vmem:[#allocation18 + $0x5c0] sm:$0xff] }
 0x2fd   :  { %1695 = vmatprep.subr.mxu0 %v1325_v15  ;;  %2030 = vmatprep.subr.mxu1 %v1813_v16  ;;  %v1777_v7 = vld [vmem:[#allocation18 + $0xc8] sm:$0xff]  ;;  %v1772_v16 = vld [vmem:[#allocation18 + $0xa0] sm:$0xff] }
 0x2fe   :  { %1628 = vmatprep.mubr.f32.mxu1 %v1079_v53  ;;  %1696 = vmatpush2.msra.mxu0 %v1324_v27  ;;  %v1800_v53 = vld [vmem:[#allocation18 + $0x180] sm:$0xff]  ;;  %v1773_v12 = vld [vmem:[#allocation18 + $0xa8] sm:$0xff] }
 0x2ff   :  { %2031 = vmatpush1.msra.mxu1 %v1812_v18  ;;  %1697 = vmatprep.subr.mxu0 %v1321_v17  ;;  %v1933_v15 = vld [vmem:[#allocation18 + $0x5a8] sm:$0xff] }
 0x300   :  { %2032 = vmatprep.subr.mxu1 %v1809_v34  ;;  %1698 = vmatpush2.msra.mxu0 %v1320_v19  ;;  %v1929_v27 = vld [vmem:[#allocation18 + $0x588] sm:$0xff]  ;;  %v1764_v34 = vld [vmem:[#allocation18 + $0x60] sm:$0xff] }
 0x301   :  { %2033 = vmatpush1.msra.mxu1 %v1808_v6  ;;  %1699 = vmatprep.subr.mxu0 %v1317_v26  ;;  %v1765_v18 = vld [vmem:[#allocation18 + $0x68] sm:$0xff]  ;;  %v3851_v26 = vpop.f32.mrf.mxu1 }
 0x302   :  { %1629 = vmatmul.mubr.f32.gmra.mxu1 %v1078_v55  ;;  %2034 = vmatprep.subr.mxu1 %v1805_v32  ;;  %v1793_v55 = vld [vmem:[#allocation18 + $0x148] sm:$0xff] }
 0x303   :  { %1634 = vmatprep.mubr.f32.mxu1 %v1087_v1  ;;  %1700 = vmatpush2.msra.mxu0 %v1316_v37  ;;  %v1792_v1 = vld [vmem:[#allocation18 + $0x140] sm:$0xff]  ;;  %v1925_v17 = vld [vmem:[#allocation18 + $0x568] sm:$0xff] }
 0x304   :  { %2035 = vmatpush1.msra.mxu1 %v1804_v40  ;;  %1701 = vmatprep.subr.mxu0 %v1313_v45  ;;  %v1921_v19 = vld [vmem:[#allocation18 + $0x548] sm:$0xff]  ;;  %v1756_v37 = vld [vmem:[#allocation18 + $0x20] sm:$0xff] }
 0x305   :  { %2036 = vmatprep.subr.mxu1 %v1801_v38  ;;  %1702 = vmatpush2.msra.mxu0 %v1312_v49  ;;  %v1757_v6 = vld [vmem:[#allocation18 + $0x28] sm:$0xff]  ;;  %v1912_v40 = vld [vmem:[#allocation18 + $0x500] sm:$0xff]  ;;  %v3855_v38 = vpop.f32.mrf.mxu1 }
 0x306   :  { %2037 = vmatpush1.msra.mxu1 %v1800_v53  ;;  %1703 = vmatprep.subr.mxu0 %v1309_v41  ;;  %v1917_v32 = vld [vmem:[#allocation18 + $0x528] sm:$0xff]  ;;  %v1876_v53 = vld [vmem:[#allocation18 + $0x3e0] sm:$0xff] }
 0x307   :  { %1635 = vmatmul.mubr.f32.gmra.mxu1 %v1086_v3  ;;  %2038 = vmatprep.subr.mxu1 %v1797_v42  ;;  %v1785_v3 = vld [vmem:[#allocation18 + $0x108] sm:$0xff]  ;;  %v1908_v41 = vld [vmem:[#allocation18 + $0x4e0] sm:$0xff] }
 0x308   :  { %1640 = vmatprep.mubr.f32.mxu1 %v1095_v20  ;;  %1704 = vmatpush2.msra.mxu0 %v1308_v43  ;;  %v1784_v20 = vld [vmem:[#allocation18 + $0x100] sm:$0xff]  ;;  %v1913_v25 = vld [vmem:[#allocation18 + $0x508] sm:$0xff] }
 0x309   :  { %2039 = vmatpush1.msra.mxu1 %v1796_v48  ;;  %1705 = vmatprep.subr.mxu0 %v1305_v46  ;;  %v1877_v45 = vld [vmem:[#allocation18 + $0x3e8] sm:$0xff]  ;;  %v1904_v43 = vld [vmem:[#allocation18 + $0x4c0] sm:$0xff]  ;;  %v3857_v46 = vpop.f32.mrf.mxu1 }
 0x30a   :  { %2040 = vmatprep.subr.mxu1 %v1793_v55  ;;  %1706 = vmatpush2.msra.mxu0 %v1304_v60  ;;  %v1909_v49 = vld [vmem:[#allocation18 + $0x4e8] sm:$0xff]  ;;  %v1868_v60 = vld [vmem:[#allocation18 + $0x3a0] sm:$0xff] }
 0x30b   :  { %2041 = vmatpush1.msra.mxu1 %v1792_v1  ;;  %1707 = vmatprep.subr.mxu0 %v1301_v51  ;;  %v1873_v42 = vld [vmem:[#allocation18 + $0x3c8] sm:$0xff]  ;;  %v1900_v1 = vld [vmem:[#allocation18 + $0x4a0] sm:$0xff] }
 0x30c   :  { %1641 = vmatmul.mubr.f32.gmra.mxu1 %v1094_v14  ;;  %2042 = vmatprep.subr.mxu1 %v1789_v52  ;;  %v1776_v14 = vld [vmem:[#allocation18 + $0xc0] sm:$0xff]  ;;  %v1905_v13 = vld [vmem:[#allocation18 + $0x4c8] sm:$0xff] }
 0x30d   :  { %1708 = vmatpush2.msra.mxu0 %v1300_v57  ;;  %2043 = vmatpush1.msra.mxu1 %v1788_v58  ;;  %v1869_v48 = vld [vmem:[#allocation18 + $0x3a8] sm:$0xff]  ;;  %v1864_v57 = vld [vmem:[#allocation18 + $0x380] sm:$0xff] }
 0x30e   :  { %1709 = vmatprep.subr.mxu0 %v1297_v56  ;;  %2044 = vmatprep.subr.mxu1 %v1785_v3  ;;  %v1901_v55 = vld [vmem:[#allocation18 + $0x4a8] sm:$0xff]  ;;  %v1896_v58 = vld [vmem:[#allocation18 + $0x480] sm:$0xff]  ;;  %v3859_v3 = vpop.f32.mrf.mxu1 }
 0x30f   :  { %1710 = vmatpush2.msra.mxu0 %v1296_v8  ;;  %2045 = vmatpush1.msra.mxu1 %v1784_v20  ;;  %v1865_v51 = vld [vmem:[#allocation18 + $0x388] sm:$0xff]  ;;  %v1860_v20 = vld [vmem:[#allocation18 + $0x360] sm:$0xff] }
 0x310   :  { %1712 = vmatmul.mubr.f32.vlgmr.msra.gmra.mxu0 %v1072_v21  ;;  %2046 = vmatprep.subr.mxu1 %v1781_v61  ;;  %v1769_v21 = vld [vmem:[#allocation18 + $0x88] sm:$0xff]  ;;  %v1892_v61 = vld [vmem:[#allocation18 + $0x460] sm:$0xff] }
 0x311   :  { %2119 = vmatprep.subr.mxu0 %v1941_v63  ;;  %1717 = vmatprep.mubr.f32.mxu0 %v1081_v47  ;;  %v1928_v47 = vld [vmem:[#allocation18 + $0x580] sm:$0xff]  ;;  %v1897_v52 = vld [vmem:[#allocation18 + $0x488] sm:$0xff] }
 0x312   :  { %2047 = vmatpush1.msra.mxu1 %v1780_v0  ;;  %2120 = vmatpush1.msra.mxu0 %v1940_v5  ;;  %v1861_v56 = vld [vmem:[#allocation18 + $0x368] sm:$0xff]  ;;  %v1856_v5 = vld [vmem:[#allocation18 + $0x340] sm:$0xff] }
 0x313   :  { %2048 = vmatprep.subr.mxu1 %v1777_v7  ;;  %2121 = vmatprep.subr.mxu0 %v1937_v4  ;;  %v1893_v8 = vld [vmem:[#allocation18 + $0x468] sm:$0xff]  ;;  %v1888_v7 = vld [vmem:[#allocation18 + $0x440] sm:$0xff] }
 0x314   :  { %2049 = vmatpush1.msra.mxu1 %v1776_v14  ;;  %2122 = vmatpush1.msra.mxu0 %v1936_v11  ;;  %v1857_v63 = vld [vmem:[#allocation18 + $0x348] sm:$0xff]  ;;  %v3861_v14 = vpop.f32.mrf.mxu1 }
 0x315   :  { %1718 = vmatmul.mubr.f32.gmra.mxu0 %v1080_v44  ;;  %2050 = vmatprep.subr.mxu1 %v1773_v12  ;;  %v1761_v44 = vld [vmem:[#allocation18 + $0x48] sm:$0xff]  ;;  %v1852_v12 = vld [vmem:[#allocation18 + $0x320] sm:$0xff] }
 0x316   :  { %2123 = vmatprep.subr.mxu0 %v1933_v15  ;;  %1723 = vmatprep.mubr.f32.mxu0 %v1089_v2  ;;  %v1920_v2 = vld [vmem:[#allocation18 + $0x540] sm:$0xff]  ;;  %v1889_v0 = vld [vmem:[#allocation18 + $0x448] sm:$0xff] }
 0x317   :  { %2051 = vmatpush1.msra.mxu1 %v1772_v16  ;;  %2124 = vmatpush1.msra.mxu0 %v1932_v30  ;;  %v1853_v4 = vld [vmem:[#allocation18 + $0x328] sm:$0xff]  ;;  %v1884_v15 = vld [vmem:[#allocation18 + $0x420] sm:$0xff] }
 0x318   :  { %2052 = vmatprep.subr.mxu1 %v1769_v21  ;;  %2125 = vmatprep.subr.mxu0 %v1929_v27  ;;  %v1885_v11 = vld [vmem:[#allocation18 + $0x428] sm:$0xff]  ;;  %v1848_v21 = vld [vmem:[#allocation18 + $0x300] sm:$0xff] }
 0x319   :  { %2053 = vmatpush1.msra.mxu1 %v1768_v36  ;;  %2126 = vmatpush1.msra.mxu0 %v1928_v47  ;;  %v1849_v16 = vld [vmem:[#allocation18 + $0x308] sm:$0xff]  ;;  %v1880_v27 = vld [vmem:[#allocation18 + $0x400] sm:$0xff]  ;;  %v960_v47 = vpop.f32.mrf.mxu1 }
 0x31a   :  { %1724 = vmatmul.mubr.f32.gmra.mxu0 %v1088_v9  ;;  %2054 = vmatprep.subr.mxu1 %v1765_v18  ;;  %v1753_v9 = vld [vmem:[#allocation18 + $0x8] sm:$0xff] }
 0x31b   :  { %2127 = vmatprep.subr.mxu0 %v1925_v17  ;;  %1729 = vmatprep.mubr.f32.mxu0 %v1097_v22  ;;  %v1752_v22 = vld [vmem:[#allocation18] sm:$0xff]  ;;  %v1881_v30 = vld [vmem:[#allocation18 + $0x408] sm:$0xff] }
 0x31c   :  { %2055 = vmatpush1.msra.mxu1 %v1764_v34  ;;  %2128 = vmatpush1.msra.mxu0 %v1924_v10  ;;  %v1845_v36 = vld [vmem:[#allocation18 + $0x2e8] sm:$0xff]  ;;  %v1844_v17 = vld [vmem:[#allocation18 + $0x2e0] sm:$0xff] }
 0x31d   :  { %2056 = vmatprep.subr.mxu1 %v1761_v44  ;;  %2129 = vmatprep.subr.mxu0 %v1921_v19  ;;  %v2005_v18 = vld [vmem:[#allocation18 + $0x7e8] sm:$0xff]  ;;  %v2004_v34 = vld [vmem:[#allocation18 + $0x7e0] sm:$0xff] }
 0x31e   :  { %2057 = vmatpush1.msra.mxu1 %v1760_v54  ;;  %2130 = vmatpush1.msra.mxu0 %v1920_v2  ;;  %v1841_v10 = vld [vmem:[#allocation18 + $0x2c8] sm:$0xff]  ;;  %v1840_v19 = vld [vmem:[#allocation18 + $0x2c0] sm:$0xff]  ;;  %v683_v54 = vsub.s32 5, %v3707_v24 }
 0x31f   :  { %1730 = vmatmul.mubr.f32.gmra.mxu0 %v1096_v39  ;;  %2058 = vmatprep.subr.mxu1 %v1757_v6  ;;  %v1872_v39 = vld [vmem:[#allocation18 + $0x3c0] sm:$0xff]  ;;  %v2001_v44 = vld [vmem:[#allocation18 + $0x7c8] sm:$0xff] }
 0x320   :  { %2131 = vmatprep.subr.mxu0 %v1917_v32  ;;  %2059 = vmatpush1.msra.mxu1 %v1756_v37  ;;  %v2000_v2 = vld [vmem:[#allocation18 + $0x7c0] sm:$0xff]  ;;  %v1837_v6 = vld [vmem:[#allocation18 + $0x2a8] sm:$0xff]  ;;  %v3864_v32 = vpop.f32.mrf.mxu1 }
 0x321   :  { %2132 = vmatpush1.msra.mxu0 %v1916_v50  ;;  %2060 = vmatprep.subr.mxu1 %v1753_v9  ;;  %v1997_v37 = vld [vmem:[#allocation18 + $0x7a8] sm:$0xff]  ;;  %v1836_v50 = vld [vmem:[#allocation18 + $0x2a0] sm:$0xff]  ;;  %v679_v9 = vsub.s32 4, %v3707_v24 }
 0x322   :  { %2133 = vmatprep.subr.mxu0 %v1913_v25  ;;  %2061 = vmatpush1.msra.mxu1 %v1752_v22  ;;  %v1996_v25 = vld [vmem:[#allocation18 + $0x7a0] sm:$0xff]  ;;  %v1833_v22 = vld [vmem:[#allocation18 + $0x288] sm:$0xff] }
 0x323   :  { %2134 = vmatpush1.msra.mxu0 %v1912_v40  ;;  %2062 = vmatprep.subr.mxu1 %v1877_v45  ;;  %v1993_v40 = vld [vmem:[#allocation18 + $0x788] sm:$0xff]  ;;  %v1832_v45 = vld [vmem:[#allocation18 + $0x280] sm:$0xff] }
 0x324   :  { %2135 = vmatprep.subr.mxu0 %v1909_v49  ;;  %2063 = vmatpush2.msra.mxu1 %v1876_v53  ;;  %v3867_v49 = vld [vmem:[#allocation13] sm:$0xff] }
 0x325   :  { %2136 = vmatpush1.msra.mxu0 %v1908_v41  ;;  %2064 = vmatprep.subr.mxu1 %v1873_v42  ;;  %v3870_v53 = vrot.slane %v3867_v49, %v683_v54  ;;  %v1992_v41 = vld [vmem:[#allocation18 + $0x780] sm:$0xff]  ;;  %v1829_v42 = vld [vmem:[#allocation18 + $0x268] sm:$0xff]  ;;  %v1810_v54 = vld [vmem:[#allocation18 + $0x1d0] sm:$0xff] }
 0x326   :  { %2137 = vmatprep.subr.mxu0 %v1905_v13  ;;  %2065 = vmatpush2.msra.mxu1 %v1872_v39  ;;  %v966_v13 = vpop.f32.mrf.mxu1  ;;  %v1989_v39 = vld [vmem:[#allocation18 + $0x768] sm:$0xff] }
 0x327   :  { %2138 = vmatpush1.msra.mxu0 %v1904_v43  ;;  %2066 = vmatprep.subr.mxu1 %v1869_v48  ;;  %v3873_v43 = vrot.slane %v3867_v49, %v679_v9  ;;  %v1828_v48 = vld [vmem:[#allocation18 + $0x260] sm:$0xff]  ;;  %v1806_v9 = vld [vmem:[#allocation18 + $0x1b0] sm:$0xff] }
 0x328   :  { %2139 = vmatprep.subr.mxu0 %v1901_v55  ;;  %2067 = vmatpush2.msra.mxu1 %v1868_v60  ;;  %v1988_v55 = vld [vmem:[#allocation18 + $0x760] sm:$0xff]  ;;  %v1825_v60 = vld [vmem:[#allocation18 + $0x248] sm:$0xff] }
 0x329   :  { %2140 = vmatpush1.msra.mxu0 %v1900_v1  ;;  %2068 = vmatprep.subr.mxu1 %v1865_v51  ;;  %v1985_v1 = vld [vmem:[#allocation18 + $0x748] sm:$0xff]  ;;  %v3876_v51 = vadd.f32 %v960_v47, %v3870_v53  ;;  %v1814_v47 = vld [vmem:[#allocation18 + $0x1f0] sm:$0xff] }
 0x32a   :  { %2141 = vmatprep.subr.mxu0 %v1897_v52  ;;  %2069 = vmatpush2.msra.mxu1 %v1864_v57  ;;  %v1824_v52 = vld [vmem:[#allocation18 + $0x240] sm:$0xff] }
 0x32b   :  { %2142 = vmatpush1.msra.mxu0 %v1896_v58  ;;  %2070 = vmatprep.subr.mxu1 %v1861_v56  ;;  %v1984_v57 = vld [vmem:[#allocation18 + $0x740] sm:$0xff]  ;;  %v1821_v58 = vld [vmem:[#allocation18 + $0x228] sm:$0xff]  ;;  %v970_v56 = vpop.f32.mrf.mxu1 }
 0x32c   :  { %2143 = vmatprep.subr.mxu0 %v1893_v8  ;;  %2071 = vmatpush2.msra.mxu1 %v1860_v20  ;;  %v3880_v8 = vadd.f32 %v3861_v14, %v3873_v43  ;;  %v1981_v20 = vld [vmem:[#allocation18 + $0x728] sm:$0xff]  ;;  %v1976_v14 = vld [vmem:[#allocation18 + $0x700] sm:$0xff] }
 0x32d   :  { %2144 = vmatpush1.msra.mxu0 %v1892_v61  ;;  %2072 = vmatprep.subr.mxu1 %v1857_v63  ;;  %v1820_v61 = vld [vmem:[#allocation18 + $0x220] sm:$0xff] }
 0x32e   :  { %2145 = vmatprep.subr.mxu0 %v1889_v0  ;;  %2073 = vmatpush2.msra.mxu1 %v1856_v5  ;;  %v1980_v63 = vld [vmem:[#allocation18 + $0x720] sm:$0xff]  ;;  %v1817_v0 = vld [vmem:[#allocation18 + $0x208] sm:$0xff]  ;;  %v1075_v5 = vmax.f32 %v3876_v51, 0.0 }
 0x32f   :  { %2146 = vmatpush1.msra.mxu0 %v1888_v7  ;;  %2074 = vmatprep.subr.mxu1 %v1853_v4  ;;  %v1977_v7 = vld [vmem:[#allocation18 + $0x708] sm:$0xff]  ;;  %v1816_v4 = vld [vmem:[#allocation18 + $0x200] sm:$0xff] }
 0x330   :  { %2147 = vmatprep.subr.mxu0 %v1885_v11  ;;  %2075 = vmatpush2.msra.mxu1 %v1852_v12  ;;  %v3883_v11 = vpop.f32.mrf.mxu0  ;;  %v972_v12 = vpop.f32.mrf.mxu1 }
 0x331   :  { %2148 = vmatpush1.msra.mxu0 %v1884_v15  ;;  %2076 = vmatprep.subr.mxu1 %v1849_v16  ;;  %v1074_v15 = vmax.f32 %v3880_v8, 0.0  ;;  %v3887_v16 = vadd.f32 %v966_v13, %v3870_v53  ;;  %v1960_v13 = vld [vmem:[#allocation18 + $0x680] sm:$0xff] }
 0x332   :  { %2149 = vmatprep.subr.mxu0 %v1881_v30  ;;  %2077 = vmatpush2.msra.mxu1 %v1848_v21  ;;  %v1973_v30 = vld [vmem:[#allocation18 + $0x6e8] sm:$0xff]  ;;  %v1815_v21 = vld [vmem:[#allocation18 + $0x1f8] sm:$0xff] }
 0x333   :  { %2150 = vmatpush1.msra.mxu0 %v1880_v27  ;;  %2078 = vmatprep.subr.mxu1 %v1845_v36  ;;  %v1972_v27 = vld [vmem:[#allocation18 + $0x6e0] sm:$0xff]  ;;  %v3891_v36 = vadd.f32 %v3864_v32, %v3873_v43  ;;  %v1807_v32 = vld [vmem:[#allocation18 + $0x1b8] sm:$0xff] }
 0x334   :  { %2151 = vmatprep.subr.mxu0 %v2005_v18  ;;  %2079 = vmatpush2.msra.mxu1 %v1844_v17  ;;  %v1969_v18 = vld [vmem:[#allocation18 + $0x6c8] sm:$0xff]  ;;  %v1049_v17 = vpop.f32.mrf.mxu0 }
 0x335   :  { %2152 = vmatpush2.msra.mxu0 %v2004_v34  ;;  %2080 = vmatprep.subr.mxu1 %v1841_v10  ;;  %v1811_v34 = vld [vmem:[#allocation18 + $0x1d8] sm:$0xff]  ;;  %v1968_v10 = vld [vmem:[#allocation18 + $0x6c0] sm:$0xff] }
 0x336   :  { %2153 = vmatprep.subr.mxu0 %v2001_v44  ;;  %2081 = vmatpush2.msra.mxu1 %v1840_v19  ;;  %v976_v44 = vpop.f32.mrf.mxu1  ;;  %v1083_v19 = vmax.f32 %v3887_v16, 0.0 }
 0x337   :  { %2154 = vmatpush2.msra.mxu0 %v2000_v2  ;;  %2082 = vmatprep.subr.mxu1 %v1837_v6  ;;  %v1965_v2 = vld [vmem:[#allocation18 + $0x6a8] sm:$0xff]  ;;  %v3899_v6 = vadd.f32 %v972_v12, %v3870_v53 }
 0x338   :  { %2155 = vmatprep.subr.mxu0 %v1997_v37  ;;  %2083 = vmatpush2.msra.mxu1 %v1836_v50  ;;  %v1082_v37 = vmax.f32 %v3891_v36, 0.0  ;;  %v1964_v50 = vld [vmem:[#allocation18 + $0x6a0] sm:$0xff]  ;;  %v1949_v12 = vld [vmem:[#allocation18 + $0x628] sm:$0xff] }
 0x339   :  { %2156 = vmatpush2.msra.mxu0 %v1996_v25  ;;  %2084 = vmatprep.subr.mxu1 %v1833_v22  ;;  %v691_v25 = vsub.s32 7, %v3707_v24  ;;  %v3903_v22 = vpop.f32.mrf.mxu0 }
 0x33a   :  { %2157 = vmatprep.subr.mxu0 %v1993_v40  ;;  %2085 = vmatpush2.msra.mxu1 %v1832_v45  ;;  %v3906_v40 = vadd.f32 %v970_v56, %v3873_v43  ;;  %v1961_v45 = vld [vmem:[#allocation18 + $0x688] sm:$0xff] }
 0x33b   :  { %2158 = vmatpush2.msra.mxu0 %v1992_v41  ;;  %2086 = vmatprep.subr.mxu1 %v1829_v42  ;;  %v978_v41 = vpop.f32.mrf.mxu1  ;;  %v1803_v42 = vld [vmem:[#allocation18 + $0x198] sm:$0xff] }
 0x33c   :  { %2159 = vmatprep.subr.mxu0 %v1989_v39  ;;  %2087 = vmatpush2.msra.mxu1 %v1828_v48  ;;  %v1091_v39 = vmax.f32 %v3899_v6, 0.0  ;;  %v1802_v48 = vld [vmem:[#allocation18 + $0x190] sm:$0xff]  ;;  %v1090_v56 = vmax.f32 %v3906_v40, 0.0 }
 0x33d   :  { %2160 = vmatpush2.msra.mxu0 %v1988_v55  ;;  %2088 = vmatprep.subr.mxu1 %v1825_v60  ;;  %v687_v55 = vsub.s32 6, %v3707_v24  ;;  %v1957_v60 = vld [vmem:[#allocation18 + $0x668] sm:$0xff]  ;;  %v3922_v24 = vadd.f32 %v976_v44, %v3873_v43  ;;  %v1794_v43 = vld [vmem:[#allocation18 + $0x150] sm:$0xff]  ;;  %v1944_v44 = vld [vmem:[#allocation18 + $0x600] sm:$0xff] }
 0x33e   :  { %2161 = vmatprep.subr.mxu0 %v1985_v1  ;;  %2089 = vmatpush2.msra.mxu1 %v1824_v52  ;;  %v3915_v1 = vadd.f32 %v978_v41, %v3870_v53  ;;  %v1799_v52 = vld [vmem:[#allocation18 + $0x178] sm:$0xff]  ;;  %v1942_v41 = vld [vmem:[#allocation18 + $0x5f0] sm:$0xff] }
 0x33f   :  { %2162 = vmatpush2.msra.mxu0 %v1984_v57  ;;  %2090 = vmatprep.subr.mxu1 %v1821_v58  ;;  %v3918_v57 = vrot.slane %v3867_v49, %v691_v25  ;;  %v1055_v58 = vpop.f32.mrf.mxu0  ;;  %v3925_v53 = vrot.slane %v3867_v49, %v687_v55  ;;  %v1791_v49 = vld [vmem:[#allocation18 + $0x138] sm:$0xff]  ;;  %v1954_v6 = vld [vmem:[#allocation18 + $0x650] sm:$0xff] }
 0x340   :  { %2163 = vmatprep.subr.mxu0 %v1981_v20  ;;  %2091 = vmatpush2.msra.mxu1 %v1820_v61  ;;  %v1956_v20 = vld [vmem:[#allocation18 + $0x660] sm:$0xff]  ;;  %v1798_v61 = vld [vmem:[#allocation18 + $0x170] sm:$0xff]  ;;  %v1943_v25 = vld [vmem:[#allocation18 + $0x5f8] sm:$0xff] }
 0x341   :  { %2164 = vmatpush2.msra.mxu0 %v1980_v63  ;;  %2092 = vmatprep.subr.mxu1 %v1817_v0  ;;  %v1953_v63 = vld [vmem:[#allocation18 + $0x648] sm:$0xff]  ;;  %v1795_v0 = vld [vmem:[#allocation18 + $0x158] sm:$0xff] }
 0x342   :  { %2165 = vmatprep.subr.mxu0 %v1977_v7  ;;  %2093 = vmatpush2.msra.mxu1 %v1816_v4  ;;  %v1952_v7 = vld [vmem:[#allocation18 + $0x640] sm:$0xff]  ;;  %v1099_v4 = vmax.f32 %v3915_v1, 0.0  ;;  %v2475_v1 = vld [vmem:[#allocation21 + $0x208] sm:$0xff] }
 0x343   :  { %2166 = vmatpush2.msra.mxu0 %v1976_v14  ;;  %2094 = vmatprep.mubr.f32.mxu1 %v1075_v5  ;;  %v3931_v14 = vadd.f32 %v1049_v17, %v3918_v57  ;;  %v1945_v17 = vld [vmem:[#allocation18 + $0x608] sm:$0xff] }
 0x344   :  { %2167 = vmatprep.subr.mxu0 %v1973_v30  ;;  %2208 = vmatprep.subr.mxu1 %v1815_v21  ;;  %v1059_v30 = vpop.f32.mrf.mxu0  ;;  %v1098_v21 = vmax.f32 %v3922_v24, 0.0  ;;  %v2466_v24 = vld [vmem:[#allocation21 + $0x1c0] sm:$0xff] }
 0x345   :  { %2095 = vmatmul.mubr.f32.vlgmr.msra.gmra.mxu1 %v1074_v15  ;;  %2168 = vmatpush2.msra.mxu0 %v1972_v27  ;;  %v1948_v27 = vld [vmem:[#allocation18 + $0x620] sm:$0xff]  ;;  %v3965_v51 = vadd.f32 %v1059_v30, %v3925_v53 }
 0x346   :  { %2209 = vmatpush1.msra.mxu1 %v1814_v47  ;;  %2169 = vmatprep.subr.mxu0 %v1969_v18  ;;  %v1790_v47 = vld [vmem:[#allocation18 + $0x130] sm:$0xff]  ;;  %v3938_v18 = vadd.f32 %v3883_v11, %v3925_v53 }
 0x347   :  { %2210 = vmatprep.subr.mxu1 %v1811_v34  ;;  %2170 = vmatpush2.msra.mxu0 %v1968_v10  ;;  %v1077_v34 = vmax.f32 %v3931_v14, 0.0  ;;  %v1787_v10 = vld [vmem:[#allocation18 + $0x118] sm:$0xff]  ;;  %v1870_v14 = vld [vmem:[#allocation18 + $0x3b0] sm:$0xff] }
 0x348   :  { %2211 = vmatpush1.msra.mxu1 %v1810_v54  ;;  %2171 = vmatprep.subr.mxu0 %v1965_v2  ;;  %v1061_v54 = vpop.f32.mrf.mxu0  ;;  %v3944_v2 = vadd.f32 %v1055_v58, %v3918_v57  ;;  %v1076_v11 = vmax.f32 %v3938_v18, 0.0  ;;  %v1938_v58 = vld [vmem:[#allocation18 + $0x5d0] sm:$0xff] }
 0x349   :  { %2212 = vmatprep.subr.mxu1 %v1807_v32  ;;  %2100 = vmatprep.mubr.f32.mxu1 %v1083_v19  ;;  %v1786_v32 = vld [vmem:[#allocation18 + $0x110] sm:$0xff]  ;;  %v3961_v55 = vadd.f32 %v1061_v54, %v3918_v57 }
 0x34a   :  { %2172 = vmatpush2.msra.mxu0 %v1964_v50  ;;  %2213 = vmatpush1.msra.mxu1 %v1806_v9  ;;  %v3951_v50 = vadd.f32 %v3903_v22, %v3925_v53  ;;  %v1783_v9 = vld [vmem:[#allocation18 + $0xf8] sm:$0xff]  ;;  %v1766_v54 = vld [vmem:[#allocation18 + $0x70] sm:$0xff] }
 0x34b   :  { %2101 = vmatmul.mubr.f32.gmra.mxu1 %v1082_v37  ;;  %2173 = vmatprep.subr.mxu0 %v1961_v45  ;;  %v1782_v45 = vld [vmem:[#allocation18 + $0xf0] sm:$0xff]  ;;  %v1779_v22 = vld [vmem:[#allocation18 + $0xd8] sm:$0xff] }
 0x34c   :  { %2214 = vmatprep.subr.mxu1 %v1803_v42  ;;  %2174 = vmatpush2.msra.mxu0 %v1960_v13  ;;  %v1065_v42 = vpop.f32.mrf.mxu0  ;;  %v1085_v13 = vmax.f32 %v3944_v2, 0.0  ;;  %v2516_v18 = vld [vmem:[#allocation21 + $0x350] sm:$0xff]  ;;  %v2442_v2 = vld [vmem:[#allocation21 + $0x100] sm:$0xff] }
 0x34d   :  { %2215 = vmatpush1.msra.mxu1 %v1802_v48  ;;  %2175 = vmatprep.subr.mxu0 %v1957_v60  ;;  %v1939_v48 = vld [vmem:[#allocation18 + $0x5d8] sm:$0xff]  ;;  %v1778_v60 = vld [vmem:[#allocation18 + $0xd0] sm:$0xff] }
 0x34e   :  { %2216 = vmatprep.subr.mxu1 %v1799_v52  ;;  %2106 = vmatprep.mubr.f32.mxu1 %v1091_v39  ;;  %v1084_v52 = vmax.f32 %v3951_v50, 0.0  ;;  %v2427_v50 = vld [vmem:[#allocation21 + $0x88] sm:$0xff] }
 0x34f   :  { %2176 = vmatpush2.msra.mxu0 %v1956_v20  ;;  %2217 = vmatpush1.msra.mxu1 %v1798_v61  ;;  %v1775_v20 = vld [vmem:[#allocation18 + $0xb8] sm:$0xff]  ;;  %v1067_v61 = vpop.f32.mrf.mxu0 }
 0x350   :  { %2107 = vmatmul.mubr.f32.gmra.mxu1 %v1090_v56  ;;  %2177 = vmatprep.subr.mxu0 %v1953_v63  ;;  %v1774_v63 = vld [vmem:[#allocation18 + $0xb0] sm:$0xff]  ;;  %v3973_v30 = vadd.f32 %v1067_v61, %v3918_v57 }
 0x351   :  { %2218 = vmatprep.subr.mxu1 %v1795_v0  ;;  %2178 = vmatpush2.msra.mxu0 %v1952_v7  ;;  %v1934_v0 = vld [vmem:[#allocation18 + $0x5b0] sm:$0xff]  ;;  %v1093_v7 = vmax.f32 %v3961_v55, 0.0  ;;  %v2426_v55 = vld [vmem:[#allocation21 + $0x80] sm:$0xff] }
 0x352   :  { %2219 = vmatpush1.msra.mxu1 %v1794_v43  ;;  %2179 = vmatprep.subr.mxu0 %v1949_v12  ;;  %v1771_v43 = vld [vmem:[#allocation18 + $0x98] sm:$0xff]  ;;  %v1926_v57 = vld [vmem:[#allocation18 + $0x570] sm:$0xff] }
 0x353   :  { %2220 = vmatprep.subr.mxu1 %v1791_v49  ;;  %2112 = vmatprep.mubr.f32.mxu1 %v1099_v4  ;;  %v1931_v12 = vld [vmem:[#allocation18 + $0x598] sm:$0xff]  ;;  %v1770_v49 = vld [vmem:[#allocation18 + $0x90] sm:$0xff] }
 0x354   :  { %2180 = vmatpush2.msra.mxu0 %v1948_v27  ;;  %2221 = vmatpush1.msra.mxu1 %v1790_v47  ;;  %v1092_v27 = vmax.f32 %v3965_v51, 0.0  ;;  %v1930_v47 = vld [vmem:[#allocation18 + $0x590] sm:$0xff] }
 0x355   :  { %2113 = vmatmul.mubr.f32.gmra.mxu1 %v1098_v21  ;;  %2181 = vmatprep.subr.mxu0 %v1945_v17  ;;  %v1767_v17 = vld [vmem:[#allocation18 + $0x78] sm:$0xff]  ;;  %v1914_v61 = vld [vmem:[#allocation18 + $0x510] sm:$0xff] }
 0x356   :  { %2222 = vmatprep.subr.mxu1 %v1787_v10  ;;  %2182 = vmatpush2.msra.mxu0 %v1944_v44  ;;  %v3977_v10 = vadd.f32 %v1065_v42, %v3925_v53  ;;  %v1927_v44 = vld [vmem:[#allocation18 + $0x578] sm:$0xff]  ;;  %v1762_v53 = vld [vmem:[#allocation18 + $0x50] sm:$0xff] }
 0x357   :  { %2183 = vmatprep.mubr.f32.mxu0 %v1077_v34  ;;  %2223 = vmatpush1.msra.mxu1 %v1786_v32  ;;  %v1101_v32 = vmax.f32 %v3973_v30, 0.0  ;;  %v1759_v42 = vld [vmem:[#allocation18 + $0x38] sm:$0xff]  ;;  %v2411_v51 = vld [vmem:[#allocation21 + $0x8] sm:$0xff]  ;;  %v2410_v30 = vld [vmem:[#allocation21] sm:$0xff] }
 0x358   :  { %2272 = vmatprep.mubr.f32.mxu1 %v1075_v5  ;;  %2184 = vmatmul.mubr.f32.vlgmr.msra.gmra.mxu0 %v1076_v11  ;;  %v1935_v5 = vld [vmem:[#allocation18 + $0x5b8] sm:$0xff] }
 0x359   :  { %2224 = vmatprep.subr.mxu1 %v1783_v9  ;;  %2297 = vmatprep.subr.mxu0 %v1943_v25  ;;  %v1763_v9 = vld [vmem:[#allocation18 + $0x58] sm:$0xff] }
 0x35a   :  { %2225 = vmatpush1.msra.mxu1 %v1782_v45  ;;  %2298 = vmatpush1.msra.mxu0 %v1942_v41  ;;  %v1923_v25 = vld [vmem:[#allocation18 + $0x558] sm:$0xff]  ;;  %v1100_v45 = vmax.f32 %v3977_v10, 0.0  ;;  %v1922_v41 = vld [vmem:[#allocation18 + $0x550] sm:$0xff] }
 0x35b   :  { %2226 = vmatprep.subr.mxu1 %v1779_v22  ;;  %2299 = vmatprep.subr.mxu0 %v1939_v48  ;;  %v1919_v22 = vld [vmem:[#allocation18 + $0x538] sm:$0xff]  ;;  %v1758_v48 = vld [vmem:[#allocation18 + $0x30] sm:$0xff] }
 0x35c   :  { %2189 = vmatprep.mubr.f32.mxu0 %v1085_v13  ;;  %2227 = vmatpush1.msra.mxu1 %v1778_v60  ;;  %v1918_v60 = vld [vmem:[#allocation18 + $0x530] sm:$0xff] }
 0x35d   :  { %2300 = vmatpush1.msra.mxu0 %v1938_v58  ;;  %2228 = vmatprep.subr.mxu1 %v1775_v20  ;;  %v1755_v58 = vld [vmem:[#allocation18 + $0x18] sm:$0xff]  ;;  %v2555_v10 = vld [vmem:[#allocation21 + $0x488] sm:$0xff] }
 0x35e   :  { %2190 = vmatmul.mubr.f32.gmra.mxu0 %v1084_v52  ;;  %2301 = vmatprep.subr.mxu0 %v1935_v5  ;;  %v1915_v20 = vld [vmem:[#allocation18 + $0x518] sm:$0xff]  ;;  %v1754_v5 = vld [vmem:[#allocation18 + $0x10] sm:$0xff] }
 0x35f   :  { %2229 = vmatpush1.msra.mxu1 %v1774_v63  ;;  %2302 = vmatpush1.msra.mxu0 %v1934_v0  ;;  %v1879_v63 = vld [vmem:[#allocation18 + $0x3f8] sm:$0xff] }
 0x360   :  { %2230 = vmatprep.subr.mxu1 %v1771_v43  ;;  %2303 = vmatprep.subr.mxu0 %v1931_v12  ;;  %v1911_v0 = vld [vmem:[#allocation18 + $0x4f8] sm:$0xff]  ;;  %v1878_v43 = vld [vmem:[#allocation18 + $0x3f0] sm:$0xff] }
 0x361   :  { %2195 = vmatprep.mubr.f32.mxu0 %v1093_v7  ;;  %2231 = vmatpush1.msra.mxu1 %v1770_v49  ;;  %v1910_v12 = vld [vmem:[#allocation18 + $0x4f0] sm:$0xff]  ;;  %v1875_v49 = vld [vmem:[#allocation18 + $0x3d8] sm:$0xff] }
 0x362   :  { %2304 = vmatpush1.msra.mxu0 %v1930_v47  ;;  %2232 = vmatprep.subr.mxu1 %v1767_v17  ;;  %v1907_v47 = vld [vmem:[#allocation18 + $0x4d8] sm:$0xff]  ;;  %v1874_v17 = vld [vmem:[#allocation18 + $0x3d0] sm:$0xff] }
 0x363   :  { %2196 = vmatmul.mubr.f32.gmra.mxu0 %v1092_v27  ;;  %2305 = vmatprep.subr.mxu0 %v1927_v44  ;;  %v1906_v44 = vld [vmem:[#allocation18 + $0x4d0] sm:$0xff] }
 0x364   :  { %2233 = vmatpush1.msra.mxu1 %v1766_v54  ;;  %2306 = vmatpush1.msra.mxu0 %v1926_v57  ;;  %v1871_v54 = vld [vmem:[#allocation18 + $0x3b8] sm:$0xff] }
 0x365   :  { %2234 = vmatprep.subr.mxu1 %v1763_v9  ;;  %2307 = vmatprep.subr.mxu0 %v1923_v25  ;;  %v1903_v57 = vld [vmem:[#allocation18 + $0x4b8] sm:$0xff] }
 0x366   :  { %2201 = vmatprep.mubr.f32.mxu0 %v1101_v32  ;;  %2235 = vmatpush1.msra.mxu1 %v1762_v53  ;;  %v1867_v9 = vld [vmem:[#allocation18 + $0x398] sm:$0xff]  ;;  %v1866_v53 = vld [vmem:[#allocation18 + $0x390] sm:$0xff] }
 0x367   :  { %2308 = vmatpush1.msra.mxu0 %v1922_v41  ;;  %2236 = vmatprep.subr.mxu1 %v1759_v42  ;;  %v1899_v25 = vld [vmem:[#allocation18 + $0x498] sm:$0xff]  ;;  %v1898_v41 = vld [vmem:[#allocation18 + $0x490] sm:$0xff] }
 0x368   :  { %2202 = vmatmul.mubr.f32.gmra.mxu0 %v1100_v45  ;;  %2309 = vmatprep.subr.mxu0 %v1919_v22  ;;  %v1863_v42 = vld [vmem:[#allocation18 + $0x378] sm:$0xff] }
 0x369   :  { %2237 = vmatpush1.msra.mxu1 %v1758_v48  ;;  %2310 = vmatpush1.msra.mxu0 %v1918_v60  ;;  %v1895_v22 = vld [vmem:[#allocation18 + $0x478] sm:$0xff]  ;;  %v1862_v48 = vld [vmem:[#allocation18 + $0x370] sm:$0xff] }
 0x36a   :  { %2361 = vmatprep.mubr.f32.mxu0 %v1077_v34  ;;  %2238 = vmatprep.subr.mxu1 %v1755_v58  ;;  %v1902_v34 = vld [vmem:[#allocation18 + $0x4b0] sm:$0xff]  ;;  %v1859_v58 = vld [vmem:[#allocation18 + $0x358] sm:$0xff] }
 0x36b   :  { %2311 = vmatprep.subr.mxu0 %v1915_v20  ;;  %2239 = vmatpush1.msra.mxu1 %v1754_v5  ;;  %v1894_v60 = vld [vmem:[#allocation18 + $0x470] sm:$0xff]  ;;  %v1891_v20 = vld [vmem:[#allocation18 + $0x458] sm:$0xff] }
 0x36c   :  { %2312 = vmatpush1.msra.mxu0 %v1914_v61  ;;  %2240 = vmatprep.subr.mxu1 %v1879_v63  ;;  %v1858_v5 = vld [vmem:[#allocation18 + $0x350] sm:$0xff]  ;;  %v1855_v63 = vld [vmem:[#allocation18 + $0x338] sm:$0xff] }
 0x36d   :  { %2313 = vmatprep.subr.mxu0 %v1911_v0  ;;  %2241 = vmatpush2.msra.mxu1 %v1878_v43  ;;  %v1890_v61 = vld [vmem:[#allocation18 + $0x450] sm:$0xff]  ;;  %v1887_v0 = vld [vmem:[#allocation18 + $0x438] sm:$0xff] }
 0x36e   :  { %2314 = vmatpush1.msra.mxu0 %v1910_v12  ;;  %2242 = vmatprep.subr.mxu1 %v1875_v49  ;;  %v1854_v43 = vld [vmem:[#allocation18 + $0x330] sm:$0xff]  ;;  %v1851_v49 = vld [vmem:[#allocation18 + $0x318] sm:$0xff] }
 0x36f   :  { %2315 = vmatprep.subr.mxu0 %v1907_v47  ;;  %2243 = vmatpush2.msra.mxu1 %v1874_v17  ;;  %v1886_v12 = vld [vmem:[#allocation18 + $0x430] sm:$0xff]  ;;  %v1883_v47 = vld [vmem:[#allocation18 + $0x418] sm:$0xff] }
 0x370   :  { %2316 = vmatpush1.msra.mxu0 %v1906_v44  ;;  %2244 = vmatprep.subr.mxu1 %v1871_v54  ;;  %v1850_v17 = vld [vmem:[#allocation18 + $0x310] sm:$0xff]  ;;  %v1847_v54 = vld [vmem:[#allocation18 + $0x2f8] sm:$0xff] }
 0x371   :  { %2317 = vmatprep.subr.mxu0 %v1903_v57  ;;  %2245 = vmatpush2.msra.mxu1 %v1870_v14  ;;  %v1882_v44 = vld [vmem:[#allocation18 + $0x410] sm:$0xff]  ;;  %v2007_v57 = vld [vmem:[#allocation18 + $0x7f8] sm:$0xff] }
 0x372   :  { %2318 = vmatpush1.msra.mxu0 %v1902_v34  ;;  %2246 = vmatprep.subr.mxu1 %v1867_v9  ;;  %v1846_v14 = vld [vmem:[#allocation18 + $0x2f0] sm:$0xff] }
 0x373   :  { %2319 = vmatprep.subr.mxu0 %v1899_v25  ;;  %2247 = vmatpush2.msra.mxu1 %v1866_v53  ;;  %v2006_v9 = vld [vmem:[#allocation18 + $0x7f0] sm:$0xff]  ;;  %v1843_v25 = vld [vmem:[#allocation18 + $0x2d8] sm:$0xff] }
 0x374   :  { %2320 = vmatpush1.msra.mxu0 %v1898_v41  ;;  %2248 = vmatprep.subr.mxu1 %v1863_v42  ;;  %v2003_v53 = vld [vmem:[#allocation18 + $0x7d8] sm:$0xff]  ;;  %v1842_v41 = vld [vmem:[#allocation18 + $0x2d0] sm:$0xff] }
 0x375   :  { %2321 = vmatprep.subr.mxu0 %v1895_v22  ;;  %2249 = vmatpush2.msra.mxu1 %v1862_v48  ;;  %v2002_v42 = vld [vmem:[#allocation18 + $0x7d0] sm:$0xff]  ;;  %v1839_v22 = vld [vmem:[#allocation18 + $0x2b8] sm:$0xff] }
 0x376   :  { %2322 = vmatpush1.msra.mxu0 %v1894_v60  ;;  %2250 = vmatprep.subr.mxu1 %v1859_v58  ;;  %v1999_v48 = vld [vmem:[#allocation18 + $0x7b8] sm:$0xff]  ;;  %v1838_v60 = vld [vmem:[#allocation18 + $0x2b0] sm:$0xff] }
 0x377   :  { %2323 = vmatprep.subr.mxu0 %v1891_v20  ;;  %2251 = vmatpush2.msra.mxu1 %v1858_v5  ;;  %v1998_v20 = vld [vmem:[#allocation18 + $0x7b0] sm:$0xff]  ;;  %v1835_v5 = vld [vmem:[#allocation18 + $0x298] sm:$0xff] }
 0x378   :  { %2324 = vmatpush1.msra.mxu0 %v1890_v61  ;;  %2252 = vmatprep.subr.mxu1 %v1855_v63  ;;  %v1995_v61 = vld [vmem:[#allocation18 + $0x798] sm:$0xff]  ;;  %v1834_v63 = vld [vmem:[#allocation18 + $0x290] sm:$0xff] }
 0x379   :  { %2325 = vmatprep.subr.mxu0 %v1887_v0  ;;  %2253 = vmatpush2.msra.mxu1 %v1854_v43  ;;  %v3991_v34 = vpop.f32.mrf.mxu1  ;;  %v1994_v0 = vld [vmem:[#allocation18 + $0x790] sm:$0xff]  ;;  %v1831_v43 = vld [vmem:[#allocation18 + $0x278] sm:$0xff] }
 0x37a   :  { %2326 = vmatpush1.msra.mxu0 %v1886_v12  ;;  %2254 = vmatprep.subr.mxu1 %v1851_v49  ;;  %v3993_v12 = vld [vmem:[#allocation16] sm:$0xf] }
 0x37b   :  { %2327 = vmatprep.subr.mxu0 %v1883_v47  ;;  %2255 = vmatpush2.msra.mxu1 %v1850_v17  ;;  %v1448_v58 = vpop.f32.mrf.mxu1  ;;  %v1991_v49 = vld [vmem:[#allocation18 + $0x778] sm:$0xff]  ;;  %v1830_v47 = vld [vmem:[#allocation18 + $0x270] sm:$0xff] }
 0x37c   :  { %2328 = vmatpush1.msra.mxu0 %v1882_v44  ;;  %2256 = vmatprep.subr.mxu1 %v1847_v54  ;;  %v1990_v44 = vld [vmem:[#allocation18 + $0x770] sm:$0xff]  ;;  %v1827_v54 = vld [vmem:[#allocation18 + $0x258] sm:$0xff] }
 0x37d   :  { %2329 = vmatprep.subr.mxu0 %v2007_v57  ;;  %2257 = vmatpush2.msra.mxu1 %v1846_v14  ;;  %v1452_v17 = vpop.f32.mrf.mxu1  ;;  %v1987_v57 = vld [vmem:[#allocation18 + $0x758] sm:$0xff]  ;;  %v1826_v14 = vld [vmem:[#allocation18 + $0x250] sm:$0xff] }
 0x37e   :  { %2330 = vmatpush2.msra.mxu0 %v2006_v9  ;;  %2258 = vmatprep.subr.mxu1 %v1843_v25  ;;  %v3997_v9 = vrot.slane %v3993_v12, %v3712_v29  ;;  %v1986_v25 = vld [vmem:[#allocation18 + $0x750] sm:$0xff] }
 0x37f   :  { %2331 = vmatprep.subr.mxu0 %v2003_v53  ;;  %2259 = vmatpush2.msra.mxu1 %v1842_v41  ;;  %v1823_v53 = vld [vmem:[#allocation18 + $0x238] sm:$0xff] }
 0x380   :  { %2332 = vmatpush2.msra.mxu0 %v2002_v42  ;;  %2260 = vmatprep.subr.mxu1 %v1839_v22  ;;  %v1983_v41 = vld [vmem:[#allocation18 + $0x738] sm:$0xff]  ;;  %v1822_v42 = vld [vmem:[#allocation18 + $0x230] sm:$0xff]  ;;  %v4001_v22 = vrot.slane %v3993_v12, %v3715_v33 }
 0x381   :  { %2333 = vmatprep.subr.mxu0 %v1999_v48  ;;  %2261 = vmatpush2.msra.mxu1 %v1838_v60  ;;  %v1454_v48 = vpop.f32.mrf.mxu1  ;;  %v1982_v60 = vld [vmem:[#allocation18 + $0x730] sm:$0xff] }
 0x382   :  { %2334 = vmatpush2.msra.mxu0 %v1998_v20  ;;  %2262 = vmatprep.subr.mxu1 %v1835_v5  ;;  %v1819_v20 = vld [vmem:[#allocation18 + $0x218] sm:$0xff] }
 0x383   :  { %2335 = vmatprep.subr.mxu0 %v1995_v61  ;;  %2263 = vmatpush2.msra.mxu1 %v1834_v63  ;;  %v1979_v5 = vld [vmem:[#allocation18 + $0x718] sm:$0xff]  ;;  %v1818_v61 = vld [vmem:[#allocation18 + $0x210] sm:$0xff]  ;;  %v1447_v63 = vadd.f32 %v3991_v34, %v3997_v9 }
 0x384   :  { %2336 = vmatpush2.msra.mxu0 %v1994_v0  ;;  %2264 = vmatprep.subr.mxu1 %v1831_v43  ;;  %v1978_v0 = vld [vmem:[#allocation18 + $0x710] sm:$0xff]  ;;  %v1971_v34 = vld [vmem:[#allocation18 + $0x6d8] sm:$0xff] }
 0x385   :  { %2337 = vmatprep.subr.mxu0 %v1991_v49  ;;  %2265 = vmatpush2.msra.mxu1 %v1830_v47  ;;  %v1975_v49 = vld [vmem:[#allocation18 + $0x6f8] sm:$0xff]  ;;  %v2531_v47 = vld [vmem:[#allocation21 + $0x3c8] sm:$0xff] }
 0x386   :  { %2338 = vmatpush2.msra.mxu0 %v1990_v44  ;;  %2266 = vmatprep.subr.mxu1 %v1827_v54  ;;  %v1449_v44 = vadd.f32 %v1448_v58, %v4001_v22  ;;  %v1458_v54 = vpop.f32.mrf.mxu1  ;;  %v1970_v58 = vld [vmem:[#allocation18 + $0x6d0] sm:$0xff] }
 0x387   :  { %2339 = vmatprep.subr.mxu0 %v1987_v57  ;;  %2267 = vmatpush2.msra.mxu1 %v1826_v14  ;;  %v1974_v14 = vld [vmem:[#allocation18 + $0x6f0] sm:$0xff]  ;;  %v1459_v16 = vadd.f32 %v1458_v54, %v3997_v9 }
 0x388   :  { %2340 = vmatpush2.msra.mxu0 %v1986_v25  ;;  %2268 = vmatprep.subr.mxu1 %v1823_v53  ;;  %v2530_v25 = vld [vmem:[#allocation21 + $0x3c0] sm:$0xff]  ;;  %v1958_v54 = vld [vmem:[#allocation18 + $0x670] sm:$0xff] }
 0x389   :  { %2341 = vmatprep.subr.mxu0 %v1983_v41  ;;  %2269 = vmatpush2.msra.mxu1 %v1822_v42  ;;  %v1535_v43 = vpop.f32.mrf.mxu0  ;;  %v2523_v41 = vld [vmem:[#allocation21 + $0x388] sm:$0xff] }
 0x38a   :  { %2342 = vmatpush2.msra.mxu0 %v1982_v60  ;;  %2270 = vmatprep.subr.mxu1 %v1819_v20  ;;  %v1536_v57 = vadd.f32 %v1535_v43, %v1447_v63  ;;  %v1453_v60 = vadd.f32 %v1452_v17, %v3997_v9  ;;  %v2522_v20 = vld [vmem:[#allocation21 + $0x380] sm:$0xff]  ;;  %v1455_v63 = vadd.f32 %v1454_v48, %v4001_v22  ;;  %v1966_v17 = vld [vmem:[#allocation18 + $0x6b0] sm:$0xff] }
 0x38b   :  { %2343 = vmatprep.subr.mxu0 %v1979_v5  ;;  %2271 = vmatpush2.msra.mxu1 %v1818_v61  ;;  %v1537_v53 = vpop.f32.mrf.mxu0  ;;  %v1967_v5 = vld [vmem:[#allocation18 + $0x6b8] sm:$0xff]  ;;  %v1460_v61 = vpop.f32.mrf.mxu1  ;;  %v2514_v43 = vld [vmem:[#allocation21 + $0x340] sm:$0xff]  ;;  %v1962_v48 = vld [vmem:[#allocation18 + $0x690] sm:$0xff] }
 0x38c   :  { %2344 = vmatpush2.msra.mxu0 %v1978_v0  ;;  %2273 = vmatmul.mubr.f32.vlgmr.msra.gmra.mxu1 %v1074_v15  ;;  %1736 = vst [vmem:[%s4345_s15] sm:$0xff] %v1536_v57  ;;  %v1538_v42 = vadd.f32 %v1537_v53, %v1449_v44  ;;  %v2515_v15 = vld [vmem:[#allocation21 + $0x348] sm:$0xff]  ;;  %v1461_v36 = vadd.f32 %v1460_v61, %v4001_v22  ;;  %v2490_v61 = vld [vmem:[#allocation21 + $0x280] sm:$0xff] }
 0x38d   :  { %2345 = vmatprep.subr.mxu0 %v1975_v49  ;;  %2583 = vmatprep.subr.mxu1 %v2531_v47  ;;  %v1963_v47 = vld [vmem:[#allocation18 + $0x698] sm:$0xff]  ;;  %v2507_v44 = vld [vmem:[#allocation21 + $0x308] sm:$0xff] }
 0x38e   :  { %2346 = vmatpush2.msra.mxu0 %v1974_v14  ;;  %2584 = vmatpush1.msra.mxu1 %v2530_v25  ;;  %1737 = vst [vmem:[%s4345_s15 + $0x8] sm:$0xff] %v1538_v42  ;;  %v1541_v8 = vpop.f32.mrf.mxu0  ;;  %v2506_v14 = vld [vmem:[#allocation21 + $0x300] sm:$0xff]  ;;  %v1959_v25 = vld [vmem:[#allocation18 + $0x678] sm:$0xff] }
 0x38f   :  { %2347 = vmatprep.subr.mxu0 %v1971_v34  ;;  %2585 = vmatprep.subr.mxu1 %v2523_v41  ;;  %v1542_v0 = vadd.f32 %v1541_v8, %v1453_v60  ;;  %v2499_v34 = vld [vmem:[#allocation21 + $0x2c8] sm:$0xff]  ;;  %v2498_v41 = vld [vmem:[#allocation21 + $0x2c0] sm:$0xff]  ;;  %v1951_v8 = vld [vmem:[#allocation18 + $0x638] sm:$0xff] }
 0x390   :  { %2278 = vmatprep.mubr.f32.mxu1 %v1083_v19  ;;  %2348 = vmatpush2.msra.mxu0 %v1970_v58  ;;  %v1543_v49 = vpop.f32.mrf.mxu0  ;;  %v1464_v19 = vpop.f32.mrf.mxu1  ;;  %v1955_v58 = vld [vmem:[#allocation18 + $0x658] sm:$0xff]  ;;  %v2491_v60 = vld [vmem:[#allocation21 + $0x288] sm:$0xff] }
 0x391   :  { %2586 = vmatpush1.msra.mxu1 %v2522_v20  ;;  %2349 = vmatprep.subr.mxu0 %v1967_v5  ;;  %1740 = vst [vmem:[%s4345_s15 + $0x20] sm:$0xff] %v1542_v0  ;;  %v1544_v57 = vadd.f32 %v1543_v49, %v1455_v63  ;;  %v2483_v63 = vld [vmem:[#allocation21 + $0x248] sm:$0xff] }
 0x392   :  { %2279 = vmatmul.mubr.f32.gmra.mxu1 %v1082_v37  ;;  %2587 = vmatprep.subr.mxu1 %v2515_v15  ;;  %v1466_v20 = vpop.f32.mrf.mxu1 }
 0x393   :  { %2350 = vmatpush2.msra.mxu0 %v1966_v17  ;;  %2588 = vmatpush1.msra.mxu1 %v2514_v43  ;;  %1741 = vst [vmem:[%s4345_s15 + $0x28] sm:$0xff] %v1544_v57  ;;  %v1547_v53 = vpop.f32.mrf.mxu0  ;;  %v1467_v0 = vadd.f32 %v1466_v20, %v4001_v22  ;;  %v1947_v43 = vld [vmem:[#allocation18 + $0x618] sm:$0xff]  ;;  %v2474_v22 = vld [vmem:[#allocation21 + $0x200] sm:$0xff]  ;;  %v2459_v57 = vld [vmem:[#allocation21 + $0x188] sm:$0xff] }
 0x394   :  { %2351 = vmatprep.subr.mxu0 %v1963_v47  ;;  %2589 = vmatprep.subr.mxu1 %v2507_v44  ;;  %v1548_v37 = vadd.f32 %v1547_v53, %v1459_v16  ;;  %v4046_v47 = vmax.f32 %v3705_v23, 0.0  ;;  %v2467_v44 = vld [vmem:[#allocation21 + $0x1c8] sm:$0xff]  ;;  %v2533_v23 = vld [vmem:[#allocation21 + $0x3d8] sm:$0xff]  ;;  %v2458_v16 = vld [vmem:[#allocation21 + $0x180] sm:$0xff] }
 0x395   :  { %2284 = vmatprep.mubr.f32.mxu1 %v1091_v39  ;;  %2352 = vmatpush2.msra.mxu0 %v1962_v48  ;;  %v1549_v42 = vpop.f32.mrf.mxu0  ;;  %v1465_v39 = vadd.f32 %v1464_v19, %v3997_v9  ;;  %v2482_v9 = vld [vmem:[#allocation21 + $0x240] sm:$0xff]  ;;  %v2525_v48 = vld [vmem:[#allocation21 + $0x398] sm:$0xff]  ;;  %v2524_v19 = vld [vmem:[#allocation21 + $0x390] sm:$0xff] }
 0x396   :  { %2590 = vmatpush1.msra.mxu1 %v2506_v14  ;;  %2353 = vmatprep.subr.mxu0 %v1959_v25  ;;  %1744 = vst [vmem:[%s4345_s15 + $0x40] sm:$0xff] %v1548_v37  ;;  %v1550_v5 = vadd.f32 %v1549_v42, %v1461_v36  ;;  %v2451_v14 = vld [vmem:[#allocation21 + $0x148] sm:$0xff]  ;;  %v2517_v25 = vld [vmem:[#allocation21 + $0x358] sm:$0xff]  ;;  %v2450_v53 = vld [vmem:[#allocation21 + $0x140] sm:$0xff] }
 0x397   :  { %2285 = vmatmul.mubr.f32.gmra.mxu1 %v1090_v56  ;;  %2591 = vmatprep.subr.mxu1 %v2499_v34  ;;  %v1950_v56 = vld [vmem:[#allocation18 + $0x630] sm:$0xff]  ;;  %v2509_v34 = vld [vmem:[#allocation21 + $0x318] sm:$0xff] }
 0x398   :  { %2354 = vmatpush2.msra.mxu0 %v1958_v54  ;;  %2592 = vmatpush1.msra.mxu1 %v2498_v41  ;;  %1745 = vst [vmem:[%s4345_s15 + $0x48] sm:$0xff] %v1550_v5  ;;  %v1553_v15 = vpop.f32.mrf.mxu0  ;;  %v2435_v36 = vld [vmem:[#allocation21 + $0xc8] sm:$0xff]  ;;  %v2501_v37 = vld [vmem:[#allocation21 + $0x2d8] sm:$0xff]  ;;  %v2434_v54 = vld [vmem:[#allocation21 + $0xc0] sm:$0xff] }
 0x399   :  { %2355 = vmatprep.subr.mxu0 %v1955_v58  ;;  %2593 = vmatprep.subr.mxu1 %v2491_v60  ;;  %v1554_v40 = vadd.f32 %v1553_v15, %v1465_v39  ;;  %v2500_v41 = vld [vmem:[#allocation21 + $0x2d0] sm:$0xff]  ;;  %v2419_v42 = vld [vmem:[#allocation21 + $0x48] sm:$0xff]  ;;  %v2485_v58 = vld [vmem:[#allocation21 + $0x258] sm:$0xff] }
 0x39a   :  { %2290 = vmatprep.mubr.f32.mxu1 %v1099_v4  ;;  %2356 = vmatpush2.msra.mxu0 %v1954_v6  ;;  %v1555_v17 = vpop.f32.mrf.mxu0  ;;  %v1946_v4 = vld [vmem:[#allocation18 + $0x610] sm:$0xff]  ;;  %v2418_v60 = vld [vmem:[#allocation21 + $0x40] sm:$0xff]  ;;  %v2469_v6 = vld [vmem:[#allocation21 + $0x1d8] sm:$0xff] }
 0x39b   :  { %2594 = vmatpush1.msra.mxu1 %v2490_v61  ;;  %2357 = vmatprep.subr.mxu0 %v1951_v8  ;;  %1748 = vst [vmem:[%s4345_s15 + $0x60] sm:$0xff] %v1554_v40  ;;  %v1556_v49 = vadd.f32 %v1555_v17, %v1467_v0  ;;  %v2484_v20 = vld [vmem:[#allocation21 + $0x250] sm:$0xff]  ;;  %v2563_v5 = vld [vmem:[#allocation21 + $0x4c8] sm:$0xff]  ;;  %v2562_v39 = vld [vmem:[#allocation21 + $0x4c0] sm:$0xff] }
 0x39c   :  { %2291 = vmatmul.mubr.f32.gmra.mxu1 %v1098_v21  ;;  %2595 = vmatprep.subr.mxu1 %v2483_v63  ;;  %v2532_v21 = vld [vmem:[#allocation21 + $0x3d0] sm:$0xff]  ;;  %v4071_v61 = vld [vmem:[#allocation9] ss:$0 sm:$0xff]  ;;  %v2547_v0 = vld [vmem:[#allocation21 + $0x448] sm:$0xff] }
 0x39d   :  { %2358 = vmatpush2.msra.mxu0 %v1950_v56  ;;  %2596 = vmatpush1.msra.mxu1 %v2482_v9  ;;  %1749 = vst [vmem:[%s4345_s15 + $0x68] sm:$0xff] %v1556_v49  ;;  %v2468_v8 = vld [vmem:[#allocation21 + $0x1d0] sm:$0xff]  ;;  %v2554_v15 = vld [vmem:[#allocation21 + $0x480] sm:$0xff]  ;;  %v426_v40 = vadd.f32 %v4071_v61, %v3855_v38  ;;  %v2453_v56 = vld [vmem:[#allocation21 + $0x158] sm:$0xff] }
 0x39e   :  { %3017 = vmatprep.mubr.msk.f32.mxu1 %vm2570_vm4, %v4046_v47  ;;  %2359 = vmatprep.subr.mxu0 %v1947_v43  ;;  %v2460_v63 = vld [vmem:[#allocation21 + $0x190] sm:$0xff]  ;;  %v2546_v9 = vld [vmem:[#allocation21 + $0x440] sm:$0xff]  ;;  %v2539_v43 = vld [vmem:[#allocation21 + $0x408] sm:$0xff] }
 0x39f   :  { %2597 = vmatprep.subr.mxu1 %v2475_v1  ;;  %2360 = vmatpush2.msra.mxu0 %v1946_v4  ;;  %v2452_v17 = vld [vmem:[#allocation21 + $0x150] sm:$0xff]  ;;  %v2445_v49 = vld [vmem:[#allocation21 + $0x118] sm:$0xff]  ;;  %v2538_v1 = vld [vmem:[#allocation21 + $0x400] sm:$0xff] }
 0x3a0   :  { %2598 = vmatpush1.msra.mxu1 %v2474_v22  ;;  %2362 = vmatmul.mubr.f32.vlgmr.msra.gmra.mxu0 %v1076_v11  ;;  %v2443_v11 = vld [vmem:[#allocation21 + $0x108] sm:$0xff]  ;;  %v2444_v4 = vld [vmem:[#allocation21 + $0x110] sm:$0xff]  ;;  %v4075_v22 = vmax.f32 %v426_v40, 0.0  ;;  %v2437_v38 = vld [vmem:[#allocation21 + $0xd8] sm:$0xff] }
 0x3a1   :  { %2599 = vmatprep.subr.mxu1 %v2467_v44  ;;  %2672 = vmatprep.subr.mxu0 %v2533_v23  ;;  %v2535_v44 = vld [vmem:[#allocation21 + $0x3e8] sm:$0xff]  ;;  %v2436_v23 = vld [vmem:[#allocation21 + $0xd0] sm:$0xff]  ;;  %v2470_v40 = vld [vmem:[#allocation21 + $0x1e0] sm:$0xff] }
 0x3a2   :  { %2367 = vmatprep.mubr.f32.mxu0 %v1085_v13  ;;  %2600 = vmatpush1.msra.mxu1 %v2466_v24  ;;  %v2508_v13 = vld [vmem:[#allocation21 + $0x310] sm:$0xff]  ;;  %v4078_v24 = vmax.f32 %v3703_v31, 0.0  ;;  %v2519_v31 = vld [vmem:[#allocation21 + $0x368] sm:$0xff] }
 0x3a3   :  { %2673 = vmatpush1.msra.mxu0 %v2532_v21  ;;  %2601 = vmatprep.subr.mxu1 %v2459_v57  ;;  %v431_v21 = vadd.f32 %v3851_v26, %v4071_v61  ;;  %v2534_v57 = vld [vmem:[#allocation21 + $0x3e0] sm:$0xff]  ;;  %v2420_v26 = vld [vmem:[#allocation21 + $0x50] sm:$0xff] }
 0x3a4   :  { %2674 = vmatprep.subr.mxu0 %v2525_v48  ;;  %2602 = vmatpush1.msra.mxu1 %v2458_v16  ;;  %v2429_v48 = vld [vmem:[#allocation21 + $0x98] sm:$0xff]  ;;  %v2527_v16 = vld [vmem:[#allocation21 + $0x3a8] sm:$0xff] }
 0x3a5   :  { %2675 = vmatpush1.msra.mxu0 %v2524_v19  ;;  %2603 = vmatprep.subr.mxu1 %v2451_v14  ;;  %v2428_v19 = vld [vmem:[#allocation21 + $0x90] sm:$0xff]  ;;  %v2526_v14 = vld [vmem:[#allocation21 + $0x3a0] sm:$0xff] }
 0x3a6   :  { %2368 = vmatmul.mubr.f32.gmra.mxu0 %v1084_v52  ;;  %2676 = vmatprep.subr.mxu0 %v2517_v25  ;;  %v2493_v52 = vld [vmem:[#allocation21 + $0x298] sm:$0xff] }
 0x3a7   :  { %2373 = vmatprep.mubr.f32.mxu0 %v1093_v7  ;;  %2604 = vmatpush1.msra.mxu1 %v2450_v53  ;;  %v2492_v7 = vld [vmem:[#allocation21 + $0x290] sm:$0xff]  ;;  %v2421_v25 = vld [vmem:[#allocation21 + $0x58] sm:$0xff]  ;;  %v4085_v53 = vmax.f32 %v431_v21, 0.0 }
 0x3a8   :  { %2677 = vmatpush1.msra.mxu0 %v2516_v18  ;;  %2605 = vmatprep.subr.mxu1 %v2443_v11  ;;  %v4088_v18 = vmax.f32 %v3717_v35, 0.0  ;;  %v436_v11 = vadd.f32 %v4071_v61, %v3859_v3  ;;  %v2565_v35 = vld [vmem:[#allocation21 + $0x4d8] sm:$0xff] }
 0x3a9   :  { %2678 = vmatprep.subr.mxu0 %v2509_v34  ;;  %2606 = vmatpush1.msra.mxu1 %v2442_v2  ;;  %v2518_v34 = vld [vmem:[#allocation21 + $0x360] sm:$0xff]  ;;  %v2413_v2 = vld [vmem:[#allocation21 + $0x18] sm:$0xff] }
 0x3aa   :  { %2679 = vmatpush1.msra.mxu0 %v2508_v13  ;;  %2607 = vmatprep.subr.mxu1 %v2435_v36  ;;  %v2511_v36 = vld [vmem:[#allocation21 + $0x328] sm:$0xff]  ;;  %v4095_v3 = vmax.f32 %v436_v11, 0.0  ;;  %v2513_v11 = vld [vmem:[#allocation21 + $0x338] sm:$0xff] }
 0x3ab   :  { %2374 = vmatmul.mubr.f32.gmra.mxu0 %v1092_v27  ;;  %2680 = vmatprep.subr.mxu0 %v2501_v37  ;;  %v2477_v27 = vld [vmem:[#allocation21 + $0x218] sm:$0xff]  ;;  %v2412_v37 = vld [vmem:[#allocation21 + $0x10] sm:$0xff] }
 0x3ac   :  { %2379 = vmatprep.mubr.f32.mxu0 %v1101_v32  ;;  %2608 = vmatpush1.msra.mxu1 %v2434_v54  ;;  %v2476_v32 = vld [vmem:[#allocation21 + $0x210] sm:$0xff]  ;;  %v2510_v54 = vld [vmem:[#allocation21 + $0x320] sm:$0xff] }
 0x3ad   :  { %2681 = vmatpush1.msra.mxu0 %v2500_v41  ;;  %2609 = vmatprep.subr.mxu1 %v2427_v50  ;;  %v2503_v41 = vld [vmem:[#allocation21 + $0x2e8] sm:$0xff]  ;;  %v2564_v50 = vld [vmem:[#allocation21 + $0x4d0] sm:$0xff] }
 0x3ae   :  { %2682 = vmatprep.subr.mxu0 %v2493_v52  ;;  %2610 = vmatpush1.msra.mxu1 %v2426_v55  ;;  %v4098_v55 = vmax.f32 %v3709_v28, 0.0  ;;  %v2487_v28 = vld [vmem:[#allocation21 + $0x268] sm:$0xff] }
 0x3af   :  { %2683 = vmatpush1.msra.mxu0 %v2492_v7  ;;  %2611 = vmatprep.subr.mxu1 %v2419_v42  ;;  %v441_v7 = vadd.f32 %v3857_v46, %v4071_v61  ;;  %v2502_v42 = vld [vmem:[#allocation21 + $0x2e0] sm:$0xff]  ;;  %v2479_v61 = vld [vmem:[#allocation21 + $0x228] sm:$0xff] }
 0x3b0   :  { %2380 = vmatmul.mubr.f32.gmra.mxu0 %v1100_v45  ;;  %2684 = vmatprep.subr.mxu0 %v2485_v58  ;;  %v2461_v45 = vld [vmem:[#allocation21 + $0x198] sm:$0xff] }
 0x3b1   :  { %2612 = vmatpush1.msra.mxu1 %v2418_v60  ;;  %2685 = vmatpush1.msra.mxu0 %v2484_v20  ;;  %v2557_v58 = vld [vmem:[#allocation21 + $0x498] sm:$0xff]  ;;  %v2495_v60 = vld [vmem:[#allocation21 + $0x2a8] sm:$0xff]  ;;  %v2556_v20 = vld [vmem:[#allocation21 + $0x490] sm:$0xff]  ;;  %v4105_v46 = vmax.f32 %v441_v7, 0.0 }
 0x3b2   :  { %3021 = vmatprep.mubr.msk.f32.mxu0 %vm2570_vm4, %v4046_v47  ;;  %2613 = vmatprep.subr.mxu1 %v2411_v51  ;;  %v2494_v51 = vld [vmem:[#allocation21 + $0x2a0] sm:$0xff] }
 0x3b3   :  { %2686 = vmatprep.subr.mxu0 %v2477_v27  ;;  %2614 = vmatpush1.msra.mxu1 %v2410_v30  ;;  %v2549_v27 = vld [vmem:[#allocation21 + $0x458] sm:$0xff] }
 0x3b4   :  { %2687 = vmatpush1.msra.mxu0 %v2476_v32  ;;  %2639 = vmatprep.subr.mxu1 %v2563_v5  ;;  %v2548_v32 = vld [vmem:[#allocation21 + $0x450] sm:$0xff]  ;;  %v2486_v5 = vld [vmem:[#allocation21 + $0x260] sm:$0xff] }
 0x3b5   :  { %2688 = vmatprep.subr.mxu0 %v2469_v6  ;;  %2640 = vmatpush2.msra.mxu1 %v2562_v39  ;;  %v2541_v6 = vld [vmem:[#allocation21 + $0x418] sm:$0xff]  ;;  %v4109_v39 = vrot.slane %v3993_v12, %v3740_v59 }
 0x3b6   :  { %2689 = vmatpush1.msra.mxu0 %v2468_v8  ;;  %2641 = vmatprep.subr.mxu1 %v2555_v10  ;;  %v2540_v8 = vld [vmem:[#allocation21 + $0x410] sm:$0xff]  ;;  %v2478_v10 = vld [vmem:[#allocation21 + $0x220] sm:$0xff] }
 0x3b7   :  { %2690 = vmatprep.subr.mxu0 %v2461_v45  ;;  %2642 = vmatpush2.msra.mxu1 %v2554_v15  ;;  %v4114_v45 = vrot.slane %v3993_v12, %v3747_v62  ;;  %v2529_v12 = vld [vmem:[#allocation21 + $0x3b8] sm:$0xff] }
 0x3b8   :  { %2691 = vmatpush1.msra.mxu0 %v2460_v63  ;;  %2643 = vmatprep.subr.mxu1 %v2547_v0  ;;  %v2471_v63 = vld [vmem:[#allocation21 + $0x1e8] sm:$0xff]  ;;  %v2537_v0 = vld [vmem:[#allocation21 + $0x3f8] sm:$0xff] }
 0x3b9   :  { %2692 = vmatprep.subr.mxu0 %v2453_v56  ;;  %2644 = vmatpush2.msra.mxu1 %v2546_v9  ;;  %v2536_v9 = vld [vmem:[#allocation21 + $0x3f0] sm:$0xff] }
 0x3ba   :  { %2693 = vmatpush1.msra.mxu0 %v2452_v17  ;;  %2645 = vmatprep.subr.mxu1 %v2539_v43  ;;  %v2463_v17 = vld [vmem:[#allocation21 + $0x1a8] sm:$0xff] }
 0x3bb   :  { %2694 = vmatprep.subr.mxu0 %v2445_v49  ;;  %2646 = vmatpush2.msra.mxu1 %v2538_v1  ;;  %v2462_v49 = vld [vmem:[#allocation21 + $0x1a0] sm:$0xff] }
 0x3bc   :  { %2695 = vmatpush1.msra.mxu0 %v2444_v4  ;;  %2648 = vmatmul.mubr.f32.vlgmr.msra.gmra.mxu1 %v4075_v22  ;;  %v1624_v13 = vpop.f32.mrf.mxu1 }
 0x3bd   :  { %2696 = vmatprep.subr.mxu0 %v2437_v38  ;;  %2761 = vmatprep.subr.mxu1 %v2535_v44  ;;  %v1625_v56 = vadd.f32 %v1624_v13, %v4109_v39  ;;  %v2528_v44 = vld [vmem:[#allocation21 + $0x3b0] sm:$0xff] }
 0x3be   :  { %3018 = vmatprep.mubr.msk.f32.mxu1 %vm2570_vm4, %v4078_v24  ;;  %2697 = vmatpush1.msra.mxu0 %v2436_v23  ;;  %v1626_v52 = vpop.f32.mrf.mxu1  ;;  %v2455_v23 = vld [vmem:[#allocation21 + $0x168] sm:$0xff] }
 0x3bf   :  { %2762 = vmatpush1.msra.mxu1 %v2534_v57  ;;  %2698 = vmatprep.subr.mxu0 %v2429_v48  ;;  %v1627_v1 = vadd.f32 %v1626_v52, %v4114_v45  ;;  %v2521_v57 = vld [vmem:[#allocation21 + $0x378] sm:$0xff] }
 0x3c0   :  { %2763 = vmatprep.subr.mxu1 %v2527_v16  ;;  %2699 = vmatpush1.msra.mxu0 %v2428_v19  ;;  %v2454_v16 = vld [vmem:[#allocation21 + $0x160] sm:$0xff] }
 0x3c1   :  { %2764 = vmatpush1.msra.mxu1 %v2526_v14  ;;  %2700 = vmatprep.subr.mxu0 %v2421_v25  ;;  %v2520_v14 = vld [vmem:[#allocation21 + $0x370] sm:$0xff]  ;;  %v2447_v25 = vld [vmem:[#allocation21 + $0x128] sm:$0xff] }
 0x3c2   :  { %2654 = vmatmul.mubr.f32.gmra.mxu1 %v4085_v53  ;;  %2765 = vmatprep.subr.mxu1 %v2519_v31  ;;  %v1630_v30 = vpop.f32.mrf.mxu1 }
 0x3c3   :  { %3019 = vmatprep.mubr.msk.f32.mxu1 %vm2570_vm4, %v4088_v18  ;;  %2701 = vmatpush1.msra.mxu0 %v2420_v26  ;;  %v1631_v19 = vadd.f32 %v1630_v30, %v4109_v39  ;;  %v2496_v30 = vld [vmem:[#allocation21 + $0x2b0] sm:$0xff] }
 0x3c4   :  { %2766 = vmatpush1.msra.mxu1 %v2518_v34  ;;  %2702 = vmatprep.subr.mxu0 %v2413_v2  ;;  %v1632_v15 = vpop.f32.mrf.mxu1  ;;  %v2446_v34 = vld [vmem:[#allocation21 + $0x120] sm:$0xff] }
 0x3c5   :  { %2767 = vmatprep.subr.mxu1 %v2511_v36  ;;  %2703 = vmatpush1.msra.mxu0 %v2412_v37  ;;  %v1633_v2 = vadd.f32 %v1632_v15, %v4114_v45  ;;  %v2512_v36 = vld [vmem:[#allocation21 + $0x330] sm:$0xff]  ;;  %v2439_v37 = vld [vmem:[#allocation21 + $0xe8] sm:$0xff] }
 0x3c6   :  { %2768 = vmatpush1.msra.mxu1 %v2510_v54  ;;  %2728 = vmatprep.subr.mxu0 %v2565_v35  ;;  %v2505_v35 = vld [vmem:[#allocation21 + $0x2f8] sm:$0xff]  ;;  %v2488_v15 = vld [vmem:[#allocation21 + $0x270] sm:$0xff] }
 0x3c7   :  { %2660 = vmatmul.mubr.f32.gmra.mxu1 %v4095_v3  ;;  %2769 = vmatprep.subr.mxu1 %v2503_v41  ;;  %v1636_v4 = vpop.f32.mrf.mxu1 }
 0x3c8   :  { %3020 = vmatprep.mubr.msk.f32.mxu1 %vm2570_vm4, %v4098_v55  ;;  %2729 = vmatpush2.msra.mxu0 %v2564_v50  ;;  %v2438_v50 = vld [vmem:[#allocation21 + $0xe0] sm:$0xff]  ;;  %v1637_v52 = vadd.f32 %v1636_v4, %v4109_v39 }
 0x3c9   :  { %2770 = vmatpush1.msra.mxu1 %v2502_v42  ;;  %2730 = vmatprep.subr.mxu0 %v2557_v58  ;;  %v1638_v31 = vpop.f32.mrf.mxu1  ;;  %v2504_v42 = vld [vmem:[#allocation21 + $0x2f0] sm:$0xff]  ;;  %v2431_v58 = vld [vmem:[#allocation21 + $0xa8] sm:$0xff]  ;;  %v2566_v4 = vld [vmem:[#allocation21 + $0x4e0] sm:$0xff] }
 0x3ca   :  { %2771 = vmatprep.subr.mxu1 %v2495_v60  ;;  %2731 = vmatpush2.msra.mxu0 %v2556_v20  ;;  %v2497_v20 = vld [vmem:[#allocation21 + $0x2b8] sm:$0xff] }
 0x3cb   :  { %2772 = vmatpush1.msra.mxu1 %v2494_v51  ;;  %2732 = vmatprep.subr.mxu0 %v2549_v27  ;;  %v2430_v51 = vld [vmem:[#allocation21 + $0xa0] sm:$0xff]  ;;  %v1639_v27 = vadd.f32 %v1638_v31, %v4114_v45 }
 0x3cc   :  { %2666 = vmatmul.mubr.f32.gmra.mxu1 %v4105_v46  ;;  %2773 = vmatprep.subr.mxu1 %v2487_v28  ;;  %v1642_v7 = vpop.f32.mrf.mxu1  ;;  %v2542_v31 = vld [vmem:[#allocation21 + $0x420] sm:$0xff] }
 0x3cd   :  { %2733 = vmatpush2.msra.mxu0 %v2548_v32  ;;  %2774 = vmatpush1.msra.mxu1 %v2486_v5  ;;  %v2423_v32 = vld [vmem:[#allocation21 + $0x68] sm:$0xff] }
 0x3ce   :  { %3025 = vmatprep.mubr.msk.f32.mxu1 %vm2570_vm4, %v4046_v47  ;;  %2734 = vmatprep.subr.mxu0 %v2541_v6  ;;  %v2489_v6 = vld [vmem:[#allocation21 + $0x278] sm:$0xff] }
 0x3cf   :  { %2775 = vmatprep.subr.mxu1 %v2479_v61  ;;  %2735 = vmatpush2.msra.mxu0 %v2540_v8  ;;  %v1644_v61 = vpop.f32.mrf.mxu1 }
 0x3d0   :  { %2776 = vmatpush1.msra.mxu1 %v2478_v10  ;;  %2737 = vmatmul.mubr.f32.vlgmr.msra.gmra.mxu0 %v4075_v22  ;;  %v1713_v43 = vpop.f32.mrf.mxu0  ;;  %v2422_v10 = vld [vmem:[#allocation21 + $0x60] sm:$0xff] }
 0x3d1   :  { %2777 = vmatprep.subr.mxu1 %v2471_v63  ;;  %2850 = vmatprep.subr.mxu0 %v2537_v0  ;;  %v1714_v38 = vadd.f32 %v1713_v43, %v1625_v56  ;;  %v1643_v63 = vadd.f32 %v1642_v7, %v4109_v39  ;;  %v2415_v0 = vld [vmem:[#allocation21 + $0x28] sm:$0xff]  ;;  %v2481_v56 = vld [vmem:[#allocation21 + $0x238] sm:$0xff]  ;;  %v2560_v7 = vld [vmem:[#allocation21 + $0x4b0] sm:$0xff] }
 0x3d2   :  { %3022 = vmatprep.mubr.msk.f32.mxu0 %vm2570_vm4, %v4078_v24  ;;  %2778 = vmatpush1.msra.mxu1 %v2470_v40  ;;  %v1715_v21 = vpop.f32.mrf.mxu0  ;;  %v2567_v39 = vld [vmem:[#allocation21 + $0x4e8] sm:$0xff] }
 0x3d3   :  { %2851 = vmatpush1.msra.mxu0 %v2536_v9  ;;  %2779 = vmatprep.subr.mxu1 %v2463_v17  ;;  %1738 = vst [vmem:[%s4345_s15 + $0x10] sm:$0xff] %v1714_v38  ;;  %v1716_v48 = vadd.f32 %v1715_v21, %v1627_v1  ;;  %v2414_v9 = vld [vmem:[#allocation21 + $0x20] sm:$0xff]  ;;  %v1645_v17 = vadd.f32 %v1644_v61, %v4114_v45  ;;  %v2473_v1 = vld [vmem:[#allocation21 + $0x1f8] sm:$0xff]  ;;  %v2472_v45 = vld [vmem:[#allocation21 + $0x1f0] sm:$0xff] }
 0x3d4   :  { %2852 = vmatprep.subr.mxu0 %v2529_v12  ;;  %2780 = vmatpush1.msra.mxu1 %v2462_v49  ;;  %v2480_v12 = vld [vmem:[#allocation21 + $0x230] sm:$0xff]  ;;  %v2558_v21 = vld [vmem:[#allocation21 + $0x4a0] sm:$0xff] }
 0x3d5   :  { %2853 = vmatpush1.msra.mxu0 %v2528_v44  ;;  %2781 = vmatprep.subr.mxu1 %v2455_v23  ;;  %1739 = vst [vmem:[%s4345_s15 + $0x18] sm:$0xff] %v1716_v48  ;;  %v1719_v26 = vpop.f32.mrf.mxu0  ;;  %v2559_v44 = vld [vmem:[#allocation21 + $0x4a8] sm:$0xff]  ;;  %v2465_v23 = vld [vmem:[#allocation21 + $0x1b8] sm:$0xff] }
 0x3d6   :  { %2743 = vmatmul.mubr.f32.gmra.mxu0 %v4085_v53  ;;  %2854 = vmatprep.subr.mxu0 %v2521_v57  ;;  %v1720_v13 = vadd.f32 %v1719_v26, %v1631_v19  ;;  %v2551_v57 = vld [vmem:[#allocation21 + $0x468] sm:$0xff]  ;;  %v2457_v48 = vld [vmem:[#allocation21 + $0x178] sm:$0xff]  ;;  %v2456_v19 = vld [vmem:[#allocation21 + $0x170] sm:$0xff] }
 0x3d7   :  { %3023 = vmatprep.mubr.msk.f32.mxu0 %vm2570_vm4, %v4088_v18  ;;  %2782 = vmatpush1.msra.mxu1 %v2454_v16  ;;  %v1721_v54 = vpop.f32.mrf.mxu0  ;;  %v2550_v16 = vld [vmem:[#allocation21 + $0x460] sm:$0xff]  ;;  %v2448_v26 = vld [vmem:[#allocation21 + $0x130] sm:$0xff] }
 0x3d8   :  { %2855 = vmatpush1.msra.mxu0 %v2520_v14  ;;  %2783 = vmatprep.subr.mxu1 %v2447_v25  ;;  %1742 = vst [vmem:[%s4345_s15 + $0x30] sm:$0xff] %v1720_v13  ;;  %v1722_v41 = vadd.f32 %v1721_v54, %v1633_v2  ;;  %v2543_v14 = vld [vmem:[#allocation21 + $0x428] sm:$0xff]  ;;  %v2449_v25 = vld [vmem:[#allocation21 + $0x138] sm:$0xff]  ;;  %v2432_v13 = vld [vmem:[#allocation21 + $0xb0] sm:$0xff] }
 0x3d9   :  { %2856 = vmatprep.subr.mxu0 %v2513_v11  ;;  %2784 = vmatpush1.msra.mxu1 %v2446_v34  ;;  %v2441_v11 = vld [vmem:[#allocation21 + $0xf8] sm:$0xff]  ;;  %v2440_v34 = vld [vmem:[#allocation21 + $0xf0] sm:$0xff] }
 0x3da   :  { %2857 = vmatpush1.msra.mxu0 %v2512_v36  ;;  %2785 = vmatprep.subr.mxu1 %v2439_v37  ;;  %1743 = vst [vmem:[%s4345_s15 + $0x38] sm:$0xff] %v1722_v41  ;;  %v1725_v60 = vpop.f32.mrf.mxu0  ;;  %v2433_v2 = vld [vmem:[#allocation21 + $0xb8] sm:$0xff]  ;;  %v2424_v37 = vld [vmem:[#allocation21 + $0x70] sm:$0xff] }
 0x3db   :  { %2749 = vmatmul.mubr.f32.gmra.mxu0 %v4095_v3  ;;  %2858 = vmatprep.subr.mxu0 %v2505_v35  ;;  %v1726_v28 = vadd.f32 %v1725_v60, %v1637_v52  ;;  %v2425_v36 = vld [vmem:[#allocation21 + $0x78] sm:$0xff]  ;;  %v2416_v35 = vld [vmem:[#allocation21 + $0x30] sm:$0xff] }
 0x3dc   :  { %3024 = vmatprep.mubr.msk.f32.mxu0 %vm2570_vm4, %v4098_v55  ;;  %2786 = vmatpush1.msra.mxu1 %v2438_v50  ;;  %v1727_v5 = vpop.f32.mrf.mxu0  ;;  %v2417_v54 = vld [vmem:[#allocation21 + $0x38] sm:$0xff]  ;;  %v2568_v50 = vld [vmem:[#allocation21 + $0x4f0] sm:$0xff] }
 0x3dd   :  { %2859 = vmatpush1.msra.mxu0 %v2504_v42  ;;  %2787 = vmatprep.subr.mxu1 %v2431_v58  ;;  %1746 = vst [vmem:[%s4345_s15 + $0x50] sm:$0xff] %v1726_v28  ;;  %v1728_v8 = vadd.f32 %v1727_v5, %v1639_v27  ;;  %v2569_v41 = vld [vmem:[#allocation21 + $0x4f8] sm:$0xff]  ;;  %v2552_v58 = vld [vmem:[#allocation21 + $0x470] sm:$0xff] }
 0x3de   :  { %2860 = vmatprep.subr.mxu0 %v2497_v20  ;;  %2788 = vmatpush1.msra.mxu1 %v2430_v51  ;;  %v2561_v52 = vld [vmem:[#allocation21 + $0x4b8] sm:$0xff]  ;;  %v2544_v20 = vld [vmem:[#allocation21 + $0x430] sm:$0xff] }
 0x3df   :  { %2861 = vmatpush1.msra.mxu0 %v2496_v30  ;;  %2789 = vmatprep.subr.mxu1 %v2423_v32  ;;  %1747 = vst [vmem:[%s4345_s15 + $0x58] sm:$0xff] %v1728_v8  ;;  %v1731_v40 = vpop.f32.mrf.mxu0  ;;  %v2553_v42 = vld [vmem:[#allocation21 + $0x478] sm:$0xff] }
 0x3e0   :  { %2755 = vmatmul.mubr.f32.gmra.mxu0 %v4105_v46  ;;  %2862 = vmatprep.subr.mxu0 %v2489_v6  ;;  %v1732_v43 = vadd.f32 %v1731_v40, %v1643_v63  ;;  %v2545_v60 = vld [vmem:[#allocation21 + $0x438] sm:$0xff] }
 0x3e1   :  { %2790 = vmatpush1.msra.mxu1 %v2422_v10  ;;  %2863 = vmatpush1.msra.mxu0 %v2488_v15  ;;  %v1733_v49 = vpop.f32.mrf.mxu0  ;;  %v2008_v27 = vld [vmem:[#allocation19] sm:$0xf] }
 0x3e2   :  { %3029 = vmatprep.mubr.msk.f32.mxu0 %vm2570_vm4, %v4046_v47  ;;  %2791 = vmatprep.subr.mxu1 %v2415_v0  ;;  %1750 = vst [vmem:[%s4345_s15 + $0x70] sm:$0xff] %v1732_v43  ;;  %v1734_v38 = vadd.f32 %v1733_v49, %v1645_v17  ;;  %v2464_v47 = vld [vmem:[#allocation21 + $0x1b0] sm:$0xff] }
 0x3e3   :  { %2864 = vmatprep.subr.mxu0 %v2481_v56  ;;  %2792 = vmatpush1.msra.mxu1 %v2414_v9 }
 0x3e4   :  { %2865 = vmatpush1.msra.mxu0 %v2480_v12  ;;  %2817 = vmatprep.subr.mxu1 %v2567_v39  ;;  %1751 = vst [vmem:[%s4345_s15 + $0x78] sm:$0xff] %v1734_v38 }
 0x3e5   :  { %2866 = vmatprep.subr.mxu0 %v2473_v1  ;;  %2818 = vmatpush2.msra.mxu1 %v2566_v4 }
 0x3e6   :  { %2867 = vmatpush1.msra.mxu0 %v2472_v45  ;;  %2819 = vmatprep.subr.mxu1 %v2559_v44 }
 0x3e7   :  { %2868 = vmatprep.subr.mxu0 %v2465_v23  ;;  %2820 = vmatpush2.msra.mxu1 %v2558_v21 }
 0x3e8   :  { %2869 = vmatpush1.msra.mxu0 %v2464_v47  ;;  %2821 = vmatprep.subr.mxu1 %v2551_v57  ;;  %v2021_v57 = vrot.slane %v2008_v27, %v3740_v59 }
 0x3e9   :  { %2870 = vmatprep.subr.mxu0 %v2457_v48  ;;  %2822 = vmatpush2.msra.mxu1 %v2550_v16  ;;  %v2025_v48 = vrot.slane %v2008_v27, %v3747_v62 }
 0x3ea   :  { %2871 = vmatpush1.msra.mxu0 %v2456_v19  ;;  %2823 = vmatprep.subr.mxu1 %v2543_v14 }
 0x3eb   :  { %2872 = vmatprep.subr.mxu0 %v2449_v25  ;;  %2824 = vmatpush2.msra.mxu1 %v2542_v31 }
 0x3ec   :  { %2873 = vmatpush1.msra.mxu0 %v2448_v26  ;;  %2826 = vmatmul.mubr.f32.vlgmr.msra.gmra.mxu1 %v4075_v22 }
 0x3ed   :  { %2874 = vmatprep.subr.mxu0 %v2441_v11  ;;  %3026 = vmatprep.mubr.msk.f32.mxu1 %vm2570_vm4, %v4078_v24 }
 0x3ee   :  { %2875 = vmatpush1.msra.mxu0 %v2440_v34 }
 0x3ef   :  { %2876 = vmatprep.subr.mxu0 %v2433_v2 }
 0x3f0   :  { %2877 = vmatpush1.msra.mxu0 %v2432_v13  ;;  %2832 = vmatmul.mubr.f32.gmra.mxu1 %v4085_v53 }
 0x3f1   :  { %2878 = vmatprep.subr.mxu0 %v2425_v36  ;;  %3027 = vmatprep.mubr.msk.f32.mxu1 %vm2570_vm4, %v4088_v18 }
 0x3f2   :  { %2879 = vmatpush1.msra.mxu0 %v2424_v37 }
 0x3f3   :  { %2880 = vmatprep.subr.mxu0 %v2417_v54 }
 0x3f4   :  { %2881 = vmatpush1.msra.mxu0 %v2416_v35  ;;  %2838 = vmatmul.mubr.f32.gmra.mxu1 %v4095_v3 }
 0x3f5   :  { %2906 = vmatprep.subr.mxu0 %v2569_v41  ;;  %3028 = vmatprep.mubr.msk.f32.mxu1 %vm2570_vm4, %v4098_v55 }
 0x3f6   :  { %2907 = vmatpush2.msra.mxu0 %v2568_v50 }
 0x3f7   :  { %2908 = vmatprep.subr.mxu0 %v2561_v52 }
 0x3f8   :  { %2909 = vmatpush2.msra.mxu0 %v2560_v7  ;;  %2844 = vmatmul.mubr.f32.gmra.mxu1 %v4105_v46 }
 0x3f9   :  { %2910 = vmatprep.subr.mxu0 %v2553_v42 }
 0x3fa   :  { %2911 = vmatpush2.msra.mxu0 %v2552_v58 }
 0x3fb   :  { %2912 = vmatprep.subr.mxu0 %v2545_v60 }
 0x3fc   :  { %2913 = vmatpush2.msra.mxu0 %v2544_v20 }
 0x3fd   :  { %2915 = vmatmul.mubr.f32.vlgmr.msra.gmra.mxu0 %v4075_v22  ;;  %v2013_v22 = vrot.slane %v2008_v27, %v3712_v29 }
 0x3fe   :  { %3030 = vmatprep.mubr.msk.f32.mxu0 %vm2570_vm4, %v4078_v24  ;;  %v2017_v24 = vrot.slane %v2008_v27, %v3715_v33 }
 0x401   :  { %2921 = vmatmul.mubr.f32.gmra.mxu0 %v4085_v53 }
 0x402   :  { %3031 = vmatprep.mubr.msk.f32.mxu0 %vm2570_vm4, %v4088_v18 }
 0x405   :  { %2927 = vmatmul.mubr.f32.gmra.mxu0 %v4095_v3  ;;  %v2096_v51 = vpop.f32.mrf.mxu1 }
 0x406   :  { %3032 = vmatprep.mubr.msk.f32.mxu0 %vm2570_vm4, %v4098_v55  ;;  %v2097_v32 = vadd.f32 %v2096_v51, %v2013_v22 }
 0x407   :  { %v2098_v28 = vpop.f32.mrf.mxu1 }
 0x408   :  { %v2099_v6 = vadd.f32 %v2098_v28, %v2017_v24 }
 0x409   :  { %2933 = vmatmul.mubr.f32.gmra.mxu0 %v4105_v46 }
 0x40b   :  { %v2102_v30 = vpop.f32.mrf.mxu1 }
 0x40c   :  { %v2103_v46 = vadd.f32 %v2102_v30, %v2013_v22 }
 0x40d   :  { %v2104_v53 = vpop.f32.mrf.mxu1 }
 0x40e   :  { %v2105_v29 = vadd.f32 %v2104_v53, %v2017_v24 }
 0x410   :  { %v2108_v3 = vpop.f32.mrf.mxu1 }
 0x411   :  { %v2109_v15 = vadd.f32 %v2108_v3, %v2013_v22 }
 0x412   :  { %v2110_v8 = vpop.f32.mrf.mxu1 }
 0x413   :  { %v2111_v40 = vadd.f32 %v2110_v8, %v2017_v24 }
 0x415   :  { %v2114_v56 = vpop.f32.mrf.mxu1 }
 0x416   :  { %v2115_v43 = vadd.f32 %v2114_v56, %v2013_v22 }
 0x417   :  { %v2116_v39 = vpop.f32.mrf.mxu1 }
 0x418   :  { %v2185_v5 = vpop.f32.mrf.mxu0  ;;  %v2117_v1 = vadd.f32 %v2116_v39, %v2017_v24 }
 0x419   :  { %v2186_v18 = vadd.f32 %v2185_v5, %v2097_v32 }
 0x41a   :  { %v2187_v61 = vpop.f32.mrf.mxu0 }
 0x41b   :  { %2386 = vst [vmem:[%s4346_s16] sm:$0xff] %v2186_v18  ;;  %v2188_v55 = vadd.f32 %v2187_v61, %v2099_v6 }
 0x41d   :  { %2387 = vst [vmem:[%s4346_s16 + $0x8] sm:$0xff] %v2188_v55 }
 0x41e   :  { %v2191_v10 = vpop.f32.mrf.mxu0 }
 0x41f   :  { %v2192_v33 = vadd.f32 %v2191_v10, %v2103_v46 }
 0x420   :  { %v2193_v63 = vpop.f32.mrf.mxu0 }
 0x421   :  { %2390 = vst [vmem:[%s4346_s16 + $0x20] sm:$0xff] %v2192_v33  ;;  %v2194_v0 = vadd.f32 %v2193_v63, %v2105_v29 }
 0x423   :  { %2391 = vst [vmem:[%s4346_s16 + $0x28] sm:$0xff] %v2194_v0  ;;  %v2197_v9 = vpop.f32.mrf.mxu0 }
 0x424   :  { %v2198_v17 = vadd.f32 %v2197_v9, %v2109_v15 }
 0x425   :  { %v2199_v12 = vpop.f32.mrf.mxu0 }
 0x426   :  { %2394 = vst [vmem:[%s4346_s16 + $0x40] sm:$0xff] %v2198_v17  ;;  %v2200_v49 = vadd.f32 %v2199_v12, %v2111_v40 }
 0x428   :  { %2395 = vst [vmem:[%s4346_s16 + $0x48] sm:$0xff] %v2200_v49  ;;  %v2203_v4 = vpop.f32.mrf.mxu0 }
 0x429   :  { %v2204_v38 = vadd.f32 %v2203_v4, %v2115_v43 }
 0x42a   :  { %v2205_v45 = vpop.f32.mrf.mxu0 }
 0x42b   :  { %2398 = vst [vmem:[%s4346_s16 + $0x60] sm:$0xff] %v2204_v38  ;;  %v2206_v44 = vadd.f32 %v2205_v45, %v2117_v1 }
 0x42d   :  { %2399 = vst [vmem:[%s4346_s16 + $0x68] sm:$0xff] %v2206_v44 }
 0x44c   :  { %v2274_v23 = vpop.f32.mrf.mxu1 }
 0x44d   :  { %v2275_v19 = vadd.f32 %v2274_v23, %v2021_v57 }
 0x44e   :  { %v2276_v21 = vpop.f32.mrf.mxu1 }
 0x44f   :  { %v2277_v25 = vadd.f32 %v2276_v21, %v2025_v48 }
 0x452   :  { %v2280_v47 = vpop.f32.mrf.mxu1 }
 0x453   :  { %v2281_v2 = vadd.f32 %v2280_v47, %v2021_v57 }
 0x454   :  { %v2282_v16 = vpop.f32.mrf.mxu1 }
 0x455   :  { %v2283_v62 = vadd.f32 %v2282_v16, %v2025_v48 }
 0x457   :  { %v2286_v26 = vpop.f32.mrf.mxu1 }
 0x458   :  { %v2287_v35 = vadd.f32 %v2286_v26, %v2021_v57 }
 0x459   :  { %v2288_v59 = vpop.f32.mrf.mxu1 }
 0x45a   :  { %v2289_v52 = vadd.f32 %v2288_v59, %v2025_v48 }
 0x45c   :  { %v2292_v41 = vpop.f32.mrf.mxu1 }
 0x45d   :  { %v2293_v20 = vadd.f32 %v2292_v41, %v2021_v57 }
 0x45e   :  { %v2294_v58 = vpop.f32.mrf.mxu1 }
 0x45f   :  { %v2295_v27 = vadd.f32 %v2294_v58, %v2025_v48 }
 0x460   :  { %v2363_v14 = vpop.f32.mrf.mxu0 }
 0x461   :  { %v2364_v31 = vadd.f32 %v2363_v14, %v2275_v19 }
 0x462   :  { %v2365_v11 = vpop.f32.mrf.mxu0 }
 0x463   :  { %2388 = vst [vmem:[%s4346_s16 + $0x10] sm:$0xff] %v2364_v31  ;;  %v2366_v34 = vadd.f32 %v2365_v11, %v2277_v25 }
 0x465   :  { %2389 = vst [vmem:[%s4346_s16 + $0x18] sm:$0xff] %v2366_v34 }
 0x466   :  { %v2369_v13 = vpop.f32.mrf.mxu0 }
 0x467   :  { %v2370_v36 = vadd.f32 %v2369_v13, %v2281_v2 }
 0x468   :  { %v2371_v37 = vpop.f32.mrf.mxu0 }
 0x469   :  { %2392 = vst [vmem:[%s4346_s16 + $0x30] sm:$0xff] %v2370_v36  ;;  %v2372_v54 = vadd.f32 %v2371_v37, %v2283_v62 }
 0x46b   :  { %2393 = vst [vmem:[%s4346_s16 + $0x38] sm:$0xff] %v2372_v54  ;;  %v2375_v50 = vpop.f32.mrf.mxu0 }
 0x46c   :  { %v2376_v7 = vadd.f32 %v2375_v50, %v2287_v35 }
 0x46d   :  { %v2377_v42 = vpop.f32.mrf.mxu0 }
 0x46e   :  { %2396 = vst [vmem:[%s4346_s16 + $0x50] sm:$0xff] %v2376_v7  ;;  %v2378_v60 = vadd.f32 %v2377_v42, %v2289_v52 }
 0x470   :  { %2397 = vst [vmem:[%s4346_s16 + $0x58] sm:$0xff] %v2378_v60  ;;  %v2381_v51 = vpop.f32.mrf.mxu0 }
 0x471   :  { %v2382_v28 = vadd.f32 %v2381_v51, %v2293_v20 }
 0x472   :  { %v2383_v22 = vpop.f32.mrf.mxu0 }
 0x473   :  { %2400 = vst [vmem:[%s4346_s16 + $0x70] sm:$0xff] %v2382_v28  ;;  %v2384_v30 = vadd.f32 %v2383_v22, %v2295_v27 }
 0x475   :  { %2401 = vst [vmem:[%s4346_s16 + $0x78] sm:$0xff] %v2384_v30 }
 0x47c   :  { %v2649_v32 = vpop.f32.mrf.mxu1 }
 0x47d   :  { %2939 = vst [vmem:[%s4347_s17] sm:$0xff] %v2649_v32 }
 0x47e   :  { %v2651_v24 = vpop.f32.mrf.mxu1 }
 0x47f   :  { %2940 = vst [vmem:[%s4347_s17 + $0x8] sm:$0xff] %v2651_v24 }
 0x482   :  { %v2655_v53 = vpop.f32.mrf.mxu1 }
 0x483   :  { %2947 = vst [vmem:[%s4347_s17 + $0x40] sm:$0xff] %v2655_v53 }
 0x484   :  { %v2657_v5 = vpop.f32.mrf.mxu1 }
 0x485   :  { %2948 = vst [vmem:[%s4347_s17 + $0x48] sm:$0xff] %v2657_v5 }
 0x487   :  { %v2661_v6 = vpop.f32.mrf.mxu1 }
 0x488   :  { %2955 = vst [vmem:[%s4347_s17 + $0x80] sm:$0xff] %v2661_v6 }
 0x489   :  { %v2663_v18 = vpop.f32.mrf.mxu1 }
 0x48a   :  { %2956 = vst [vmem:[%s4347_s17 + $0x88] sm:$0xff] %v2663_v18 }
 0x48c   :  { %v2667_v61 = vpop.f32.mrf.mxu1 }
 0x48d   :  { %2963 = vst [vmem:[%s4347_s17 + $0xc0] sm:$0xff] %v2667_v61 }
 0x48e   :  { %v2669_v3 = vpop.f32.mrf.mxu1 }
 0x48f   :  { %2964 = vst [vmem:[%s4347_s17 + $0xc8] sm:$0xff] %v2669_v3 }
 0x490   :  { %v2738_v55 = vpop.f32.mrf.mxu0 }
 0x491   :  { %2941 = vst [vmem:[%s4347_s17 + $0x10] sm:$0xff] %v2738_v55 }
 0x492   :  { %v2740_v46 = vpop.f32.mrf.mxu0 }
 0x493   :  { %2942 = vst [vmem:[%s4347_s17 + $0x18] sm:$0xff] %v2740_v46 }
 0x496   :  { %v2744_v29 = vpop.f32.mrf.mxu0 }
 0x497   :  { %2949 = vst [vmem:[%s4347_s17 + $0x50] sm:$0xff] %v2744_v29 }
 0x498   :  { %v2746_v8 = vpop.f32.mrf.mxu0 }
 0x499   :  { %2950 = vst [vmem:[%s4347_s17 + $0x58] sm:$0xff] %v2746_v8 }
 0x49b   :  { %v2750_v10 = vpop.f32.mrf.mxu0 }
 0x49c   :  { %2957 = vst [vmem:[%s4347_s17 + $0x90] sm:$0xff] %v2750_v10 }
 0x49d   :  { %v2752_v33 = vpop.f32.mrf.mxu0 }
 0x49e   :  { %2958 = vst [vmem:[%s4347_s17 + $0x98] sm:$0xff] %v2752_v33 }
 0x4a0   :  { %v2756_v15 = vpop.f32.mrf.mxu0 }
 0x4a1   :  { %2965 = vst [vmem:[%s4347_s17 + $0xd0] sm:$0xff] %v2756_v15 }
 0x4a2   :  { %v2758_v63 = vpop.f32.mrf.mxu0 }
 0x4a3   :  { %2966 = vst [vmem:[%s4347_s17 + $0xd8] sm:$0xff] %v2758_v63 }
 0x4ac   :  { %v2827_v0 = vpop.f32.mrf.mxu1 }
 0x4ad   :  { %2943 = vst [vmem:[%s4347_s17 + $0x20] sm:$0xff] %v2827_v0 }
 0x4ae   :  { %v2829_v40 = vpop.f32.mrf.mxu1 }
 0x4af   :  { %2944 = vst [vmem:[%s4347_s17 + $0x28] sm:$0xff] %v2829_v40 }
 0x4b0   :  { %v2833_v56 = vpop.f32.mrf.mxu1 }
 0x4b1   :  { %2951 = vst [vmem:[%s4347_s17 + $0x60] sm:$0xff] %v2833_v56 }
 0x4b2   :  { %v2835_v9 = vpop.f32.mrf.mxu1 }
 0x4b3   :  { %2952 = vst [vmem:[%s4347_s17 + $0x68] sm:$0xff] %v2835_v9 }
 0x4b4   :  { %v2839_v17 = vpop.f32.mrf.mxu1 }
 0x4b5   :  { %2959 = vst [vmem:[%s4347_s17 + $0xa0] sm:$0xff] %v2839_v17 }
 0x4b6   :  { %v2841_v43 = vpop.f32.mrf.mxu1 }
 0x4b7   :  { %2960 = vst [vmem:[%s4347_s17 + $0xa8] sm:$0xff] %v2841_v43 }
 0x4b8   :  { %v2845_v12 = vpop.f32.mrf.mxu1 }
 0x4b9   :  { %2967 = vst [vmem:[%s4347_s17 + $0xe0] sm:$0xff] %v2845_v12 }
 0x4ba   :  { %v2847_v39 = vpop.f32.mrf.mxu1 }
 0x4bb   :  { %2968 = vst [vmem:[%s4347_s17 + $0xe8] sm:$0xff] %v2847_v39 }
 0x4bd   :  { %v2916_v49 = vpop.f32.mrf.mxu0 }
 0x4be   :  { %2945 = vst [vmem:[%s4347_s17 + $0x30] sm:$0xff] %v2916_v49 }
 0x4bf   :  { %v2918_v1 = vpop.f32.mrf.mxu0 }
 0x4c0   :  { %2946 = vst [vmem:[%s4347_s17 + $0x38] sm:$0xff] %v2918_v1 }
 0x4c1   :  { %v2922_v4 = vpop.f32.mrf.mxu0 }
 0x4c2   :  { %2953 = vst [vmem:[%s4347_s17 + $0x70] sm:$0xff] %v2922_v4 }
 0x4c3   :  { %v2924_v38 = vpop.f32.mrf.mxu0 }
 0x4c4   :  { %2954 = vst [vmem:[%s4347_s17 + $0x78] sm:$0xff] %v2924_v38 }
 0x4c5   :  { %v2928_v45 = vpop.f32.mrf.mxu0 }
 0x4c6   :  { %2961 = vst [vmem:[%s4347_s17 + $0xb0] sm:$0xff] %v2928_v45 }
 0x4c7   :  { %v2930_v44 = vpop.f32.mrf.mxu0 }
 0x4c8   :  { %2962 = vst [vmem:[%s4347_s17 + $0xb8] sm:$0xff] %v2930_v44 }
 0x4c9   :  { %v2934_v23 = vpop.f32.mrf.mxu0 }
 0x4ca   :  { %2969 = vst [vmem:[%s4347_s17 + $0xf0] sm:$0xff] %v2934_v23 }
 0x4cb   :  { %v2936_v21 = vpop.f32.mrf.mxu0 }
 0x4cc   :  { %2970 = vst [vmem:[%s4347_s17 + $0xf8] sm:$0xff] %v2936_v21 }
 0x4cd   :  { %2983 = vsyncpa [#allocation3], 1 }
 0x4ce   :  { %2984 = vsyncpa [#allocation5], 1 }
 0x4cf   :  { %2985 = vsyncpa [#allocation8], 1 }
 0x4d0   :  { %2986 = vsyncpa [#allocation11], 1 }
 0x4d1   :  { %2987 = vsyncpa [#allocation14], 1 }
 0x4d2   :  { %2988 = vsyncpa [#allocation17], 1 }
 0x4d3   :  { %2989 = vsyncpa [#allocation20], 1 }

// kernel: _batched_forward.3
= control target key start
LH: loop header
LB: loop body
LE: loop exit
PB: predicated region body
PF: predicated region fallthrough
CT: control target
= control target key end

     0   :  { %s9920_s0 = inlined_call_operand.vmem [shape: f32[32,512], index: 0, kind: input, shape index: {}]   ;;  %s9921_s1 = inlined_call_operand.vmem [shape: f32[32,512], index: 1, kind: input, shape index: {}]   ;;  %s9922_s2 = inlined_call_operand.vmem [shape: f32[32,1024], index: 2, kind: input, shape index: {}]   ;;  %s9923_s3 = inlined_call_operand.vmem [shape: f32[1,512], index: 3, kind: input, shape index: {}]   ;;  %s9924_s4 = inlined_call_operand.vmem [shape: f32[8192,16], index: 4, kind: input, shape index: {}]   ;;  %s9925_s5 = inlined_call_operand.<no memory space> [shape: f32[1,1], index: 5, kind: input, shape index: {}]   ;;  %s9926_s6 = inlined_call_operand.hbm [shape: f32[2,16,16], index: 6, kind: output, shape index: {}]  }
   0x1   :  { %11 = sst [smem:[#allocation2]] %s9925_s5 }
   0x2   :  { %12 = vsyncpa [#allocation4], 0 }
   0x3   :  { %14 = vsyncpa [#allocation4 + $0x1], 0  ;;  %s5990_s23 = smov 0   ;;  %s5992_s24 = smov 0  }
   0x4   :  { %s5994_s25 = smov 0   ;;  %s5996_s26 = smov 0  }
   0x5 LB: > { %s6011_s5 = sadd.s32 4294967295, %s5947_s26   ;;  %s4573_s27 = sadd.s32 4294967294, %s5947_s26   ;;  %s5947_s26 = sphi %s5996_s26, %s9974_s26   ;;  %s5943_s25 = sphi %s5994_s25, %s9973_s25   ;;  %s5939_s24 = sphi %s5992_s24, %s9972_s24   ;;  %s5935_s23 = sphi %s5990_s23, %s9971_s23  }
   0x6   : > { %s6015_s28 = sadd.s32 1, %s5947_s26   ;;  %s168_s29 = sadd.s32 1, %s5943_s25 }
   0x7   : > { %s165_s30 = ssub.s32 %s5947_s26, %s6015_s28  ;;  %p178_p0 = scmp.ne.s32.totalorder %s5943_s25, %s5939_s24 }
   0x8   : > { %p166_p1 = scmp.eq.s32.totalorder %s165_s30, 0  ;;  %p179_p2 = scmp.eq.s32.totalorder %s6011_s5, 1 }
   0x9   : > { %p184_p3 = scmp.ne.s32.totalorder %s5939_s24, %s5935_s23  ;;  %p185_p4 = scmp.eq.s32.totalorder %s4573_s27, 1 }
   0xa   : > { %s6026_s7 = scalar_select %p166_p1, %s5943_s25, %s168_s29  }
   0xb   : > { %p6028_p5 = por %p179_p2, %p178_p0  ;;  %p6032_p6 = por %p185_p4, %p184_p3 }
   0xc   : > { %p4576_p7 = scmp.ge.s32.totalorder %s5947_s26, 1  ;;  %p242_p8 = scmp.lt.s32.totalorder %s5947_s26, 3 }
   0xe   : > { %p243_p9 = pnand %p4576_p7, %p242_p8 }
  0x10   : > { %246 = sbr.rel (%p243_p9) target bundleno = 864 (0x360), region = 44 }
  0x15   : > { %s4578_s10 = sshll.u32 %s6011_s5, 1  ;;  %v520_v10 = vld [vmem:[%s9924_s4 + $0xf8] sm:$0xff]  ;;  %v519_v16 = vld [vmem:[%s9924_s4 + $0xf0] sm:$0xff]  ;;  %v518_v20 = vld [vmem:[%s9924_s4 + $0xe8] sm:$0xff]  ;;  %v1515_v22 = vlaneseq  ;;  %s1513_s15 = sld [smem:[#allocation2]]  ;;  %vm4470_vm0 = vcmask 130048  }
  0x16   : > { %p286_p10 = scmp.lt.s32.totalorder %s4578_s10, 3  ;;  %v552_v11 = vld [vmem:[%s9924_s4 + $0x1f8] sm:$0xff]  ;;  %v551_v17 = vld [vmem:[%s9924_s4 + $0x1f0] sm:$0xff]  ;;  %v550_v21 = vld [vmem:[%s9924_s4 + $0x1e8] sm:$0xff]  ;;  %s4597_s18 = sshll.u32 %s6011_s5, 8 }
  0x17   : > { %v504_v14 = vld [vmem:[%s9924_s4 + $0x78] sm:$0xff]  ;;  %v503_v18 = vld [vmem:[%s9924_s4 + $0x70] sm:$0xff]  ;;  %v502_v23 = vld [vmem:[%s9924_s4 + $0x68] sm:$0xff]  ;;  %v6108_v31 = vshrl.u32 %v1515_v22, 7  ;;  %s9876_s29 = scalar_lea.hbm %s9926_s6, %s4597_s18  ;;  %s5949_s5 = smov [#allocation3]  }
  0x18   : > { %s9976_s10 = smov (!%p286_p10, %s4578_s10), 3  ;;  %v536_v15 = vld [vmem:[%s9924_s4 + $0x178] sm:$0xff]  ;;  %v535_v19 = vld [vmem:[%s9924_s4 + $0x170] sm:$0xff]  ;;  %v534_v24 = vld [vmem:[%s9924_s4 + $0x168] sm:$0xff]  ;;  %s5891_s12 = sshll.u32 %s5949_s5, 4  ;;  %s5892_s12 = int_to_ptr.vmem [resolvable:$false] %s5891_s12 }
  0x19   : > { %s4594_s11 = sshll.u32 %s9976_s10, 5  ;;  %v517_v25 = vld [vmem:[%s9924_s4 + $0xe0] sm:$0xff]  ;;  %v516_v29 = vld [vmem:[%s9924_s4 + $0xd8] sm:$0xff]  ;;  %v515_v34 = vld [vmem:[%s9924_s4 + $0xd0] sm:$0xff]  ;;  %s4596_s20 = sshll.u32 %s9976_s10, 6  ;;  %v6136_v40 = vsub.s32 1, %v6108_v31 }
  0x1a   : > { %s297_s14 = scalar_lea.vmem %s9921_s1, %s4594_s11  ;;  %s6048_s17 = scalar_lea.vmem %s9920_s0, %s4594_s11  ;;  %v549_v26 = vld [vmem:[%s9924_s4 + $0x1e0] sm:$0xff]  ;;  %v548_v30 = vld [vmem:[%s9924_s4 + $0x1d8] sm:$0xff]  ;;  %v547_v35 = vld [vmem:[%s9924_s4 + $0x1d0] sm:$0xff]  ;;  %v6145_v43 = vsub.s32 0, %v6108_v31  ;;  %v6162_v47 = vsub.s32 3, %v6108_v31  ;;  %v6171_v50 = vsub.s32 2, %v6108_v31 }
  0x1b   : > { %v319_v0 = vld [vmem:[%s297_s14 + $0x28] sm:$0xff]  ;;  %v321_v1 = vld [vmem:[%s297_s14 + $0x38] sm:$0xff]  ;;  %v318_v2 = vld [vmem:[%s297_s14 + $0x20] sm:$0xff]  ;;  %s6150_s21 = scalar_lea.vmem %s9922_s2, %s4596_s20  ;;  %s5893_s20 = scalar_lea.vmem %s5892_s12, 512 }
  0x1c   : > { %350 = vmatprep.subr.mxu0 %v319_v0  ;;  %425 = vmatprep.subr.mxu1 %v321_v1  ;;  %v320_v3 = vld [vmem:[%s297_s14 + $0x30] sm:$0xff]  ;;  %v315_v4 = vld [vmem:[%s297_s14 + $0x8] sm:$0xff]  ;;  %v317_v5 = vld [vmem:[%s297_s14 + $0x18] sm:$0xff] }
  0x1d   : > { %351 = vmatpush1.xpose.msra.mxu0 %v318_v2  ;;  %426 = vmatpush1.xpose.msra.mxu1 %v320_v3  ;;  %v307_v6 = vld [vmem:[%s6048_s17 + $0x8] sm:$0xff]  ;;  %v314_v7 = vld [vmem:[%s297_s14] sm:$0xff]  ;;  %v316_v8 = vld [vmem:[%s297_s14 + $0x10] sm:$0xff] }
  0x1e   : > { %352 = vmatprep.subr.mxu0 %v315_v4  ;;  %427 = vmatprep.subr.mxu1 %v317_v5  ;;  %v309_v9 = vld [vmem:[%s6048_s17 + $0x18] sm:$0xff]  ;;  %v306_v12 = vld [vmem:[%s6048_s17] sm:$0xff]  ;;  %v308_v13 = vld [vmem:[%s6048_s17 + $0x10] sm:$0xff] }
  0x1f   : > { %386 = vmatprep.mubr.f32.mxu0 %v307_v6  ;;  %461 = vmatprep.mubr.f32.mxu1 %v309_v9  ;;  %v501_v27 = vld [vmem:[%s9924_s4 + $0x60] sm:$0xff]  ;;  %v500_v32 = vld [vmem:[%s9924_s4 + $0x58] sm:$0xff]  ;;  %v499_v36 = vld [vmem:[%s9924_s4 + $0x50] sm:$0xff] }
  0x20   : > { %v533_v28 = vld [vmem:[%s9924_s4 + $0x160] sm:$0xff]  ;;  %v532_v33 = vld [vmem:[%s9924_s4 + $0x158] sm:$0xff]  ;;  %v531_v37 = vld [vmem:[%s9924_s4 + $0x150] sm:$0xff] }
  0x21   : > { %353 = vmatpush1.xpose.msra.mxu0 %v314_v7  ;;  %428 = vmatpush1.xpose.msra.mxu1 %v316_v8  ;;  %v514_v38 = vld [vmem:[%s9924_s4 + $0xc8] sm:$0xff]  ;;  %v513_v44 = vld [vmem:[%s9924_s4 + $0xc0] sm:$0xff]  ;;  %v512_v51 = vld [vmem:[%s9924_s4 + $0xb8] sm:$0xff] }
  0x22   : > { %4598 = vmatprep.subr.mxu0 %v520_v10  ;;  %4636 = vmatprep.subr.mxu1 %v552_v11  ;;  %v546_v39 = vld [vmem:[%s9924_s4 + $0x1c8] sm:$0xff]  ;;  %v545_v45 = vld [vmem:[%s9924_s4 + $0x1c0] sm:$0xff]  ;;  %v544_v52 = vld [vmem:[%s9924_s4 + $0x1b8] sm:$0xff] }
  0x23   : > { %v498_v41 = vld [vmem:[%s9924_s4 + $0x48] sm:$0xff]  ;;  %v488_v46 = vld [vmem:[%s9923_s3] sm:$0xf]  ;;  %v496_v54 = vld [vmem:[%s9924_s4 + $0x38] sm:$0xff] }
  0x24   : > { %387 = vmatmul.mubr.f32.vlgmr.msra.gmra.mxu0 %v306_v12  ;;  %462 = vmatmul.mubr.f32.vlgmr.msra.gmra.mxu1 %v308_v13  ;;  %v530_v42 = vld [vmem:[%s9924_s4 + $0x148] sm:$0xff]  ;;  %v497_v48 = vld [vmem:[%s9924_s4 + $0x40] sm:$0xff]  ;;  %v6180_v53 = vrot.slane %v488_v46, %v6136_v40  ;;  %v528_v55 = vld [vmem:[%s9924_s4 + $0x138] sm:$0xff]  ;;  %v6190_v57 = vrot.slane %v488_v46, %v6145_v43  ;;  %v6200_v61 = vrot.slane %v488_v46, %v6162_v47 }
  0x25   : > { %4599 = vmatpush3.msra.mxu0 %v504_v14  ;;  %4637 = vmatpush3.msra.mxu1 %v536_v15  ;;  %v529_v49 = vld [vmem:[%s9924_s4 + $0x140] sm:$0xff]  ;;  %v477_v56 = vld [vmem:[%s6150_s21 + $0x28] sm:$0xff]  ;;  %v511_v58 = vld [vmem:[%s9924_s4 + $0xb0] sm:$0xff]  ;;  %v6210_v1 = vrot.slane %v488_v46, %v6171_v50 }
  0x26   : > { %4600 = vmatprep.subr.mxu0 %v519_v16  ;;  %4638 = vmatprep.subr.mxu1 %v551_v17  ;;  %v543_v59 = vld [vmem:[%s9924_s4 + $0x1b0] sm:$0xff]  ;;  %v476_v60 = vld [vmem:[%s6150_s21 + $0x20] sm:$0xff]  ;;  %v479_v0 = vld [vmem:[%s6150_s21 + $0x38] sm:$0xff]  ;;  %v6219_v4 = vadd.f32 %v6180_v53, %v477_v56 }
  0x27   : > { %4601 = vmatpush3.msra.mxu0 %v503_v18  ;;  %4639 = vmatpush3.msra.mxu1 %v535_v19  ;;  %v495_v62 = vld [vmem:[%s9924_s4 + $0x30] sm:$0xff]  ;;  %v510_v2 = vld [vmem:[%s9924_s4 + $0xa8] sm:$0xff]  ;;  %v6229_v8 = vadd.f32 %v6190_v57, %v476_v60  ;;  %v509_v9 = vld [vmem:[%s9924_s4 + $0xa0] sm:$0xff]  ;;  %v6238_v11 = vadd.f32 %v6200_v61, %v479_v0 }
  0x28   : > { %4602 = vmatprep.subr.mxu0 %v518_v20  ;;  %4640 = vmatprep.subr.mxu1 %v550_v21  ;;  %v527_v63 = vld [vmem:[%s9924_s4 + $0x130] sm:$0xff]  ;;  %v542_v3 = vld [vmem:[%s9924_s4 + $0x1a8] sm:$0xff]  ;;  %v541_v10 = vld [vmem:[%s9924_s4 + $0x1a0] sm:$0xff]  ;;  %v6257_v17 = vrot.slane %v6219_v4, %v6145_v43 }
  0x29   : > { %4603 = vmatpush3.msra.mxu0 %v502_v23  ;;  %4641 = vmatpush3.msra.mxu1 %v534_v24  ;;  %v478_v5 = vld [vmem:[%s6150_s21 + $0x30] sm:$0xff]  ;;  %v494_v6 = vld [vmem:[%s9924_s4 + $0x28] sm:$0xff]  ;;  %v493_v12 = vld [vmem:[%s9924_s4 + $0x20] sm:$0xff]  ;;  %v6270_v21 = vrot.slane %v6229_v8, %v6145_v43 }
  0x2a   : > { %4604 = vmatprep.subr.mxu0 %v517_v25  ;;  %4642 = vmatprep.subr.mxu1 %v549_v26  ;;  %v526_v7 = vld [vmem:[%s9924_s4 + $0x128] sm:$0xff]  ;;  %v525_v13 = vld [vmem:[%s9924_s4 + $0x120] sm:$0xff]  ;;  %v6247_v14 = vadd.f32 %v6210_v1, %v478_v5  ;;  %v508_v15 = vld [vmem:[%s9924_s4 + $0x98] sm:$0xff]  ;;  %v6281_v25 = vrot.slane %v6238_v11, %v6145_v43 }
  0x2b   : > { %4605 = vmatpush3.msra.mxu0 %v501_v27  ;;  %4643 = vmatpush3.msra.mxu1 %v533_v28  ;;  %v540_v16 = vld [vmem:[%s9924_s4 + $0x198] sm:$0xff]  ;;  %v6266_v20 = vld [vmem:[%s6150_s21 + $0x8] sm:$0xff]  ;;  %v507_v23 = vld [vmem:[%s9924_s4 + $0x90] sm:$0xff] }
  0x2c   : > { %4606 = vmatprep.subr.mxu0 %v516_v29  ;;  %4644 = vmatprep.subr.mxu1 %v548_v30  ;;  %v492_v18 = vld [vmem:[%s9924_s4 + $0x18] sm:$0xff]  ;;  %v311_v22 = vld [vmem:[%s6048_s17 + $0x28] sm:$0xff]  ;;  %v6277_v24 = vld [vmem:[%s6150_s21] sm:$0xff]  ;;  %v6292_v29 = vrot.slane %v6247_v14, %v6145_v43 }
  0x2d   : > { %4607 = vmatpush3.msra.mxu0 %v500_v32  ;;  %4645 = vmatpush3.msra.mxu1 %v532_v33  ;;  %v524_v19 = vld [vmem:[%s9924_s4 + $0x118] sm:$0xff]  ;;  %v539_v26 = vld [vmem:[%s9924_s4 + $0x190] sm:$0xff]  ;;  %v310_v27 = vld [vmem:[%s6048_s17 + $0x20] sm:$0xff]  ;;  %v1556_v33 = vadd.f32 %v6257_v17, %v6266_v20 }
  0x2e   : > { %4608 = vmatprep.subr.mxu0 %v515_v34  ;;  %4646 = vmatprep.subr.mxu1 %v547_v35  ;;  %v6288_v28 = vld [vmem:[%s6150_s21 + $0x18] sm:$0xff]  ;;  %v491_v30 = vld [vmem:[%s9924_s4 + $0x10] sm:$0xff]  ;;  %v505_v46 = vld [vmem:[%s9924_s4 + $0x80] sm:$0xff] }
  0x2f   : > { %4609 = vmatpush3.msra.mxu0 %v499_v36  ;;  %4647 = vmatpush3.msra.mxu1 %v531_v37  ;;  %v523_v32 = vld [vmem:[%s9924_s4 + $0x110] sm:$0xff]  ;;  %v313_v35 = vld [vmem:[%s6048_s17 + $0x38] sm:$0xff]  ;;  %v506_v36 = vld [vmem:[%s9924_s4 + $0x88] sm:$0xff]  ;;  %v1555_v37 = vadd.f32 %v6270_v21, %v6277_v24 }
  0x30   : > { %4610 = vmatprep.subr.mxu0 %v514_v38  ;;  %4648 = vmatprep.subr.mxu1 %v546_v39  ;;  %v6303_v34 = vld [vmem:[%s6150_s21 + $0x10] sm:$0xff]  ;;  %v538_v38 = vld [vmem:[%s9924_s4 + $0x188] sm:$0xff]  ;;  %v584_v56 = vld [vmem:[%s9924_s4 + $0x2f8] sm:$0xff] }
  0x31   : > { %4611 = vmatpush3.msra.mxu0 %v498_v41  ;;  %4649 = vmatpush3.msra.mxu1 %v530_v42  ;;  %v312_v39 = vld [vmem:[%s6048_s17 + $0x30] sm:$0xff]  ;;  %v1558_v41 = vadd.f32 %v6281_v25, %v6288_v28  ;;  %v490_v42 = vld [vmem:[%s9924_s4 + $0x8] sm:$0xff]  ;;  %v568_v60 = vld [vmem:[%s9924_s4 + $0x278] sm:$0xff]  ;;  %s282_s17 = sand.u32 1, %s5939_s24  }
  0x32   : > { %4612 = vmatprep.subr.mxu0 %v513_v44  ;;  %4650 = vmatprep.subr.mxu1 %v545_v45  ;;  %v522_v44 = vld [vmem:[%s9924_s4 + $0x108] sm:$0xff]  ;;  %v1557_v45 = vadd.f32 %v6292_v29, %v6303_v34  ;;  %v615_v0 = vld [vmem:[%s9924_s4 + $0x3f0] sm:$0xff]  ;;  %s4577_s16 = sshll.u32 %s282_s17, 4  ;;  %s9880_s30 = scalar_lea.sflag [#allocation4], %s282_s17 }
  0x33   : > { %4613 = vmatpush3.msra.mxu0 %v497_v48  ;;  %4651 = vmatpush3.msra.mxu1 %v529_v49  ;;  %v537_v48 = vld [vmem:[%s9924_s4 + $0x180] sm:$0xff]  ;;  %v1564_v49 = vmax.f32 %v1556_v33, 0.0  ;;  %v582_v5 = vld [vmem:[%s9924_s4 + $0x2e8] sm:$0xff] }
  0x34   : > { %4614 = vmatprep.subr.mxu0 %v512_v51  ;;  %4652 = vmatprep.subr.mxu1 %v544_v52  ;;  %v489_v51 = vld [vmem:[%s9924_s4] sm:$0xff]  ;;  %v1563_v52 = vmax.f32 %v1555_v37, 0.0  ;;  %v610_v33 = vld [vmem:[%s9924_s4 + $0x3c8] sm:$0xff] }
  0x35   : > { %4615 = vmatpush3.msra.mxu0 %v496_v54  ;;  %4653 = vmatpush3.msra.mxu1 %v528_v55  ;;  %v521_v54 = vld [vmem:[%s9924_s4 + $0x100] sm:$0xff]  ;;  %v1566_v55 = vmax.f32 %v1558_v41, 0.0 }
  0x36   : > { %4616 = vmatprep.subr.mxu0 %v511_v58  ;;  %4654 = vmatprep.subr.mxu1 %v543_v59  ;;  %v1565_v58 = vmax.f32 %v1557_v45, 0.0  ;;  %v616_v59 = vld [vmem:[%s9924_s4 + $0x3f8] sm:$0xff]  ;;  %v577_v37 = vld [vmem:[%s9924_s4 + $0x2c0] sm:$0xff] }
  0x37   : > { %4617 = vmatpush3.msra.mxu0 %v495_v62  ;;  %4655 = vmatpush3.msra.mxu1 %v527_v63  ;;  %v600_v62 = vld [vmem:[%s9924_s4 + $0x378] sm:$0xff]  ;;  %v583_v63 = vld [vmem:[%s9924_s4 + $0x2f0] sm:$0xff]  ;;  %v593_v41 = vld [vmem:[%s9924_s4 + $0x340] sm:$0xff] }
  0x38   : > { %4618 = vmatprep.subr.mxu0 %v510_v2  ;;  %4656 = vmatprep.subr.mxu1 %v542_v3  ;;  %v567_v2 = vld [vmem:[%s9924_s4 + $0x270] sm:$0xff]  ;;  %v560_v45 = vld [vmem:[%s9924_s4 + $0x238] sm:$0xff] }
  0x39   : > { %4619 = vmatpush3.msra.mxu0 %v494_v6  ;;  %4657 = vmatpush3.msra.mxu1 %v526_v7  ;;  %v599_v3 = vld [vmem:[%s9924_s4 + $0x370] sm:$0xff]  ;;  %v614_v6 = vld [vmem:[%s9924_s4 + $0x3e8] sm:$0xff] }
  0x3a   : > { %4620 = vmatprep.subr.mxu0 %v509_v9  ;;  %4658 = vmatprep.subr.mxu1 %v541_v10  ;;  %v566_v7 = vld [vmem:[%s9924_s4 + $0x268] sm:$0xff]  ;;  %v581_v10 = vld [vmem:[%s9924_s4 + $0x2e0] sm:$0xff] }
  0x3b   : > { %4621 = vmatpush3.msra.mxu0 %v493_v12  ;;  %4659 = vmatpush3.msra.mxu1 %v525_v13  ;;  %v598_v9 = vld [vmem:[%s9924_s4 + $0x368] sm:$0xff]  ;;  %v613_v12 = vld [vmem:[%s9924_s4 + $0x3e0] sm:$0xff] }
  0x3c   : > { %4622 = vmatprep.subr.mxu0 %v508_v15  ;;  %4660 = vmatprep.subr.mxu1 %v540_v16  ;;  %v565_v13 = vld [vmem:[%s9924_s4 + $0x260] sm:$0xff]  ;;  %v580_v16 = vld [vmem:[%s9924_s4 + $0x2d8] sm:$0xff] }
  0x3d   : > { %4623 = vmatpush3.msra.mxu0 %v492_v18  ;;  %4661 = vmatpush3.msra.mxu1 %v524_v19  ;;  %v597_v15 = vld [vmem:[%s9924_s4 + $0x360] sm:$0xff]  ;;  %v612_v18 = vld [vmem:[%s9924_s4 + $0x3d8] sm:$0xff] }
  0x3e   : > { %391 = vmatprep.mubr.f32.mxu0 %v311_v22  ;;  %4624 = vmatprep.subr.mxu0 %v507_v23  ;;  %v564_v19 = vld [vmem:[%s9924_s4 + $0x258] sm:$0xff]  ;;  %v579_v23 = vld [vmem:[%s9924_s4 + $0x2d0] sm:$0xff] }
  0x3f   : > { %4662 = vmatprep.subr.mxu1 %v539_v26  ;;  %392 = vmatmul.mubr.f32.gmra.mxu0 %v310_v27  ;;  %v596_v22 = vld [vmem:[%s9924_s4 + $0x358] sm:$0xff]  ;;  %v611_v26 = vld [vmem:[%s9924_s4 + $0x3d0] sm:$0xff] }
  0x40   : > { %4625 = vmatpush3.msra.mxu0 %v491_v30  ;;  %4663 = vmatpush3.msra.mxu1 %v523_v32  ;;  %v563_v27 = vld [vmem:[%s9924_s4 + $0x250] sm:$0xff]  ;;  %v578_v32 = vld [vmem:[%s9924_s4 + $0x2c8] sm:$0xff] }
  0x41   : > { %466 = vmatprep.mubr.f32.mxu1 %v313_v35  ;;  %4626 = vmatprep.subr.mxu0 %v506_v36  ;;  %v595_v30 = vld [vmem:[%s9924_s4 + $0x350] sm:$0xff]  ;;  %v562_v35 = vld [vmem:[%s9924_s4 + $0x248] sm:$0xff] }
  0x42   : > { %4664 = vmatprep.subr.mxu1 %v538_v38  ;;  %467 = vmatmul.mubr.f32.gmra.mxu1 %v312_v39  ;;  %v594_v36 = vld [vmem:[%s9924_s4 + $0x348] sm:$0xff]  ;;  %v609_v38 = vld [vmem:[%s9924_s4 + $0x3c0] sm:$0xff] }
  0x43   : > { %4627 = vmatpush3.msra.mxu0 %v490_v42  ;;  %4665 = vmatpush3.msra.mxu1 %v522_v44  ;;  %v561_v39 = vld [vmem:[%s9924_s4 + $0x240] sm:$0xff]  ;;  %v576_v42 = vld [vmem:[%s9924_s4 + $0x2b8] sm:$0xff] }
  0x44   : > { %4628 = vmatprep.subr.mxu0 %v505_v46  ;;  %4666 = vmatprep.subr.mxu1 %v537_v48  ;;  %v608_v44 = vld [vmem:[%s9924_s4 + $0x3b8] sm:$0xff]  ;;  %v575_v48 = vld [vmem:[%s9924_s4 + $0x2b0] sm:$0xff] }
  0x45   : > { %4629 = vmatpush3.msra.mxu0 %v489_v51  ;;  %2120 = vmatprep.mubr.f32.mxu0 %v1564_v49  ;;  %v592_v46 = vld [vmem:[%s9924_s4 + $0x338] sm:$0xff]  ;;  %v607_v49 = vld [vmem:[%s9924_s4 + $0x3b0] sm:$0xff]  ;;  %v6452_v51 = vld [vmem:[%s6150_s21 + $0x48] sm:$0xff] }
  0x46   : > { %4667 = vmatpush3.msra.mxu1 %v521_v54  ;;  %2121 = vmatmul.mubr.f32.vlgmr.msra.gmra.mxu0 %v1563_v52  ;;  %v559_v52 = vld [vmem:[%s9924_s4 + $0x230] sm:$0xff] }
  0x47   : > { %2195 = vmatprep.mubr.f32.mxu1 %v1566_v55  ;;  %4674 = vmatprep.subr.mxu0 %v584_v56  ;;  %v591_v54 = vld [vmem:[%s9924_s4 + $0x330] sm:$0xff]  ;;  %v6461_v55 = vld [vmem:[%s6150_s21 + $0x40] sm:$0xff]  ;;  %v574_v56 = vld [vmem:[%s9924_s4 + $0x2a8] sm:$0xff] }
  0x48   : > { %4712 = vmatprep.subr.mxu1 %v616_v59  ;;  %2196 = vmatmul.mubr.f32.vlgmr.msra.gmra.mxu1 %v1565_v58  ;;  %v606_v58 = vld [vmem:[%s9924_s4 + $0x3a8] sm:$0xff] }
  0x49   : > { %4675 = vmatpush3.msra.mxu0 %v568_v60  ;;  %4713 = vmatpush3.msra.mxu1 %v600_v62  ;;  %v558_v59 = vld [vmem:[%s9924_s4 + $0x228] sm:$0xff]  ;;  %v1560_v62 = vadd.f32 %v6257_v17, %v6452_v51  ;;  %v557_v17 = vld [vmem:[%s9924_s4 + $0x220] sm:$0xff] }
  0x4a   : > { %4676 = vmatprep.subr.mxu0 %v583_v63  ;;  %4714 = vmatprep.subr.mxu1 %v615_v0  ;;  %v590_v60 = vld [vmem:[%s9924_s4 + $0x328] sm:$0xff]  ;;  %v6478_v63 = vld [vmem:[%s6150_s21 + $0x58] sm:$0xff]  ;;  %v573_v0 = vld [vmem:[%s9924_s4 + $0x2a0] sm:$0xff] }
  0x4b   : > { %4677 = vmatpush3.msra.mxu0 %v567_v2  ;;  %4715 = vmatpush3.msra.mxu1 %v599_v3  ;;  %v605_v2 = vld [vmem:[%s9924_s4 + $0x3a0] sm:$0xff]  ;;  %v1559_v3 = vadd.f32 %v6270_v21, %v6461_v55  ;;  %v604_v21 = vld [vmem:[%s9924_s4 + $0x398] sm:$0xff] }
  0x4c   : > { %4678 = vmatprep.subr.mxu0 %v582_v5  ;;  %4716 = vmatprep.subr.mxu1 %v614_v6  ;;  %v6489_v5 = vld [vmem:[%s6150_s21 + $0x50] sm:$0xff]  ;;  %v589_v6 = vld [vmem:[%s9924_s4 + $0x320] sm:$0xff] }
  0x4d   : > { %4679 = vmatpush3.msra.mxu0 %v566_v7  ;;  %4717 = vmatpush3.msra.mxu1 %v598_v9  ;;  %v572_v7 = vld [vmem:[%s9924_s4 + $0x298] sm:$0xff]  ;;  %v1562_v9 = vadd.f32 %v6281_v25, %v6478_v63  ;;  %v1574_v25 = vrot.slane %v6229_v8, %v6136_v40 }
  0x4e   : > { %4680 = vmatprep.subr.mxu0 %v581_v10  ;;  %4718 = vmatprep.subr.mxu1 %v613_v12  ;;  %v1578_v10 = vrot.slane %v6219_v4, %v6136_v40  ;;  %v556_v12 = vld [vmem:[%s9924_s4 + $0x218] sm:$0xff] }
  0x4f   : > { %4681 = vmatpush3.msra.mxu0 %v565_v13  ;;  %4719 = vmatpush3.msra.mxu1 %v597_v15  ;;  %v588_v13 = vld [vmem:[%s9924_s4 + $0x318] sm:$0xff]  ;;  %v1568_v15 = vmax.f32 %v1560_v62, 0.0 }
  0x50   : > { %4682 = vmatprep.subr.mxu0 %v580_v16  ;;  %4720 = vmatprep.subr.mxu1 %v612_v18  ;;  %v1561_v16 = vadd.f32 %v6292_v29, %v6489_v5  ;;  %v571_v18 = vld [vmem:[%s9924_s4 + $0x290] sm:$0xff]  ;;  %v1582_v29 = vrot.slane %v6247_v14, %v6136_v40  ;;  %v680_v62 = vld [vmem:[%s9924_s4 + $0x5f8] sm:$0xff] }
  0x51   : > { %4683 = vmatpush3.msra.mxu0 %v564_v19  ;;  %4721 = vmatpush3.msra.mxu1 %v596_v22  ;;  %v1567_v19 = vmax.f32 %v1559_v3, 0.0  ;;  %v1586_v22 = vrot.slane %v6238_v11, %v6136_v40 }
  0x52   : > { %4684 = vmatprep.subr.mxu0 %v579_v23  ;;  %4722 = vmatprep.subr.mxu1 %v611_v26  ;;  %v603_v23 = vld [vmem:[%s9924_s4 + $0x390] sm:$0xff] }
  0x53   : > { %4685 = vmatpush3.msra.mxu0 %v563_v27  ;;  %4723 = vmatpush3.msra.mxu1 %v595_v30  ;;  %v555_v26 = vld [vmem:[%s9924_s4 + $0x210] sm:$0xff]  ;;  %v1570_v30 = vmax.f32 %v1562_v9, 0.0  ;;  %v1594_v3 = vadd.f32 %v1586_v22, %v6478_v63 }
  0x54   : > { %4686 = vmatprep.subr.mxu0 %v578_v32  ;;  %4724 = vmatprep.subr.mxu1 %v610_v33  ;;  %v587_v27 = vld [vmem:[%s9924_s4 + $0x310] sm:$0xff]  ;;  %v1588_v32 = vadd.f32 %v1578_v10, %v6266_v20  ;;  %v570_v33 = vld [vmem:[%s9924_s4 + $0x288] sm:$0xff] }
  0x55   : > { %4687 = vmatpush3.msra.mxu0 %v562_v35  ;;  %4725 = vmatpush3.msra.mxu1 %v594_v36  ;;  %v1569_v35 = vmax.f32 %v1561_v16, 0.0  ;;  %v1587_v36 = vadd.f32 %v1574_v25, %v6277_v24  ;;  %v1602_v16 = vmax.f32 %v1594_v3, 0.0  ;;  %v670_v3 = vld [vmem:[%s9924_s4 + $0x5a8] sm:$0xff] }
  0x56   : > { %4688 = vmatprep.subr.mxu0 %v577_v37  ;;  %4726 = vmatprep.subr.mxu1 %v609_v38  ;;  %v602_v37 = vld [vmem:[%s9924_s4 + $0x388] sm:$0xff]  ;;  %v1590_v38 = vadd.f32 %v1586_v22, %v6288_v28  ;;  %v645_v22 = vld [vmem:[%s9924_s4 + $0x4e0] sm:$0xff] }
  0x57   : > { %4689 = vmatpush3.msra.mxu0 %v561_v39  ;;  %4727 = vmatpush3.msra.mxu1 %v593_v41  ;;  %v554_v39 = vld [vmem:[%s9924_s4 + $0x208] sm:$0xff] }
  0x58   : > { %4690 = vmatprep.subr.mxu0 %v576_v42  ;;  %4728 = vmatprep.subr.mxu1 %v608_v44  ;;  %v586_v41 = vld [vmem:[%s9924_s4 + $0x308] sm:$0xff]  ;;  %v1589_v42 = vadd.f32 %v1582_v29, %v6303_v34  ;;  %v569_v44 = vld [vmem:[%s9924_s4 + $0x280] sm:$0xff] }
  0x59   : > { %4691 = vmatpush3.msra.mxu0 %v560_v45  ;;  %4729 = vmatpush3.msra.mxu1 %v592_v46  ;;  %v601_v45 = vld [vmem:[%s9924_s4 + $0x380] sm:$0xff]  ;;  %v1596_v46 = vmax.f32 %v1588_v32, 0.0  ;;  %v628_v32 = vld [vmem:[%s9924_s4 + $0x458] sm:$0xff] }
  0x5a   : > { %4692 = vmatprep.subr.mxu0 %v575_v48  ;;  %4730 = vmatprep.subr.mxu1 %v607_v49  ;;  %v553_v48 = vld [vmem:[%s9924_s4 + $0x200] sm:$0xff]  ;;  %v1595_v49 = vmax.f32 %v1587_v36, 0.0  ;;  %v675_v36 = vld [vmem:[%s9924_s4 + $0x5d0] sm:$0xff] }
  0x5b   : > { %4693 = vmatpush3.msra.mxu0 %v559_v52  ;;  %4731 = vmatpush3.msra.mxu1 %v591_v54  ;;  %v585_v52 = vld [vmem:[%s9924_s4 + $0x300] sm:$0xff]  ;;  %v1598_v54 = vmax.f32 %v1590_v38, 0.0  ;;  %v659_v38 = vld [vmem:[%s9924_s4 + $0x550] sm:$0xff] }
  0x5c   : > { %4694 = vmatprep.subr.mxu0 %v574_v56  ;;  %4732 = vmatprep.subr.mxu1 %v606_v58  ;;  %v1592_v56 = vadd.f32 %v1578_v10, %v6452_v51  ;;  %v648_v58 = vld [vmem:[%s9924_s4 + $0x4f8] sm:$0xff]  ;;  %v1593_v10 = vadd.f32 %v1582_v29, %v6489_v5  ;;  %v629_v29 = vld [vmem:[%s9924_s4 + $0x460] sm:$0xff] }
  0x5d   : > { %4695 = vmatpush3.msra.mxu0 %v558_v59  ;;  %4733 = vmatpush3.msra.mxu1 %v590_v60  ;;  %v1597_v59 = vmax.f32 %v1589_v42, 0.0  ;;  %v1591_v60 = vadd.f32 %v1574_v25, %v6461_v55  ;;  %v630_v25 = vld [vmem:[%s9924_s4 + $0x468] sm:$0xff] }
  0x5e   : > { %4696 = vmatprep.subr.mxu0 %v573_v0  ;;  %4734 = vmatprep.subr.mxu1 %v605_v2  ;;  %v632_v0 = vld [vmem:[%s9924_s4 + $0x478] sm:$0xff]  ;;  %v626_v42 = vld [vmem:[%s9924_s4 + $0x448] sm:$0xff] }
  0x5f   : > { %4697 = vmatpush3.msra.mxu0 %v557_v17  ;;  %4735 = vmatpush3.msra.mxu1 %v589_v6  ;;  %v664_v2 = vld [vmem:[%s9924_s4 + $0x578] sm:$0xff]  ;;  %v647_v17 = vld [vmem:[%s9924_s4 + $0x4f0] sm:$0xff]  ;;  %v1599_v9 = vmax.f32 %v1591_v60, 0.0 }
  0x60   : > { %4698 = vmatprep.subr.mxu0 %v572_v7  ;;  %4736 = vmatprep.subr.mxu1 %v604_v21  ;;  %v679_v6 = vld [vmem:[%s9924_s4 + $0x5f0] sm:$0xff]  ;;  %v1600_v7 = vmax.f32 %v1592_v56, 0.0  ;;  %v624_v56 = vld [vmem:[%s9924_s4 + $0x438] sm:$0xff] }
  0x61   : > { %4699 = vmatpush3.msra.mxu0 %v556_v12  ;;  %4737 = vmatpush3.msra.mxu1 %v588_v13  ;;  %v631_v21 = vld [vmem:[%s9924_s4 + $0x470] sm:$0xff]  ;;  %v646_v13 = vld [vmem:[%s9924_s4 + $0x4e8] sm:$0xff] }
  0x62   : > { %2125 = vmatprep.mubr.f32.mxu0 %v1568_v15  ;;  %4700 = vmatprep.subr.mxu0 %v571_v18  ;;  %v663_v12 = vld [vmem:[%s9924_s4 + $0x570] sm:$0xff]  ;;  %v678_v15 = vld [vmem:[%s9924_s4 + $0x5e8] sm:$0xff] }
  0x63   : > { %4738 = vmatprep.subr.mxu1 %v603_v23  ;;  %2126 = vmatmul.mubr.f32.gmra.mxu0 %v1567_v19  ;;  %v662_v18 = vld [vmem:[%s9924_s4 + $0x568] sm:$0xff]  ;;  %v1601_v19 = vmax.f32 %v1593_v10, 0.0  ;;  %v677_v23 = vld [vmem:[%s9924_s4 + $0x5e0] sm:$0xff]  ;;  %v671_v60 = vld [vmem:[%s9924_s4 + $0x5b0] sm:$0xff] }
  0x64   : > { %4701 = vmatpush3.msra.mxu0 %v555_v26  ;;  %4739 = vmatpush3.msra.mxu1 %v587_v27  ;;  %v661_v26 = vld [vmem:[%s9924_s4 + $0x560] sm:$0xff]  ;;  %v644_v27 = vld [vmem:[%s9924_s4 + $0x4d8] sm:$0xff] }
  0x65   : > { %2200 = vmatprep.mubr.f32.mxu1 %v1570_v30  ;;  %4702 = vmatprep.subr.mxu0 %v570_v33  ;;  %v676_v30 = vld [vmem:[%s9924_s4 + $0x5d8] sm:$0xff]  ;;  %v621_v10 = vld [vmem:[%s9924_s4 + $0x420] sm:$0xff] }
  0x66   : > { %4740 = vmatprep.subr.mxu1 %v602_v37  ;;  %2201 = vmatmul.mubr.f32.gmra.mxu1 %v1569_v35  ;;  %v660_v33 = vld [vmem:[%s9924_s4 + $0x558] sm:$0xff]  ;;  %v643_v35 = vld [vmem:[%s9924_s4 + $0x4d0] sm:$0xff] }
  0x67   : > { %4703 = vmatpush3.msra.mxu0 %v554_v39  ;;  %4741 = vmatpush3.msra.mxu1 %v586_v41  ;;  %v627_v37 = vld [vmem:[%s9924_s4 + $0x450] sm:$0xff]  ;;  %v642_v39 = vld [vmem:[%s9924_s4 + $0x4c8] sm:$0xff] }
  0x68   : > { %4704 = vmatprep.subr.mxu0 %v569_v44  ;;  %4742 = vmatprep.subr.mxu1 %v601_v45  ;;  %v674_v41 = vld [vmem:[%s9924_s4 + $0x5c8] sm:$0xff]  ;;  %v641_v45 = vld [vmem:[%s9924_s4 + $0x4c0] sm:$0xff] }
  0x69   : > { %4705 = vmatpush3.msra.mxu0 %v553_v48  ;;  %2270 = vmatprep.mubr.f32.mxu0 %v1596_v46  ;;  %v658_v44 = vld [vmem:[%s9924_s4 + $0x548] sm:$0xff]  ;;  %v673_v46 = vld [vmem:[%s9924_s4 + $0x5c0] sm:$0xff] }
  0x6a   : > { %4743 = vmatpush3.msra.mxu1 %v585_v52  ;;  %2271 = vmatmul.mubr.f32.vlgmr.msra.gmra.mxu0 %v1595_v49  ;;  %v625_v48 = vld [vmem:[%s9924_s4 + $0x440] sm:$0xff]  ;;  %v640_v52 = vld [vmem:[%s9924_s4 + $0x4b8] sm:$0xff] }
  0x6b   : > { %2345 = vmatprep.mubr.f32.mxu1 %v1598_v54  ;;  %4750 = vmatprep.subr.mxu0 %v648_v58  ;;  %v657_v49 = vld [vmem:[%s9924_s4 + $0x540] sm:$0xff]  ;;  %v672_v54 = vld [vmem:[%s9924_s4 + $0x5b8] sm:$0xff] }
  0x6c   : > { %4788 = vmatprep.subr.mxu1 %v680_v62  ;;  %2346 = vmatmul.mubr.f32.vlgmr.msra.gmra.mxu1 %v1597_v59  ;;  %v656_v58 = vld [vmem:[%s9924_s4 + $0x538] sm:$0xff]  ;;  %v639_v59 = vld [vmem:[%s9924_s4 + $0x4b0] sm:$0xff] }
  0x6d   : > { %4751 = vmatpush3.msra.mxu0 %v632_v0  ;;  %4789 = vmatpush3.msra.mxu1 %v664_v2  ;;  %v623_v62 = vld [vmem:[%s9924_s4 + $0x430] sm:$0xff]  ;;  %v638_v2 = vld [vmem:[%s9924_s4 + $0x4a8] sm:$0xff] }
  0x6e   : > { %4752 = vmatprep.subr.mxu0 %v647_v17  ;;  %4790 = vmatprep.subr.mxu1 %v679_v6  ;;  %v655_v0 = vld [vmem:[%s9924_s4 + $0x530] sm:$0xff]  ;;  %v622_v17 = vld [vmem:[%s9924_s4 + $0x428] sm:$0xff] }
  0x6f   : > { %2275 = vmatprep.mubr.f32.mxu0 %v1600_v7  ;;  %4753 = vmatpush3.msra.mxu0 %v631_v21  ;;  %v654_v6 = vld [vmem:[%s9924_s4 + $0x528] sm:$0xff]  ;;  %v637_v7 = vld [vmem:[%s9924_s4 + $0x4a0] sm:$0xff] }
  0x70   : > { %4791 = vmatpush3.msra.mxu1 %v663_v12  ;;  %2276 = vmatmul.mubr.f32.gmra.mxu0 %v1599_v9  ;;  %v669_v21 = vld [vmem:[%s9924_s4 + $0x5a0] sm:$0xff]  ;;  %v1610_v9 = vrot.slane %v6219_v4, %v6171_v50 }
  0x71   : > { %4754 = vmatprep.subr.mxu0 %v646_v13  ;;  %4792 = vmatprep.subr.mxu1 %v678_v15  ;;  %v653_v12 = vld [vmem:[%s9924_s4 + $0x520] sm:$0xff]  ;;  %v1606_v13 = vrot.slane %v6229_v8, %v6171_v50  ;;  %v636_v15 = vld [vmem:[%s9924_s4 + $0x498] sm:$0xff] }
  0x72   : > { %2350 = vmatprep.mubr.f32.mxu1 %v1602_v16  ;;  %4755 = vmatpush3.msra.mxu0 %v630_v25  ;;  %v668_v16 = vld [vmem:[%s9924_s4 + $0x598] sm:$0xff]  ;;  %v1618_v25 = vrot.slane %v6238_v11, %v6171_v50 }
  0x73   : > { %4793 = vmatpush3.msra.mxu1 %v662_v18  ;;  %4756 = vmatprep.subr.mxu0 %v645_v22  ;;  %v620_v18 = vld [vmem:[%s9924_s4 + $0x418] sm:$0xff]  ;;  %v1614_v22 = vrot.slane %v6247_v14, %v6171_v50 }
  0x74   : > { %2351 = vmatmul.mubr.f32.gmra.mxu1 %v1601_v19  ;;  %4794 = vmatprep.subr.mxu1 %v677_v23  ;;  %v652_v19 = vld [vmem:[%s9924_s4 + $0x518] sm:$0xff]  ;;  %v635_v23 = vld [vmem:[%s9924_s4 + $0x490] sm:$0xff] }
  0x75   : > { %4757 = vmatpush3.msra.mxu0 %v629_v29  ;;  %4795 = vmatpush3.msra.mxu1 %v661_v26  ;;  %v667_v29 = vld [vmem:[%s9924_s4 + $0x590] sm:$0xff]  ;;  %v1620_v26 = vadd.f32 %v1610_v9, %v6266_v20 }
  0x76   : > { %4758 = vmatprep.subr.mxu0 %v644_v27  ;;  %4796 = vmatprep.subr.mxu1 %v676_v30  ;;  %v619_v27 = vld [vmem:[%s9924_s4 + $0x410] sm:$0xff] }
  0x77   : > { %4759 = vmatpush3.msra.mxu0 %v628_v32  ;;  %4797 = vmatpush3.msra.mxu1 %v660_v33  ;;  %v651_v30 = vld [vmem:[%s9924_s4 + $0x510] sm:$0xff]  ;;  %v1619_v32 = vadd.f32 %v1606_v13, %v6277_v24  ;;  %v634_v33 = vld [vmem:[%s9924_s4 + $0x488] sm:$0xff] }
  0x78   : > { %4760 = vmatprep.subr.mxu0 %v643_v35  ;;  %4798 = vmatprep.subr.mxu1 %v675_v36  ;;  %v666_v35 = vld [vmem:[%s9924_s4 + $0x588] sm:$0xff]  ;;  %v1622_v36 = vadd.f32 %v1618_v25, %v6288_v28 }
  0x79   : > { %4761 = vmatpush3.msra.mxu0 %v627_v37  ;;  %4799 = vmatpush3.msra.mxu1 %v659_v38  ;;  %v618_v37 = vld [vmem:[%s9924_s4 + $0x408] sm:$0xff] }
  0x7a   : > { %4762 = vmatprep.subr.mxu0 %v642_v39  ;;  %4800 = vmatprep.subr.mxu1 %v674_v41  ;;  %v650_v38 = vld [vmem:[%s9924_s4 + $0x508] sm:$0xff]  ;;  %v1621_v39 = vadd.f32 %v1614_v22, %v6303_v34  ;;  %v633_v41 = vld [vmem:[%s9924_s4 + $0x480] sm:$0xff] }
  0x7b   : > { %4763 = vmatpush3.msra.mxu0 %v626_v42  ;;  %4801 = vmatpush3.msra.mxu1 %v658_v44  ;;  %v665_v42 = vld [vmem:[%s9924_s4 + $0x580] sm:$0xff]  ;;  %v1628_v44 = vmax.f32 %v1620_v26, 0.0  ;;  %v740_v26 = vld [vmem:[%s9924_s4 + $0x7d8] sm:$0xff] }
  0x7c   : > { %4764 = vmatprep.subr.mxu0 %v641_v45  ;;  %4802 = vmatprep.subr.mxu1 %v673_v46  ;;  %v617_v45 = vld [vmem:[%s9924_s4 + $0x400] sm:$0xff]  ;;  %v1627_v46 = vmax.f32 %v1619_v32, 0.0  ;;  %v707_v32 = vld [vmem:[%s9924_s4 + $0x6d0] sm:$0xff] }
  0x7d   : > { %4765 = vmatpush3.msra.mxu0 %v625_v48  ;;  %4803 = vmatpush3.msra.mxu1 %v657_v49  ;;  %v649_v48 = vld [vmem:[%s9924_s4 + $0x500] sm:$0xff]  ;;  %v1630_v49 = vmax.f32 %v1622_v36, 0.0  ;;  %v723_v36 = vld [vmem:[%s9924_s4 + $0x750] sm:$0xff] }
  0x7e   : > { %4766 = vmatprep.subr.mxu0 %v640_v52  ;;  %4804 = vmatprep.subr.mxu1 %v672_v54  ;;  %v1624_v52 = vadd.f32 %v1610_v9, %v6452_v51  ;;  %v712_v54 = vld [vmem:[%s9924_s4 + $0x6f8] sm:$0xff]  ;;  %v727_v9 = vld [vmem:[%s9924_s4 + $0x770] sm:$0xff] }
  0x7f   : > { %4767 = vmatpush3.msra.mxu0 %v624_v56  ;;  %4805 = vmatpush3.msra.mxu1 %v656_v58  ;;  %v1629_v56 = vmax.f32 %v1621_v39, 0.0  ;;  %v1623_v58 = vadd.f32 %v1606_v13, %v6461_v55  ;;  %v690_v39 = vld [vmem:[%s9924_s4 + $0x648] sm:$0xff] }
  0x80   : > { %4768 = vmatprep.subr.mxu0 %v639_v59  ;;  %4806 = vmatprep.subr.mxu1 %v671_v60  ;;  %v744_v59 = vld [vmem:[%s9924_s4 + $0x7f8] sm:$0xff] }
  0x81   : > { %4769 = vmatpush3.msra.mxu0 %v623_v62  ;;  %4807 = vmatpush3.msra.mxu1 %v655_v0  ;;  %v696_v60 = vld [vmem:[%s9924_s4 + $0x678] sm:$0xff]  ;;  %v1626_v0 = vadd.f32 %v1618_v25, %v6478_v63 }
  0x82   : > { %4770 = vmatprep.subr.mxu0 %v638_v2  ;;  %4808 = vmatprep.subr.mxu1 %v670_v3  ;;  %v728_v62 = vld [vmem:[%s9924_s4 + $0x778] sm:$0xff]  ;;  %v711_v2 = vld [vmem:[%s9924_s4 + $0x6f0] sm:$0xff] }
  0x83   : > { %4771 = vmatpush3.msra.mxu0 %v622_v17  ;;  %4809 = vmatpush3.msra.mxu1 %v654_v6  ;;  %v743_v3 = vld [vmem:[%s9924_s4 + $0x7f0] sm:$0xff]  ;;  %v1632_v17 = vmax.f32 %v1624_v52, 0.0  ;;  %v1634_v13 = vmax.f32 %v1626_v0, 0.0  ;;  %v688_v52 = vld [vmem:[%s9924_s4 + $0x638] sm:$0xff]  ;;  %v734_v0 = vld [vmem:[%s9924_s4 + $0x7a8] sm:$0xff] }
  0x84   : > { %4772 = vmatprep.subr.mxu0 %v637_v7  ;;  %4810 = vmatprep.subr.mxu1 %v669_v21  ;;  %v695_v6 = vld [vmem:[%s9924_s4 + $0x670] sm:$0xff]  ;;  %v1631_v7 = vmax.f32 %v1623_v58, 0.0  ;;  %v1625_v21 = vadd.f32 %v1614_v22, %v6489_v5  ;;  %v693_v22 = vld [vmem:[%s9924_s4 + $0x660] sm:$0xff] }
  0x85   : > { %4773 = vmatpush3.msra.mxu0 %v621_v10  ;;  %4811 = vmatpush3.msra.mxu1 %v653_v12  ;;  %v710_v10 = vld [vmem:[%s9924_s4 + $0x6e8] sm:$0xff]  ;;  %v735_v58 = vld [vmem:[%s9924_s4 + $0x7b0] sm:$0xff] }
  0x86   : > { %4774 = vmatprep.subr.mxu0 %v636_v15  ;;  %4812 = vmatprep.subr.mxu1 %v668_v16  ;;  %v742_v12 = vld [vmem:[%s9924_s4 + $0x7e8] sm:$0xff]  ;;  %v1633_v25 = vmax.f32 %v1625_v21, 0.0  ;;  %v685_v21 = vld [vmem:[%s9924_s4 + $0x620] sm:$0xff] }
  0x87   : > { %4775 = vmatpush3.msra.mxu0 %v620_v18  ;;  %4813 = vmatpush3.msra.mxu1 %v652_v19  ;;  %v694_v15 = vld [vmem:[%s9924_s4 + $0x668] sm:$0xff]  ;;  %v709_v18 = vld [vmem:[%s9924_s4 + $0x6e0] sm:$0xff] }
  0x88   : > { %4776 = vmatprep.subr.mxu0 %v635_v23  ;;  %4814 = vmatprep.subr.mxu1 %v667_v29  ;;  %v726_v16 = vld [vmem:[%s9924_s4 + $0x768] sm:$0xff]  ;;  %v741_v19 = vld [vmem:[%s9924_s4 + $0x7e0] sm:$0xff]  ;;  %v708_v29 = vld [vmem:[%s9924_s4 + $0x6d8] sm:$0xff] }
  0x89   : > { %4777 = vmatpush3.msra.mxu0 %v619_v27  ;;  %4815 = vmatpush3.msra.mxu1 %v651_v30  ;;  %v725_v23 = vld [vmem:[%s9924_s4 + $0x760] sm:$0xff]  ;;  %v692_v27 = vld [vmem:[%s9924_s4 + $0x658] sm:$0xff] }
  0x8a   : > { %4778 = vmatprep.subr.mxu0 %v634_v33  ;;  %4816 = vmatprep.subr.mxu1 %v666_v35  ;;  %v724_v30 = vld [vmem:[%s9924_s4 + $0x758] sm:$0xff]  ;;  %v739_v33 = vld [vmem:[%s9924_s4 + $0x7d0] sm:$0xff] }
  0x8b   : > { %4779 = vmatpush3.msra.mxu0 %v618_v37  ;;  %4817 = vmatpush3.msra.mxu1 %v650_v38  ;;  %v691_v35 = vld [vmem:[%s9924_s4 + $0x650] sm:$0xff]  ;;  %v706_v37 = vld [vmem:[%s9924_s4 + $0x6c8] sm:$0xff] }
  0x8c   : > { %4780 = vmatprep.subr.mxu0 %v633_v41  ;;  %4818 = vmatprep.subr.mxu1 %v665_v42  ;;  %v738_v38 = vld [vmem:[%s9924_s4 + $0x7c8] sm:$0xff]  ;;  %v705_v42 = vld [vmem:[%s9924_s4 + $0x6c0] sm:$0xff] }
  0x8d   : > { %4781 = vmatpush3.msra.mxu0 %v617_v45  ;;  %2420 = vmatprep.mubr.f32.mxu0 %v1628_v44  ;;  %v722_v41 = vld [vmem:[%s9924_s4 + $0x748] sm:$0xff]  ;;  %v737_v44 = vld [vmem:[%s9924_s4 + $0x7c0] sm:$0xff] }
  0x8e   : > { %4819 = vmatpush3.msra.mxu1 %v649_v48  ;;  %2421 = vmatmul.mubr.f32.vlgmr.msra.gmra.mxu0 %v1627_v46  ;;  %v689_v45 = vld [vmem:[%s9924_s4 + $0x640] sm:$0xff]  ;;  %v704_v48 = vld [vmem:[%s9924_s4 + $0x6b8] sm:$0xff] }
  0x8f   : > { %2495 = vmatprep.mubr.f32.mxu1 %v1630_v49  ;;  %4826 = vmatprep.subr.mxu0 %v712_v54  ;;  %v721_v46 = vld [vmem:[%s9924_s4 + $0x740] sm:$0xff]  ;;  %v736_v49 = vld [vmem:[%s9924_s4 + $0x7b8] sm:$0xff] }
  0x90   : > { %4864 = vmatprep.subr.mxu1 %v744_v59  ;;  %2496 = vmatmul.mubr.f32.vlgmr.msra.gmra.mxu1 %v1629_v56  ;;  %v720_v54 = vld [vmem:[%s9924_s4 + $0x738] sm:$0xff]  ;;  %v703_v56 = vld [vmem:[%s9924_s4 + $0x6b0] sm:$0xff] }
  0x91   : > { %4827 = vmatpush3.msra.mxu0 %v696_v60  ;;  %4865 = vmatpush3.msra.mxu1 %v728_v62  ;;  %v687_v59 = vld [vmem:[%s9924_s4 + $0x630] sm:$0xff]  ;;  %v702_v62 = vld [vmem:[%s9924_s4 + $0x6a8] sm:$0xff] }
  0x92   : > { %4828 = vmatprep.subr.mxu0 %v711_v2  ;;  %4866 = vmatprep.subr.mxu1 %v743_v3  ;;  %v719_v60 = vld [vmem:[%s9924_s4 + $0x730] sm:$0xff]  ;;  %v686_v2 = vld [vmem:[%s9924_s4 + $0x628] sm:$0xff] }
  0x93   : > { %2425 = vmatprep.mubr.f32.mxu0 %v1632_v17  ;;  %4829 = vmatpush3.msra.mxu0 %v695_v6  ;;  %v718_v3 = vld [vmem:[%s9924_s4 + $0x728] sm:$0xff]  ;;  %v701_v17 = vld [vmem:[%s9924_s4 + $0x6a0] sm:$0xff] }
  0x94   : > { %4867 = vmatpush3.msra.mxu1 %v727_v9  ;;  %2426 = vmatmul.mubr.f32.gmra.mxu0 %v1631_v7  ;;  %v733_v6 = vld [vmem:[%s9924_s4 + $0x7a0] sm:$0xff]  ;;  %v1642_v7 = vrot.slane %v6219_v4, %v6162_v47 }
  0x95   : > { %4830 = vmatprep.subr.mxu0 %v710_v10  ;;  %4868 = vmatprep.subr.mxu1 %v742_v12  ;;  %v717_v9 = vld [vmem:[%s9924_s4 + $0x720] sm:$0xff]  ;;  %v1638_v10 = vrot.slane %v6229_v8, %v6162_v47  ;;  %v700_v12 = vld [vmem:[%s9924_s4 + $0x698] sm:$0xff] }
  0x96   : > { %2500 = vmatprep.mubr.f32.mxu1 %v1634_v13  ;;  %4831 = vmatpush3.msra.mxu0 %v694_v15  ;;  %v732_v13 = vld [vmem:[%s9924_s4 + $0x798] sm:$0xff]  ;;  %v1650_v15 = vrot.slane %v6238_v11, %v6162_v47 }
  0x97   : > { %4869 = vmatpush3.msra.mxu1 %v726_v16  ;;  %4832 = vmatprep.subr.mxu0 %v709_v18  ;;  %v684_v16 = vld [vmem:[%s9924_s4 + $0x618] sm:$0xff]  ;;  %v1646_v18 = vrot.slane %v6247_v14, %v6162_v47 }
  0x98   : > { %2501 = vmatmul.mubr.f32.gmra.mxu1 %v1633_v25  ;;  %4870 = vmatprep.subr.mxu1 %v741_v19  ;;  %v716_v25 = vld [vmem:[%s9924_s4 + $0x718] sm:$0xff]  ;;  %v699_v19 = vld [vmem:[%s9924_s4 + $0x690] sm:$0xff] }
  0x99   : > { %4833 = vmatpush3.msra.mxu0 %v693_v22  ;;  %4871 = vmatpush3.msra.mxu1 %v725_v23  ;;  %v731_v22 = vld [vmem:[%s9924_s4 + $0x790] sm:$0xff]  ;;  %v1652_v23 = vadd.f32 %v1642_v7, %v6266_v20  ;;  %v730_v20 = vld [vmem:[%s9924_s4 + $0x788] sm:$0xff] }
  0x9a   : > { %4834 = vmatprep.subr.mxu0 %v708_v29  ;;  %4872 = vmatprep.subr.mxu1 %v740_v26  ;;  %v683_v29 = vld [vmem:[%s9924_s4 + $0x610] sm:$0xff] }
  0x9b   : > { %4835 = vmatpush3.msra.mxu0 %v692_v27  ;;  %4873 = vmatpush3.msra.mxu1 %v724_v30  ;;  %v715_v26 = vld [vmem:[%s9924_s4 + $0x710] sm:$0xff]  ;;  %v1651_v27 = vadd.f32 %v1638_v10, %v6277_v24  ;;  %v698_v30 = vld [vmem:[%s9924_s4 + $0x688] sm:$0xff] }
  0x9c   : > { %4836 = vmatprep.subr.mxu0 %v707_v32  ;;  %4874 = vmatprep.subr.mxu1 %v739_v33  ;;  %v1654_v32 = vadd.f32 %v1650_v15, %v6288_v28  ;;  %v682_v33 = vld [vmem:[%s9924_s4 + $0x608] sm:$0xff]  ;;  %v729_v28 = vld [vmem:[%s9924_s4 + $0x780] sm:$0xff] }
  0x9d   : > { %4837 = vmatpush3.msra.mxu0 %v691_v35  ;;  %4875 = vmatpush3.msra.mxu1 %v723_v36  ;;  %v714_v24 = vld [vmem:[%s9924_s4 + $0x708] sm:$0xff]  ;;  %v1653_v35 = vadd.f32 %v1646_v18, %v6303_v34  ;;  %v697_v36 = vld [vmem:[%s9924_s4 + $0x680] sm:$0xff] }
  0x9e   : > { %4838 = vmatprep.subr.mxu0 %v706_v37  ;;  %4876 = vmatprep.subr.mxu1 %v738_v38  ;;  %v1660_v37 = vmax.f32 %v1652_v23, 0.0  ;;  %v681_v38 = vld [vmem:[%s9924_s4 + $0x600] sm:$0xff]  ;;  %v802_v23 = vld [vmem:[%s9924_s4 + $0x9c8] sm:$0xff] }
  0x9f   : > { %4839 = vmatpush3.msra.mxu0 %v690_v39  ;;  %4877 = vmatpush3.msra.mxu1 %v722_v41  ;;  %v1659_v39 = vmax.f32 %v1651_v27, 0.0  ;;  %v713_v34 = vld [vmem:[%s9924_s4 + $0x700] sm:$0xff]  ;;  %v1662_v41 = vmax.f32 %v1654_v32, 0.0 }
  0xa0   : > { %4840 = vmatprep.subr.mxu0 %v705_v42  ;;  %4878 = vmatprep.subr.mxu1 %v737_v44  ;;  %v1656_v42 = vadd.f32 %v1642_v7, %v6452_v51  ;;  %v776_v44 = vld [vmem:[%s9924_s4 + $0x8f8] sm:$0xff]  ;;  %v805_v7 = vld [vmem:[%s9924_s4 + $0x9e0] sm:$0xff] }
  0xa1   : > { %4841 = vmatpush3.msra.mxu0 %v689_v45  ;;  %4879 = vmatpush3.msra.mxu1 %v721_v46  ;;  %v1661_v45 = vmax.f32 %v1653_v35, 0.0  ;;  %v1655_v46 = vadd.f32 %v1638_v10, %v6461_v55  ;;  %v760_v51 = vld [vmem:[%s9924_s4 + $0x878] sm:$0xff]  ;;  %v775_v55 = vld [vmem:[%s9924_s4 + $0x8f0] sm:$0xff]  ;;  %v769_v27 = vld [vmem:[%s9924_s4 + $0x8c0] sm:$0xff] }
  0xa2   : > { %4842 = vmatprep.subr.mxu0 %v704_v48  ;;  %4880 = vmatprep.subr.mxu1 %v736_v49  ;;  %v808_v48 = vld [vmem:[%s9924_s4 + $0x9f8] sm:$0xff]  ;;  %v785_v32 = vld [vmem:[%s9924_s4 + $0x940] sm:$0xff] }
  0xa3   : > { %4843 = vmatpush3.msra.mxu0 %v688_v52  ;;  %4881 = vmatpush3.msra.mxu1 %v720_v54  ;;  %v792_v49 = vld [vmem:[%s9924_s4 + $0x978] sm:$0xff]  ;;  %v1658_v52 = vadd.f32 %v1650_v15, %v6478_v63  ;;  %v807_v54 = vld [vmem:[%s9924_s4 + $0x9f0] sm:$0xff]  ;;  %v1657_v63 = vadd.f32 %v1646_v18, %v6489_v5  ;;  %v758_v5 = vld [vmem:[%s9924_s4 + $0x868] sm:$0xff] }
  0xa4   : > { %4844 = vmatprep.subr.mxu0 %v703_v56  ;;  %4882 = vmatprep.subr.mxu1 %v735_v58  ;;  %v1664_v56 = vmax.f32 %v1656_v42, 0.0  ;;  %v759_v58 = vld [vmem:[%s9924_s4 + $0x870] sm:$0xff]  ;;  %v772_v10 = vld [vmem:[%s9924_s4 + $0x8d8] sm:$0xff]  ;;  %v798_v42 = vld [vmem:[%s9924_s4 + $0x9a8] sm:$0xff] }
  0xa5   : > { %4845 = vmatpush3.msra.mxu0 %v687_v59  ;;  %4883 = vmatpush3.msra.mxu1 %v719_v60  ;;  %v1663_v59 = vmax.f32 %v1655_v46, 0.0  ;;  %v791_v60 = vld [vmem:[%s9924_s4 + $0x970] sm:$0xff]  ;;  %v788_v15 = vld [vmem:[%s9924_s4 + $0x958] sm:$0xff]  ;;  %v765_v46 = vld [vmem:[%s9924_s4 + $0x8a0] sm:$0xff] }
  0xa6   : > { %4846 = vmatprep.subr.mxu0 %v702_v62  ;;  %4884 = vmatprep.subr.mxu1 %v734_v0  ;;  %v774_v62 = vld [vmem:[%s9924_s4 + $0x8e8] sm:$0xff]  ;;  %v755_v18 = vld [vmem:[%s9924_s4 + $0x850] sm:$0xff]  ;;  %v752_v35 = vld [vmem:[%s9924_s4 + $0x838] sm:$0xff] }
  0xa7   : > { %4847 = vmatpush3.msra.mxu0 %v686_v2  ;;  %4885 = vmatpush3.msra.mxu1 %v718_v3  ;;  %v806_v0 = vld [vmem:[%s9924_s4 + $0x9e8] sm:$0xff]  ;;  %v1666_v2 = vmax.f32 %v1658_v52, 0.0  ;;  %v781_v52 = vld [vmem:[%s9924_s4 + $0x920] sm:$0xff] }
  0xa8   : > { %4848 = vmatprep.subr.mxu0 %v701_v17  ;;  %4886 = vmatprep.subr.mxu1 %v733_v6  ;;  %v790_v3 = vld [vmem:[%s9924_s4 + $0x968] sm:$0xff]  ;;  %v1665_v17 = vmax.f32 %v1657_v63, 0.0  ;;  %v773_v6 = vld [vmem:[%s9924_s4 + $0x8e0] sm:$0xff]  ;;  %v780_v63 = vld [vmem:[%s9924_s4 + $0x918] sm:$0xff] }
  0xa9   : > { %4849 = vmatpush3.msra.mxu0 %v685_v21  ;;  %4887 = vmatpush3.msra.mxu1 %v717_v9  ;;  %v757_v21 = vld [vmem:[%s9924_s4 + $0x860] sm:$0xff] }
  0xaa   : > { %4850 = vmatprep.subr.mxu0 %v700_v12  ;;  %4888 = vmatprep.subr.mxu1 %v732_v13  ;;  %v789_v9 = vld [vmem:[%s9924_s4 + $0x960] sm:$0xff]  ;;  %v804_v12 = vld [vmem:[%s9924_s4 + $0x9d8] sm:$0xff] }
  0xab   : > { %4851 = vmatpush3.msra.mxu0 %v684_v16  ;;  %4889 = vmatpush3.msra.mxu1 %v716_v25  ;;  %v756_v13 = vld [vmem:[%s9924_s4 + $0x858] sm:$0xff]  ;;  %v771_v16 = vld [vmem:[%s9924_s4 + $0x8d0] sm:$0xff] }
  0xac   : > { %4852 = vmatprep.subr.mxu0 %v699_v19  ;;  %4890 = vmatprep.subr.mxu1 %v731_v22  ;;  %v803_v25 = vld [vmem:[%s9924_s4 + $0x9d0] sm:$0xff]  ;;  %v770_v22 = vld [vmem:[%s9924_s4 + $0x8c8] sm:$0xff] }
  0xad   : > { %4853 = vmatpush3.msra.mxu0 %v683_v29  ;;  %4891 = vmatpush3.msra.mxu1 %v715_v26  ;;  %v787_v19 = vld [vmem:[%s9924_s4 + $0x950] sm:$0xff]  ;;  %v754_v29 = vld [vmem:[%s9924_s4 + $0x848] sm:$0xff] }
  0xae   : > { %4854 = vmatprep.subr.mxu0 %v698_v30  ;;  %4892 = vmatprep.subr.mxu1 %v730_v20  ;;  %v786_v26 = vld [vmem:[%s9924_s4 + $0x948] sm:$0xff]  ;;  %v801_v30 = vld [vmem:[%s9924_s4 + $0x9c0] sm:$0xff] }
  0xaf   : > { %4855 = vmatpush3.msra.mxu0 %v682_v33  ;;  %4893 = vmatpush3.msra.mxu1 %v714_v24  ;;  %v753_v20 = vld [vmem:[%s9924_s4 + $0x840] sm:$0xff]  ;;  %v768_v33 = vld [vmem:[%s9924_s4 + $0x8b8] sm:$0xff] }
  0xb0   : > { %4856 = vmatprep.subr.mxu0 %v697_v36  ;;  %4894 = vmatprep.subr.mxu1 %v729_v28  ;;  %v800_v24 = vld [vmem:[%s9924_s4 + $0x9b8] sm:$0xff]  ;;  %v767_v28 = vld [vmem:[%s9924_s4 + $0x8b0] sm:$0xff] }
  0xb1   : > { %4857 = vmatpush3.msra.mxu0 %v681_v38  ;;  %2570 = vmatprep.mubr.f32.mxu0 %v1660_v37  ;;  %v784_v36 = vld [vmem:[%s9924_s4 + $0x938] sm:$0xff]  ;;  %v799_v37 = vld [vmem:[%s9924_s4 + $0x9b0] sm:$0xff]  ;;  %v7096_v38 = vsub.s32 4, %v6108_v31 }
  0xb2   : > { %4895 = vmatpush3.msra.mxu1 %v713_v34  ;;  %2571 = vmatmul.mubr.f32.vlgmr.msra.gmra.mxu0 %v1659_v39  ;;  %v751_v39 = vld [vmem:[%s9924_s4 + $0x830] sm:$0xff] }
  0xb3   : > { %2645 = vmatprep.mubr.f32.mxu1 %v1662_v41  ;;  %4902 = vmatprep.subr.mxu0 %v776_v44  ;;  %v783_v34 = vld [vmem:[%s9924_s4 + $0x930] sm:$0xff]  ;;  %v766_v41 = vld [vmem:[%s9924_s4 + $0x8a8] sm:$0xff] }
  0xb4   : > { %4940 = vmatprep.subr.mxu1 %v808_v48  ;;  %2646 = vmatmul.mubr.f32.vlgmr.msra.gmra.mxu1 %v1661_v45  ;;  %v750_v44 = vld [vmem:[%s9924_s4 + $0x828] sm:$0xff]  ;;  %v797_v48 = vld [vmem:[%s9924_s4 + $0x9a0] sm:$0xff] }
  0xb5   : > { %4903 = vmatpush3.msra.mxu0 %v760_v51  ;;  %4941 = vmatpush3.msra.mxu1 %v792_v49  ;;  %v782_v45 = vld [vmem:[%s9924_s4 + $0x928] sm:$0xff]  ;;  %v1674_v51 = vrot.slane %v6219_v4, %v7096_v38  ;;  %v749_v49 = vld [vmem:[%s9924_s4 + $0x820] sm:$0xff] }
  0xb6   : > { %4904 = vmatprep.subr.mxu0 %v775_v55  ;;  %4942 = vmatprep.subr.mxu1 %v807_v54  ;;  %v1670_v55 = vrot.slane %v6229_v8, %v7096_v38  ;;  %v764_v54 = vld [vmem:[%s9924_s4 + $0x898] sm:$0xff] }
  0xb7   : > { %2575 = vmatprep.mubr.f32.mxu0 %v1664_v56  ;;  %4905 = vmatpush3.msra.mxu0 %v759_v58  ;;  %v796_v56 = vld [vmem:[%s9924_s4 + $0x998] sm:$0xff]  ;;  %v1682_v58 = vrot.slane %v6238_v11, %v7096_v38 }
  0xb8   : > { %4943 = vmatpush3.msra.mxu1 %v791_v60  ;;  %2576 = vmatmul.mubr.f32.gmra.mxu0 %v1663_v59  ;;  %v748_v59 = vld [vmem:[%s9924_s4 + $0x818] sm:$0xff]  ;;  %v7148_v60 = vrot.slane %v6247_v14, %v7096_v38 }
  0xb9   : > { %4906 = vmatprep.subr.mxu0 %v774_v62  ;;  %4944 = vmatprep.subr.mxu1 %v806_v0  ;;  %v763_v62 = vld [vmem:[%s9924_s4 + $0x890] sm:$0xff] }
  0xba   : > { %2650 = vmatprep.mubr.f32.mxu1 %v1666_v2  ;;  %4907 = vmatpush3.msra.mxu0 %v758_v5  ;;  %v795_v0 = vld [vmem:[%s9924_s4 + $0x990] sm:$0xff]  ;;  %v7157_v2 = vld [vmem:[%s6150_s21 + $0x8] sm:$0xff] }
  0xbb   : > { %4945 = vmatpush3.msra.mxu1 %v790_v3  ;;  %4908 = vmatprep.subr.mxu0 %v773_v6  ;;  %v1684_v5 = vadd.f32 %v7157_v2, %v1674_v51  ;;  %v747_v3 = vld [vmem:[%s9924_s4 + $0x810] sm:$0xff]  ;;  %v7167_v6 = vld [vmem:[%s6150_s21] sm:$0xff] }
  0xbc   : > { %2651 = vmatmul.mubr.f32.gmra.mxu1 %v1665_v17  ;;  %4946 = vmatprep.subr.mxu1 %v805_v7  ;;  %v779_v17 = vld [vmem:[%s9924_s4 + $0x910] sm:$0xff]  ;;  %v1683_v7 = vadd.f32 %v7167_v6, %v1670_v55 }
  0xbd   : > { %4909 = vmatpush3.msra.mxu0 %v757_v21  ;;  %4947 = vmatpush3.msra.mxu1 %v789_v9  ;;  %v762_v21 = vld [vmem:[%s9924_s4 + $0x888] sm:$0xff] }
  0xbe   : > { %4910 = vmatprep.subr.mxu0 %v772_v10  ;;  %4948 = vmatprep.subr.mxu1 %v804_v12  ;;  %v794_v9 = vld [vmem:[%s9924_s4 + $0x988] sm:$0xff]  ;;  %v7177_v10 = vld [vmem:[%s6150_s21 + $0x18] sm:$0xff] }
  0xbf   : > { %4911 = vmatpush3.msra.mxu0 %v756_v13  ;;  %4949 = vmatpush3.msra.mxu1 %v788_v15  ;;  %v1686_v12 = vadd.f32 %v7177_v10, %v1682_v58  ;;  %v746_v13 = vld [vmem:[%s9924_s4 + $0x808] sm:$0xff] }
  0xc0   : > { %4912 = vmatprep.subr.mxu0 %v771_v16  ;;  %4950 = vmatprep.subr.mxu1 %v803_v25  ;;  %v778_v15 = vld [vmem:[%s9924_s4 + $0x908] sm:$0xff]  ;;  %v7187_v16 = vld [vmem:[%s6150_s21 + $0x10] sm:$0xff] }
  0xc1   : > { %4913 = vmatpush3.msra.mxu0 %v755_v18  ;;  %4951 = vmatpush3.msra.mxu1 %v787_v19  ;;  %v1685_v25 = vadd.f32 %v7187_v16, %v7148_v60  ;;  %v761_v18 = vld [vmem:[%s9924_s4 + $0x880] sm:$0xff] }
  0xc2   : > { %4914 = vmatprep.subr.mxu0 %v770_v22  ;;  %4952 = vmatprep.subr.mxu1 %v802_v23  ;;  %v793_v19 = vld [vmem:[%s9924_s4 + $0x980] sm:$0xff]  ;;  %v1692_v22 = vmax.f32 %v1684_v5, 0.0  ;;  %v836_v5 = vld [vmem:[%s9924_s4 + $0xad8] sm:$0xff] }
  0xc3   : > { %4915 = vmatpush3.msra.mxu0 %v754_v29  ;;  %4953 = vmatpush3.msra.mxu1 %v786_v26  ;;  %v745_v23 = vld [vmem:[%s9924_s4 + $0x800] sm:$0xff]  ;;  %v1691_v29 = vmax.f32 %v1683_v7, 0.0  ;;  %v852_v7 = vld [vmem:[%s9924_s4 + $0xb58] sm:$0xff] }
  0xc4   : > { %4916 = vmatprep.subr.mxu0 %v769_v27  ;;  %4954 = vmatprep.subr.mxu1 %v801_v30  ;;  %v777_v26 = vld [vmem:[%s9924_s4 + $0x900] sm:$0xff]  ;;  %v1694_v27 = vmax.f32 %v1686_v12, 0.0  ;;  %v7204_v30 = vld [vmem:[%s6150_s21 + $0x48] sm:$0xff]  ;;  %v819_v12 = vld [vmem:[%s9924_s4 + $0xa50] sm:$0xff] }
  0xc5   : > { %4917 = vmatpush3.msra.mxu0 %v753_v20  ;;  %4955 = vmatpush3.msra.mxu1 %v785_v32  ;;  %v1688_v20 = vadd.f32 %v7204_v30, %v1674_v51  ;;  %v840_v32 = vld [vmem:[%s9924_s4 + $0xaf8] sm:$0xff] }
  0xc6   : > { %4918 = vmatprep.subr.mxu0 %v768_v33  ;;  %4956 = vmatprep.subr.mxu1 %v800_v24  ;;  %v1693_v33 = vmax.f32 %v1685_v25, 0.0  ;;  %v7211_v24 = vld [vmem:[%s6150_s21 + $0x40] sm:$0xff]  ;;  %v866_v25 = vld [vmem:[%s9924_s4 + $0xbc8] sm:$0xff] }
  0xc7   : > { %4919 = vmatpush3.msra.mxu0 %v752_v35  ;;  %4957 = vmatpush3.msra.mxu1 %v784_v36  ;;  %v1687_v35 = vadd.f32 %v7211_v24, %v1670_v55  ;;  %v872_v36 = vld [vmem:[%s9924_s4 + $0xbf8] sm:$0xff]  ;;  %v870_v55 = vld [vmem:[%s9924_s4 + $0xbe8] sm:$0xff] }
  0xc8   : > { %4920 = vmatprep.subr.mxu0 %v767_v28  ;;  %4958 = vmatprep.subr.mxu1 %v799_v37  ;;  %v824_v28 = vld [vmem:[%s9924_s4 + $0xa78] sm:$0xff] }
  0xc9   : > { %4921 = vmatpush3.msra.mxu0 %v751_v39  ;;  %4959 = vmatpush3.msra.mxu1 %v783_v34  ;;  %v856_v37 = vld [vmem:[%s9924_s4 + $0xb78] sm:$0xff] }
  0xca   : > { %4922 = vmatprep.subr.mxu0 %v766_v41  ;;  %4960 = vmatprep.subr.mxu1 %v798_v42  ;;  %v7224_v39 = vld [vmem:[%s6150_s21 + $0x58] sm:$0xff]  ;;  %v839_v41 = vld [vmem:[%s9924_s4 + $0xaf0] sm:$0xff] }
  0xcb   : > { %4923 = vmatpush3.msra.mxu0 %v750_v44  ;;  %4961 = vmatpush3.msra.mxu1 %v782_v45  ;;  %v1690_v34 = vadd.f32 %v7224_v39, %v1682_v58  ;;  %v871_v42 = vld [vmem:[%s9924_s4 + $0xbf0] sm:$0xff]  ;;  %v1696_v44 = vmax.f32 %v1688_v20, 0.0  ;;  %v854_v58 = vld [vmem:[%s9924_s4 + $0xb68] sm:$0xff]  ;;  %v817_v20 = vld [vmem:[%s9924_s4 + $0xa40] sm:$0xff] }
  0xcc   : > { %4924 = vmatprep.subr.mxu0 %v765_v46  ;;  %4962 = vmatprep.subr.mxu1 %v797_v48  ;;  %v823_v45 = vld [vmem:[%s9924_s4 + $0xa70] sm:$0xff]  ;;  %v1695_v46 = vmax.f32 %v1687_v35, 0.0 }
  0xcd   : > { %4925 = vmatpush3.msra.mxu0 %v749_v49  ;;  %4963 = vmatpush3.msra.mxu1 %v781_v52  ;;  %v7237_v48 = vld [vmem:[%s6150_s21 + $0x50] sm:$0xff]  ;;  %v838_v52 = vld [vmem:[%s9924_s4 + $0xae8] sm:$0xff] }
  0xce   : > { %4926 = vmatprep.subr.mxu0 %v764_v54  ;;  %4964 = vmatprep.subr.mxu1 %v796_v56  ;;  %v1689_v51 = vadd.f32 %v7237_v48, %v7148_v60  ;;  %v855_v49 = vld [vmem:[%s9924_s4 + $0xb70] sm:$0xff]  ;;  %v1698_v54 = vmax.f32 %v1690_v34, 0.0  ;;  %v822_v56 = vld [vmem:[%s9924_s4 + $0xa68] sm:$0xff]  ;;  %v869_v60 = vld [vmem:[%s9924_s4 + $0xbe0] sm:$0xff] }
  0xcf   : > { %4927 = vmatpush3.msra.mxu0 %v748_v59  ;;  %4965 = vmatpush3.msra.mxu1 %v780_v63  ;;  %v837_v63 = vld [vmem:[%s9924_s4 + $0xae0] sm:$0xff]  ;;  %v848_v34 = vld [vmem:[%s9924_s4 + $0xb38] sm:$0xff] }
  0xd0   : > { %4928 = vmatprep.subr.mxu0 %v763_v62  ;;  %4966 = vmatprep.subr.mxu1 %v795_v0  ;;  %v1697_v59 = vmax.f32 %v1689_v51, 0.0  ;;  %v821_v62 = vld [vmem:[%s9924_s4 + $0xa60] sm:$0xff]  ;;  %v830_v51 = vld [vmem:[%s9924_s4 + $0xaa8] sm:$0xff] }
  0xd1   : > { %4929 = vmatpush3.msra.mxu0 %v747_v3  ;;  %4967 = vmatpush3.msra.mxu1 %v779_v17  ;;  %v853_v0 = vld [vmem:[%s9924_s4 + $0xb60] sm:$0xff]  ;;  %v868_v3 = vld [vmem:[%s9924_s4 + $0xbd8] sm:$0xff] }
  0xd2   : > { %4930 = vmatprep.subr.mxu0 %v762_v21  ;;  %4968 = vmatprep.subr.mxu1 %v794_v9  ;;  %v820_v17 = vld [vmem:[%s9924_s4 + $0xa58] sm:$0xff]  ;;  %v835_v21 = vld [vmem:[%s9924_s4 + $0xad0] sm:$0xff] }
  0xd3   : > { %4931 = vmatpush3.msra.mxu0 %v746_v13  ;;  %4969 = vmatpush3.msra.mxu1 %v778_v15  ;;  %v867_v9 = vld [vmem:[%s9924_s4 + $0xbd0] sm:$0xff]  ;;  %v834_v15 = vld [vmem:[%s9924_s4 + $0xac8] sm:$0xff] }
  0xd4   : > { %4932 = vmatprep.subr.mxu0 %v761_v18  ;;  %4970 = vmatprep.subr.mxu1 %v793_v19  ;;  %v851_v13 = vld [vmem:[%s9924_s4 + $0xb50] sm:$0xff]  ;;  %v818_v18 = vld [vmem:[%s9924_s4 + $0xa48] sm:$0xff] }
  0xd5   : > { %4933 = vmatpush3.msra.mxu0 %v745_v23  ;;  %2720 = vmatprep.mubr.f32.mxu0 %v1692_v22  ;;  %v850_v19 = vld [vmem:[%s9924_s4 + $0xb48] sm:$0xff] }
  0xd6   : > { %4971 = vmatpush3.msra.mxu1 %v777_v26  ;;  %2721 = vmatmul.mubr.f32.vlgmr.msra.gmra.mxu0 %v1691_v29  ;;  %v833_v29 = vld [vmem:[%s9924_s4 + $0xac0] sm:$0xff] }
  0xd7   : > { %2795 = vmatprep.mubr.f32.mxu1 %v1694_v27  ;;  %4978 = vmatprep.subr.mxu0 %v840_v32  ;;  %v865_v26 = vld [vmem:[%s9924_s4 + $0xbc0] sm:$0xff] }
  0xd8   : > { %5016 = vmatprep.subr.mxu1 %v872_v36  ;;  %2796 = vmatmul.mubr.f32.vlgmr.msra.gmra.mxu1 %v1693_v33  ;;  %v849_v32 = vld [vmem:[%s9924_s4 + $0xb40] sm:$0xff]  ;;  %v832_v36 = vld [vmem:[%s9924_s4 + $0xab8] sm:$0xff] }
  0xd9   : > { %4979 = vmatpush3.msra.mxu0 %v824_v28  ;;  %5017 = vmatpush3.msra.mxu1 %v856_v37  ;;  %v864_v28 = vld [vmem:[%s9924_s4 + $0xbb8] sm:$0xff] }
  0xda   : > { %4980 = vmatprep.subr.mxu0 %v839_v41  ;;  %5018 = vmatprep.subr.mxu1 %v871_v42  ;;  %v816_v37 = vld [vmem:[%s9924_s4 + $0xa38] sm:$0xff]  ;;  %v831_v41 = vld [vmem:[%s9924_s4 + $0xab0] sm:$0xff] }
  0xdb   : > { %2725 = vmatprep.mubr.f32.mxu0 %v1696_v44  ;;  %4981 = vmatpush3.msra.mxu0 %v823_v45  ;;  %v863_v42 = vld [vmem:[%s9924_s4 + $0xbb0] sm:$0xff]  ;;  %v7337_v44 = vsub.s32 5, %v6108_v31 }
  0xdc   : > { %5019 = vmatpush3.msra.mxu1 %v855_v49  ;;  %2726 = vmatmul.mubr.f32.gmra.mxu0 %v1695_v46  ;;  %v815_v45 = vld [vmem:[%s9924_s4 + $0xa30] sm:$0xff]  ;;  %v862_v49 = vld [vmem:[%s9924_s4 + $0xba8] sm:$0xff] }
  0xdd   : > { %4982 = vmatprep.subr.mxu0 %v838_v52  ;;  %5020 = vmatprep.subr.mxu1 %v870_v55  ;;  %v847_v46 = vld [vmem:[%s9924_s4 + $0xb30] sm:$0xff]  ;;  %v814_v52 = vld [vmem:[%s9924_s4 + $0xa28] sm:$0xff] }
  0xde   : > { %2800 = vmatprep.mubr.f32.mxu1 %v1698_v54  ;;  %4983 = vmatpush3.msra.mxu0 %v822_v56  ;;  %v846_v55 = vld [vmem:[%s9924_s4 + $0xb28] sm:$0xff]  ;;  %v829_v54 = vld [vmem:[%s9924_s4 + $0xaa0] sm:$0xff] }
  0xdf   : > { %5021 = vmatpush3.msra.mxu1 %v854_v58  ;;  %4984 = vmatprep.subr.mxu0 %v837_v63  ;;  %v861_v56 = vld [vmem:[%s9924_s4 + $0xba0] sm:$0xff]  ;;  %v1706_v58 = vrot.slane %v6219_v4, %v7337_v44 }
  0xe0   : > { %2801 = vmatmul.mubr.f32.gmra.mxu1 %v1697_v59  ;;  %5022 = vmatprep.subr.mxu1 %v869_v60  ;;  %v813_v59 = vld [vmem:[%s9924_s4 + $0xa20] sm:$0xff]  ;;  %v1702_v60 = vrot.slane %v6229_v8, %v7337_v44 }
  0xe1   : > { %4985 = vmatpush3.msra.mxu0 %v821_v62  ;;  %5023 = vmatpush3.msra.mxu1 %v853_v0  ;;  %v845_v63 = vld [vmem:[%s9924_s4 + $0xb20] sm:$0xff]  ;;  %v828_v62 = vld [vmem:[%s9924_s4 + $0xa98] sm:$0xff] }
  0xe2   : > { %4986 = vmatprep.subr.mxu0 %v836_v5  ;;  %5024 = vmatprep.subr.mxu1 %v868_v3  ;;  %v860_v0 = vld [vmem:[%s9924_s4 + $0xb98] sm:$0xff]  ;;  %v1714_v5 = vrot.slane %v6238_v11, %v7337_v44 }
  0xe3   : > { %4987 = vmatpush3.msra.mxu0 %v820_v17  ;;  %5025 = vmatpush3.msra.mxu1 %v852_v7  ;;  %v812_v3 = vld [vmem:[%s9924_s4 + $0xa18] sm:$0xff]  ;;  %v1710_v7 = vrot.slane %v6247_v14, %v7337_v44 }
  0xe4   : > { %4988 = vmatprep.subr.mxu0 %v835_v21  ;;  %5026 = vmatprep.subr.mxu1 %v867_v9  ;;  %v388_v22 = vpop.f32.mrf.mxu0  ;;  %v463_v23 = vpop.f32.mrf.mxu1  ;;  %v844_v17 = vld [vmem:[%s9924_s4 + $0xb18] sm:$0xff]  ;;  %v827_v21 = vld [vmem:[%s9924_s4 + $0xa90] sm:$0xff] }
  0xe5   : > { %4989 = vmatpush3.msra.mxu0 %v819_v12  ;;  %5027 = vmatpush3.msra.mxu1 %v851_v13  ;;  %v7310_v27 = vadd.f32 %v463_v23, %v388_v22  ;;  %v859_v9 = vld [vmem:[%s9924_s4 + $0xb90] sm:$0xff]  ;;  %v1716_v12 = vadd.f32 %v7157_v2, %v1706_v58  ;;  %v1718_v22 = vadd.f32 %v7177_v10, %v1714_v5  ;;  %v810_v23 = vld [vmem:[%s9924_s4 + $0xa08] sm:$0xff] }
  0xe6   : > { %4990 = vmatprep.subr.mxu0 %v834_v15  ;;  %5028 = vmatprep.subr.mxu1 %v866_v25  ;;  %v390_v33 = vpop.f32.mrf.mxu0  ;;  %v465_v35 = vpop.f32.mrf.mxu1  ;;  %v811_v13 = vld [vmem:[%s9924_s4 + $0xa10] sm:$0xff]  ;;  %v1715_v25 = vadd.f32 %v7167_v6, %v1702_v60 }
  0xe7   : > { %9929 = vst [vmem:[#allocation6_spill] sm:$0xff] %v7310_v27  ;;  %4991 = vmatpush3.msra.mxu0 %v818_v18  ;;  %5029 = vmatpush3.msra.mxu1 %v850_v19  ;;  %v843_v15 = vld [vmem:[%s9924_s4 + $0xb10] sm:$0xff]  ;;  %v826_v18 = vld [vmem:[%s9924_s4 + $0xa88] sm:$0xff]  ;;  %v1724_v33 = vmax.f32 %v1716_v12, 0.0  ;;  %v809_v35 = vld [vmem:[%s9924_s4 + $0xa00] sm:$0xff] }
  0xe8   : > { %4992 = vmatprep.subr.mxu0 %v833_v29  ;;  %5030 = vmatprep.subr.mxu1 %v865_v26  ;;  %v858_v19 = vld [vmem:[%s9924_s4 + $0xb88] sm:$0xff]  ;;  %v1717_v26 = vadd.f32 %v7187_v16, %v1710_v7  ;;  %v933_v12 = vld [vmem:[%s9924_s4 + $0xde0] sm:$0xff] }
  0xe9   : > { %4993 = vmatpush3.msra.mxu0 %v817_v20  ;;  %5031 = vmatpush3.msra.mxu1 %v849_v32  ;;  %v842_v29 = vld [vmem:[%s9924_s4 + $0xb08] sm:$0xff]  ;;  %v825_v20 = vld [vmem:[%s9924_s4 + $0xa80] sm:$0xff] }
  0xea   : > { %4994 = vmatprep.subr.mxu0 %v832_v36  ;;  %5032 = vmatprep.subr.mxu1 %v864_v28  ;;  %v857_v32 = vld [vmem:[%s9924_s4 + $0xb80] sm:$0xff]  ;;  %v1723_v36 = vmax.f32 %v1715_v25, 0.0 }
  0xeb   : > { %4995 = vmatpush3.msra.mxu0 %v816_v37  ;;  %5033 = vmatpush3.msra.mxu1 %v848_v34  ;;  %v841_v28 = vld [vmem:[%s9924_s4 + $0xb00] sm:$0xff]  ;;  %v1726_v37 = vmax.f32 %v1718_v22, 0.0  ;;  %v1720_v34 = vadd.f32 %v7204_v30, %v1706_v58  ;;  %v887_v58 = vld [vmem:[%s9924_s4 + $0xc70] sm:$0xff]  ;;  %v932_v22 = vld [vmem:[%s9924_s4 + $0xdd8] sm:$0xff] }
  0xec   : > { %4996 = vmatprep.subr.mxu0 %v831_v41  ;;  %5034 = vmatprep.subr.mxu1 %v863_v42  ;;  %v904_v41 = vld [vmem:[%s9924_s4 + $0xcf8] sm:$0xff]  ;;  %v1725_v42 = vmax.f32 %v1717_v26, 0.0  ;;  %v917_v25 = vld [vmem:[%s9924_s4 + $0xd60] sm:$0xff] }
  0xed   : > { %4997 = vmatpush3.msra.mxu0 %v815_v45  ;;  %5035 = vmatpush3.msra.mxu1 %v847_v46  ;;  %v1719_v45 = vadd.f32 %v7211_v24, %v1702_v60  ;;  %v936_v46 = vld [vmem:[%s9924_s4 + $0xdf8] sm:$0xff]  ;;  %v919_v60 = vld [vmem:[%s9924_s4 + $0xd70] sm:$0xff] }
  0xee   : > { %4998 = vmatprep.subr.mxu0 %v830_v51  ;;  %5036 = vmatprep.subr.mxu1 %v862_v49  ;;  %v888_v51 = vld [vmem:[%s9924_s4 + $0xc78] sm:$0xff] }
  0xef   : > { %4999 = vmatpush3.msra.mxu0 %v814_v52  ;;  %5037 = vmatpush3.msra.mxu1 %v846_v55  ;;  %v920_v49 = vld [vmem:[%s9924_s4 + $0xd78] sm:$0xff]  ;;  %v1722_v52 = vadd.f32 %v7224_v39, %v1714_v5  ;;  %v903_v55 = vld [vmem:[%s9924_s4 + $0xcf0] sm:$0xff] }
  0xf0   : > { %5000 = vmatprep.subr.mxu0 %v829_v54  ;;  %5038 = vmatprep.subr.mxu1 %v861_v56  ;;  %v935_v54 = vld [vmem:[%s9924_s4 + $0xdf0] sm:$0xff]  ;;  %v1728_v56 = vmax.f32 %v1720_v34, 0.0  ;;  %v916_v26 = vld [vmem:[%s9924_s4 + $0xd58] sm:$0xff]  ;;  %v882_v34 = vld [vmem:[%s9924_s4 + $0xc48] sm:$0xff] }
  0xf1   : > { %5001 = vmatpush3.msra.mxu0 %v813_v59  ;;  %5039 = vmatpush3.msra.mxu1 %v845_v63  ;;  %v1727_v59 = vmax.f32 %v1719_v45, 0.0  ;;  %v1721_v63 = vadd.f32 %v7237_v48, %v1710_v7  ;;  %v1730_v5 = vmax.f32 %v1722_v52, 0.0  ;;  %v918_v7 = vld [vmem:[%s9924_s4 + $0xd68] sm:$0xff]  ;;  %v929_v45 = vld [vmem:[%s9924_s4 + $0xdc0] sm:$0xff]  ;;  %v928_v52 = vld [vmem:[%s9924_s4 + $0xdb8] sm:$0xff] }
  0xf2   : > { %5002 = vmatprep.subr.mxu0 %v828_v62  ;;  %5040 = vmatprep.subr.mxu1 %v860_v0  ;;  %v902_v62 = vld [vmem:[%s9924_s4 + $0xce8] sm:$0xff] }
  0xf3   : > { %5003 = vmatpush3.msra.mxu0 %v812_v3  ;;  %5041 = vmatpush3.msra.mxu1 %v844_v17  ;;  %v934_v0 = vld [vmem:[%s9924_s4 + $0xde8] sm:$0xff] }
  0xf4   : > { %5004 = vmatprep.subr.mxu0 %v827_v21  ;;  %5042 = vmatprep.subr.mxu1 %v859_v9  ;;  %v886_v3 = vld [vmem:[%s9924_s4 + $0xc68] sm:$0xff]  ;;  %v1729_v21 = vmax.f32 %v1721_v63, 0.0  ;;  %v901_v9 = vld [vmem:[%s9924_s4 + $0xce0] sm:$0xff]  ;;  %v879_v63 = vld [vmem:[%s9924_s4 + $0xc30] sm:$0xff] }
  0xf5   : > { %5005 = vmatpush3.msra.mxu0 %v811_v13  ;;  %5043 = vmatpush3.msra.mxu1 %v843_v15  ;;  %v885_v15 = vld [vmem:[%s9924_s4 + $0xc60] sm:$0xff] }
  0xf6   : > { %5006 = vmatprep.subr.mxu0 %v826_v18  ;;  %5044 = vmatprep.subr.mxu1 %v858_v19  ;;  %v900_v19 = vld [vmem:[%s9924_s4 + $0xcd8] sm:$0xff] }
  0xf7   : > { %5007 = vmatpush3.msra.mxu0 %v810_v23  ;;  %5045 = vmatpush3.msra.mxu1 %v842_v29  ;;  %v884_v29 = vld [vmem:[%s9924_s4 + $0xc58] sm:$0xff] }
  0xf8   : > { %5008 = vmatprep.subr.mxu0 %v825_v20  ;;  %5046 = vmatprep.subr.mxu1 %v857_v32  ;;  %v899_v32 = vld [vmem:[%s9924_s4 + $0xcd0] sm:$0xff] }
  0xf9   : > { %5009 = vmatpush3.msra.mxu0 %v809_v35  ;;  %2870 = vmatprep.mubr.f32.mxu0 %v1724_v33  ;;  %v931_v33 = vld [vmem:[%s9924_s4 + $0xdd0] sm:$0xff] }
  0xfa   : > { %5047 = vmatpush3.msra.mxu1 %v841_v28  ;;  %2871 = vmatmul.mubr.f32.vlgmr.msra.gmra.mxu0 %v1723_v36  ;;  %v883_v35 = vld [vmem:[%s9924_s4 + $0xc50] sm:$0xff]  ;;  %v898_v28 = vld [vmem:[%s9924_s4 + $0xcc8] sm:$0xff] }
  0xfb   : > { %2945 = vmatprep.mubr.f32.mxu1 %v1726_v37  ;;  %5054 = vmatprep.subr.mxu0 %v904_v41  ;;  %v915_v36 = vld [vmem:[%s9924_s4 + $0xd50] sm:$0xff]  ;;  %v930_v37 = vld [vmem:[%s9924_s4 + $0xdc8] sm:$0xff] }
  0xfc   : > { %5092 = vmatprep.subr.mxu1 %v936_v46  ;;  %2946 = vmatmul.mubr.f32.vlgmr.msra.gmra.mxu1 %v1725_v42  ;;  %v914_v41 = vld [vmem:[%s9924_s4 + $0xd48] sm:$0xff]  ;;  %v897_v42 = vld [vmem:[%s9924_s4 + $0xcc0] sm:$0xff] }
  0xfd   : > { %5055 = vmatpush3.msra.mxu0 %v888_v51  ;;  %5093 = vmatpush3.msra.mxu1 %v920_v49  ;;  %v881_v46 = vld [vmem:[%s9924_s4 + $0xc40] sm:$0xff]  ;;  %v896_v49 = vld [vmem:[%s9924_s4 + $0xcb8] sm:$0xff] }
  0xfe   : > { %5056 = vmatprep.subr.mxu0 %v903_v55  ;;  %5094 = vmatprep.subr.mxu1 %v935_v54  ;;  %v913_v51 = vld [vmem:[%s9924_s4 + $0xd40] sm:$0xff]  ;;  %v880_v55 = vld [vmem:[%s9924_s4 + $0xc38] sm:$0xff] }
  0xff   : > { %2875 = vmatprep.mubr.f32.mxu0 %v1728_v56  ;;  %5057 = vmatpush3.msra.mxu0 %v887_v58  ;;  %v393_v17 = vpop.f32.mrf.mxu0  ;;  %v912_v54 = vld [vmem:[%s9924_s4 + $0xd38] sm:$0xff]  ;;  %v895_v56 = vld [vmem:[%s9924_s4 + $0xcb0] sm:$0xff] }
 0x100   : > { %5095 = vmatpush3.msra.mxu1 %v919_v60  ;;  %2876 = vmatmul.mubr.f32.gmra.mxu0 %v1727_v59  ;;  %v927_v58 = vld [vmem:[%s9924_s4 + $0xdb0] sm:$0xff]  ;;  %v7550_v59 = vsub.s32 6, %v6108_v31 }
 0x101   : > { %5058 = vmatprep.subr.mxu0 %v902_v62  ;;  %5096 = vmatprep.subr.mxu1 %v934_v0  ;;  %v395_v13 = vpop.f32.mrf.mxu0  ;;  %v911_v60 = vld [vmem:[%s9924_s4 + $0xd30] sm:$0xff]  ;;  %v894_v62 = vld [vmem:[%s9924_s4 + $0xca8] sm:$0xff] }
 0x102   : > { %2950 = vmatprep.mubr.f32.mxu1 %v1730_v5  ;;  %5059 = vmatpush3.msra.mxu0 %v886_v3  ;;  %v468_v18 = vpop.f32.mrf.mxu1  ;;  %v926_v0 = vld [vmem:[%s9924_s4 + $0xda8] sm:$0xff]  ;;  %v1734_v13 = vrot.slane %v6229_v8, %v7550_v59 }
 0x103   : > { %5097 = vmatpush3.msra.mxu1 %v918_v7  ;;  %5060 = vmatprep.subr.mxu0 %v901_v9  ;;  %v7487_v23 = vadd.f32 %v468_v18, %v393_v17  ;;  %v878_v5 = vld [vmem:[%s9924_s4 + $0xc28] sm:$0xff]  ;;  %v893_v17 = vld [vmem:[%s9924_s4 + $0xca0] sm:$0xff]  ;;  %v1746_v18 = vrot.slane %v6238_v11, %v7550_v59 }
 0x104   : > { %2951 = vmatmul.mubr.f32.gmra.mxu1 %v1729_v21  ;;  %5098 = vmatprep.subr.mxu1 %v933_v12  ;;  %v470_v20 = vpop.f32.mrf.mxu1  ;;  %v910_v3 = vld [vmem:[%s9924_s4 + $0xd28] sm:$0xff]  ;;  %v925_v7 = vld [vmem:[%s9924_s4 + $0xda0] sm:$0xff]  ;;  %v1738_v21 = vrot.slane %v6219_v4, %v7550_v59 }
 0x105   : > { %9930 = vst [vmem:[#allocation7_spill] sm:$0xff] %v7487_v23  ;;  %5061 = vmatpush3.msra.mxu0 %v885_v15  ;;  %5099 = vmatpush3.msra.mxu1 %v917_v25  ;;  %v877_v9 = vld [vmem:[%s9924_s4 + $0xc20] sm:$0xff]  ;;  %v892_v15 = vld [vmem:[%s9924_s4 + $0xc98] sm:$0xff]  ;;  %v923_v20 = vld [vmem:[%s9924_s4 + $0xd90] sm:$0xff] }
 0x106   : > { %5062 = vmatprep.subr.mxu0 %v900_v19  ;;  %5100 = vmatprep.subr.mxu1 %v932_v22  ;;  %v909_v12 = vld [vmem:[%s9924_s4 + $0xd20] sm:$0xff]  ;;  %v924_v25 = vld [vmem:[%s9924_s4 + $0xd98] sm:$0xff] }
 0x107   : > { %5063 = vmatpush3.msra.mxu0 %v884_v29  ;;  %5101 = vmatpush3.msra.mxu1 %v916_v26  ;;  %v876_v19 = vld [vmem:[%s9924_s4 + $0xc18] sm:$0xff]  ;;  %v1742_v29 = vrot.slane %v6247_v14, %v7550_v59  ;;  %v891_v26 = vld [vmem:[%s9924_s4 + $0xc90] sm:$0xff] }
 0x108   : > { %5064 = vmatprep.subr.mxu0 %v899_v32  ;;  %5102 = vmatprep.subr.mxu1 %v931_v33  ;;  %v908_v22 = vld [vmem:[%s9924_s4 + $0xd18] sm:$0xff]  ;;  %v1748_v32 = vadd.f32 %v7157_v2, %v1738_v21  ;;  %v875_v33 = vld [vmem:[%s9924_s4 + $0xc10] sm:$0xff] }
 0x109   : > { %5065 = vmatpush3.msra.mxu0 %v883_v35  ;;  %5103 = vmatpush3.msra.mxu1 %v915_v36  ;;  %v907_v35 = vld [vmem:[%s9924_s4 + $0xd10] sm:$0xff]  ;;  %v1747_v36 = vadd.f32 %v7167_v6, %v1734_v13 }
 0x10a   : > { %5066 = vmatprep.subr.mxu0 %v898_v28  ;;  %5104 = vmatprep.subr.mxu1 %v930_v37  ;;  %v890_v28 = vld [vmem:[%s9924_s4 + $0xc88] sm:$0xff] }
 0x10b   : > { %5067 = vmatpush3.msra.mxu0 %v882_v34  ;;  %5105 = vmatpush3.msra.mxu1 %v914_v41  ;;  %v922_v37 = vld [vmem:[%s9924_s4 + $0xd88] sm:$0xff]  ;;  %v1750_v34 = vadd.f32 %v7177_v10, %v1746_v18 }
 0x10c   : > { %5068 = vmatprep.subr.mxu0 %v897_v42  ;;  %5106 = vmatprep.subr.mxu1 %v929_v45  ;;  %v874_v41 = vld [vmem:[%s9924_s4 + $0xc08] sm:$0xff]  ;;  %v1749_v45 = vadd.f32 %v7187_v16, %v1742_v29 }
 0x10d   : > { %5069 = vmatpush3.msra.mxu0 %v881_v46  ;;  %5107 = vmatpush3.msra.mxu1 %v913_v51  ;;  %v906_v42 = vld [vmem:[%s9924_s4 + $0xd08] sm:$0xff]  ;;  %v889_v46 = vld [vmem:[%s9924_s4 + $0xc80] sm:$0xff] }
 0x10e   : > { %5070 = vmatprep.subr.mxu0 %v896_v49  ;;  %5108 = vmatprep.subr.mxu1 %v928_v52  ;;  %v921_v51 = vld [vmem:[%s9924_s4 + $0xd80] sm:$0xff]  ;;  %v1756_v49 = vmax.f32 %v1748_v32, 0.0 }
 0x10f   : > { %5071 = vmatpush3.msra.mxu0 %v880_v55  ;;  %5109 = vmatpush3.msra.mxu1 %v912_v54  ;;  %v873_v52 = vld [vmem:[%s9924_s4 + $0xc00] sm:$0xff]  ;;  %v1755_v55 = vmax.f32 %v1747_v36, 0.0 }
 0x110   : > { %5072 = vmatprep.subr.mxu0 %v895_v56  ;;  %5110 = vmatprep.subr.mxu1 %v927_v58  ;;  %v905_v54 = vld [vmem:[%s9924_s4 + $0xd00] sm:$0xff]  ;;  %v1758_v56 = vmax.f32 %v1750_v34, 0.0  ;;  %v1752_v58 = vadd.f32 %v7204_v30, %v1738_v21  ;;  %v999_v21 = vld [vmem:[%s9924_s4 + $0xff0] sm:$0xff]  ;;  %v948_v34 = vld [vmem:[%s9924_s4 + $0xe58] sm:$0xff] }
 0x111   : > { %5073 = vmatpush3.msra.mxu0 %v879_v63  ;;  %5111 = vmatpush3.msra.mxu1 %v911_v60  ;;  %v968_v63 = vld [vmem:[%s9924_s4 + $0xef8] sm:$0xff]  ;;  %v1757_v60 = vmax.f32 %v1749_v45, 0.0  ;;  %v965_v32 = vld [vmem:[%s9924_s4 + $0xee0] sm:$0xff]  ;;  %v995_v45 = vld [vmem:[%s9924_s4 + $0xfd0] sm:$0xff] }
 0x112   : > { %5074 = vmatprep.subr.mxu0 %v894_v62  ;;  %5112 = vmatprep.subr.mxu1 %v926_v0  ;;  %v1751_v62 = vadd.f32 %v7211_v24, %v1734_v13  ;;  %v1000_v0 = vld [vmem:[%s9924_s4 + $0xff8] sm:$0xff]  ;;  %v981_v36 = vld [vmem:[%s9924_s4 + $0xf60] sm:$0xff] }
 0x113   : > { %5075 = vmatpush3.msra.mxu0 %v878_v5  ;;  %5113 = vmatpush3.msra.mxu1 %v910_v3  ;;  %v952_v5 = vld [vmem:[%s9924_s4 + $0xe78] sm:$0xff] }
 0x114   : > { %5076 = vmatprep.subr.mxu0 %v893_v17  ;;  %5114 = vmatprep.subr.mxu1 %v925_v7  ;;  %v984_v3 = vld [vmem:[%s9924_s4 + $0xf78] sm:$0xff]  ;;  %v1754_v17 = vadd.f32 %v7224_v39, %v1746_v18  ;;  %v967_v7 = vld [vmem:[%s9924_s4 + $0xef0] sm:$0xff]  ;;  %v1759_v13 = vmax.f32 %v1751_v62, 0.0  ;;  %v966_v18 = vld [vmem:[%s9924_s4 + $0xee8] sm:$0xff] }
 0x115   : > { %5077 = vmatpush3.msra.mxu0 %v877_v9  ;;  %5115 = vmatpush3.msra.mxu1 %v909_v12  ;;  %v1760_v9 = vmax.f32 %v1752_v58, 0.0  ;;  %v951_v12 = vld [vmem:[%s9924_s4 + $0xe70] sm:$0xff]  ;;  %v993_v58 = vld [vmem:[%s9924_s4 + $0xfc0] sm:$0xff]  ;;  %v960_v62 = vld [vmem:[%s9924_s4 + $0xeb8] sm:$0xff] }
 0x116   : > { %5078 = vmatprep.subr.mxu0 %v892_v15  ;;  %5116 = vmatprep.subr.mxu1 %v924_v25  ;;  %v1753_v15 = vadd.f32 %v7237_v48, %v1742_v29  ;;  %v983_v25 = vld [vmem:[%s9924_s4 + $0xf70] sm:$0xff]  ;;  %v950_v29 = vld [vmem:[%s9924_s4 + $0xe68] sm:$0xff] }
 0x117   : > { %5079 = vmatpush3.msra.mxu0 %v876_v19  ;;  %5117 = vmatpush3.msra.mxu1 %v908_v22  ;;  %v998_v19 = vld [vmem:[%s9924_s4 + $0xfe8] sm:$0xff]  ;;  %v1762_v22 = vmax.f32 %v1754_v17, 0.0  ;;  %v959_v17 = vld [vmem:[%s9924_s4 + $0xeb0] sm:$0xff] }
 0x118   : > { %5080 = vmatprep.subr.mxu0 %v891_v26  ;;  %5118 = vmatprep.subr.mxu1 %v923_v20  ;;  %v982_v26 = vld [vmem:[%s9924_s4 + $0xf68] sm:$0xff]  ;;  %v1761_v20 = vmax.f32 %v1753_v15, 0.0 }
 0x119   : > { %5081 = vmatpush3.msra.mxu0 %v875_v33  ;;  %5119 = vmatpush3.msra.mxu1 %v907_v35  ;;  %v997_v33 = vld [vmem:[%s9924_s4 + $0xfe0] sm:$0xff]  ;;  %v942_v15 = vld [vmem:[%s9924_s4 + $0xe28] sm:$0xff] }
 0x11a   : > { %5082 = vmatprep.subr.mxu0 %v890_v28  ;;  %5120 = vmatprep.subr.mxu1 %v922_v37  ;;  %v949_v35 = vld [vmem:[%s9924_s4 + $0xe60] sm:$0xff]  ;;  %v964_v28 = vld [vmem:[%s9924_s4 + $0xed8] sm:$0xff] }
 0x11b   : > { %5083 = vmatpush3.msra.mxu0 %v874_v41  ;;  %5121 = vmatpush3.msra.mxu1 %v906_v42  ;;  %v996_v37 = vld [vmem:[%s9924_s4 + $0xfd8] sm:$0xff]  ;;  %v963_v42 = vld [vmem:[%s9924_s4 + $0xed0] sm:$0xff] }
 0x11c   : > { %5084 = vmatprep.subr.mxu0 %v889_v46  ;;  %5122 = vmatprep.subr.mxu1 %v921_v51  ;;  %v980_v41 = vld [vmem:[%s9924_s4 + $0xf58] sm:$0xff]  ;;  %v947_v46 = vld [vmem:[%s9924_s4 + $0xe50] sm:$0xff] }
 0x11d   : > { %5085 = vmatpush3.msra.mxu0 %v873_v52  ;;  %3020 = vmatprep.mubr.f32.mxu0 %v1756_v49  ;;  %v979_v51 = vld [vmem:[%s9924_s4 + $0xf50] sm:$0xff]  ;;  %v962_v49 = vld [vmem:[%s9924_s4 + $0xec8] sm:$0xff] }
 0x11e   : > { %5123 = vmatpush3.msra.mxu1 %v905_v54  ;;  %3021 = vmatmul.mubr.f32.vlgmr.msra.gmra.mxu0 %v1755_v55  ;;  %v994_v52 = vld [vmem:[%s9924_s4 + $0xfc8] sm:$0xff] }
 0x11f   : > { %3095 = vmatprep.mubr.f32.mxu1 %v1758_v56  ;;  %5130 = vmatprep.subr.mxu0 %v968_v63  ;;  %v946_v55 = vld [vmem:[%s9924_s4 + $0xe48] sm:$0xff]  ;;  %v961_v56 = vld [vmem:[%s9924_s4 + $0xec0] sm:$0xff] }
 0x120   : > { %5168 = vmatprep.subr.mxu1 %v1000_v0  ;;  %3096 = vmatmul.mubr.f32.vlgmr.msra.gmra.mxu1 %v1757_v60  ;;  %v978_v54 = vld [vmem:[%s9924_s4 + $0xf48] sm:$0xff]  ;;  %v945_v63 = vld [vmem:[%s9924_s4 + $0xe40] sm:$0xff]  ;;  %v992_v0 = vld [vmem:[%s9924_s4 + $0xfb8] sm:$0xff] }
 0x121   : > { %5131 = vmatpush3.msra.mxu0 %v952_v5  ;;  %5169 = vmatpush3.msra.mxu1 %v984_v3  ;;  %v977_v60 = vld [vmem:[%s9924_s4 + $0xf40] sm:$0xff]  ;;  %v944_v5 = vld [vmem:[%s9924_s4 + $0xe38] sm:$0xff] }
 0x122   : > { %5132 = vmatprep.subr.mxu0 %v967_v7  ;;  %5170 = vmatprep.subr.mxu1 %v999_v21  ;;  %v976_v3 = vld [vmem:[%s9924_s4 + $0xf38] sm:$0xff]  ;;  %v991_v7 = vld [vmem:[%s9924_s4 + $0xfb0] sm:$0xff]  ;;  %v7761_v21 = vsub.s32 7, %v6108_v31  ;;  %v990_v31 = vld [vmem:[%s9924_s4 + $0xfa8] sm:$0xff] }
 0x123   : > { %3025 = vmatprep.mubr.f32.mxu0 %v1760_v9  ;;  %5133 = vmatpush3.msra.mxu0 %v951_v12  ;;  %v943_v9 = vld [vmem:[%s9924_s4 + $0xe30] sm:$0xff] }
 0x124   : > { %5171 = vmatpush3.msra.mxu1 %v983_v25  ;;  %3026 = vmatmul.mubr.f32.gmra.mxu0 %v1759_v13  ;;  %v975_v12 = vld [vmem:[%s9924_s4 + $0xf30] sm:$0xff]  ;;  %v958_v13 = vld [vmem:[%s9924_s4 + $0xea8] sm:$0xff] }
 0x125   : > { %5134 = vmatprep.subr.mxu0 %v966_v18  ;;  %5172 = vmatprep.subr.mxu1 %v998_v19  ;;  %v974_v25 = vld [vmem:[%s9924_s4 + $0xf28] sm:$0xff]  ;;  %v957_v18 = vld [vmem:[%s9924_s4 + $0xea0] sm:$0xff] }
 0x126   : > { %3100 = vmatprep.mubr.f32.mxu1 %v1762_v22  ;;  %5135 = vmatpush3.msra.mxu0 %v950_v29  ;;  %v989_v19 = vld [vmem:[%s9924_s4 + $0xfa0] sm:$0xff]  ;;  %v1770_v22 = vrot.slane %v6219_v4, %v7761_v21  ;;  %v988_v4 = vld [vmem:[%s9924_s4 + $0xf98] sm:$0xff] }
 0x127   : > { %5173 = vmatpush3.msra.mxu1 %v982_v26  ;;  %5136 = vmatprep.subr.mxu0 %v965_v32  ;;  %v941_v29 = vld [vmem:[%s9924_s4 + $0xe20] sm:$0xff]  ;;  %v956_v32 = vld [vmem:[%s9924_s4 + $0xe98] sm:$0xff] }
 0x128   : > { %3101 = vmatmul.mubr.f32.gmra.mxu1 %v1761_v20  ;;  %5174 = vmatprep.subr.mxu1 %v997_v33  ;;  %v973_v26 = vld [vmem:[%s9924_s4 + $0xf20] sm:$0xff]  ;;  %v1766_v20 = vrot.slane %v6229_v8, %v7761_v21  ;;  %v1778_v33 = vrot.slane %v6238_v11, %v7761_v21  ;;  %v972_v8 = vld [vmem:[%s9924_s4 + $0xf18] sm:$0xff]  ;;  %v987_v11 = vld [vmem:[%s9924_s4 + $0xf90] sm:$0xff] }
 0x129   : > { %5137 = vmatpush3.msra.mxu0 %v949_v35  ;;  %5175 = vmatpush3.msra.mxu1 %v981_v36  ;;  %v940_v35 = vld [vmem:[%s9924_s4 + $0xe18] sm:$0xff]  ;;  %v1774_v36 = vrot.slane %v6247_v14, %v7761_v21  ;;  %v971_v14 = vld [vmem:[%s9924_s4 + $0xf10] sm:$0xff] }
 0x12a   : > { %5138 = vmatprep.subr.mxu0 %v964_v28  ;;  %5176 = vmatprep.subr.mxu1 %v996_v37  ;;  %v955_v28 = vld [vmem:[%s9924_s4 + $0xe90] sm:$0xff]  ;;  %v1780_v37 = vadd.f32 %v7157_v2, %v1770_v22  ;;  %v986_v2 = vld [vmem:[%s9924_s4 + $0xf88] sm:$0xff] }
 0x12b   : > { %5139 = vmatpush3.msra.mxu0 %v948_v34  ;;  %5177 = vmatpush3.msra.mxu1 %v980_v41  ;;  %v939_v34 = vld [vmem:[%s9924_s4 + $0xe10] sm:$0xff]  ;;  %v1779_v41 = vadd.f32 %v7167_v6, %v1766_v20  ;;  %v970_v6 = vld [vmem:[%s9924_s4 + $0xf08] sm:$0xff] }
 0x12c   : > { %5140 = vmatprep.subr.mxu0 %v963_v42  ;;  %5178 = vmatprep.subr.mxu1 %v995_v45  ;;  %v954_v42 = vld [vmem:[%s9924_s4 + $0xe88] sm:$0xff]  ;;  %v1782_v45 = vadd.f32 %v7177_v10, %v1778_v33  ;;  %v985_v10 = vld [vmem:[%s9924_s4 + $0xf80] sm:$0xff] }
 0x12d   : > { %5141 = vmatpush3.msra.mxu0 %v947_v46  ;;  %5179 = vmatpush3.msra.mxu1 %v979_v51  ;;  %v938_v46 = vld [vmem:[%s9924_s4 + $0xe08] sm:$0xff]  ;;  %v1781_v51 = vadd.f32 %v7187_v16, %v1774_v36  ;;  %v969_v16 = vld [vmem:[%s9924_s4 + $0xf00] sm:$0xff] }
 0x12e   : > { %5142 = vmatprep.subr.mxu0 %v962_v49  ;;  %5180 = vmatprep.subr.mxu1 %v994_v52  ;;  %v953_v49 = vld [vmem:[%s9924_s4 + $0xe80] sm:$0xff]  ;;  %v1788_v52 = vmax.f32 %v1780_v37, 0.0  ;;  %v1026_v37 = vld [vmem:[%s9924_s4 + $0x10c8] sm:$0xff] }
 0x12f   : > { %5143 = vmatpush3.msra.mxu0 %v946_v55  ;;  %5181 = vmatpush3.msra.mxu1 %v978_v54  ;;  %v937_v55 = vld [vmem:[%s9924_s4 + $0xe00] sm:$0xff]  ;;  %v1787_v54 = vmax.f32 %v1779_v41, 0.0  ;;  %v1042_v41 = vld [vmem:[%s9924_s4 + $0x1148] sm:$0xff] }
 0x130   : > { %5144 = vmatprep.subr.mxu0 %v961_v56  ;;  %5182 = vmatprep.subr.mxu1 %v993_v58  ;;  %v1790_v56 = vmax.f32 %v1782_v45, 0.0  ;;  %v1784_v58 = vadd.f32 %v7204_v30, %v1770_v22  ;;  %v1016_v30 = vld [vmem:[%s9924_s4 + $0x1078] sm:$0xff]  ;;  %v1029_v22 = vld [vmem:[%s9924_s4 + $0x10e0] sm:$0xff] }
 0x131   : > { %5145 = vmatpush3.msra.mxu0 %v945_v63  ;;  %5183 = vmatpush3.msra.mxu1 %v977_v60  ;;  %v1032_v63 = vld [vmem:[%s9924_s4 + $0x10f8] sm:$0xff]  ;;  %v1789_v60 = vmax.f32 %v1781_v51, 0.0  ;;  %v1009_v45 = vld [vmem:[%s9924_s4 + $0x1040] sm:$0xff] }
 0x132   : > { %5146 = vmatprep.subr.mxu0 %v960_v62  ;;  %5184 = vmatprep.subr.mxu1 %v992_v0  ;;  %v1783_v62 = vadd.f32 %v7211_v24, %v1766_v20  ;;  %v1064_v0 = vld [vmem:[%s9924_s4 + $0x11f8] sm:$0xff]  ;;  %v1031_v24 = vld [vmem:[%s9924_s4 + $0x10f0] sm:$0xff]  ;;  %v1045_v20 = vld [vmem:[%s9924_s4 + $0x1160] sm:$0xff] }
 0x133   : > { %5147 = vmatpush3.msra.mxu0 %v944_v5  ;;  %5185 = vmatpush3.msra.mxu1 %v976_v3  ;;  %v1048_v5 = vld [vmem:[%s9924_s4 + $0x1178] sm:$0xff]  ;;  %v1786_v3 = vadd.f32 %v7224_v39, %v1778_v33  ;;  %v1785_v39 = vadd.f32 %v7237_v48, %v1774_v36  ;;  %v1014_v48 = vld [vmem:[%s9924_s4 + $0x1068] sm:$0xff]  ;;  %v1059_v36 = vld [vmem:[%s9924_s4 + $0x11d0] sm:$0xff] }
 0x134   : > { %5148 = vmatprep.subr.mxu0 %v959_v17  ;;  %5186 = vmatprep.subr.mxu1 %v991_v7  ;;  %v1063_v17 = vld [vmem:[%s9924_s4 + $0x11f0] sm:$0xff]  ;;  %v1792_v7 = vmax.f32 %v1784_v58, 0.0  ;;  %v1012_v33 = vld [vmem:[%s9924_s4 + $0x1058] sm:$0xff] }
 0x135   : > { %5149 = vmatpush3.msra.mxu0 %v943_v9  ;;  %5187 = vmatpush3.msra.mxu1 %v975_v12  ;;  %v1015_v9 = vld [vmem:[%s9924_s4 + $0x1070] sm:$0xff]  ;;  %v1791_v12 = vmax.f32 %v1783_v62, 0.0  ;;  %v1024_v51 = vld [vmem:[%s9924_s4 + $0x10b8] sm:$0xff] }
 0x136   : > { %5150 = vmatprep.subr.mxu0 %v958_v13  ;;  %5188 = vmatprep.subr.mxu1 %v990_v31  ;;  %v1047_v13 = vld [vmem:[%s9924_s4 + $0x1170] sm:$0xff]  ;;  %v1030_v31 = vld [vmem:[%s9924_s4 + $0x10e8] sm:$0xff] }
 0x137   : > { %5151 = vmatpush3.msra.mxu0 %v942_v15  ;;  %5189 = vmatpush3.msra.mxu1 %v974_v25  ;;  %v1062_v15 = vld [vmem:[%s9924_s4 + $0x11e8] sm:$0xff]  ;;  %v1794_v25 = vmax.f32 %v1786_v3, 0.0  ;;  %v1039_v62 = vld [vmem:[%s9924_s4 + $0x1130] sm:$0xff] }
 0x138   : > { %5152 = vmatprep.subr.mxu0 %v957_v18  ;;  %5190 = vmatprep.subr.mxu1 %v989_v19  ;;  %v1046_v18 = vld [vmem:[%s9924_s4 + $0x1168] sm:$0xff]  ;;  %v1793_v19 = vmax.f32 %v1785_v39, 0.0  ;;  %v1020_v39 = vld [vmem:[%s9924_s4 + $0x1098] sm:$0xff] }
 0x139   : > { %5153 = vmatpush3.msra.mxu0 %v941_v29  ;;  %5191 = vmatpush3.msra.mxu1 %v973_v26  ;;  %v1061_v29 = vld [vmem:[%s9924_s4 + $0x11e0] sm:$0xff]  ;;  %v1038_v3 = vld [vmem:[%s9924_s4 + $0x1128] sm:$0xff] }
 0x13a   : > { %5154 = vmatprep.subr.mxu0 %v956_v32  ;;  %5192 = vmatprep.subr.mxu1 %v988_v4  ;;  %v1013_v26 = vld [vmem:[%s9924_s4 + $0x1060] sm:$0xff]  ;;  %v1028_v32 = vld [vmem:[%s9924_s4 + $0x10d8] sm:$0xff] }
 0x13b   : > { %5155 = vmatpush3.msra.mxu0 %v940_v35  ;;  %5193 = vmatpush3.msra.mxu1 %v972_v8  ;;  %v1060_v4 = vld [vmem:[%s9924_s4 + $0x11d8] sm:$0xff]  ;;  %v1027_v8 = vld [vmem:[%s9924_s4 + $0x10d0] sm:$0xff] }
 0x13c   : > { %5156 = vmatprep.subr.mxu0 %v955_v28  ;;  %5194 = vmatprep.subr.mxu1 %v987_v11  ;;  %v1044_v35 = vld [vmem:[%s9924_s4 + $0x1158] sm:$0xff]  ;;  %v1011_v28 = vld [vmem:[%s9924_s4 + $0x1050] sm:$0xff] }
 0x13d   : > { %5157 = vmatpush3.msra.mxu0 %v939_v34  ;;  %5195 = vmatpush3.msra.mxu1 %v971_v14  ;;  %v1043_v11 = vld [vmem:[%s9924_s4 + $0x1150] sm:$0xff]  ;;  %v1058_v34 = vld [vmem:[%s9924_s4 + $0x11c8] sm:$0xff] }
 0x13e   : > { %5158 = vmatprep.subr.mxu0 %v954_v42  ;;  %5196 = vmatprep.subr.mxu1 %v986_v2  ;;  %v1010_v14 = vld [vmem:[%s9924_s4 + $0x1048] sm:$0xff]  ;;  %v1025_v42 = vld [vmem:[%s9924_s4 + $0x10c0] sm:$0xff] }
 0x13f   : > { %5159 = vmatpush3.msra.mxu0 %v938_v46  ;;  %5197 = vmatpush3.msra.mxu1 %v970_v6  ;;  %v1057_v2 = vld [vmem:[%s9924_s4 + $0x11c0] sm:$0xff]  ;;  %v485_v6 = vld [vmem:[%s6150_s21 + $0x68] sm:$0xff] }
 0x140   : > { %5160 = vmatprep.subr.mxu0 %v953_v49  ;;  %5198 = vmatprep.subr.mxu1 %v985_v10  ;;  %v1041_v46 = vld [vmem:[%s9924_s4 + $0x1140] sm:$0xff]  ;;  %v1056_v49 = vld [vmem:[%s9924_s4 + $0x11b8] sm:$0xff]  ;;  %v7975_v58 = vadd.f32 %v6180_v53, %v485_v6  ;;  %v1022_v53 = vld [vmem:[%s9924_s4 + $0x10a8] sm:$0xff] }
 0x141   : > { %5161 = vmatpush3.msra.mxu0 %v937_v55  ;;  %3170 = vmatprep.mubr.f32.mxu0 %v1788_v52  ;;  %v484_v10 = vld [vmem:[%s6150_s21 + $0x60] sm:$0xff]  ;;  %v1008_v52 = vld [vmem:[%s9924_s4 + $0x1038] sm:$0xff]  ;;  %v8093_v6 = vld [vmem:[%s6150_s21 + $0x48] sm:$0xff] }
 0x142   : > { %5199 = vmatpush3.msra.mxu1 %v969_v16  ;;  %3171 = vmatmul.mubr.f32.vlgmr.msra.gmra.mxu0 %v1787_v54  ;;  %v1040_v55 = vld [vmem:[%s9924_s4 + $0x1138] sm:$0xff]  ;;  %v1023_v16 = vld [vmem:[%s9924_s4 + $0x10b0] sm:$0xff] }
 0x143   : > { %3245 = vmatprep.mubr.f32.mxu1 %v1790_v56  ;;  %5206 = vmatprep.subr.mxu0 %v1032_v63  ;;  %v487_v54 = vld [vmem:[%s6150_s21 + $0x78] sm:$0xff]  ;;  %v1055_v56 = vld [vmem:[%s9924_s4 + $0x11b0] sm:$0xff] }
 0x144   : > { %5244 = vmatprep.subr.mxu1 %v1064_v0  ;;  %3246 = vmatmul.mubr.f32.vlgmr.msra.gmra.mxu1 %v1789_v60  ;;  %v486_v63 = vld [vmem:[%s6150_s21 + $0x70] sm:$0xff]  ;;  %v7985_v0 = vadd.f32 %v6190_v57, %v484_v10  ;;  %v1006_v57 = vld [vmem:[%s9924_s4 + $0x1028] sm:$0xff] }
 0x145   : > { %5207 = vmatpush3.msra.mxu0 %v1016_v30  ;;  %5245 = vmatpush3.msra.mxu1 %v1048_v5  ;;  %v1007_v60 = vld [vmem:[%s9924_s4 + $0x1030] sm:$0xff]  ;;  %v1054_v30 = vld [vmem:[%s9924_s4 + $0x11a8] sm:$0xff]  ;;  %v7994_v5 = vadd.f32 %v6200_v61, %v487_v54  ;;  %v1021_v61 = vld [vmem:[%s9924_s4 + $0x10a0] sm:$0xff] }
 0x146   : > { %5208 = vmatprep.subr.mxu0 %v1031_v24  ;;  %5246 = vmatprep.subr.mxu1 %v1063_v17  ;;  %v8003_v24 = vadd.f32 %v6210_v1, %v486_v63  ;;  %v1053_v17 = vld [vmem:[%s9924_s4 + $0x11a0] sm:$0xff]  ;;  %v1128_v54 = vld [vmem:[%s9924_s4 + $0x13f8] sm:$0xff] }
 0x147   : > { %3175 = vmatprep.mubr.f32.mxu0 %v1792_v7  ;;  %5209 = vmatpush3.msra.mxu0 %v1015_v9  ;;  %v1806_v7 = vrot.slane %v7975_v58, %v6145_v43  ;;  %v1005_v1 = vld [vmem:[%s9924_s4 + $0x1020] sm:$0xff]  ;;  %v8113_v63 = vld [vmem:[%s6150_s21 + $0x58] sm:$0xff] }
 0x148   : > { %5247 = vmatpush3.msra.mxu1 %v1047_v13  ;;  %3176 = vmatmul.mubr.f32.gmra.mxu0 %v1791_v12  ;;  %v1037_v9 = vld [vmem:[%s9924_s4 + $0x1120] sm:$0xff]  ;;  %v1802_v12 = vrot.slane %v7985_v0, %v6145_v43  ;;  %v1052_v13 = vld [vmem:[%s9924_s4 + $0x1198] sm:$0xff] }
 0x149   : > { %5210 = vmatprep.subr.mxu0 %v1030_v31  ;;  %5248 = vmatprep.subr.mxu1 %v1062_v15  ;;  %v1814_v31 = vrot.slane %v7994_v5, %v6145_v43  ;;  %v1004_v15 = vld [vmem:[%s9924_s4 + $0x1018] sm:$0xff] }
 0x14a   : > { %3250 = vmatprep.mubr.f32.mxu1 %v1794_v25  ;;  %5211 = vmatpush3.msra.mxu0 %v1014_v48  ;;  %v1036_v25 = vld [vmem:[%s9924_s4 + $0x1118] sm:$0xff]  ;;  %v8037_v48 = vrot.slane %v8003_v24, %v6145_v43  ;;  %v1003_v43 = vld [vmem:[%s9924_s4 + $0x1010] sm:$0xff] }
 0x14b   : > { %5249 = vmatpush3.msra.mxu1 %v1046_v18  ;;  %5212 = vmatprep.subr.mxu0 %v1029_v22  ;;  %v1019_v18 = vld [vmem:[%s9924_s4 + $0x1090] sm:$0xff]  ;;  %v8046_v22 = vld [vmem:[%s6150_s21 + $0x8] sm:$0xff] }
 0x14c   : > { %3251 = vmatmul.mubr.f32.gmra.mxu1 %v1793_v19  ;;  %5250 = vmatprep.subr.mxu1 %v1061_v29  ;;  %v1051_v19 = vld [vmem:[%s9924_s4 + $0x1190] sm:$0xff]  ;;  %v1816_v29 = vadd.f32 %v8046_v22, %v1806_v7 }
 0x14d   : > { %5213 = vmatpush3.msra.mxu0 %v1013_v26  ;;  %5251 = vmatpush3.msra.mxu1 %v1045_v20  ;;  %v1035_v26 = vld [vmem:[%s9924_s4 + $0x1110] sm:$0xff]  ;;  %v8056_v20 = vld [vmem:[%s6150_s21] sm:$0xff] }
 0x14e   : > { %5214 = vmatprep.subr.mxu0 %v1028_v32  ;;  %5252 = vmatprep.subr.mxu1 %v1060_v4  ;;  %v1815_v32 = vadd.f32 %v8056_v20, %v1802_v12  ;;  %v1018_v4 = vld [vmem:[%s9924_s4 + $0x1088] sm:$0xff] }
 0x14f   : > { %5215 = vmatpush3.msra.mxu0 %v1012_v33  ;;  %5253 = vmatpush3.msra.mxu1 %v1044_v35  ;;  %v1050_v33 = vld [vmem:[%s9924_s4 + $0x1188] sm:$0xff]  ;;  %v8066_v35 = vld [vmem:[%s6150_s21 + $0x18] sm:$0xff] }
 0x150   : > { %5216 = vmatprep.subr.mxu0 %v1027_v8  ;;  %5254 = vmatprep.subr.mxu1 %v1059_v36  ;;  %v1818_v8 = vadd.f32 %v8066_v35, %v1814_v31  ;;  %v1002_v36 = vld [vmem:[%s9924_s4 + $0x1008] sm:$0xff] }
 0x151   : > { %5217 = vmatpush3.msra.mxu0 %v1011_v28  ;;  %5255 = vmatpush3.msra.mxu1 %v1043_v11  ;;  %v1034_v28 = vld [vmem:[%s9924_s4 + $0x1108] sm:$0xff]  ;;  %v8076_v11 = vld [vmem:[%s6150_s21 + $0x10] sm:$0xff] }
 0x152   : > { %5218 = vmatprep.subr.mxu0 %v1026_v37  ;;  %5256 = vmatprep.subr.mxu1 %v1058_v34  ;;  %v1817_v37 = vadd.f32 %v8076_v11, %v8037_v48  ;;  %v1017_v34 = vld [vmem:[%s9924_s4 + $0x1080] sm:$0xff] }
 0x153   : > { %5219 = vmatpush3.msra.mxu0 %v1010_v14  ;;  %5257 = vmatpush3.msra.mxu1 %v1042_v41  ;;  %v1049_v14 = vld [vmem:[%s9924_s4 + $0x1180] sm:$0xff]  ;;  %v1824_v41 = vmax.f32 %v1816_v29, 0.0  ;;  %v1124_v29 = vld [vmem:[%s9924_s4 + $0x13d8] sm:$0xff] }
 0x154   : > { %5220 = vmatprep.subr.mxu0 %v1025_v42  ;;  %5258 = vmatprep.subr.mxu1 %v1057_v2  ;;  %v1001_v42 = vld [vmem:[%s9924_s4 + $0x1000] sm:$0xff]  ;;  %v1823_v2 = vmax.f32 %v1815_v32, 0.0  ;;  %v1825_v10 = vmax.f32 %v1817_v37, 0.0  ;;  %v1091_v32 = vld [vmem:[%s9924_s4 + $0x12d0] sm:$0xff]  ;;  %v1074_v37 = vld [vmem:[%s9924_s4 + $0x1248] sm:$0xff] }
 0x155   : > { %5221 = vmatpush3.msra.mxu0 %v1009_v45  ;;  %5259 = vmatpush3.msra.mxu1 %v1041_v46  ;;  %v1033_v45 = vld [vmem:[%s9924_s4 + $0x1100] sm:$0xff]  ;;  %v1826_v46 = vmax.f32 %v1818_v8, 0.0  ;;  %v1107_v8 = vld [vmem:[%s9924_s4 + $0x1350] sm:$0xff] }
 0x156   : > { %5222 = vmatprep.subr.mxu0 %v1024_v51  ;;  %5260 = vmatprep.subr.mxu1 %v1056_v49  ;;  %v1820_v51 = vadd.f32 %v8093_v6, %v1806_v7  ;;  %v1096_v49 = vld [vmem:[%s9924_s4 + $0x12f8] sm:$0xff]  ;;  %v1111_v7 = vld [vmem:[%s9924_s4 + $0x1370] sm:$0xff] }
 0x157   : > { %5223 = vmatpush3.msra.mxu0 %v1008_v52  ;;  %5261 = vmatpush3.msra.mxu1 %v1040_v55  ;;  %v8100_v52 = vld [vmem:[%s6150_s21 + $0x40] sm:$0xff] }
 0x158   : > { %5224 = vmatprep.subr.mxu0 %v1023_v16  ;;  %5262 = vmatprep.subr.mxu1 %v1055_v56  ;;  %v1819_v55 = vadd.f32 %v8100_v52, %v1802_v12  ;;  %v1080_v16 = vld [vmem:[%s9924_s4 + $0x1278] sm:$0xff] }
 0x159   : > { %5225 = vmatpush3.msra.mxu0 %v1007_v60  ;;  %5263 = vmatpush3.msra.mxu1 %v1039_v62  ;;  %v1112_v56 = vld [vmem:[%s9924_s4 + $0x1378] sm:$0xff]  ;;  %v1822_v60 = vadd.f32 %v8113_v63, %v1814_v31  ;;  %v1095_v62 = vld [vmem:[%s9924_s4 + $0x12f0] sm:$0xff] }
 0x15a   : > { %5226 = vmatprep.subr.mxu0 %v1022_v53  ;;  %5264 = vmatprep.subr.mxu1 %v1054_v30  ;;  %v1127_v53 = vld [vmem:[%s9924_s4 + $0x13f0] sm:$0xff]  ;;  %v1828_v30 = vmax.f32 %v1820_v51, 0.0  ;;  %v1072_v51 = vld [vmem:[%s9924_s4 + $0x1238] sm:$0xff] }
 0x15b   : > { %5227 = vmatpush3.msra.mxu0 %v1006_v57  ;;  %5265 = vmatpush3.msra.mxu1 %v1038_v3  ;;  %v1079_v57 = vld [vmem:[%s9924_s4 + $0x1270] sm:$0xff]  ;;  %v1827_v3 = vmax.f32 %v1819_v55, 0.0  ;;  %v1830_v12 = vmax.f32 %v1822_v60, 0.0  ;;  %v1118_v60 = vld [vmem:[%s9924_s4 + $0x13a8] sm:$0xff] }
 0x15c   : > { %5228 = vmatprep.subr.mxu0 %v1021_v61  ;;  %5266 = vmatprep.subr.mxu1 %v1053_v17  ;;  %v8126_v61 = vld [vmem:[%s6150_s21 + $0x50] sm:$0xff] }
 0x15d   : > { %5229 = vmatpush3.msra.mxu0 %v1005_v1  ;;  %5267 = vmatpush3.msra.mxu1 %v1037_v9  ;;  %v1821_v17 = vadd.f32 %v8126_v61, %v8037_v48  ;;  %v1094_v1 = vld [vmem:[%s9924_s4 + $0x12e8] sm:$0xff]  ;;  %v1077_v48 = vld [vmem:[%s9924_s4 + $0x1260] sm:$0xff]  ;;  %v1119_v55 = vld [vmem:[%s9924_s4 + $0x13b0] sm:$0xff] }
 0x15e   : > { %5230 = vmatprep.subr.mxu0 %v1020_v39  ;;  %5268 = vmatprep.subr.mxu1 %v1052_v13  ;;  %v1126_v9 = vld [vmem:[%s9924_s4 + $0x13e8] sm:$0xff] }
 0x15f   : > { %5231 = vmatpush3.msra.mxu0 %v1004_v15  ;;  %5269 = vmatpush3.msra.mxu1 %v1036_v25  ;;  %v1078_v39 = vld [vmem:[%s9924_s4 + $0x1268] sm:$0xff]  ;;  %v1829_v31 = vmax.f32 %v1821_v17, 0.0  ;;  %v1093_v15 = vld [vmem:[%s9924_s4 + $0x12e0] sm:$0xff] }
 0x160   : > { %5232 = vmatprep.subr.mxu0 %v1019_v18  ;;  %5270 = vmatprep.subr.mxu1 %v1051_v19  ;;  %v1110_v13 = vld [vmem:[%s9924_s4 + $0x1368] sm:$0xff]  ;;  %v1125_v25 = vld [vmem:[%s9924_s4 + $0x13e0] sm:$0xff]  ;;  %v1092_v19 = vld [vmem:[%s9924_s4 + $0x12d8] sm:$0xff] }
 0x161   : > { %5233 = vmatpush3.msra.mxu0 %v1003_v43  ;;  %5271 = vmatpush3.msra.mxu1 %v1035_v26  ;;  %v1109_v18 = vld [vmem:[%s9924_s4 + $0x1360] sm:$0xff]  ;;  %v1076_v43 = vld [vmem:[%s9924_s4 + $0x1258] sm:$0xff] }
 0x162   : > { %5234 = vmatprep.subr.mxu0 %v1018_v4  ;;  %5272 = vmatprep.subr.mxu1 %v1050_v33  ;;  %v1108_v26 = vld [vmem:[%s9924_s4 + $0x1358] sm:$0xff]  ;;  %v1123_v4 = vld [vmem:[%s9924_s4 + $0x13d0] sm:$0xff]  ;;  %v1069_v17 = vld [vmem:[%s9924_s4 + $0x1220] sm:$0xff] }
 0x163   : > { %5235 = vmatpush3.msra.mxu0 %v1002_v36  ;;  %5273 = vmatpush3.msra.mxu1 %v1034_v28  ;;  %v1075_v33 = vld [vmem:[%s9924_s4 + $0x1250] sm:$0xff]  ;;  %v1090_v36 = vld [vmem:[%s9924_s4 + $0x12c8] sm:$0xff] }
 0x164   : > { %5236 = vmatprep.subr.mxu0 %v1017_v34  ;;  %5274 = vmatprep.subr.mxu1 %v1049_v14  ;;  %v1122_v28 = vld [vmem:[%s9924_s4 + $0x13c8] sm:$0xff]  ;;  %v1089_v14 = vld [vmem:[%s9924_s4 + $0x12c0] sm:$0xff] }
 0x165   : > { %5237 = vmatpush3.msra.mxu0 %v1001_v42  ;;  %3320 = vmatprep.mubr.f32.mxu0 %v1824_v41  ;;  %v1106_v34 = vld [vmem:[%s9924_s4 + $0x1348] sm:$0xff]  ;;  %v1121_v41 = vld [vmem:[%s9924_s4 + $0x13c0] sm:$0xff] }
 0x166   : > { %5275 = vmatpush3.msra.mxu1 %v1033_v45  ;;  %3321 = vmatmul.mubr.f32.vlgmr.msra.gmra.mxu0 %v1823_v2  ;;  %v1073_v42 = vld [vmem:[%s9924_s4 + $0x1240] sm:$0xff]  ;;  %v1088_v45 = vld [vmem:[%s9924_s4 + $0x12b8] sm:$0xff] }
 0x167   : > { %3395 = vmatprep.mubr.f32.mxu1 %v1826_v46  ;;  %5282 = vmatprep.subr.mxu0 %v1096_v49  ;;  %v1105_v2 = vld [vmem:[%s9924_s4 + $0x1340] sm:$0xff]  ;;  %v1120_v46 = vld [vmem:[%s9924_s4 + $0x13b8] sm:$0xff] }
 0x168   : > { %5320 = vmatprep.subr.mxu1 %v1128_v54  ;;  %3396 = vmatmul.mubr.f32.vlgmr.msra.gmra.mxu1 %v1825_v10  ;;  %v1104_v49 = vld [vmem:[%s9924_s4 + $0x1338] sm:$0xff]  ;;  %v1087_v10 = vld [vmem:[%s9924_s4 + $0x12b0] sm:$0xff] }
 0x169   : > { %5283 = vmatpush3.msra.mxu0 %v1080_v16  ;;  %5321 = vmatpush3.msra.mxu1 %v1112_v56  ;;  %v1071_v54 = vld [vmem:[%s9924_s4 + $0x1230] sm:$0xff]  ;;  %v1086_v56 = vld [vmem:[%s9924_s4 + $0x12a8] sm:$0xff] }
 0x16a   : > { %5284 = vmatprep.subr.mxu0 %v1095_v62  ;;  %5322 = vmatprep.subr.mxu1 %v1127_v53  ;;  %v1103_v16 = vld [vmem:[%s9924_s4 + $0x1330] sm:$0xff]  ;;  %v1070_v62 = vld [vmem:[%s9924_s4 + $0x1228] sm:$0xff] }
 0x16b   : > { %3325 = vmatprep.mubr.f32.mxu0 %v1828_v30  ;;  %5285 = vmatpush3.msra.mxu0 %v1079_v57  ;;  %v1102_v53 = vld [vmem:[%s9924_s4 + $0x1328] sm:$0xff]  ;;  %v1085_v30 = vld [vmem:[%s9924_s4 + $0x12a0] sm:$0xff] }
 0x16c   : > { %5323 = vmatpush3.msra.mxu1 %v1111_v7  ;;  %3326 = vmatmul.mubr.f32.gmra.mxu0 %v1827_v3  ;;  %v1117_v57 = vld [vmem:[%s9924_s4 + $0x13a0] sm:$0xff]  ;;  %v1838_v3 = vrot.slane %v7975_v58, %v6136_v40 }
 0x16d   : > { %5286 = vmatprep.subr.mxu0 %v1094_v1  ;;  %5324 = vmatprep.subr.mxu1 %v1126_v9  ;;  %v1101_v7 = vld [vmem:[%s9924_s4 + $0x1320] sm:$0xff]  ;;  %v1834_v1 = vrot.slane %v7985_v0, %v6136_v40  ;;  %v1084_v9 = vld [vmem:[%s9924_s4 + $0x1298] sm:$0xff] }
 0x16e   : > { %3400 = vmatprep.mubr.f32.mxu1 %v1830_v12  ;;  %5287 = vmatpush3.msra.mxu0 %v1078_v39  ;;  %v1116_v12 = vld [vmem:[%s9924_s4 + $0x1398] sm:$0xff]  ;;  %v1846_v39 = vrot.slane %v7994_v5, %v6136_v40 }
 0x16f   : > { %5325 = vmatpush3.msra.mxu1 %v1110_v13  ;;  %5288 = vmatprep.subr.mxu0 %v1093_v15  ;;  %v1068_v13 = vld [vmem:[%s9924_s4 + $0x1218] sm:$0xff]  ;;  %v1842_v15 = vrot.slane %v8003_v24, %v6136_v40  ;;  %v1099_v40 = vld [vmem:[%s9924_s4 + $0x1310] sm:$0xff] }
 0x170   : > { %3401 = vmatmul.mubr.f32.gmra.mxu1 %v1829_v31  ;;  %5326 = vmatprep.subr.mxu1 %v1125_v25  ;;  %v1100_v31 = vld [vmem:[%s9924_s4 + $0x1318] sm:$0xff]  ;;  %v1083_v25 = vld [vmem:[%s9924_s4 + $0x1290] sm:$0xff] }
 0x171   : > { %5289 = vmatpush3.msra.mxu0 %v1077_v48  ;;  %5327 = vmatpush3.msra.mxu1 %v1109_v18  ;;  %v1115_v48 = vld [vmem:[%s9924_s4 + $0x1390] sm:$0xff]  ;;  %v1848_v18 = vadd.f32 %v8046_v22, %v1838_v3 }
 0x172   : > { %5290 = vmatprep.subr.mxu0 %v1092_v19  ;;  %5328 = vmatprep.subr.mxu1 %v1124_v29  ;;  %v1067_v19 = vld [vmem:[%s9924_s4 + $0x1210] sm:$0xff]  ;;  %v1847_v29 = vadd.f32 %v8056_v20, %v1834_v1 }
 0x173   : > { %5291 = vmatpush3.msra.mxu0 %v1076_v43  ;;  %5329 = vmatpush3.msra.mxu1 %v1108_v26  ;;  %v1082_v43 = vld [vmem:[%s9924_s4 + $0x1288] sm:$0xff] }
 0x174   : > { %5292 = vmatprep.subr.mxu0 %v1091_v32  ;;  %5330 = vmatprep.subr.mxu1 %v1123_v4  ;;  %v1114_v26 = vld [vmem:[%s9924_s4 + $0x1388] sm:$0xff]  ;;  %v1850_v32 = vadd.f32 %v8066_v35, %v1846_v39 }
 0x175   : > { %5293 = vmatpush3.msra.mxu0 %v1075_v33  ;;  %5331 = vmatpush3.msra.mxu1 %v1107_v8  ;;  %v1066_v4 = vld [vmem:[%s9924_s4 + $0x1208] sm:$0xff]  ;;  %v1849_v8 = vadd.f32 %v8076_v11, %v1842_v15 }
 0x176   : > { %5294 = vmatprep.subr.mxu0 %v1090_v36  ;;  %5332 = vmatprep.subr.mxu1 %v1122_v28  ;;  %v1098_v33 = vld [vmem:[%s9924_s4 + $0x1308] sm:$0xff]  ;;  %v1081_v36 = vld [vmem:[%s9924_s4 + $0x1280] sm:$0xff] }
 0x177   : > { %5295 = vmatpush3.msra.mxu0 %v1074_v37  ;;  %5333 = vmatpush3.msra.mxu1 %v1106_v34  ;;  %v1113_v28 = vld [vmem:[%s9924_s4 + $0x1380] sm:$0xff]  ;;  %v1856_v37 = vmax.f32 %v1848_v18, 0.0  ;;  %v1140_v18 = vld [vmem:[%s9924_s4 + $0x1458] sm:$0xff] }
 0x178   : > { %5296 = vmatprep.subr.mxu0 %v1089_v14  ;;  %5334 = vmatprep.subr.mxu1 %v1121_v41  ;;  %v1065_v34 = vld [vmem:[%s9924_s4 + $0x1200] sm:$0xff]  ;;  %v1855_v14 = vmax.f32 %v1847_v29, 0.0  ;;  %v1187_v29 = vld [vmem:[%s9924_s4 + $0x15d0] sm:$0xff] }
 0x179   : > { %5297 = vmatpush3.msra.mxu0 %v1073_v42  ;;  %5335 = vmatpush3.msra.mxu1 %v1105_v2  ;;  %v1097_v41 = vld [vmem:[%s9924_s4 + $0x1300] sm:$0xff]  ;;  %v1858_v42 = vmax.f32 %v1850_v32, 0.0  ;;  %v1852_v2 = vadd.f32 %v8093_v6, %v1838_v3  ;;  %v1158_v3 = vld [vmem:[%s9924_s4 + $0x14e8] sm:$0xff] }
 0x17a   : > { %5298 = vmatprep.subr.mxu0 %v1088_v45  ;;  %5336 = vmatprep.subr.mxu1 %v1120_v46  ;;  %v1160_v45 = vld [vmem:[%s9924_s4 + $0x14f8] sm:$0xff]  ;;  %v1857_v46 = vmax.f32 %v1849_v8, 0.0  ;;  %v1154_v32 = vld [vmem:[%s9924_s4 + $0x14c8] sm:$0xff] }
 0x17b   : > { %5299 = vmatpush3.msra.mxu0 %v1072_v51  ;;  %5337 = vmatpush3.msra.mxu1 %v1104_v49  ;;  %v1851_v51 = vadd.f32 %v8100_v52, %v1834_v1  ;;  %v1192_v49 = vld [vmem:[%s9924_s4 + $0x15f8] sm:$0xff]  ;;  %v1142_v1 = vld [vmem:[%s9924_s4 + $0x1468] sm:$0xff] }
 0x17c   : > { %5300 = vmatprep.subr.mxu0 %v1087_v10  ;;  %5338 = vmatprep.subr.mxu1 %v1119_v55  ;;  %v1144_v10 = vld [vmem:[%s9924_s4 + $0x1478] sm:$0xff]  ;;  %v1170_v8 = vld [vmem:[%s9924_s4 + $0x1548] sm:$0xff] }
 0x17d   : > { %5301 = vmatpush3.msra.mxu0 %v1071_v54  ;;  %5339 = vmatpush3.msra.mxu1 %v1103_v16  ;;  %v1176_v55 = vld [vmem:[%s9924_s4 + $0x1578] sm:$0xff]  ;;  %v1854_v54 = vadd.f32 %v8113_v63, %v1846_v39  ;;  %v1159_v16 = vld [vmem:[%s9924_s4 + $0x14f0] sm:$0xff]  ;;  %v1157_v39 = vld [vmem:[%s9924_s4 + $0x14e0] sm:$0xff] }
 0x17e   : > { %5302 = vmatprep.subr.mxu0 %v1086_v56  ;;  %5340 = vmatprep.subr.mxu1 %v1118_v60  ;;  %v1191_v56 = vld [vmem:[%s9924_s4 + $0x15f0] sm:$0xff]  ;;  %v1860_v60 = vmax.f32 %v1852_v2, 0.0  ;;  %v1168_v2 = vld [vmem:[%s9924_s4 + $0x1538] sm:$0xff] }
 0x17f   : > { %5303 = vmatpush3.msra.mxu0 %v1070_v62  ;;  %5341 = vmatpush3.msra.mxu1 %v1102_v53  ;;  %v1143_v62 = vld [vmem:[%s9924_s4 + $0x1470] sm:$0xff]  ;;  %v1859_v53 = vmax.f32 %v1851_v51, 0.0 }
 0x180   : > { %5304 = vmatprep.subr.mxu0 %v1085_v30  ;;  %5342 = vmatprep.subr.mxu1 %v1117_v57  ;;  %v1853_v30 = vadd.f32 %v8126_v61, %v1842_v15  ;;  %v1175_v57 = vld [vmem:[%s9924_s4 + $0x1570] sm:$0xff]  ;;  %v1173_v15 = vld [vmem:[%s9924_s4 + $0x1560] sm:$0xff] }
 0x181   : > { %5305 = vmatpush3.msra.mxu0 %v1069_v17  ;;  %5343 = vmatpush3.msra.mxu1 %v1101_v7  ;;  %v1190_v17 = vld [vmem:[%s9924_s4 + $0x15e8] sm:$0xff]  ;;  %v1862_v7 = vmax.f32 %v1854_v54, 0.0  ;;  %v1135_v51 = vld [vmem:[%s9924_s4 + $0x1430] sm:$0xff] }
 0x182   : > { %5306 = vmatprep.subr.mxu0 %v1084_v9  ;;  %5344 = vmatprep.subr.mxu1 %v1116_v12  ;;  %v1174_v9 = vld [vmem:[%s9924_s4 + $0x1568] sm:$0xff]  ;;  %v1861_v12 = vmax.f32 %v1853_v30, 0.0  ;;  %v1165_v30 = vld [vmem:[%s9924_s4 + $0x1520] sm:$0xff] }
 0x183   : > { %5307 = vmatpush3.msra.mxu0 %v1068_v13  ;;  %5345 = vmatpush3.msra.mxu1 %v1100_v31  ;;  %v1189_v13 = vld [vmem:[%s9924_s4 + $0x15e0] sm:$0xff]  ;;  %v1134_v54 = vld [vmem:[%s9924_s4 + $0x1428] sm:$0xff] }
 0x184   : > { %5308 = vmatprep.subr.mxu0 %v1083_v25  ;;  %5346 = vmatprep.subr.mxu1 %v1115_v48  ;;  %v1141_v31 = vld [vmem:[%s9924_s4 + $0x1460] sm:$0xff]  ;;  %v1156_v25 = vld [vmem:[%s9924_s4 + $0x14d8] sm:$0xff] }
 0x185   : > { %5309 = vmatpush3.msra.mxu0 %v1067_v19  ;;  %5347 = vmatpush3.msra.mxu1 %v1099_v40  ;;  %v1188_v48 = vld [vmem:[%s9924_s4 + $0x15d8] sm:$0xff]  ;;  %v1155_v40 = vld [vmem:[%s9924_s4 + $0x14d0] sm:$0xff] }
 0x186   : > { %5310 = vmatprep.subr.mxu0 %v1082_v43  ;;  %5348 = vmatprep.subr.mxu1 %v1114_v26  ;;  %v1172_v19 = vld [vmem:[%s9924_s4 + $0x1558] sm:$0xff]  ;;  %v1139_v43 = vld [vmem:[%s9924_s4 + $0x1450] sm:$0xff] }
 0x187   : > { %5311 = vmatpush3.msra.mxu0 %v1066_v4  ;;  %5349 = vmatpush3.msra.mxu1 %v1098_v33  ;;  %v1171_v26 = vld [vmem:[%s9924_s4 + $0x1550] sm:$0xff]  ;;  %v1186_v4 = vld [vmem:[%s9924_s4 + $0x15c8] sm:$0xff] }
 0x188   : > { %5312 = vmatprep.subr.mxu0 %v1081_v36  ;;  %5350 = vmatprep.subr.mxu1 %v1113_v28  ;;  %v1138_v33 = vld [vmem:[%s9924_s4 + $0x1448] sm:$0xff]  ;;  %v1153_v36 = vld [vmem:[%s9924_s4 + $0x14c0] sm:$0xff] }
 0x189   : > { %5313 = vmatpush3.msra.mxu0 %v1065_v34  ;;  %3470 = vmatprep.mubr.f32.mxu0 %v1856_v37  ;;  %v1185_v28 = vld [vmem:[%s9924_s4 + $0x15c0] sm:$0xff] }
 0x18a   : > { %5351 = vmatpush3.msra.mxu1 %v1097_v41  ;;  %3471 = vmatmul.mubr.f32.vlgmr.msra.gmra.mxu0 %v1855_v14  ;;  %v1137_v37 = vld [vmem:[%s9924_s4 + $0x1440] sm:$0xff]  ;;  %v1152_v14 = vld [vmem:[%s9924_s4 + $0x14b8] sm:$0xff] }
 0x18b   : > { %3545 = vmatprep.mubr.f32.mxu1 %v1858_v42  ;;  %5358 = vmatprep.subr.mxu0 %v1160_v45  ;;  %v1169_v34 = vld [vmem:[%s9924_s4 + $0x1540] sm:$0xff]  ;;  %v1184_v41 = vld [vmem:[%s9924_s4 + $0x15b8] sm:$0xff]  ;;  %v1151_v45 = vld [vmem:[%s9924_s4 + $0x14b0] sm:$0xff] }
 0x18c   : > { %5396 = vmatprep.subr.mxu1 %v1192_v49  ;;  %3546 = vmatmul.mubr.f32.vlgmr.msra.gmra.mxu1 %v1857_v46  ;;  %v1136_v42 = vld [vmem:[%s9924_s4 + $0x1438] sm:$0xff]  ;;  %v1183_v46 = vld [vmem:[%s9924_s4 + $0x15b0] sm:$0xff] }
 0x18d   : > { %5359 = vmatpush3.msra.mxu0 %v1144_v10  ;;  %5397 = vmatpush3.msra.mxu1 %v1176_v55  ;;  %v1167_v49 = vld [vmem:[%s9924_s4 + $0x1530] sm:$0xff]  ;;  %v1150_v10 = vld [vmem:[%s9924_s4 + $0x14a8] sm:$0xff] }
 0x18e   : > { %5360 = vmatprep.subr.mxu0 %v1159_v16  ;;  %5398 = vmatprep.subr.mxu1 %v1191_v56  ;;  %v1182_v55 = vld [vmem:[%s9924_s4 + $0x15a8] sm:$0xff]  ;;  %v1149_v56 = vld [vmem:[%s9924_s4 + $0x14a0] sm:$0xff] }
 0x18f   : > { %3475 = vmatprep.mubr.f32.mxu0 %v1860_v60  ;;  %5361 = vmatpush3.msra.mxu0 %v1143_v62  ;;  %v1166_v16 = vld [vmem:[%s9924_s4 + $0x1528] sm:$0xff]  ;;  %v1181_v60 = vld [vmem:[%s9924_s4 + $0x15a0] sm:$0xff]  ;;  %v1870_v62 = vrot.slane %v7975_v58, %v6171_v50 }
 0x190   : > { %5399 = vmatpush3.msra.mxu1 %v1175_v57  ;;  %3476 = vmatmul.mubr.f32.gmra.mxu0 %v1859_v53  ;;  %v1133_v53 = vld [vmem:[%s9924_s4 + $0x1420] sm:$0xff]  ;;  %v1866_v57 = vrot.slane %v7985_v0, %v6171_v50 }
 0x191   : > { %5362 = vmatprep.subr.mxu0 %v1158_v3  ;;  %5400 = vmatprep.subr.mxu1 %v1190_v17  ;;  %v1148_v3 = vld [vmem:[%s9924_s4 + $0x1498] sm:$0xff] }
 0x192   : > { %3550 = vmatprep.mubr.f32.mxu1 %v1862_v7  ;;  %5363 = vmatpush3.msra.mxu0 %v1142_v1  ;;  %v1180_v17 = vld [vmem:[%s9924_s4 + $0x1598] sm:$0xff]  ;;  %v1878_v7 = vrot.slane %v7994_v5, %v6171_v50 }
 0x193   : > { %5401 = vmatpush3.msra.mxu1 %v1174_v9  ;;  %5364 = vmatprep.subr.mxu0 %v1157_v39  ;;  %v1132_v1 = vld [vmem:[%s9924_s4 + $0x1418] sm:$0xff]  ;;  %v1147_v39 = vld [vmem:[%s9924_s4 + $0x1490] sm:$0xff] }
 0x194   : > { %3551 = vmatmul.mubr.f32.gmra.mxu1 %v1861_v12  ;;  %5402 = vmatprep.subr.mxu1 %v1189_v13  ;;  %v1164_v9 = vld [vmem:[%s9924_s4 + $0x1518] sm:$0xff]  ;;  %v1874_v12 = vrot.slane %v8003_v24, %v6171_v50  ;;  %v1179_v13 = vld [vmem:[%s9924_s4 + $0x1590] sm:$0xff] }
 0x195   : > { %5365 = vmatpush3.msra.mxu0 %v1141_v31  ;;  %5403 = vmatpush3.msra.mxu1 %v1173_v15  ;;  %v1880_v31 = vadd.f32 %v8046_v22, %v1870_v62  ;;  %v1131_v15 = vld [vmem:[%s9924_s4 + $0x1410] sm:$0xff] }
 0x196   : > { %5366 = vmatprep.subr.mxu0 %v1156_v25  ;;  %5404 = vmatprep.subr.mxu1 %v1188_v48  ;;  %v1163_v50 = vld [vmem:[%s9924_s4 + $0x1510] sm:$0xff]  ;;  %v1879_v25 = vadd.f32 %v8056_v20, %v1866_v57  ;;  %v1146_v48 = vld [vmem:[%s9924_s4 + $0x1488] sm:$0xff] }
 0x197   : > { %5367 = vmatpush3.msra.mxu0 %v1140_v18  ;;  %5405 = vmatpush3.msra.mxu1 %v1172_v19  ;;  %v1178_v18 = vld [vmem:[%s9924_s4 + $0x1588] sm:$0xff]  ;;  %v1882_v19 = vadd.f32 %v8066_v35, %v1878_v7 }
 0x198   : > { %5368 = vmatprep.subr.mxu0 %v1155_v40  ;;  %5406 = vmatprep.subr.mxu1 %v1187_v29  ;;  %v1130_v40 = vld [vmem:[%s9924_s4 + $0x1408] sm:$0xff] }
 0x199   : > { %5369 = vmatpush3.msra.mxu0 %v1139_v43  ;;  %5407 = vmatpush3.msra.mxu1 %v1171_v26  ;;  %v1162_v29 = vld [vmem:[%s9924_s4 + $0x1508] sm:$0xff]  ;;  %v1881_v43 = vadd.f32 %v8076_v11, %v1874_v12  ;;  %v1145_v26 = vld [vmem:[%s9924_s4 + $0x1480] sm:$0xff] }
 0x19a   : > { %5370 = vmatprep.subr.mxu0 %v1154_v32  ;;  %5408 = vmatprep.subr.mxu1 %v1186_v4  ;;  %v1177_v32 = vld [vmem:[%s9924_s4 + $0x1580] sm:$0xff]  ;;  %v1888_v4 = vmax.f32 %v1880_v31, 0.0  ;;  %v1236_v31 = vld [vmem:[%s9924_s4 + $0x1758] sm:$0xff] }
 0x19b   : > { %5371 = vmatpush3.msra.mxu0 %v1138_v33  ;;  %5409 = vmatpush3.msra.mxu1 %v1170_v8  ;;  %v1129_v33 = vld [vmem:[%s9924_s4 + $0x1400] sm:$0xff]  ;;  %v1887_v8 = vmax.f32 %v1879_v25, 0.0  ;;  %v1203_v25 = vld [vmem:[%s9924_s4 + $0x1650] sm:$0xff] }
 0x19c   : > { %5372 = vmatprep.subr.mxu0 %v1153_v36  ;;  %5410 = vmatprep.subr.mxu1 %v1185_v28  ;;  %v1161_v36 = vld [vmem:[%s9924_s4 + $0x1500] sm:$0xff]  ;;  %v1890_v28 = vmax.f32 %v1882_v19, 0.0  ;;  %v1250_v19 = vld [vmem:[%s9924_s4 + $0x17c8] sm:$0xff] }
 0x19d   : > { %5373 = vmatpush3.msra.mxu0 %v1137_v37  ;;  %5411 = vmatpush3.msra.mxu1 %v1169_v34  ;;  %v1884_v37 = vadd.f32 %v8093_v6, %v1870_v62  ;;  %v1224_v34 = vld [vmem:[%s9924_s4 + $0x16f8] sm:$0xff]  ;;  %v1254_v62 = vld [vmem:[%s9924_s4 + $0x17e8] sm:$0xff] }
 0x19e   : > { %5374 = vmatprep.subr.mxu0 %v1152_v14  ;;  %5412 = vmatprep.subr.mxu1 %v1184_v41  ;;  %v1889_v14 = vmax.f32 %v1881_v43, 0.0  ;;  %v1883_v41 = vadd.f32 %v8100_v52, %v1866_v57  ;;  %v1238_v57 = vld [vmem:[%s9924_s4 + $0x1768] sm:$0xff]  ;;  %v1217_v43 = vld [vmem:[%s9924_s4 + $0x16c0] sm:$0xff] }
 0x19f   : > { %5375 = vmatpush3.msra.mxu0 %v1136_v42  ;;  %5413 = vmatpush3.msra.mxu1 %v1168_v2  ;;  %v1256_v42 = vld [vmem:[%s9924_s4 + $0x17f8] sm:$0xff] }
 0x1a0   : > { %5376 = vmatprep.subr.mxu0 %v1151_v45  ;;  %5414 = vmatprep.subr.mxu1 %v1183_v46  ;;  %v1208_v2 = vld [vmem:[%s9924_s4 + $0x1678] sm:$0xff]  ;;  %v1886_v46 = vadd.f32 %v8113_v63, %v1878_v7  ;;  %v1253_v7 = vld [vmem:[%s9924_s4 + $0x17e0] sm:$0xff] }
 0x1a1   : > { %5377 = vmatpush3.msra.mxu0 %v1135_v51  ;;  %5415 = vmatpush3.msra.mxu1 %v1167_v49  ;;  %v1240_v45 = vld [vmem:[%s9924_s4 + $0x1778] sm:$0xff]  ;;  %v1223_v51 = vld [vmem:[%s9924_s4 + $0x16f0] sm:$0xff] }
 0x1a2   : > { %5378 = vmatprep.subr.mxu0 %v1150_v10  ;;  %5416 = vmatprep.subr.mxu1 %v1182_v55  ;;  %v1255_v49 = vld [vmem:[%s9924_s4 + $0x17f0] sm:$0xff]  ;;  %v1892_v10 = vmax.f32 %v1884_v37, 0.0 }
 0x1a3   : > { %5379 = vmatpush3.msra.mxu0 %v1134_v54  ;;  %5417 = vmatpush3.msra.mxu1 %v1166_v16  ;;  %v1207_v55 = vld [vmem:[%s9924_s4 + $0x1670] sm:$0xff]  ;;  %v1891_v54 = vmax.f32 %v1883_v41, 0.0  ;;  %v1885_v16 = vadd.f32 %v8126_v61, %v1874_v12  ;;  %v1220_v12 = vld [vmem:[%s9924_s4 + $0x16d8] sm:$0xff] }
 0x1a4   : > { %5380 = vmatprep.subr.mxu0 %v1149_v56  ;;  %5418 = vmatprep.subr.mxu1 %v1181_v60  ;;  %v1239_v56 = vld [vmem:[%s9924_s4 + $0x1770] sm:$0xff]  ;;  %v1222_v60 = vld [vmem:[%s9924_s4 + $0x16e8] sm:$0xff] }
 0x1a5   : > { %5381 = vmatpush3.msra.mxu0 %v1133_v53  ;;  %5419 = vmatpush3.msra.mxu1 %v1165_v30  ;;  %v1894_v53 = vmax.f32 %v1886_v46, 0.0  ;;  %v1206_v30 = vld [vmem:[%s9924_s4 + $0x1668] sm:$0xff]  ;;  %v1215_v37 = vld [vmem:[%s9924_s4 + $0x16b0] sm:$0xff] }
 0x1a6   : > { %5382 = vmatprep.subr.mxu0 %v1148_v3  ;;  %5420 = vmatprep.subr.mxu1 %v1180_v17  ;;  %v1893_v3 = vmax.f32 %v1885_v16, 0.0  ;;  %v1221_v17 = vld [vmem:[%s9924_s4 + $0x16e0] sm:$0xff]  ;;  %v1231_v41 = vld [vmem:[%s9924_s4 + $0x1730] sm:$0xff]  ;;  %v1230_v46 = vld [vmem:[%s9924_s4 + $0x1728] sm:$0xff]  ;;  %v1898_v16 = vrot.slane %v7985_v0, %v6162_v47 }
 0x1a7   : > { %5383 = vmatpush3.msra.mxu0 %v1132_v1  ;;  %5421 = vmatpush3.msra.mxu1 %v1164_v9  ;;  %v1205_v1 = vld [vmem:[%s9924_s4 + $0x1660] sm:$0xff] }
 0x1a8   : > { %5384 = vmatprep.subr.mxu0 %v1147_v39  ;;  %5422 = vmatprep.subr.mxu1 %v1179_v13  ;;  %v1237_v9 = vld [vmem:[%s9924_s4 + $0x1760] sm:$0xff]  ;;  %v1252_v39 = vld [vmem:[%s9924_s4 + $0x17d8] sm:$0xff] }
 0x1a9   : > { %5385 = vmatpush3.msra.mxu0 %v1131_v15  ;;  %5423 = vmatpush3.msra.mxu1 %v1163_v50  ;;  %v1204_v13 = vld [vmem:[%s9924_s4 + $0x1658] sm:$0xff]  ;;  %v1219_v15 = vld [vmem:[%s9924_s4 + $0x16d0] sm:$0xff] }
 0x1aa   : > { %5386 = vmatprep.subr.mxu0 %v1146_v48  ;;  %5424 = vmatprep.subr.mxu1 %v1178_v18  ;;  %v1251_v50 = vld [vmem:[%s9924_s4 + $0x17d0] sm:$0xff]  ;;  %v1218_v18 = vld [vmem:[%s9924_s4 + $0x16c8] sm:$0xff] }
 0x1ab   : > { %5387 = vmatpush3.msra.mxu0 %v1130_v40  ;;  %5425 = vmatpush3.msra.mxu1 %v1162_v29  ;;  %v1235_v48 = vld [vmem:[%s9924_s4 + $0x1750] sm:$0xff]  ;;  %v1202_v40 = vld [vmem:[%s9924_s4 + $0x1648] sm:$0xff] }
 0x1ac   : > { %5388 = vmatprep.subr.mxu0 %v1145_v26  ;;  %5426 = vmatprep.subr.mxu1 %v1177_v32  ;;  %v1234_v29 = vld [vmem:[%s9924_s4 + $0x1748] sm:$0xff]  ;;  %v1249_v26 = vld [vmem:[%s9924_s4 + $0x17c0] sm:$0xff] }
 0x1ad   : > { %5389 = vmatpush3.msra.mxu0 %v1129_v33  ;;  %3620 = vmatprep.mubr.f32.mxu0 %v1888_v4  ;;  %v1201_v32 = vld [vmem:[%s9924_s4 + $0x1640] sm:$0xff]  ;;  %v1216_v33 = vld [vmem:[%s9924_s4 + $0x16b8] sm:$0xff] }
 0x1ae   : > { %5427 = vmatpush3.msra.mxu1 %v1161_v36  ;;  %3621 = vmatmul.mubr.f32.vlgmr.msra.gmra.mxu0 %v1887_v8  ;;  %v1233_v4 = vld [vmem:[%s9924_s4 + $0x1740] sm:$0xff]  ;;  %v1248_v8 = vld [vmem:[%s9924_s4 + $0x17b8] sm:$0xff] }
 0x1af   : > { %3695 = vmatprep.mubr.f32.mxu1 %v1890_v28  ;;  %5434 = vmatprep.subr.mxu0 %v1224_v34  ;;  %v1200_v36 = vld [vmem:[%s9924_s4 + $0x1638] sm:$0xff]  ;;  %v1247_v34 = vld [vmem:[%s9924_s4 + $0x17b0] sm:$0xff] }
 0x1b0   : > { %5472 = vmatprep.subr.mxu1 %v1256_v42  ;;  %3696 = vmatmul.mubr.f32.vlgmr.msra.gmra.mxu1 %v1889_v14  ;;  %v1232_v28 = vld [vmem:[%s9924_s4 + $0x1738] sm:$0xff]  ;;  %v1199_v14 = vld [vmem:[%s9924_s4 + $0x1630] sm:$0xff]  ;;  %v1214_v42 = vld [vmem:[%s9924_s4 + $0x16a8] sm:$0xff] }
 0x1b1   : > { %5435 = vmatpush3.msra.mxu0 %v1208_v2  ;;  %5473 = vmatpush3.msra.mxu1 %v1240_v45  ;;  %v1246_v2 = vld [vmem:[%s9924_s4 + $0x17a8] sm:$0xff] }
 0x1b2   : > { %5436 = vmatprep.subr.mxu0 %v1223_v51  ;;  %5474 = vmatprep.subr.mxu1 %v1255_v49  ;;  %v1198_v45 = vld [vmem:[%s9924_s4 + $0x1628] sm:$0xff]  ;;  %v1213_v51 = vld [vmem:[%s9924_s4 + $0x16a0] sm:$0xff] }
 0x1b3   : > { %3625 = vmatprep.mubr.f32.mxu0 %v1892_v10  ;;  %5437 = vmatpush3.msra.mxu0 %v1207_v55  ;;  %v1245_v49 = vld [vmem:[%s9924_s4 + $0x17a0] sm:$0xff]  ;;  %v1902_v10 = vrot.slane %v7975_v58, %v6162_v47 }
 0x1b4   : > { %5475 = vmatpush3.msra.mxu1 %v1239_v56  ;;  %3626 = vmatmul.mubr.f32.gmra.mxu0 %v1891_v54  ;;  %v1197_v55 = vld [vmem:[%s9924_s4 + $0x1620] sm:$0xff]  ;;  %v1212_v56 = vld [vmem:[%s9924_s4 + $0x1698] sm:$0xff] }
 0x1b5   : > { %5438 = vmatprep.subr.mxu0 %v1222_v60  ;;  %5476 = vmatprep.subr.mxu1 %v1254_v62  ;;  %v1229_v54 = vld [vmem:[%s9924_s4 + $0x1720] sm:$0xff]  ;;  %v1244_v60 = vld [vmem:[%s9924_s4 + $0x1798] sm:$0xff]  ;;  %v1910_v62 = vrot.slane %v7994_v5, %v6162_v47 }
 0x1b6   : > { %3700 = vmatprep.mubr.f32.mxu1 %v1894_v53  ;;  %5439 = vmatpush3.msra.mxu0 %v1206_v30  ;;  %v1196_v53 = vld [vmem:[%s9924_s4 + $0x1618] sm:$0xff] }
 0x1b7   : > { %5477 = vmatpush3.msra.mxu1 %v1238_v57  ;;  %5440 = vmatprep.subr.mxu0 %v1221_v17  ;;  %v1228_v30 = vld [vmem:[%s9924_s4 + $0x1718] sm:$0xff]  ;;  %v1906_v57 = vrot.slane %v8003_v24, %v6162_v47  ;;  %v1243_v17 = vld [vmem:[%s9924_s4 + $0x1790] sm:$0xff] }
 0x1b8   : > { %3701 = vmatmul.mubr.f32.gmra.mxu1 %v1893_v3  ;;  %5478 = vmatprep.subr.mxu1 %v1253_v7  ;;  %v1211_v3 = vld [vmem:[%s9924_s4 + $0x1690] sm:$0xff]  ;;  %v1912_v7 = vadd.f32 %v8046_v22, %v1902_v10  ;;  %v1242_v22 = vld [vmem:[%s9924_s4 + $0x1788] sm:$0xff] }
 0x1b9   : > { %5441 = vmatpush3.msra.mxu0 %v1205_v1  ;;  %5479 = vmatpush3.msra.mxu1 %v1237_v9  ;;  %v1195_v1 = vld [vmem:[%s9924_s4 + $0x1610] sm:$0xff]  ;;  %v1911_v9 = vadd.f32 %v8056_v20, %v1898_v16  ;;  %v1226_v20 = vld [vmem:[%s9924_s4 + $0x1708] sm:$0xff] }
 0x1ba   : > { %5442 = vmatprep.subr.mxu0 %v1220_v12  ;;  %5480 = vmatprep.subr.mxu1 %v1252_v39  ;;  %v1227_v47 = vld [vmem:[%s9924_s4 + $0x1710] sm:$0xff]  ;;  %v1210_v12 = vld [vmem:[%s9924_s4 + $0x1688] sm:$0xff]  ;;  %v1914_v39 = vadd.f32 %v8066_v35, %v1910_v62  ;;  %v1241_v35 = vld [vmem:[%s9924_s4 + $0x1780] sm:$0xff] }
 0x1bb   : > { %5443 = vmatpush3.msra.mxu0 %v1204_v13  ;;  %5481 = vmatpush3.msra.mxu1 %v1236_v31  ;;  %v1194_v13 = vld [vmem:[%s9924_s4 + $0x1608] sm:$0xff]  ;;  %v1913_v31 = vadd.f32 %v8076_v11, %v1906_v57  ;;  %v1225_v11 = vld [vmem:[%s9924_s4 + $0x1700] sm:$0xff] }
 0x1bc   : > { %5444 = vmatprep.subr.mxu0 %v1219_v15  ;;  %5482 = vmatprep.subr.mxu1 %v1251_v50  ;;  %v1209_v15 = vld [vmem:[%s9924_s4 + $0x1680] sm:$0xff]  ;;  %v1920_v50 = vmax.f32 %v1912_v7, 0.0 }
 0x1bd   : > { %5445 = vmatpush3.msra.mxu0 %v1203_v25  ;;  %5483 = vmatpush3.msra.mxu1 %v1235_v48  ;;  %v1193_v25 = vld [vmem:[%s9924_s4 + $0x1600] sm:$0xff]  ;;  %v1919_v48 = vmax.f32 %v1911_v9, 0.0 }
 0x1be   : > { %5446 = vmatprep.subr.mxu0 %v1218_v18  ;;  %5484 = vmatprep.subr.mxu1 %v1250_v19  ;;  %v1922_v18 = vmax.f32 %v1914_v39, 0.0  ;;  %v1916_v19 = vadd.f32 %v8093_v6, %v1902_v10  ;;  %v1272_v6 = vld [vmem:[%s9924_s4 + $0x1878] sm:$0xff]  ;;  %v1281_v7 = vld [vmem:[%s9924_s4 + $0x18c0] sm:$0xff] }
 0x1bf   : > { %5447 = vmatpush3.msra.mxu0 %v1202_v40  ;;  %5485 = vmatpush3.msra.mxu1 %v1234_v29  ;;  %v1288_v40 = vld [vmem:[%s9924_s4 + $0x18f8] sm:$0xff]  ;;  %v1921_v29 = vmax.f32 %v1913_v31, 0.0  ;;  %v1297_v9 = vld [vmem:[%s9924_s4 + $0x1940] sm:$0xff]  ;;  %v1311_v31 = vld [vmem:[%s9924_s4 + $0x19b0] sm:$0xff] }
 0x1c0   : > { %5448 = vmatprep.subr.mxu0 %v1217_v43  ;;  %5486 = vmatprep.subr.mxu1 %v1249_v26  ;;  %v1915_v43 = vadd.f32 %v8100_v52, %v1898_v16  ;;  %v1320_v26 = vld [vmem:[%s9924_s4 + $0x19f8] sm:$0xff]  ;;  %v1287_v52 = vld [vmem:[%s9924_s4 + $0x18f0] sm:$0xff] }
 0x1c1   : > { %5449 = vmatpush3.msra.mxu0 %v1201_v32  ;;  %5487 = vmatpush3.msra.mxu1 %v1233_v4  ;;  %v1304_v32 = vld [vmem:[%s9924_s4 + $0x1978] sm:$0xff]  ;;  %v1918_v4 = vadd.f32 %v8113_v63, %v1910_v62  ;;  %v1917_v63 = vadd.f32 %v8126_v61, %v1906_v57  ;;  %v1270_v61 = vld [vmem:[%s9924_s4 + $0x1868] sm:$0xff]  ;;  %v1267_v62 = vld [vmem:[%s9924_s4 + $0x1850] sm:$0xff] }
 0x1c2   : > { %5450 = vmatprep.subr.mxu0 %v1216_v33  ;;  %5488 = vmatprep.subr.mxu1 %v1248_v8  ;;  %v1319_v33 = vld [vmem:[%s9924_s4 + $0x19f0] sm:$0xff]  ;;  %v1924_v8 = vmax.f32 %v1916_v19, 0.0  ;;  %v1284_v10 = vld [vmem:[%s9924_s4 + $0x18d8] sm:$0xff]  ;;  %v1314_v57 = vld [vmem:[%s9924_s4 + $0x19c8] sm:$0xff] }
 0x1c3   : > { %5451 = vmatpush3.msra.mxu0 %v1200_v36  ;;  %5489 = vmatpush3.msra.mxu1 %v1232_v28  ;;  %v1271_v36 = vld [vmem:[%s9924_s4 + $0x1870] sm:$0xff]  ;;  %v1923_v28 = vmax.f32 %v1915_v43, 0.0  ;;  %v1300_v16 = vld [vmem:[%s9924_s4 + $0x1958] sm:$0xff]  ;;  %v1309_v19 = vld [vmem:[%s9924_s4 + $0x19a0] sm:$0xff] }
 0x1c4   : > { %5452 = vmatprep.subr.mxu0 %v1215_v37  ;;  %5490 = vmatprep.subr.mxu1 %v1247_v34  ;;  %v1303_v37 = vld [vmem:[%s9924_s4 + $0x1970] sm:$0xff]  ;;  %v1286_v34 = vld [vmem:[%s9924_s4 + $0x18e8] sm:$0xff]  ;;  %v1264_v39 = vld [vmem:[%s9924_s4 + $0x1838] sm:$0xff] }
 0x1c5   : > { %5453 = vmatpush3.msra.mxu0 %v1199_v14  ;;  %5491 = vmatpush3.msra.mxu1 %v1231_v41  ;;  %v1318_v14 = vld [vmem:[%s9924_s4 + $0x19e8] sm:$0xff]  ;;  %v1926_v41 = vmax.f32 %v1918_v4, 0.0  ;;  %v1293_v43 = vld [vmem:[%s9924_s4 + $0x1920] sm:$0xff]  ;;  %v1942_v4 = vrot.slane %v7994_v5, %v7096_v38 }
 0x1c6   : > { %5454 = vmatprep.subr.mxu0 %v1214_v42  ;;  %5492 = vmatprep.subr.mxu1 %v1246_v2  ;;  %v1302_v42 = vld [vmem:[%s9924_s4 + $0x1968] sm:$0xff]  ;;  %v1925_v2 = vmax.f32 %v1917_v63, 0.0 }
 0x1c7   : > { %5455 = vmatpush3.msra.mxu0 %v1198_v45  ;;  %5493 = vmatpush3.msra.mxu1 %v1230_v46  ;;  %v1285_v45 = vld [vmem:[%s9924_s4 + $0x18e0] sm:$0xff]  ;;  %v8906_v63 = vld [vmem:[%s6150_s21 + $0x8] sm:$0xff] }
 0x1c8   : > { %5456 = vmatprep.subr.mxu0 %v1213_v51  ;;  %5494 = vmatprep.subr.mxu1 %v1245_v49  ;;  %v1317_v46 = vld [vmem:[%s9924_s4 + $0x19e0] sm:$0xff] }
 0x1c9   : > { %5457 = vmatpush3.msra.mxu0 %v1197_v55  ;;  %5495 = vmatpush3.msra.mxu1 %v1229_v54  ;;  %v1269_v51 = vld [vmem:[%s9924_s4 + $0x1860] sm:$0xff]  ;;  %v1316_v55 = vld [vmem:[%s9924_s4 + $0x19d8] sm:$0xff] }
 0x1ca   : > { %5458 = vmatprep.subr.mxu0 %v1212_v56  ;;  %5496 = vmatprep.subr.mxu1 %v1244_v60  ;;  %v1301_v49 = vld [vmem:[%s9924_s4 + $0x1960] sm:$0xff]  ;;  %v1268_v54 = vld [vmem:[%s9924_s4 + $0x1858] sm:$0xff]  ;;  %v1283_v56 = vld [vmem:[%s9924_s4 + $0x18d0] sm:$0xff] }
 0x1cb   : > { %5459 = vmatpush3.msra.mxu0 %v1196_v53  ;;  %5497 = vmatpush3.msra.mxu1 %v1228_v30  ;;  %v1315_v60 = vld [vmem:[%s9924_s4 + $0x19d0] sm:$0xff]  ;;  %v1282_v30 = vld [vmem:[%s9924_s4 + $0x18c8] sm:$0xff] }
 0x1cc   : > { %5460 = vmatprep.subr.mxu0 %v1211_v3  ;;  %5498 = vmatprep.subr.mxu1 %v1243_v17  ;;  %v1299_v53 = vld [vmem:[%s9924_s4 + $0x1950] sm:$0xff]  ;;  %v1266_v3 = vld [vmem:[%s9924_s4 + $0x1848] sm:$0xff] }
 0x1cd   : > { %5461 = vmatpush3.msra.mxu0 %v1195_v1  ;;  %5499 = vmatpush3.msra.mxu1 %v1227_v47  ;;  %v1298_v17 = vld [vmem:[%s9924_s4 + $0x1948] sm:$0xff]  ;;  %v1313_v1 = vld [vmem:[%s9924_s4 + $0x19c0] sm:$0xff] }
 0x1ce   : > { %5462 = vmatprep.subr.mxu0 %v1210_v12  ;;  %5500 = vmatprep.subr.mxu1 %v1242_v22  ;;  %v1265_v47 = vld [vmem:[%s9924_s4 + $0x1840] sm:$0xff]  ;;  %v1280_v12 = vld [vmem:[%s9924_s4 + $0x18b8] sm:$0xff] }
 0x1cf   : > { %5463 = vmatpush3.msra.mxu0 %v1194_v13  ;;  %5501 = vmatpush3.msra.mxu1 %v1226_v20  ;;  %v1312_v22 = vld [vmem:[%s9924_s4 + $0x19b8] sm:$0xff]  ;;  %v1279_v20 = vld [vmem:[%s9924_s4 + $0x18b0] sm:$0xff] }
 0x1d0   : > { %5464 = vmatprep.subr.mxu0 %v1209_v15  ;;  %5502 = vmatprep.subr.mxu1 %v1241_v35  ;;  %v1296_v13 = vld [vmem:[%s9924_s4 + $0x1938] sm:$0xff]  ;;  %v1263_v15 = vld [vmem:[%s9924_s4 + $0x1830] sm:$0xff] }
 0x1d1   : > { %5465 = vmatpush3.msra.mxu0 %v1193_v25  ;;  %3770 = vmatprep.mubr.f32.mxu0 %v1920_v50  ;;  %v1295_v35 = vld [vmem:[%s9924_s4 + $0x1930] sm:$0xff]  ;;  %v1278_v50 = vld [vmem:[%s9924_s4 + $0x18a8] sm:$0xff] }
 0x1d2   : > { %5503 = vmatpush3.msra.mxu1 %v1225_v11  ;;  %3771 = vmatmul.mubr.f32.vlgmr.msra.gmra.mxu0 %v1919_v48  ;;  %v1310_v25 = vld [vmem:[%s9924_s4 + $0x19a8] sm:$0xff] }
 0x1d3   : > { %3845 = vmatprep.mubr.f32.mxu1 %v1922_v18  ;;  %5510 = vmatprep.subr.mxu0 %v1288_v40  ;;  %v1262_v48 = vld [vmem:[%s9924_s4 + $0x1828] sm:$0xff]  ;;  %v1277_v18 = vld [vmem:[%s9924_s4 + $0x18a0] sm:$0xff]  ;;  %v1934_v40 = vrot.slane %v7975_v58, %v7096_v38 }
 0x1d4   : > { %5548 = vmatprep.subr.mxu1 %v1320_v26  ;;  %3846 = vmatmul.mubr.f32.vlgmr.msra.gmra.mxu1 %v1921_v29  ;;  %v1294_v11 = vld [vmem:[%s9924_s4 + $0x1928] sm:$0xff]  ;;  %v1261_v29 = vld [vmem:[%s9924_s4 + $0x1820] sm:$0xff]  ;;  %v1930_v26 = vrot.slane %v7985_v0, %v7096_v38 }
 0x1d5   : > { %5511 = vmatpush3.msra.mxu0 %v1272_v6  ;;  %5549 = vmatpush3.msra.mxu1 %v1304_v32  ;;  %v1276_v6 = vld [vmem:[%s9924_s4 + $0x1898] sm:$0xff] }
 0x1d6   : > { %5512 = vmatprep.subr.mxu0 %v1287_v52  ;;  %5550 = vmatprep.subr.mxu1 %v1319_v33  ;;  %v1308_v32 = vld [vmem:[%s9924_s4 + $0x1998] sm:$0xff] }
 0x1d7   : > { %3775 = vmatprep.mubr.f32.mxu0 %v1924_v8  ;;  %5513 = vmatpush3.msra.mxu0 %v1271_v36  ;;  %v1260_v52 = vld [vmem:[%s9924_s4 + $0x1818] sm:$0xff]  ;;  %v8897_v8 = vrot.slane %v8003_v24, %v7096_v38  ;;  %v1275_v36 = vld [vmem:[%s9924_s4 + $0x1890] sm:$0xff] }
 0x1d8   : > { %5551 = vmatpush3.msra.mxu1 %v1303_v37  ;;  %3776 = vmatmul.mubr.f32.gmra.mxu0 %v1923_v28  ;;  %v1292_v33 = vld [vmem:[%s9924_s4 + $0x1918] sm:$0xff]  ;;  %v1307_v28 = vld [vmem:[%s9924_s4 + $0x1990] sm:$0xff]  ;;  %v1944_v37 = vadd.f32 %v8906_v63, %v1934_v40 }
 0x1d9   : > { %5514 = vmatprep.subr.mxu0 %v1286_v34  ;;  %5552 = vmatprep.subr.mxu1 %v1318_v14  ;;  %v1259_v38 = vld [vmem:[%s9924_s4 + $0x1810] sm:$0xff]  ;;  %v8916_v14 = vld [vmem:[%s6150_s21] sm:$0xff] }
 0x1da   : > { %3850 = vmatprep.mubr.f32.mxu1 %v1926_v41  ;;  %5515 = vmatpush3.msra.mxu0 %v1270_v61  ;;  %v1291_v34 = vld [vmem:[%s9924_s4 + $0x1910] sm:$0xff]  ;;  %v1943_v41 = vadd.f32 %v8916_v14, %v1930_v26  ;;  %v1274_v61 = vld [vmem:[%s9924_s4 + $0x1888] sm:$0xff] }
 0x1db   : > { %5553 = vmatpush3.msra.mxu1 %v1302_v42  ;;  %5516 = vmatprep.subr.mxu0 %v1285_v45  ;;  %v1306_v42 = vld [vmem:[%s9924_s4 + $0x1988] sm:$0xff] }
 0x1dc   : > { %3851 = vmatmul.mubr.f32.gmra.mxu1 %v1925_v2  ;;  %5554 = vmatprep.subr.mxu1 %v1317_v46  ;;  %v8926_v2 = vld [vmem:[%s6150_s21 + $0x18] sm:$0xff]  ;;  %v1258_v46 = vld [vmem:[%s9924_s4 + $0x1808] sm:$0xff] }
 0x1dd   : > { %5517 = vmatpush3.msra.mxu0 %v1269_v51  ;;  %5555 = vmatpush3.msra.mxu1 %v1301_v49  ;;  %v1946_v45 = vadd.f32 %v8926_v2, %v1942_v4  ;;  %v1290_v51 = vld [vmem:[%s9924_s4 + $0x1908] sm:$0xff]  ;;  %v8936_v49 = vld [vmem:[%s6150_s21 + $0x10] sm:$0xff] }
 0x1de   : > { %5518 = vmatprep.subr.mxu0 %v1284_v10  ;;  %5556 = vmatprep.subr.mxu1 %v1316_v55  ;;  %v1945_v10 = vadd.f32 %v8936_v49, %v8897_v8  ;;  %v1273_v55 = vld [vmem:[%s9924_s4 + $0x1880] sm:$0xff] }
 0x1df   : > { %5519 = vmatpush3.msra.mxu0 %v1268_v54  ;;  %5557 = vmatpush3.msra.mxu1 %v1300_v16  ;;  %v1305_v54 = vld [vmem:[%s9924_s4 + $0x1980] sm:$0xff]  ;;  %v1952_v16 = vmax.f32 %v1944_v37, 0.0  ;;  %v1379_v37 = vld [vmem:[%s9924_s4 + $0x1bd0] sm:$0xff] }
 0x1e0   : > { %5520 = vmatprep.subr.mxu0 %v1283_v56  ;;  %5558 = vmatprep.subr.mxu1 %v1315_v60  ;;  %v1257_v56 = vld [vmem:[%s9924_s4 + $0x1800] sm:$0xff]  ;;  %v1951_v60 = vmax.f32 %v1943_v41, 0.0  ;;  %v1346_v41 = vld [vmem:[%s9924_s4 + $0x1ac8] sm:$0xff] }
 0x1e1   : > { %5521 = vmatpush3.msra.mxu0 %v1267_v62  ;;  %5559 = vmatpush3.msra.mxu1 %v1299_v53  ;;  %v1289_v62 = vld [vmem:[%s9924_s4 + $0x1900] sm:$0xff]  ;;  %v1954_v53 = vmax.f32 %v1946_v45, 0.0  ;;  %v1362_v45 = vld [vmem:[%s9924_s4 + $0x1b48] sm:$0xff] }
 0x1e2   : > { %5522 = vmatprep.subr.mxu0 %v1282_v30  ;;  %5560 = vmatprep.subr.mxu1 %v1314_v57  ;;  %v8953_v30 = vld [vmem:[%s6150_s21 + $0x48] sm:$0xff] }
 0x1e3   : > { %5523 = vmatpush3.msra.mxu0 %v1266_v3  ;;  %5561 = vmatpush3.msra.mxu1 %v1298_v17  ;;  %v1948_v57 = vadd.f32 %v8953_v30, %v1934_v40  ;;  %v1352_v3 = vld [vmem:[%s9924_s4 + $0x1af8] sm:$0xff]  ;;  %v1953_v17 = vmax.f32 %v1945_v10, 0.0  ;;  %v1334_v40 = vld [vmem:[%s9924_s4 + $0x1a68] sm:$0xff]  ;;  %v1329_v10 = vld [vmem:[%s9924_s4 + $0x1a40] sm:$0xff] }
 0x1e4   : > { %5524 = vmatprep.subr.mxu0 %v1281_v7  ;;  %5562 = vmatprep.subr.mxu1 %v1313_v1  ;;  %v8960_v7 = vld [vmem:[%s6150_s21 + $0x40] sm:$0xff] }
 0x1e5   : > { %5525 = vmatpush3.msra.mxu0 %v1265_v47  ;;  %5563 = vmatpush3.msra.mxu1 %v1297_v9  ;;  %v1947_v1 = vadd.f32 %v8960_v7, %v1930_v26  ;;  %v1384_v47 = vld [vmem:[%s9924_s4 + $0x1bf8] sm:$0xff]  ;;  %v1349_v26 = vld [vmem:[%s9924_s4 + $0x1ae0] sm:$0xff] }
 0x1e6   : > { %5526 = vmatprep.subr.mxu0 %v1280_v12  ;;  %5564 = vmatprep.subr.mxu1 %v1312_v22  ;;  %v1336_v9 = vld [vmem:[%s9924_s4 + $0x1a78] sm:$0xff] }
 0x1e7   : > { %5527 = vmatpush3.msra.mxu0 %v1264_v39  ;;  %5565 = vmatpush3.msra.mxu1 %v1296_v13  ;;  %v1368_v12 = vld [vmem:[%s9924_s4 + $0x1b78] sm:$0xff]  ;;  %v1351_v13 = vld [vmem:[%s9924_s4 + $0x1af0] sm:$0xff] }
 0x1e8   : > { %5528 = vmatprep.subr.mxu0 %v1279_v20  ;;  %5566 = vmatprep.subr.mxu1 %v1311_v31  ;;  %v8973_v22 = vld [vmem:[%s6150_s21 + $0x58] sm:$0xff]  ;;  %v1383_v20 = vld [vmem:[%s9924_s4 + $0x1bf0] sm:$0xff]  ;;  %v1956_v31 = vmax.f32 %v1948_v57, 0.0 }
 0x1e9   : > { %5529 = vmatpush3.msra.mxu0 %v1263_v15  ;;  %5567 = vmatpush3.msra.mxu1 %v1295_v35  ;;  %v1950_v39 = vadd.f32 %v8973_v22, %v1942_v4  ;;  %v1335_v15 = vld [vmem:[%s9924_s4 + $0x1a70] sm:$0xff]  ;;  %v1955_v35 = vmax.f32 %v1947_v1, 0.0  ;;  %v1365_v4 = vld [vmem:[%s9924_s4 + $0x1b60] sm:$0xff]  ;;  %v1374_v1 = vld [vmem:[%s9924_s4 + $0x1ba8] sm:$0xff] }
 0x1ea   : > { %5530 = vmatprep.subr.mxu0 %v1278_v50  ;;  %5568 = vmatprep.subr.mxu1 %v1310_v25  ;;  %v8986_v50 = vld [vmem:[%s6150_s21 + $0x50] sm:$0xff]  ;;  %s284_s21 = scalar_lea.vmem [#allocation3], %s4577_s16 }
 0x1eb   : > { %5531 = vmatpush3.msra.mxu0 %v1262_v48  ;;  %5569 = vmatpush3.msra.mxu1 %v1294_v11  ;;  %v1949_v25 = vadd.f32 %v8986_v50, %v8897_v8  ;;  %v1367_v48 = vld [vmem:[%s9924_s4 + $0x1b70] sm:$0xff]  ;;  %v1350_v11 = vld [vmem:[%s9924_s4 + $0x1ae8] sm:$0xff]  ;;  %v1332_v8 = vld [vmem:[%s9924_s4 + $0x1a58] sm:$0xff]  ;;  %s4487_s19 = sshll.u32 %s284_s21, 4  ;;  %s9878_s19 = int_to_ptr.vmem [resolvable:$true] %s4487_s19 }
 0x1ec   : > { %5532 = vmatprep.subr.mxu0 %v1277_v18  ;;  %5570 = vmatprep.subr.mxu1 %v1309_v19  ;;  %v1382_v18 = vld [vmem:[%s9924_s4 + $0x1be8] sm:$0xff]  ;;  %v1958_v19 = vmax.f32 %v1950_v39, 0.0  ;;  %v1327_v57 = vld [vmem:[%s9924_s4 + $0x1a30] sm:$0xff]  ;;  %v1373_v39 = vld [vmem:[%s9924_s4 + $0x1ba0] sm:$0xff]  ;;  %s5887_s11 = scalar_lea.vmem %s9878_s19, 256  ;;  %p5894_p0 = scmp.lt.s32.totalorder %s9878_s19, %s5892_s12 }
 0x1ed   : > { %5533 = vmatpush3.msra.mxu0 %v1261_v29  ;;  %5571 = vmatpush3.msra.mxu1 %v1293_v43  ;;  %v1366_v29 = vld [vmem:[%s9924_s4 + $0x1b68] sm:$0xff]  ;;  %v1957_v43 = vmax.f32 %v1949_v25, 0.0  ;;  %v1372_v25 = vld [vmem:[%s9924_s4 + $0x1b98] sm:$0xff]  ;;  %p5888_p11 = scmp.ne.s32.totalorder %s9878_s19, %s5887_s11  ;;  %p5895_p1 = scmp.lt.s32.totalorder %s5893_s20, %s5887_s11 }
 0x1ee   : > { %5534 = vmatprep.subr.mxu0 %v1276_v6  ;;  %5572 = vmatprep.subr.mxu1 %v1308_v32  ;;  %v1381_v6 = vld [vmem:[%s9924_s4 + $0x1be0] sm:$0xff] }
 0x1ef   : > { %5535 = vmatpush3.msra.mxu0 %v1260_v52  ;;  %5573 = vmatpush3.msra.mxu1 %v1292_v33  ;;  %v1333_v32 = vld [vmem:[%s9924_s4 + $0x1a60] sm:$0xff]  ;;  %v1348_v52 = vld [vmem:[%s9924_s4 + $0x1ad8] sm:$0xff]  ;;  %p5889_p12 = pnand %p5888_p11, %p6028_p5  ;;  %p5896_p2 = por %p5895_p1, %p5894_p0 }
 0x1f0   : > { %5536 = vmatprep.subr.mxu0 %v1275_v36  ;;  %5574 = vmatprep.subr.mxu1 %v1307_v28  ;;  %v1380_v33 = vld [vmem:[%s9924_s4 + $0x1bd8] sm:$0xff]  ;;  %v1347_v28 = vld [vmem:[%s9924_s4 + $0x1ad0] sm:$0xff] }
 0x1f1   : > { %5537 = vmatpush3.msra.mxu0 %v1259_v38  ;;  %5575 = vmatpush3.msra.mxu1 %v1291_v34  ;;  %v1364_v36 = vld [vmem:[%s9924_s4 + $0x1b58] sm:$0xff]  ;;  %v1331_v38 = vld [vmem:[%s9924_s4 + $0x1a50] sm:$0xff]  ;;  %p5890_p13 = pneg %p5889_p12 }
 0x1f2   : > { %5538 = vmatprep.subr.mxu0 %v1274_v61  ;;  %5576 = vmatprep.subr.mxu1 %v1306_v42  ;;  %v1363_v34 = vld [vmem:[%s9924_s4 + $0x1b50] sm:$0xff]  ;;  %v1378_v61 = vld [vmem:[%s9924_s4 + $0x1bc8] sm:$0xff] }
 0x1f3   : > { %5539 = vmatpush3.msra.mxu0 %v1258_v46  ;;  %5577 = vmatpush3.msra.mxu1 %v1290_v51  ;;  %v1330_v42 = vld [vmem:[%s9924_s4 + $0x1a48] sm:$0xff]  ;;  %v1345_v46 = vld [vmem:[%s9924_s4 + $0x1ac0] sm:$0xff]  ;;  %p5897_p3 = pnand %p5896_p2, %p5890_p13 }
 0x1f4   : > { %5540 = vmatprep.subr.mxu0 %v1273_v55  ;;  %5578 = vmatprep.subr.mxu1 %v1305_v54  ;;  %v1377_v51 = vld [vmem:[%s9924_s4 + $0x1bc0] sm:$0xff]  ;;  %v1344_v54 = vld [vmem:[%s9924_s4 + $0x1ab8] sm:$0xff] }
 0x1f5   : > { %5541 = vmatpush3.msra.mxu0 %v1257_v56  ;;  %3920 = vmatprep.mubr.f32.mxu0 %v1952_v16  ;;  %v1361_v55 = vld [vmem:[%s9924_s4 + $0x1b40] sm:$0xff]  ;;  %v1376_v16 = vld [vmem:[%s9924_s4 + $0x1bb8] sm:$0xff] }
 0x1f6   : > { %5579 = vmatpush3.msra.mxu1 %v1289_v62  ;;  %3921 = vmatmul.mubr.f32.vlgmr.msra.gmra.mxu0 %v1951_v60  ;;  %v1328_v56 = vld [vmem:[%s9924_s4 + $0x1a38] sm:$0xff]  ;;  %v1343_v62 = vld [vmem:[%s9924_s4 + $0x1ab0] sm:$0xff] }
 0x1f7   : > { %3995 = vmatprep.mubr.f32.mxu1 %v1954_v53  ;;  %5586 = vmatprep.subr.mxu0 %v1352_v3  ;;  %v1360_v60 = vld [vmem:[%s9924_s4 + $0x1b38] sm:$0xff]  ;;  %v1375_v53 = vld [vmem:[%s9924_s4 + $0x1bb0] sm:$0xff] }
 0x1f8   : > { %5624 = vmatprep.subr.mxu1 %v1384_v47  ;;  %3996 = vmatmul.mubr.f32.vlgmr.msra.gmra.mxu1 %v1953_v17  ;;  %v1359_v3 = vld [vmem:[%s9924_s4 + $0x1b30] sm:$0xff]  ;;  %v1342_v17 = vld [vmem:[%s9924_s4 + $0x1aa8] sm:$0xff] }
 0x1f9   : > { %5587 = vmatpush3.msra.mxu0 %v1336_v9  ;;  %5625 = vmatpush3.msra.mxu1 %v1368_v12  ;;  %v1326_v47 = vld [vmem:[%s9924_s4 + $0x1a28] sm:$0xff]  ;;  %v1341_v12 = vld [vmem:[%s9924_s4 + $0x1aa0] sm:$0xff] }
 0x1fa   : > { %5588 = vmatprep.subr.mxu0 %v1351_v13  ;;  %5626 = vmatprep.subr.mxu1 %v1383_v20  ;;  %v1358_v9 = vld [vmem:[%s9924_s4 + $0x1b28] sm:$0xff]  ;;  %v1966_v13 = vrot.slane %v7975_v58, %v7337_v44  ;;  %v1325_v20 = vld [vmem:[%s9924_s4 + $0x1a20] sm:$0xff] }
 0x1fb   : > { %3925 = vmatprep.mubr.f32.mxu0 %v1956_v31  ;;  %5589 = vmatpush3.msra.mxu0 %v1335_v15  ;;  %v1357_v31 = vld [vmem:[%s9924_s4 + $0x1b20] sm:$0xff]  ;;  %v1962_v15 = vrot.slane %v7985_v0, %v7337_v44 }
 0x1fc   : > { %5627 = vmatpush3.msra.mxu1 %v1367_v48  ;;  %3926 = vmatmul.mubr.f32.gmra.mxu0 %v1955_v35  ;;  %v1340_v35 = vld [vmem:[%s9924_s4 + $0x1a98] sm:$0xff]  ;;  %v1974_v48 = vrot.slane %v7994_v5, %v7337_v44 }
 0x1fd   : > { %5590 = vmatprep.subr.mxu0 %v1350_v11  ;;  %5628 = vmatprep.subr.mxu1 %v1382_v18  ;;  %v1324_v11 = vld [vmem:[%s9924_s4 + $0x1a18] sm:$0xff] }
 0x1fe   : > { %4000 = vmatprep.mubr.f32.mxu1 %v1958_v19  ;;  %5591 = vmatpush3.msra.mxu0 %v1334_v40  ;;  %v1356_v18 = vld [vmem:[%s9924_s4 + $0x1b18] sm:$0xff]  ;;  %v1970_v19 = vrot.slane %v8003_v24, %v7337_v44  ;;  %v1339_v40 = vld [vmem:[%s9924_s4 + $0x1a90] sm:$0xff] }
 0x1ff   : > { %5629 = vmatpush3.msra.mxu1 %v1366_v29  ;;  %5592 = vmatprep.subr.mxu0 %v1349_v26  ;;  %v1371_v29 = vld [vmem:[%s9924_s4 + $0x1b90] sm:$0xff] }
 0x200   : > { %4001 = vmatmul.mubr.f32.gmra.mxu1 %v1957_v43  ;;  %5630 = vmatprep.subr.mxu1 %v1381_v6  ;;  %v1976_v43 = vadd.f32 %v8906_v63, %v1966_v13  ;;  %v1323_v26 = vld [vmem:[%s9924_s4 + $0x1a10] sm:$0xff]  ;;  %v1975_v6 = vadd.f32 %v8916_v14, %v1962_v15 }
 0x201   : > { %5593 = vmatpush3.msra.mxu0 %v1333_v32  ;;  %5631 = vmatpush3.msra.mxu1 %v1365_v4  ;;  %v1355_v44 = vld [vmem:[%s9924_s4 + $0x1b10] sm:$0xff]  ;;  %v1338_v32 = vld [vmem:[%s9924_s4 + $0x1a88] sm:$0xff] }
 0x202   : > { %5594 = vmatprep.subr.mxu0 %v1348_v52  ;;  %5632 = vmatprep.subr.mxu1 %v1380_v33  ;;  %v1370_v4 = vld [vmem:[%s9924_s4 + $0x1b88] sm:$0xff]  ;;  %v1978_v52 = vadd.f32 %v8926_v2, %v1974_v48 }
 0x203   : > { %5595 = vmatpush3.msra.mxu0 %v1332_v8  ;;  %5633 = vmatpush3.msra.mxu1 %v1364_v36  ;;  %v1322_v33 = vld [vmem:[%s9924_s4 + $0x1a08] sm:$0xff]  ;;  %v1977_v36 = vadd.f32 %v8936_v49, %v1970_v19 }
 0x204   : > { %5596 = vmatprep.subr.mxu0 %v1347_v28  ;;  %5634 = vmatprep.subr.mxu1 %v1379_v37  ;;  %v1354_v8 = vld [vmem:[%s9924_s4 + $0x1b08] sm:$0xff]  ;;  %v1337_v28 = vld [vmem:[%s9924_s4 + $0x1a80] sm:$0xff] }
 0x205   : > { %5597 = vmatpush3.msra.mxu0 %v1331_v38  ;;  %5635 = vmatpush3.msra.mxu1 %v1363_v34  ;;  %v1369_v37 = vld [vmem:[%s9924_s4 + $0x1b80] sm:$0xff]  ;;  %v1984_v38 = vmax.f32 %v1976_v43, 0.0  ;;  %v1395_v43 = vld [vmem:[%s9924_s4 + $0x1c50] sm:$0xff] }
 0x206   : > { %5598 = vmatprep.subr.mxu0 %v1346_v41  ;;  %5636 = vmatprep.subr.mxu1 %v1378_v61  ;;  %v1321_v34 = vld [vmem:[%s9924_s4 + $0x1a00] sm:$0xff]  ;;  %v1983_v41 = vmax.f32 %v1975_v6, 0.0  ;;  %v1442_v6 = vld [vmem:[%s9924_s4 + $0x1dc8] sm:$0xff] }
 0x207   : > { %5599 = vmatpush3.msra.mxu0 %v1330_v42  ;;  %5637 = vmatpush3.msra.mxu1 %v1362_v45  ;;  %v1353_v61 = vld [vmem:[%s9924_s4 + $0x1b00] sm:$0xff]  ;;  %v1986_v42 = vmax.f32 %v1978_v52, 0.0  ;;  %v1980_v45 = vadd.f32 %v8953_v30, %v1966_v13  ;;  %v1430_v13 = vld [vmem:[%s9924_s4 + $0x1d68] sm:$0xff] }
 0x208   : > { %5600 = vmatprep.subr.mxu0 %v1345_v46  ;;  %5638 = vmatprep.subr.mxu1 %v1377_v51  ;;  %v1416_v46 = vld [vmem:[%s9924_s4 + $0x1cf8] sm:$0xff]  ;;  %v1985_v51 = vmax.f32 %v1977_v36, 0.0  ;;  %v1409_v52 = vld [vmem:[%s9924_s4 + $0x1cc0] sm:$0xff] }
 0x209   : > { %5601 = vmatpush3.msra.mxu0 %v1329_v10  ;;  %5639 = vmatpush3.msra.mxu1 %v1361_v55  ;;  %v1979_v10 = vadd.f32 %v8960_v7, %v1962_v15  ;;  %v1448_v55 = vld [vmem:[%s9924_s4 + $0x1df8] sm:$0xff]  ;;  %v1445_v15 = vld [vmem:[%s9924_s4 + $0x1de0] sm:$0xff] }
 0x20a   : > { %5602 = vmatprep.subr.mxu0 %v1344_v54  ;;  %5640 = vmatprep.subr.mxu1 %v1376_v16  ;;  %v1400_v54 = vld [vmem:[%s9924_s4 + $0x1c78] sm:$0xff]  ;;  %v1425_v36 = vld [vmem:[%s9924_s4 + $0x1d40] sm:$0xff] }
 0x20b   : > { %5603 = vmatpush3.msra.mxu0 %v1328_v56  ;;  %5641 = vmatpush3.msra.mxu1 %v1360_v60  ;;  %v1432_v16 = vld [vmem:[%s9924_s4 + $0x1d78] sm:$0xff]  ;;  %v1982_v56 = vadd.f32 %v8973_v22, %v1974_v48  ;;  %v1415_v60 = vld [vmem:[%s9924_s4 + $0x1cf0] sm:$0xff] }
 0x20c   : > { %5604 = vmatprep.subr.mxu0 %v1343_v62  ;;  %5642 = vmatprep.subr.mxu1 %v1375_v53  ;;  %v1447_v62 = vld [vmem:[%s9924_s4 + $0x1df0] sm:$0xff]  ;;  %v1988_v53 = vmax.f32 %v1980_v45, 0.0  ;;  %v1412_v48 = vld [vmem:[%s9924_s4 + $0x1cd8] sm:$0xff] }
 0x20d   : > { %5605 = vmatpush3.msra.mxu0 %v1327_v57  ;;  %5643 = vmatpush3.msra.mxu1 %v1359_v3  ;;  %v1399_v57 = vld [vmem:[%s9924_s4 + $0x1c70] sm:$0xff]  ;;  %v1987_v3 = vmax.f32 %v1979_v10, 0.0  ;;  %v1390_v10 = vld [vmem:[%s9924_s4 + $0x1c28] sm:$0xff] }
 0x20e   : > { %5606 = vmatprep.subr.mxu0 %v1342_v17  ;;  %5644 = vmatprep.subr.mxu1 %v1374_v1  ;;  %v1981_v17 = vadd.f32 %v8986_v50, %v1970_v19  ;;  %v1431_v1 = vld [vmem:[%s9924_s4 + $0x1d70] sm:$0xff]  ;;  %v1428_v19 = vld [vmem:[%s9924_s4 + $0x1d58] sm:$0xff] }
 0x20f   : > { %5607 = vmatpush3.msra.mxu0 %v1326_v47  ;;  %5645 = vmatpush3.msra.mxu1 %v1358_v9  ;;  %v1414_v47 = vld [vmem:[%s9924_s4 + $0x1ce8] sm:$0xff]  ;;  %v1423_v45 = vld [vmem:[%s9924_s4 + $0x1d30] sm:$0xff] }
 0x210   : > { %5608 = vmatprep.subr.mxu0 %v1341_v12  ;;  %5646 = vmatprep.subr.mxu1 %v1373_v39  ;;  %v1446_v9 = vld [vmem:[%s9924_s4 + $0x1de8] sm:$0xff]  ;;  %v1990_v12 = vmax.f32 %v1982_v56, 0.0  ;;  %v1998_v56 = vrot.slane %v7975_v58, %v7550_v59 }
 0x211   : > { %5609 = vmatpush3.msra.mxu0 %v1325_v20  ;;  %5647 = vmatpush3.msra.mxu1 %v1357_v31  ;;  %v1398_v39 = vld [vmem:[%s9924_s4 + $0x1c68] sm:$0xff]  ;;  %v1989_v20 = vmax.f32 %v1981_v17, 0.0  ;;  %v1413_v31 = vld [vmem:[%s9924_s4 + $0x1ce0] sm:$0xff]  ;;  %v2006_v17 = vrot.slane %v7994_v5, %v7550_v59 }
 0x212   : > { %5610 = vmatprep.subr.mxu0 %v1340_v35  ;;  %5648 = vmatprep.subr.mxu1 %v1372_v25  ;;  %v1397_v35 = vld [vmem:[%s9924_s4 + $0x1c60] sm:$0xff] }
 0x213   : > { %5611 = vmatpush3.msra.mxu0 %v1324_v11  ;;  %5649 = vmatpush3.msra.mxu1 %v1356_v18  ;;  %v1429_v25 = vld [vmem:[%s9924_s4 + $0x1d60] sm:$0xff]  ;;  %v1444_v11 = vld [vmem:[%s9924_s4 + $0x1dd8] sm:$0xff] }
 0x214   : > { %5612 = vmatprep.subr.mxu0 %v1339_v40  ;;  %5650 = vmatprep.subr.mxu1 %v1371_v29  ;;  %v1396_v18 = vld [vmem:[%s9924_s4 + $0x1c58] sm:$0xff]  ;;  %v1411_v40 = vld [vmem:[%s9924_s4 + $0x1cd0] sm:$0xff] }
 0x215   : > { %5613 = vmatpush3.msra.mxu0 %v1323_v26  ;;  %5651 = vmatpush3.msra.mxu1 %v1355_v44  ;;  %v1443_v29 = vld [vmem:[%s9924_s4 + $0x1dd0] sm:$0xff]  ;;  %v1410_v44 = vld [vmem:[%s9924_s4 + $0x1cc8] sm:$0xff] }
 0x216   : > { %5614 = vmatprep.subr.mxu0 %v1338_v32  ;;  %5652 = vmatprep.subr.mxu1 %v1370_v4  ;;  %v1427_v26 = vld [vmem:[%s9924_s4 + $0x1d50] sm:$0xff]  ;;  %v1394_v32 = vld [vmem:[%s9924_s4 + $0x1c48] sm:$0xff] }
 0x217   : > { %5615 = vmatpush3.msra.mxu0 %v1322_v33  ;;  %5653 = vmatpush3.msra.mxu1 %v1354_v8  ;;  %v1426_v4 = vld [vmem:[%s9924_s4 + $0x1d48] sm:$0xff]  ;;  %v1441_v33 = vld [vmem:[%s9924_s4 + $0x1dc0] sm:$0xff] }
 0x218   : > { %5616 = vmatprep.subr.mxu0 %v1337_v28  ;;  %5654 = vmatprep.subr.mxu1 %v1369_v37  ;;  %v1393_v8 = vld [vmem:[%s9924_s4 + $0x1c40] sm:$0xff]  ;;  %v1408_v28 = vld [vmem:[%s9924_s4 + $0x1cb8] sm:$0xff] }
 0x219   : > { %5617 = vmatpush3.msra.mxu0 %v1321_v34  ;;  %4070 = vmatprep.mubr.f32.mxu0 %v1984_v38  ;;  %v1440_v37 = vld [vmem:[%s9924_s4 + $0x1db8] sm:$0xff] }
 0x21a   : > { %5655 = vmatpush3.msra.mxu1 %v1353_v61  ;;  %4071 = vmatmul.mubr.f32.vlgmr.msra.gmra.mxu0 %v1983_v41  ;;  %v1392_v38 = vld [vmem:[%s9924_s4 + $0x1c38] sm:$0xff]  ;;  %v1407_v41 = vld [vmem:[%s9924_s4 + $0x1cb0] sm:$0xff] }
 0x21b   : > { %4145 = vmatprep.mubr.f32.mxu1 %v1986_v42  ;;  %5662 = vmatprep.subr.mxu0 %v1416_v46  ;;  %v1424_v34 = vld [vmem:[%s9924_s4 + $0x1d38] sm:$0xff]  ;;  %v1439_v61 = vld [vmem:[%s9924_s4 + $0x1db0] sm:$0xff]  ;;  %v1406_v46 = vld [vmem:[%s9924_s4 + $0x1ca8] sm:$0xff] }
 0x21c   : > { %5700 = vmatprep.subr.mxu1 %v1448_v55  ;;  %4146 = vmatmul.mubr.f32.vlgmr.msra.gmra.mxu1 %v1985_v51  ;;  %v1391_v42 = vld [vmem:[%s9924_s4 + $0x1c30] sm:$0xff]  ;;  %v1438_v51 = vld [vmem:[%s9924_s4 + $0x1da8] sm:$0xff] }
 0x21d   : > { %5663 = vmatpush3.msra.mxu0 %v1400_v54  ;;  %5701 = vmatpush3.msra.mxu1 %v1432_v16  ;;  %v1422_v55 = vld [vmem:[%s9924_s4 + $0x1d28] sm:$0xff]  ;;  %v1405_v54 = vld [vmem:[%s9924_s4 + $0x1ca0] sm:$0xff] }
 0x21e   : > { %5664 = vmatprep.subr.mxu0 %v1415_v60  ;;  %5702 = vmatprep.subr.mxu1 %v1447_v62  ;;  %v1437_v16 = vld [vmem:[%s9924_s4 + $0x1da0] sm:$0xff] }
 0x21f   : > { %4075 = vmatprep.mubr.f32.mxu0 %v1988_v53  ;;  %5665 = vmatpush3.msra.mxu0 %v1399_v57  ;;  %v1389_v60 = vld [vmem:[%s9924_s4 + $0x1c20] sm:$0xff]  ;;  %v1994_v53 = vrot.slane %v7985_v0, %v7550_v59  ;;  %v1404_v57 = vld [vmem:[%s9924_s4 + $0x1c98] sm:$0xff] }
 0x220   : > { %5703 = vmatpush3.msra.mxu1 %v1431_v1  ;;  %4076 = vmatmul.mubr.f32.gmra.mxu0 %v1987_v3  ;;  %v1421_v62 = vld [vmem:[%s9924_s4 + $0x1d20] sm:$0xff]  ;;  %v1436_v3 = vld [vmem:[%s9924_s4 + $0x1d98] sm:$0xff] }
 0x221   : > { %5666 = vmatprep.subr.mxu0 %v1414_v47  ;;  %5704 = vmatprep.subr.mxu1 %v1446_v9  ;;  %v1388_v1 = vld [vmem:[%s9924_s4 + $0x1c18] sm:$0xff]  ;;  %v2002_v9 = vrot.slane %v8003_v24, %v7550_v59  ;;  %v1419_v59 = vld [vmem:[%s9924_s4 + $0x1d10] sm:$0xff] }
 0x222   : > { %4150 = vmatprep.mubr.f32.mxu1 %v1990_v12  ;;  %5667 = vmatpush3.msra.mxu0 %v1398_v39  ;;  %v1420_v47 = vld [vmem:[%s9924_s4 + $0x1d18] sm:$0xff]  ;;  %v1403_v12 = vld [vmem:[%s9924_s4 + $0x1c90] sm:$0xff] }
 0x223   : > { %5705 = vmatpush3.msra.mxu1 %v1430_v13  ;;  %5668 = vmatprep.subr.mxu0 %v1413_v31  ;;  %v1435_v39 = vld [vmem:[%s9924_s4 + $0x1d90] sm:$0xff]  ;;  %v2008_v13 = vadd.f32 %v8906_v63, %v1998_v56  ;;  %v2007_v31 = vadd.f32 %v8916_v14, %v1994_v53 }
 0x224   : > { %4151 = vmatmul.mubr.f32.gmra.mxu1 %v1989_v20  ;;  %5706 = vmatprep.subr.mxu1 %v1445_v15  ;;  %v1387_v20 = vld [vmem:[%s9924_s4 + $0x1c10] sm:$0xff]  ;;  %v1402_v15 = vld [vmem:[%s9924_s4 + $0x1c88] sm:$0xff] }
 0x225   : > { %5669 = vmatpush3.msra.mxu0 %v1397_v35  ;;  %5707 = vmatpush3.msra.mxu1 %v1429_v25  ;;  %v1434_v35 = vld [vmem:[%s9924_s4 + $0x1d88] sm:$0xff]  ;;  %v2010_v25 = vadd.f32 %v8926_v2, %v2006_v17 }
 0x226   : > { %5670 = vmatprep.subr.mxu0 %v1412_v48  ;;  %5708 = vmatprep.subr.mxu1 %v1444_v11  ;;  %v1386_v48 = vld [vmem:[%s9924_s4 + $0x1c08] sm:$0xff] }
 0x227   : > { %5671 = vmatpush3.msra.mxu0 %v1396_v18  ;;  %5709 = vmatpush3.msra.mxu1 %v1428_v19  ;;  %v1418_v11 = vld [vmem:[%s9924_s4 + $0x1d08] sm:$0xff]  ;;  %v2009_v18 = vadd.f32 %v8936_v49, %v2002_v9  ;;  %v1401_v19 = vld [vmem:[%s9924_s4 + $0x1c80] sm:$0xff] }
 0x228   : > { %5672 = vmatprep.subr.mxu0 %v1411_v40  ;;  %5710 = vmatprep.subr.mxu1 %v1443_v29  ;;  %v1433_v40 = vld [vmem:[%s9924_s4 + $0x1d80] sm:$0xff]  ;;  %v2016_v29 = vmax.f32 %v2008_v13, 0.0  ;;  %v1491_v13 = vld [vmem:[%s9924_s4 + $0x1f50] sm:$0xff] }
 0x229   : > { %5673 = vmatpush3.msra.mxu0 %v1395_v43  ;;  %5711 = vmatpush3.msra.mxu1 %v1427_v26  ;;  %v1385_v43 = vld [vmem:[%s9924_s4 + $0x1c00] sm:$0xff]  ;;  %v2015_v26 = vmax.f32 %v2007_v31, 0.0  ;;  %v1458_v31 = vld [vmem:[%s9924_s4 + $0x1e48] sm:$0xff] }
 0x22a   : > { %5674 = vmatprep.subr.mxu0 %v1410_v44  ;;  %5712 = vmatprep.subr.mxu1 %v1442_v6  ;;  %v1417_v44 = vld [vmem:[%s9924_s4 + $0x1d00] sm:$0xff]  ;;  %v2018_v6 = vmax.f32 %v2010_v25, 0.0 }
 0x22b   : > { %5675 = vmatpush3.msra.mxu0 %v1394_v32  ;;  %5713 = vmatpush3.msra.mxu1 %v1426_v4  ;;  %v2012_v32 = vadd.f32 %v8953_v30, %v1998_v56  ;;  %v1480_v4 = vld [vmem:[%s9924_s4 + $0x1ef8] sm:$0xff]  ;;  %v1505_v25 = vld [vmem:[%s9924_s4 + $0x1fc0] sm:$0xff] }
 0x22c   : > { %5676 = vmatprep.subr.mxu0 %v1409_v52  ;;  %5714 = vmatprep.subr.mxu1 %v1441_v33  ;;  %v2017_v52 = vmax.f32 %v2009_v18, 0.0  ;;  %v2011_v33 = vadd.f32 %v8960_v7, %v1994_v53  ;;  %v1461_v53 = vld [vmem:[%s9924_s4 + $0x1e60] sm:$0xff]  ;;  %v9481_v18 = vpop.f32.mrf.mxu0 }
 0x22d   : > { %5677 = vmatpush3.msra.mxu0 %v1393_v8  ;;  %5715 = vmatpush3.msra.mxu1 %v1425_v36  ;;  %v1512_v8 = vld [vmem:[%s9924_s4 + $0x1ff8] sm:$0xff] }
 0x22e   : > { %5678 = vmatprep.subr.mxu0 %v1408_v28  ;;  %5716 = vmatprep.subr.mxu1 %v1440_v37  ;;  %v1464_v36 = vld [vmem:[%s9924_s4 + $0x1e78] sm:$0xff]  ;;  %v2014_v37 = vadd.f32 %v8973_v22, %v2006_v17 }
 0x22f   : > { %5679 = vmatpush3.msra.mxu0 %v1392_v38  ;;  %5717 = vmatpush3.msra.mxu1 %v1424_v34  ;;  %v1496_v28 = vld [vmem:[%s9924_s4 + $0x1f78] sm:$0xff]  ;;  %v1479_v38 = vld [vmem:[%s9924_s4 + $0x1ef0] sm:$0xff] }
 0x230   : > { %5680 = vmatprep.subr.mxu0 %v1407_v41  ;;  %5718 = vmatprep.subr.mxu1 %v1439_v61  ;;  %v1511_v34 = vld [vmem:[%s9924_s4 + $0x1ff0] sm:$0xff]  ;;  %v2020_v41 = vmax.f32 %v2012_v32, 0.0  ;;  %v1508_v17 = vld [vmem:[%s9924_s4 + $0x1fd8] sm:$0xff] }
 0x231   : > { %5681 = vmatpush3.msra.mxu0 %v1391_v42  ;;  %5719 = vmatpush3.msra.mxu1 %v1423_v45  ;;  %v1463_v61 = vld [vmem:[%s9924_s4 + $0x1e70] sm:$0xff]  ;;  %v2019_v42 = vmax.f32 %v2011_v33, 0.0  ;;  %v2013_v45 = vadd.f32 %v8986_v50, %v2002_v9  ;;  %v1470_v33 = vld [vmem:[%s9924_s4 + $0x1ea8] sm:$0xff] }
 0x232   : > { %5682 = vmatprep.subr.mxu0 %v1406_v46  ;;  %5720 = vmatprep.subr.mxu1 %v1438_v51  ;;  %v1495_v46 = vld [vmem:[%s9924_s4 + $0x1f70] sm:$0xff]  ;;  %v1478_v51 = vld [vmem:[%s9924_s4 + $0x1ee8] sm:$0xff] }
 0x233   : > { %5683 = vmatpush3.msra.mxu0 %v1390_v10  ;;  %5721 = vmatpush3.msra.mxu1 %v1422_v55  ;;  %v1510_v10 = vld [vmem:[%s9924_s4 + $0x1fe8] sm:$0xff]  ;;  %v2022_v55 = vmax.f32 %v2014_v37, 0.0  ;;  %v2021_v56 = vmax.f32 %v2013_v45, 0.0  ;;  %v1475_v9 = vld [vmem:[%s9924_s4 + $0x1ed0] sm:$0xff]  ;;  %v1485_v45 = vld [vmem:[%s9924_s4 + $0x1f20] sm:$0xff] }
 0x234   : > { %5684 = vmatprep.subr.mxu0 %v1405_v54  ;;  %5722 = vmatprep.subr.mxu1 %v1437_v16  ;;  %v1462_v54 = vld [vmem:[%s9924_s4 + $0x1e68] sm:$0xff]  ;;  %v1455_v32 = vld [vmem:[%s9924_s4 + $0x1e30] sm:$0xff] }
 0x235   : > { %5685 = vmatpush3.msra.mxu0 %v1389_v60  ;;  %5723 = vmatpush3.msra.mxu1 %v1421_v62  ;;  %v1494_v16 = vld [vmem:[%s9924_s4 + $0x1f68] sm:$0xff]  ;;  %v1477_v60 = vld [vmem:[%s9924_s4 + $0x1ee0] sm:$0xff] }
 0x236   : > { %5686 = vmatprep.subr.mxu0 %v1404_v57  ;;  %5724 = vmatprep.subr.mxu1 %v1436_v3  ;;  %v1509_v62 = vld [vmem:[%s9924_s4 + $0x1fe0] sm:$0xff]  ;;  %v1476_v3 = vld [vmem:[%s9924_s4 + $0x1ed8] sm:$0xff] }
 0x237   : > { %5687 = vmatpush3.msra.mxu0 %v1388_v1  ;;  %5725 = vmatpush3.msra.mxu1 %v1420_v47  ;;  %v1493_v57 = vld [vmem:[%s9924_s4 + $0x1f60] sm:$0xff]  ;;  %v1460_v1 = vld [vmem:[%s9924_s4 + $0x1e58] sm:$0xff] }
 0x238   : > { %5688 = vmatprep.subr.mxu0 %v1403_v12  ;;  %5726 = vmatprep.subr.mxu1 %v1435_v39  ;;  %v1492_v47 = vld [vmem:[%s9924_s4 + $0x1f58] sm:$0xff]  ;;  %v1507_v12 = vld [vmem:[%s9924_s4 + $0x1fd0] sm:$0xff] }
 0x239   : > { %5689 = vmatpush3.msra.mxu0 %v1387_v20  ;;  %5727 = vmatpush3.msra.mxu1 %v1419_v59  ;;  %v1459_v39 = vld [vmem:[%s9924_s4 + $0x1e50] sm:$0xff]  ;;  %v1474_v20 = vld [vmem:[%s9924_s4 + $0x1ec8] sm:$0xff] }
 0x23a   : > { %5690 = vmatprep.subr.mxu0 %v1402_v15  ;;  %5728 = vmatprep.subr.mxu1 %v1434_v35  ;;  %v1506_v59 = vld [vmem:[%s9924_s4 + $0x1fc8] sm:$0xff]  ;;  %v1473_v35 = vld [vmem:[%s9924_s4 + $0x1ec0] sm:$0xff] }
 0x23b   : > { %5691 = vmatpush3.msra.mxu0 %v1386_v48  ;;  %5729 = vmatpush3.msra.mxu1 %v1418_v11  ;;  %v1490_v15 = vld [vmem:[%s9924_s4 + $0x1f48] sm:$0xff]  ;;  %v1457_v48 = vld [vmem:[%s9924_s4 + $0x1e40] sm:$0xff] }
 0x23c   : > { %5692 = vmatprep.subr.mxu0 %v1401_v19  ;;  %5730 = vmatprep.subr.mxu1 %v1433_v40  ;;  %v1489_v11 = vld [vmem:[%s9924_s4 + $0x1f40] sm:$0xff]  ;;  %v1472_v19 = vld [vmem:[%s9924_s4 + $0x1eb8] sm:$0xff] }
 0x23d   : > { %5693 = vmatpush3.msra.mxu0 %v1385_v43  ;;  %4220 = vmatprep.mubr.f32.mxu0 %v2016_v29  ;;  %v1504_v40 = vld [vmem:[%s9924_s4 + $0x1fb8] sm:$0xff] }
 0x23e   : > { %5731 = vmatpush3.msra.mxu1 %v1417_v44  ;;  %4221 = vmatmul.mubr.f32.vlgmr.msra.gmra.mxu0 %v2015_v26  ;;  %v1456_v29 = vld [vmem:[%s9924_s4 + $0x1e38] sm:$0xff]  ;;  %v9495_v26 = vpop.f32.mrf.mxu1  ;;  %v1471_v44 = vld [vmem:[%s9924_s4 + $0x1eb0] sm:$0xff] }
 0x23f   : > { %4295 = vmatprep.mubr.f32.mxu1 %v2018_v6  ;;  %5738 = vmatprep.subr.mxu0 %v1480_v4  ;;  %v1488_v43 = vld [vmem:[%s9924_s4 + $0x1f38] sm:$0xff]  ;;  %v1503_v6 = vld [vmem:[%s9924_s4 + $0x1fb0] sm:$0xff] }
 0x240   : > { %5776 = vmatprep.subr.mxu1 %v1512_v8  ;;  %4296 = vmatmul.mubr.f32.vlgmr.msra.gmra.mxu1 %v2017_v52  ;;  %v1487_v4 = vld [vmem:[%s9924_s4 + $0x1f30] sm:$0xff]  ;;  %v9509_v52 = vpop.f32.mrf.mxu0  ;;  %v1502_v8 = vld [vmem:[%s9924_s4 + $0x1fa8] sm:$0xff]  ;;  %v9523_v37 = vpop.f32.mrf.mxu1 }
 0x241   : > { %5739 = vmatpush3.msra.mxu0 %v1464_v36  ;;  %5777 = vmatpush3.msra.mxu1 %v1496_v28  ;;  %v1454_v36 = vld [vmem:[%s9924_s4 + $0x1e28] sm:$0xff] }
 0x242   : > { %5740 = vmatprep.subr.mxu0 %v1479_v38  ;;  %5778 = vmatprep.subr.mxu1 %v1511_v34  ;;  %v1486_v28 = vld [vmem:[%s9924_s4 + $0x1f28] sm:$0xff]  ;;  %v9525_v38 = vpop.f32.mrf.mxu0  ;;  %v1469_v34 = vld [vmem:[%s9924_s4 + $0x1ea0] sm:$0xff] }
 0x243   : > { %4225 = vmatprep.mubr.f32.mxu0 %v2020_v41  ;;  %5741 = vmatpush3.msra.mxu0 %v1463_v61  ;;  %v1501_v41 = vld [vmem:[%s9924_s4 + $0x1fa0] sm:$0xff]  ;;  %v2030_v61 = vrot.slane %v7975_v58, %v7761_v21  ;;  %v1468_v58 = vld [vmem:[%s9924_s4 + $0x1e98] sm:$0xff] }
 0x244   : > { %5779 = vmatpush3.msra.mxu1 %v1495_v46  ;;  %4226 = vmatmul.mubr.f32.gmra.mxu0 %v2019_v42  ;;  %v1453_v42 = vld [vmem:[%s9924_s4 + $0x1e20] sm:$0xff]  ;;  %v2038_v46 = vrot.slane %v7994_v5, %v7761_v21  ;;  %v1452_v5 = vld [vmem:[%s9924_s4 + $0x1e18] sm:$0xff] }
 0x245   : > { %5742 = vmatprep.subr.mxu0 %v1478_v51  ;;  %5780 = vmatprep.subr.mxu1 %v1510_v10  ;;  %v9543_v51 = vpop.f32.mrf.mxu1  ;;  %v1500_v10 = vld [vmem:[%s9924_s4 + $0x1f98] sm:$0xff] }
 0x246   : > { %4300 = vmatprep.mubr.f32.mxu1 %v2022_v55  ;;  %5743 = vmatpush3.msra.mxu0 %v1462_v54  ;;  %v2026_v55 = vrot.slane %v7985_v0, %v7761_v21  ;;  %v2034_v54 = vrot.slane %v8003_v24, %v7761_v21  ;;  %v1467_v0 = vld [vmem:[%s9924_s4 + $0x1e90] sm:$0xff]  ;;  %v2040_v24 = vadd.f32 %v8906_v63, %v2030_v61  ;;  %v1466_v63 = vld [vmem:[%s9924_s4 + $0x1e88] sm:$0xff] }
 0x247   : > { %5781 = vmatpush3.msra.mxu1 %v1494_v16  ;;  %5744 = vmatprep.subr.mxu0 %v1477_v60  ;;  %v1484_v16 = vld [vmem:[%s9924_s4 + $0x1f18] sm:$0xff]  ;;  %v1499_v21 = vld [vmem:[%s9924_s4 + $0x1f90] sm:$0xff] }
 0x248   : > { %4301 = vmatmul.mubr.f32.gmra.mxu1 %v2021_v56  ;;  %5782 = vmatprep.subr.mxu1 %v1509_v62  ;;  %v9561_v56 = vpop.f32.mrf.mxu0  ;;  %v1451_v60 = vld [vmem:[%s9924_s4 + $0x1e10] sm:$0xff] }
 0x249   : > { %5745 = vmatpush3.msra.mxu0 %v1461_v53  ;;  %5783 = vmatpush3.msra.mxu1 %v1493_v57  ;;  %v1483_v62 = vld [vmem:[%s9924_s4 + $0x1f10] sm:$0xff]  ;;  %v2042_v53 = vadd.f32 %v8926_v2, %v2038_v46  ;;  %v9577_v57 = vpop.f32.mrf.mxu1  ;;  %v1450_v2 = vld [vmem:[%s9924_s4 + $0x1e08] sm:$0xff] }
 0x24a   : > { %5746 = vmatprep.subr.mxu0 %v1476_v3  ;;  %5784 = vmatprep.subr.mxu1 %v1508_v17  ;;  %v1498_v3 = vld [vmem:[%s9924_s4 + $0x1f88] sm:$0xff]  ;;  %v2039_v17 = vadd.f32 %v8916_v14, %v2026_v55  ;;  %v1465_v14 = vld [vmem:[%s9924_s4 + $0x1e80] sm:$0xff] }
 0x24b   : > { %5747 = vmatpush3.msra.mxu0 %v1460_v1  ;;  %5785 = vmatpush3.msra.mxu1 %v1492_v47  ;;  %v2041_v1 = vadd.f32 %v8936_v49, %v2034_v54  ;;  %v1482_v47 = vld [vmem:[%s9924_s4 + $0x1f08] sm:$0xff]  ;;  %v1497_v49 = vld [vmem:[%s9924_s4 + $0x1f80] sm:$0xff] }
 0x24c   : > { %5748 = vmatprep.subr.mxu0 %v1475_v9  ;;  %5786 = vmatprep.subr.mxu1 %v1507_v12  ;;  %v2044_v9 = vadd.f32 %v8953_v30, %v2030_v61  ;;  %v2046_v12 = vadd.f32 %v8973_v22, %v2038_v46  ;;  %v1449_v30 = vld [vmem:[%s9924_s4 + $0x1e00] sm:$0xff]  ;;  %v2050_v22 = vmax.f32 %v2042_v53, 0.0 }
 0x24d   : > { %5749 = vmatpush3.msra.mxu0 %v1459_v39  ;;  %5787 = vmatpush3.msra.mxu1 %v1491_v13  ;;  %v9595_v39 = vpop.f32.mrf.mxu0  ;;  %v2048_v13 = vmax.f32 %v2040_v24, 0.0 }
 0x24e   : > { %5750 = vmatprep.subr.mxu0 %v1474_v20  ;;  %5788 = vmatprep.subr.mxu1 %v1506_v59  ;;  %v9606_v20 = vpop.f32.mrf.mxu1  ;;  %v1481_v59 = vld [vmem:[%s9924_s4 + $0x1f00] sm:$0xff] }
 0x24f   : > { %5751 = vmatpush3.msra.mxu0 %v1458_v31  ;;  %5789 = vmatpush3.msra.mxu1 %v1490_v15  ;;  %v2047_v31 = vmax.f32 %v2039_v17, 0.0  ;;  %v2049_v15 = vmax.f32 %v2041_v1, 0.0 }
 0x250   : > { %5752 = vmatprep.subr.mxu0 %v1473_v35  ;;  %5790 = vmatprep.subr.mxu1 %v1505_v25  ;;  %v2043_v35 = vadd.f32 %v8960_v7, %v2026_v55  ;;  %v2045_v25 = vadd.f32 %v8986_v50, %v2034_v54 }
 0x251   : > { %5753 = vmatpush3.msra.mxu0 %v1457_v48  ;;  %5791 = vmatpush3.msra.mxu1 %v1489_v11  ;;  %v2052_v48 = vmax.f32 %v2044_v9, 0.0  ;;  %v2054_v11 = vmax.f32 %v2046_v12, 0.0 }
 0x252   : > { %5754 = vmatprep.subr.mxu0 %v1472_v19  ;;  %5792 = vmatprep.subr.mxu1 %v1504_v40  ;;  %v9613_v19 = vpop.f32.mrf.mxu0  ;;  %v9615_v40 = vpop.f32.mrf.mxu1 }
 0x253   : > { %5755 = vmatpush3.msra.mxu0 %v1456_v29  ;;  %5793 = vmatpush3.msra.mxu1 %v1488_v43  ;;  %v2051_v29 = vmax.f32 %v2043_v35, 0.0  ;;  %v2053_v43 = vmax.f32 %v2045_v25, 0.0 }
 0x254   : > { %5756 = vmatprep.subr.mxu0 %v1471_v44  ;;  %5794 = vmatprep.subr.mxu1 %v1503_v6  ;;  %v9617_v7 = vpop.f32.mrf.mxu0  ;;  %v9619_v50 = vpop.f32.mrf.mxu1 }
 0x255   : > { %5757 = vmatpush3.msra.mxu0 %v1455_v32  ;;  %5795 = vmatpush3.msra.mxu1 %v1487_v4 }
 0x256   : > { %5758 = vmatprep.subr.mxu0 %v1470_v33  ;;  %5796 = vmatprep.subr.mxu1 %v1502_v8  ;;  %v9621_v44 = vpop.f32.mrf.mxu0  ;;  %v9623_v6 = vpop.f32.mrf.mxu1 }
 0x257   : > { %5759 = vmatpush3.msra.mxu0 %v1454_v36  ;;  %5797 = vmatpush3.msra.mxu1 %v1486_v28 }
 0x258   : > { %5760 = vmatprep.subr.mxu0 %v1469_v34  ;;  %5798 = vmatprep.subr.mxu1 %v1501_v41  ;;  %v9625_v32 = vpop.f32.mrf.mxu0  ;;  %v9627_v4 = vpop.f32.mrf.mxu1 }
 0x259   : > { %5761 = vmatpush3.msra.mxu0 %v1453_v42  ;;  %5799 = vmatpush3.msra.mxu1 %v1485_v45 }
 0x25a   : > { %5762 = vmatprep.subr.mxu0 %v1468_v58  ;;  %5800 = vmatprep.subr.mxu1 %v1500_v10  ;;  %v9629_v33 = vpop.f32.mrf.mxu0  ;;  %v9631_v8 = vpop.f32.mrf.mxu1 }
 0x25b   : > { %5763 = vmatpush3.msra.mxu0 %v1452_v5  ;;  %5801 = vmatpush3.msra.mxu1 %v1484_v16 }
 0x25c   : > { %5764 = vmatprep.subr.mxu0 %v1467_v0  ;;  %5802 = vmatprep.subr.mxu1 %v1499_v21  ;;  %v9633_v36 = vpop.f32.mrf.mxu0  ;;  %v9635_v28 = vpop.f32.mrf.mxu1 }
 0x25d   : > { %5765 = vmatpush3.msra.mxu0 %v1451_v60  ;;  %5803 = vmatpush3.msra.mxu1 %v1483_v62 }
 0x25e   : > { %5766 = vmatprep.subr.mxu0 %v1466_v63  ;;  %5804 = vmatprep.subr.mxu1 %v1498_v3  ;;  %v9637_v34 = vpop.f32.mrf.mxu0  ;;  %v9639_v41 = vpop.f32.mrf.mxu1 }
 0x25f   : > { %5767 = vmatpush3.msra.mxu0 %v1450_v2  ;;  %5805 = vmatpush3.msra.mxu1 %v1482_v47 }
 0x260   : > { %5768 = vmatprep.subr.mxu0 %v1465_v14  ;;  %5806 = vmatprep.subr.mxu1 %v1497_v49  ;;  %v9641_v61 = vpop.f32.mrf.mxu0  ;;  %v9643_v42 = vpop.f32.mrf.mxu1 }
 0x261   : > { %5769 = vmatpush3.msra.mxu0 %v1449_v30  ;;  %4370 = vmatprep.mubr.f32.mxu0 %v2048_v13 }
 0x262   : > { %5807 = vmatpush3.msra.mxu1 %v1481_v59  ;;  %4445 = vmatprep.mubr.f32.mxu1 %v2050_v22  ;;  %v9645_v45 = vpop.f32.mrf.mxu0  ;;  %v9647_v46 = vpop.f32.mrf.mxu1 }
 0x263   : > { %4371 = vmatmul.mubr.f32.vlgmr.msra.gmra.mxu0 %v2047_v31  ;;  %4446 = vmatmul.mubr.f32.vlgmr.msra.gmra.mxu1 %v2049_v15 }
 0x264   : > { %4375 = vmatprep.mubr.f32.mxu0 %v2052_v48  ;;  %4450 = vmatprep.mubr.f32.mxu1 %v2054_v11  ;;  %v9649_v58 = vpop.f32.mrf.mxu0  ;;  %v9651_v10 = vpop.f32.mrf.mxu1 }
 0x266   : > { %v9653_v55 = vpop.f32.mrf.mxu0  ;;  %v9655_v54 = vpop.f32.mrf.mxu1 }
 0x267   : > { %4376 = vmatmul.mubr.f32.gmra.mxu0 %v2051_v29  ;;  %4451 = vmatmul.mubr.f32.gmra.mxu1 %v2053_v43 }
 0x268   : > { %v9657_v5 = vpop.f32.mrf.mxu0  ;;  %v9659_v16 = vpop.f32.mrf.mxu1 }
 0x26a   : > { %v9661_v0 = vpop.f32.mrf.mxu0  ;;  %v9663_v21 = vpop.f32.mrf.mxu1 }
 0x26c   : > { %v9665_v24 = vpop.f32.mrf.mxu0  ;;  %v9667_v60 = vpop.f32.mrf.mxu1 }
 0x26e   : > { %v9669_v62 = vpop.f32.mrf.mxu0  ;;  %v9671_v53 = vpop.f32.mrf.mxu1 }
 0x270   : > { %v9673_v63 = vpop.f32.mrf.mxu0  ;;  %v9675_v3 = vpop.f32.mrf.mxu1 }
 0x272   : > { %v9677_v17 = vpop.f32.mrf.mxu0  ;;  %v9679_v1 = vpop.f32.mrf.mxu1 }
 0x274   : > { %v9681_v2 = vpop.f32.mrf.mxu0  ;;  %v9683_v47 = vpop.f32.mrf.mxu1 }
 0x276   : > { %v9685_v9 = vpop.f32.mrf.mxu0  ;;  %v9687_v12 = vpop.f32.mrf.mxu1 }
 0x278   : > { %v9689_v14 = vpop.f32.mrf.mxu0  ;;  %v9691_v49 = vpop.f32.mrf.mxu1 }
 0x27a   : > { %v9693_v13 = vpop.f32.mrf.mxu0  ;;  %v9695_v30 = vpop.f32.mrf.mxu1 }
 0x27c   : > { %v9697_v22 = vpop.f32.mrf.mxu0  ;;  %v9699_v59 = vpop.f32.mrf.mxu1 }
 0x27d   : > { %9931 = vst [vmem:[#allocation8_spill] sm:$0xff] %v9699_v59 }
 0x27e   : > { %v9701_v31 = vpop.f32.mrf.mxu0  ;;  %v9703_v15 = vpop.f32.mrf.mxu1 }
 0x27f   : > { %9932 = vst [vmem:[#allocation9_spill] sm:$0xff] %v9701_v31  ;;  %9933 = vst [vmem:[#allocation10_spill] sm:$0xff] %v9703_v15 }
 0x280   : > { %v9705_v35 = vpop.f32.mrf.mxu0  ;;  %v9707_v25 = vpop.f32.mrf.mxu1 }
 0x281   : > { %9934 = vst [vmem:[#allocation11_spill] sm:$0xff] %v9707_v25 }
 0x282   : > { %v9709_v48 = vpop.f32.mrf.mxu0  ;;  %v9711_v11 = vpop.f32.mrf.mxu1 }
 0x283   : > { %9935 = vst [vmem:[#allocation12_spill] sm:$0xff] %v9709_v48  ;;  %9936 = vst [vmem:[#allocation13_spill] sm:$0xff] %v9711_v11 }
 0x284   : > { %v9713_v29 = vpop.f32.mrf.mxu0  ;;  %v9715_v43 = vpop.f32.mrf.mxu1 }
 0x285   : > { %9937 = vst [vmem:[#allocation14_spill] sm:$0xff] %v9713_v29  ;;  %9938 = vst [vmem:[#allocation15_spill] sm:$0xff] %v9715_v43  ;;  %v4632_v43 = vadd.f32 %v9509_v52, %v9481_v18  ;;  %v2055_v29 = vstv %s1513_s15 }
 0x286   : > { %v9717_v23 = vpop.f32.mrf.mxu0  ;;  %v9719_v27 = vpop.f32.mrf.mxu1 }
 0x287   : > { %9939 = vst [vmem:[#allocation16_spill] sm:$0xff] %v9717_v23  ;;  %9940 = vst [vmem:[#allocation17_spill] sm:$0xff] %v9719_v27 }
 0x288   : > { %v9721_v59 = vpop.f32.mrf.mxu0  ;;  %v9723_v31 = vpop.f32.mrf.mxu1 }
 0x289   : > { %9941 = vst [vmem:[#allocation18_spill] sm:$0xff] %v9721_v59  ;;  %9942 = vst [vmem:[#allocation19_spill] sm:$0xff] %v9723_v31  ;;  %v2123_v31 = vadd.f32 %v4632_v43, %v2055_v29 }
 0x28a   : > { %v9725_v15 = vpop.f32.mrf.mxu0  ;;  %v9727_v25 = vpop.f32.mrf.mxu1 }
 0x28b   : > { %9943 = vst [vmem:[#allocation20_spill] sm:$0xff] %v9725_v15  ;;  %9944 = vst [vmem:[#allocation21_spill] sm:$0xff] %v9727_v25  ;;  %v4670_v15 = vadd.f32 %v9523_v37, %v9495_v26  ;;  %v4635_v25 = vadd.f32 %v9561_v56, %v9525_v38  ;;  %v4746_v26 = vadd.f32 %v9615_v40, %v9606_v20 }
 0x28c   : > { %v9729_v48 = vpop.f32.mrf.mxu0  ;;  %v9731_v11 = vpop.f32.mrf.mxu1  ;;  %v4711_v37 = vadd.f32 %v9621_v44, %v9617_v7  ;;  %v4822_v20 = vadd.f32 %v9631_v8, %v9627_v4  ;;  %v4787_v40 = vadd.f32 %v9637_v34, %v9633_v36  ;;  %v4860_v44 = vadd.f32 %v9645_v45, %v9641_v61 }
 0x28d   : > { %9945 = vst [vmem:[#allocation22_spill] sm:$0xff] %v9729_v48  ;;  %9946 = vst [vmem:[#allocation23_spill] sm:$0xff] %v9731_v11  ;;  %v4708_v11 = vadd.f32 %v9613_v19, %v9595_v39  ;;  %v2198_v52 = vadd.f32 %v4670_v15, %v2123_v31  ;;  %v4784_v39 = vadd.f32 %v9629_v33, %v9625_v32 }
 0x28e   : > { %v9735_v23 = vpop.f32.mrf.mxu0  ;;  %v9737_v27 = vpop.f32.mrf.mxu1  ;;  %v4825_v33 = vadd.f32 %v9639_v41, %v9635_v28  ;;  %v4898_v8 = vadd.f32 %v9647_v46, %v9643_v42  ;;  %v4863_v36 = vadd.f32 %v9653_v55, %v9649_v58  ;;  %v4936_v61 = vadd.f32 %v9661_v0, %v9657_v5 }
 0x28f   : > { %9947 = vst [vmem:[#allocation24_spill] sm:$0xff] %v9735_v23  ;;  %9948 = vst [vmem:[#allocation25_spill] sm:$0xff] %v9737_v27  ;;  %v2128_v23 = vadd.f32 %v4635_v25, %v2055_v29  ;;  %v4673_v27 = vadd.f32 %v9577_v57, %v9543_v51  ;;  %v2273_v43 = vadd.f32 %v4708_v11, %v2198_v52 }
 0x290   : > { %v9739_v59 = vpop.f32.mrf.mxu0  ;;  %v9745_v48 = vpop.f32.mrf.mxu1  ;;  %v4749_v51 = vadd.f32 %v9623_v6, %v9619_v50  ;;  %v4901_v28 = vadd.f32 %v9655_v54, %v9651_v10  ;;  %v4974_v42 = vadd.f32 %v9663_v21, %v9659_v16  ;;  %v4939_v46 = vadd.f32 %v9669_v62, %v9665_v24 }
 0x291   : > { %9949 = vst [vmem:[#allocation26_spill] sm:$0xff] %v9739_v59  ;;  %v2203_v56 = vadd.f32 %v4673_v27, %v2128_v23  ;;  %v2348_v31 = vadd.f32 %v4746_v26, %v2273_v43  ;;  %v5012_v5 = vadd.f32 %v9677_v17, %v9673_v63  ;;  %v5050_v21 = vadd.f32 %v9679_v1, %v9675_v3  ;;  %v9950_v1 = vld [vmem:[#allocation9_spill] sm:$0xff] }
 0x292   : > { %v9749_v18 = vpop.f32.mrf.mxu0  ;;  %v9753_v59 = vpop.f32.mrf.mxu1  ;;  %v5015_v24 = vadd.f32 %v9685_v9, %v9681_v2  ;;  %v5088_v17 = vadd.f32 %v9693_v13, %v9689_v14  ;;  %v5126_v3 = vadd.f32 %v9695_v30, %v9691_v49  ;;  %v5091_v2 = vadd.f32 %v9950_v1, %v9697_v22  ;;  %v9951_v14 = vld [vmem:[#allocation12_spill] sm:$0xff]  ;;  %v9955_v49 = vld [vmem:[#allocation13_spill] sm:$0xff] }
 0x293   : > { %v2278_v15 = vadd.f32 %v4711_v37, %v2203_v56  ;;  %v2423_v25 = vadd.f32 %v4784_v39, %v2348_v31  ;;  %v4977_v56 = vadd.f32 %v9671_v53, %v9667_v60  ;;  %v5053_v60 = vadd.f32 %v9687_v12, %v9683_v47  ;;  %v9957_v22 = vld [vmem:[#allocation16_spill] sm:$0xff] }
 0x294   : > { %v9759_v38 = vpop.f32.mrf.mxu0  ;;  %v9763_v19 = vpop.f32.mrf.mxu1  ;;  %v5164_v13 = vadd.f32 %v9951_v14, %v9705_v35  ;;  %v9967_v14 = vld [vmem:[#allocation23_spill] sm:$0xff] }
 0x295   : > { %v2353_v7 = vadd.f32 %v4749_v51, %v2278_v15  ;;  %v2498_v50 = vadd.f32 %v4822_v20, %v2423_v25 }
 0x296   : > { %v9767_v57 = vpop.f32.mrf.mxu0  ;;  %v9773_v27 = vpop.f32.mrf.mxu1 }
 0x297   : > { %v2428_v6 = vadd.f32 %v4787_v40, %v2353_v7  ;;  %v2573_v4 = vadd.f32 %v4860_v44, %v2498_v50  ;;  %v9952_v50 = vld [vmem:[#allocation8_spill] sm:$0xff] }
 0x298   : > { %v9775_v23 = vpop.f32.mrf.mxu0  ;;  %v9779_v32 = vpop.f32.mrf.mxu1 }
 0x299   : > { %v2503_v29 = vadd.f32 %v4825_v33, %v2428_v6  ;;  %v2648_v52 = vadd.f32 %v4898_v8, %v2573_v4  ;;  %v9953_v6 = vld [vmem:[#allocation10_spill] sm:$0xff]  ;;  %v9954_v8 = vld [vmem:[#allocation11_spill] sm:$0xff] }
 0x29a   : > { %v9783_v11 = vpop.f32.mrf.mxu0  ;;  %v9789_v34 = vpop.f32.mrf.mxu1  ;;  %v5129_v47 = vadd.f32 %v9953_v6, %v9952_v50  ;;  %v5202_v30 = vadd.f32 %v9955_v49, %v9954_v8  ;;  %v5354_v6 = vadd.f32 %v9753_v59, %v9745_v48 }
 0x29b   : > { %v2578_v43 = vadd.f32 %v4863_v36, %v2503_v29  ;;  %v2723_v26 = vadd.f32 %v4936_v61, %v2648_v52  ;;  %v9956_v36 = vld [vmem:[#allocation14_spill] sm:$0xff]  ;;  %v5430_v59 = vadd.f32 %v9789_v34, %v9779_v32 }
 0x29c   : > { %v9793_v45 = vpop.f32.mrf.mxu0  ;;  %v9797_v41 = vpop.f32.mrf.mxu1  ;;  %v5167_v29 = vadd.f32 %v9957_v22, %v9956_v36 }
 0x29d   : > { %v2653_v55 = vadd.f32 %v4901_v28, %v2578_v43  ;;  %v2798_v10 = vadd.f32 %v4974_v42, %v2723_v26  ;;  %v9958_v43 = vld [vmem:[#allocation18_spill] sm:$0xff]  ;;  %v9959_v28 = vld [vmem:[#allocation20_spill] sm:$0xff] }
 0x29e   : > { %v9803_v58 = vpop.f32.mrf.mxu0  ;;  %v9807_v0 = vpop.f32.mrf.mxu1  ;;  %v5240_v35 = vadd.f32 %v9959_v28, %v9958_v43 }
 0x29f   : > { %v2728_v54 = vadd.f32 %v4939_v46, %v2653_v55  ;;  %v2873_v16 = vadd.f32 %v5012_v5, %v2798_v10  ;;  %v9960_v55 = vld [vmem:[#allocation15_spill] sm:$0xff]  ;;  %v9961_v5 = vld [vmem:[#allocation17_spill] sm:$0xff]  ;;  %v5395_v48 = vadd.f32 %v9803_v58, %v9793_v45 }
 0x2a0   : > { %v9809_v37 = vpop.f32.mrf.mxu0  ;;  %v9813_v39 = vpop.f32.mrf.mxu1  ;;  %v5205_v10 = vadd.f32 %v9961_v5, %v9960_v55 }
 0x2a1   : > { %v2803_v63 = vadd.f32 %v4977_v56, %v2728_v54  ;;  %v2948_v15 = vadd.f32 %v5050_v21, %v2873_v16  ;;  %v9962_v16 = vld [vmem:[#allocation19_spill] sm:$0xff]  ;;  %v9963_v21 = vld [vmem:[#allocation21_spill] sm:$0xff] }
 0x2a2   : > { %v5467_v62 = vpop.f32.mrf.mxu0  ;;  %v9821_v31 = vpop.f32.mrf.mxu1 }
 0x2a3   : > { %v2878_v51 = vadd.f32 %v5015_v24, %v2803_v63  ;;  %v3023_v25 = vadd.f32 %v5088_v17, %v2948_v15  ;;  %v5278_v24 = vadd.f32 %v9963_v21, %v9962_v16  ;;  %v9964_v63 = vld [vmem:[#allocation22_spill] sm:$0xff]  ;;  %v9965_v17 = vld [vmem:[#allocation24_spill] sm:$0xff]  ;;  %v5468_v28 = vadd.f32 %v5467_v62, %v9809_v37 }
 0x2a4   : > { %v5469_v53 = vpop.f32.mrf.mxu0  ;;  %v9829_v9 = vpop.f32.mrf.mxu1  ;;  %v5243_v15 = vadd.f32 %v9965_v17, %v9964_v63 }
 0x2a5   : > { %v2953_v20 = vadd.f32 %v5053_v60, %v2878_v51  ;;  %v3098_v7 = vadd.f32 %v5126_v3, %v3023_v25  ;;  %v9966_v25 = vld [vmem:[#allocation26_spill] sm:$0xff] }
 0x2a6   : > { %v5470_v40 = vpop.f32.mrf.mxu0  ;;  %v5508_v12 = vpop.f32.mrf.mxu1  ;;  %v5316_v3 = vadd.f32 %v9749_v18, %v9966_v25  ;;  %v5392_v18 = vadd.f32 %v9783_v11, %v9775_v23 }
 0x2a7   : > { %v3028_v44 = vadd.f32 %v5091_v2, %v2953_v20  ;;  %v3173_v4 = vadd.f32 %v5164_v13, %v3098_v7  ;;  %v9968_v13 = vld [vmem:[#allocation25_spill] sm:$0xff]  ;;  %v5471_v55 = vadd.f32 %v5470_v40, %v5469_v53  ;;  %v5509_v37 = vadd.f32 %v5508_v12, %v9829_v9 }
 0x2a8   : > { %v5281_v7 = vadd.f32 %v9968_v13, %v9967_v14 }
 0x2a9   : > { %v3103_v52 = vadd.f32 %v5129_v47, %v3028_v44  ;;  %v3248_v42 = vadd.f32 %v5202_v30, %v3173_v4  ;;  %v5319_v47 = vadd.f32 %v9767_v57, %v9759_v38 }
 0x2ab   : > { %v3178_v46 = vadd.f32 %v5167_v29, %v3103_v52  ;;  %v3323_v56 = vadd.f32 %v5240_v35, %v3248_v42  ;;  %v5357_v29 = vadd.f32 %v9773_v27, %v9763_v19  ;;  %v5433_v42 = vadd.f32 %v9807_v0, %v9797_v41 }
 0x2ac   : > { %v5506_v27 = vadd.f32 %v9821_v31, %v9813_v39 }
 0x2ad   : > { %v3253_v60 = vadd.f32 %v5205_v10, %v3178_v46  ;;  %v3398_v2 = vadd.f32 %v5278_v24, %v3323_v56 }
 0x2af   : > { %v3328_v20 = vadd.f32 %v5243_v15, %v3253_v60  ;;  %v3473_v50 = vadd.f32 %v5316_v3, %v3398_v2 }
 0x2b1   : > { %v3403_v49 = vadd.f32 %v5281_v7, %v3328_v20  ;;  %v3548_v36 = vadd.f32 %v5354_v6, %v3473_v50 }
 0x2b3   : > { %v3478_v22 = vadd.f32 %v5319_v47, %v3403_v49  ;;  %v3623_v43 = vadd.f32 %v5392_v18, %v3548_v36 }
 0x2b5   : > { %v3553_v57 = vadd.f32 %v5357_v29, %v3478_v22  ;;  %v3698_v23 = vadd.f32 %v5430_v59, %v3623_v43 }
 0x2b6   : > { %v5542_v33 = vpop.f32.mrf.mxu0 }
 0x2b7   : > { %v3628_v11 = vadd.f32 %v5395_v48, %v3553_v57  ;;  %v3773_v19 = vadd.f32 %v5468_v28, %v3698_v23  ;;  %v9969_v48 = vld [vmem:[#allocation6_spill] sm:$0xff] }
 0x2b8   : > { %v5580_v61 = vpop.f32.mrf.mxu1  ;;  %v5543_v26 = vpop.f32.mrf.mxu0 }
 0x2b9   : > { %v3703_v34 = vadd.f32 %v5433_v42, %v3628_v11  ;;  %v5544_v5 = vadd.f32 %v5543_v26, %v5542_v33  ;;  %v3848_v10 = vadd.f32 %v5506_v27, %v3773_v19  ;;  %v9970_v11 = vld [vmem:[#allocation7_spill] sm:$0xff] }
 0x2ba   : > { %v5581_v54 = vpop.f32.mrf.mxu1 }
 0x2bb   : > { %v3778_v56 = vadd.f32 %v5471_v55, %v3703_v34  ;;  %v3923_v16 = vadd.f32 %v5544_v5, %v3848_v10  ;;  %v5582_v21 = vadd.f32 %v5581_v54, %v5580_v61 }
 0x2bc   : > { %v5545_v51 = vpop.f32.mrf.mxu0 }
 0x2bd   : > { %v3853_v0 = vadd.f32 %v5509_v37, %v3778_v56  ;;  %v3998_v15 = vadd.f32 %v5582_v21, %v3923_v16 }
 0x2be   : > { %v5546_v44 = vpop.f32.mrf.mxu0 }
 0x2bf   : > { %v5547_v24 = vadd.f32 %v5546_v44, %v5545_v51 }
 0x2c0   : > { %v5583_v1 = vpop.f32.mrf.mxu1 }
 0x2c1   : > { %v3928_v39 = vadd.f32 %v5547_v24, %v3853_v0 }
 0x2c2   : > { %v5584_v4 = vpop.f32.mrf.mxu1 }
 0x2c3   : > { %v5585_v31 = vadd.f32 %v5584_v4, %v5583_v1 }
 0x2c5   : > { %v4003_v25 = vadd.f32 %v5585_v31, %v3928_v39 }
 0x2da   : > { %v5618_v8 = vpop.f32.mrf.mxu0 }
 0x2dc   : > { %v5656_v30 = vpop.f32.mrf.mxu1  ;;  %v5619_v52 = vpop.f32.mrf.mxu0 }
 0x2dd   : > { %v5620_v63 = vadd.f32 %v5619_v52, %v5618_v8 }
 0x2de   : > { %v5657_v38 = vpop.f32.mrf.mxu1 }
 0x2df   : > { %v4073_v40 = vadd.f32 %v5620_v63, %v3998_v15  ;;  %v5658_v33 = vadd.f32 %v5657_v38, %v5656_v30 }
 0x2e0   : > { %v5621_v35 = vpop.f32.mrf.mxu0 }
 0x2e1   : > { %v4148_v9 = vadd.f32 %v5658_v33, %v4073_v40 }
 0x2e2   : > { %v5622_v32 = vpop.f32.mrf.mxu0 }
 0x2e3   : > { %v5623_v26 = vadd.f32 %v5622_v32, %v5621_v35 }
 0x2e4   : > { %v5659_v46 = vpop.f32.mrf.mxu1 }
 0x2e5   : > { %v4078_v12 = vadd.f32 %v5623_v26, %v4003_v25 }
 0x2e6   : > { %v5660_v45 = vpop.f32.mrf.mxu1 }
 0x2e7   : > { %v5661_v20 = vadd.f32 %v5660_v45, %v5659_v46 }
 0x2e9   : > { %v4153_v44 = vadd.f32 %v5661_v20, %v4078_v12 }
 0x2fe   : > { %v5694_v58 = vpop.f32.mrf.mxu0 }
 0x300   : > { %v5732_v62 = vpop.f32.mrf.mxu1  ;;  %v5695_v41 = vpop.f32.mrf.mxu0 }
 0x301   : > { %v5696_v3 = vadd.f32 %v5695_v41, %v5694_v58 }
 0x302   : > { %v5733_v17 = vpop.f32.mrf.mxu1 }
 0x303   : > { %v4223_v54 = vadd.f32 %v5696_v3, %v4148_v9  ;;  %v5734_v51 = vadd.f32 %v5733_v17, %v5732_v62 }
 0x304   : > { %v5697_v53 = vpop.f32.mrf.mxu0 }
 0x305   : > { %v4298_v6 = vadd.f32 %v5734_v51, %v4223_v54 }
 0x306   : > { %v5698_v2 = vpop.f32.mrf.mxu0 }
 0x307   : > { %v5699_v14 = vadd.f32 %v5698_v2, %v5697_v53 }
 0x308   : > { %v5735_v60 = vpop.f32.mrf.mxu1 }
 0x309   : > { %v4228_v47 = vadd.f32 %v5699_v14, %v4153_v44 }
 0x30a   : > { %v5736_v61 = vpop.f32.mrf.mxu1 }
 0x30b   : > { %v5737_v4 = vadd.f32 %v5736_v61, %v5735_v60 }
 0x30d   : > { %v4303_v52 = vadd.f32 %v5737_v4, %v4228_v47 }
 0x323   : > { %v5770_v13 = vpop.f32.mrf.mxu0  ;;  %v5808_v7 = vpop.f32.mrf.mxu1 }
 0x325   : > { %v5771_v50 = vpop.f32.mrf.mxu0  ;;  %v5809_v1 = vpop.f32.mrf.mxu1 }
 0x326   : > { %v5772_v8 = vadd.f32 %v5771_v50, %v5770_v13  ;;  %v5810_v36 = vadd.f32 %v5809_v1, %v5808_v7 }
 0x327   : > { %v5773_v49 = vpop.f32.mrf.mxu0  ;;  %v5811_v18 = vpop.f32.mrf.mxu1 }
 0x328   : > { %v4373_v30 = vadd.f32 %v5772_v8, %v4298_v6 }
 0x329   : > { %v5774_v22 = vpop.f32.mrf.mxu0  ;;  %v5812_v29 = vpop.f32.mrf.mxu1 }
 0x32a   : > { %v4448_v43 = vadd.f32 %v5810_v36, %v4373_v30  ;;  %v5775_v59 = vadd.f32 %v5774_v22, %v5773_v49  ;;  %v5813_v28 = vadd.f32 %v5812_v29, %v5811_v18 }
 0x32c   : > { %v4456_v38 = vadd.f32 %v4448_v43, %v9969_v48  ;;  %v4378_v57 = vadd.f32 %v5775_v59, %v4303_v52 }
 0x32e   : > { %v4587_v35 = vmul.f32 -1.442695, %v4456_v38  ;;  %v4453_v23 = vadd.f32 %v5813_v28, %v4378_v57 }
 0x330   : > { %5855 = vpow2.f32 %v4587_v35  ;;  %v4457_v42 = vadd.f32 %v4453_v23, %v9970_v11 }
 0x332   : > { %v4588_v46 = vmul.f32 -1.442695, %v4457_v42 }
 0x334   : > { %5857 = vpow2.f32 %v4588_v46 }
 0x33d   : > { %v5856_v19 = vpop.eup %5855 }
 0x33e   : > { %v4464_v27 = vadd.f32 1.0, %v5856_v19 }
 0x340   : > { %5859 = vrcp.f32 %v4464_v27 }
 0x341   : > { %v5858_v55 = vpop.eup %5857 }
 0x342   : > { %v4465_v32 = vadd.f32 1.0, %v5858_v55 }
 0x344   : > { %5861 = vrcp.f32 %v4465_v32 }
 0x34d   : > { %v5860_v34 = vpop.eup %5859 }
 0x34e   : > { %4471 = vst.msk [vmem:[%s284_s21] sm:$0xff] %vm4470_vm0, %v5860_v34 }
 0x351   : > { %v5862_v5 = vpop.eup %5861 }
 0x352   : > { %4472 = vst.msk [vmem:[%s284_s21 + $0x8] sm:$0xff] %vm4470_vm0, %v5862_v5 }
 0x353   : > { %5900 = shalt.err (!%p5897_p3)
}
 0x354   : > { %s5901_s13 = scalar_lea.hbm %s9876_s29, 256  ;;  %s5905_s15 = scalar_lea.hbm %s9926_s6, 512 }
 0x355   : > { %p5902_p4 = scmp.ne.s32.totalorder %s9876_s29, %s5901_s13  ;;  %p5906_p9 = scmp.lt.s32.totalorder %s9876_s29, %s9926_s6 }
 0x356   : > { %p5907_p10 = scmp.lt.s32.totalorder %s5905_s15, %s5901_s13 }
 0x357   : > { %p5903_p7 = pnand %p5902_p4, %p6028_p5 }
 0x358   : > { %p5908_p11 = por %p5907_p10, %p5906_p9 }
 0x359   : > { %p5904_p8 = pneg %p5903_p7 }
 0x35b   : > { %p5909_p12 = pnand %p5908_p11, %p5904_p8 }
 0x35d   : > { %5912 = shalt.err (!%p5909_p12)
}
 0x35e   : > { %s5950_s18 = smov 128   ;;  %s5951_s21 = smov 8  }
 0x35f   : > { %5814 = dma.vmem_to_hbm [thread:$0]  (%p6028_p5), %s9878_s19, 256, %s9876_s29, %s9880_s30, %s5950_s18, %s5950_s18, %s5951_s21  }
 0x360 PF: > { %p5820_p13 = scmp.ge.s32.totalorder %s5947_s26, 2  ;;  %s4502_s22 = sand.u32 1, %s5935_s23  }
 0x361   : > { %s4503_s27 = scalar_lea.sflag [#allocation4], %s4502_s22 }
 0x362   : > { %p5817_p0 = pnand %p5820_p13, %p6032_p6 }
 0x364   : > { %p5818_p1 = pneg %p5817_p0 }
 0x366   : > { %5930 = dma.done.wait (%p5818_p1), %s4503_s27, 256  }
 0x367   : > { %5932 = vsyncadd (%p5818_p1), %s4503_s27, 4294967040  ;;  %p17_p2 = scmp.ge.s32.totalorder %s6015_s28, 4   ;;  %s9971_s23 = smov %s5939_s24 }
 0x368   : > { %s9972_s24 = smov %s5943_s25  ;;  %s9973_s25 = smov %s6026_s7 }
 0x369   : > { %s9974_s26 = smov %s6015_s28  ;;  %19 = sbr.rel (!%p17_p2) target bundleno = 5 (0x5), region = 85 }
 0x36e   :  { %4508 = vsyncpa [#allocation4], 1 }
 0x36f   :  { %4510 = vsyncpa [#allocation4 + $0x1], 1 }

</bundles_post_ra>
